<compile_context>
chip_gen: v7x
topology: tpu7x:2x2x1
jax: 0.10.0
libtpu: 0.0.40
codegen_flags: <defaults>
</compile_context>

<pallas_src>
import jax
import jax.numpy as jnp
import numpy as np
from jax.experimental import pallas as pl
from jax.experimental.pallas import tpu as pltpu

KSIZE = 11            # conv kernel (11, 11)
PAD = 5               # padding=5 -> "same" spatial size
BN_EPS = 1e-5
HID_PAD = 512         # head hidden 400 -> 512
OUT_PAD = 128         # head output 7 -> 128

CONV_VMEM_BUDGET = 36 * 1024 * 1024   # target pipeline footprint per conv call
VMEM_LIMIT = 48 * 1024 * 1024         # explicit scoped limit (< v7x 64 MiB)


def _round_up(x, m):
    return ((x + m - 1) // m) * m


# ---------------------------------------------------------------------------
# Conv stage kernel: 11 row-shifted matmuls against a banded weight matrix,
# bias -> ReLU -> BN(eval) -> 2x2 pool (even/odd column split + row pairs).
# ---------------------------------------------------------------------------
def _make_conv_kernel(H, Hp, WtC, Xh, pool):
    H2 = H // 2

    def kernel(x_ref, g_ref, b_ref, s_ref, off_ref, o_ref):
        x = x_ref[...].reshape(Hp, WtC)                    # (H+10, (Wt+10)*Cin) bf16
        acc_e = jnp.zeros((H, Xh), jnp.float32)
        acc_o = jnp.zeros((H, Xh), jnp.float32)
        for kh in range(KSIZE):                            # kh-unfold: row shifts
            xs = x[kh:kh + H, :]
            acc_e = acc_e + jnp.dot(xs, g_ref[kh],
                                    preferred_element_type=jnp.float32)
            acc_o = acc_o + jnp.dot(xs, g_ref[KSIZE + kh],
                                    preferred_element_type=jnp.float32)
        bias, scale, off = b_ref[...], s_ref[...], off_ref[...]
        ye = jnp.maximum(acc_e + bias, 0.0) * scale + off  # conv -> ReLU -> BN
        yo = jnp.maximum(acc_o + bias, 0.0) * scale + off
        if pool == "max":
            yc = jnp.maximum(ye, yo)                       # x-pair pool (elementwise)
            yr = jnp.max(yc.reshape(H2, 2, Xh), axis=1)    # y-pair pool
        else:  # avg
            yc = (ye + yo) * 0.5
            yr = jnp.sum(yc.reshape(H2, 2, Xh), axis=1) * 0.5
        o_ref[...] = yr.reshape(1, 1, H2, Xh).astype(o_ref.dtype)

    return kernel


def _pick_width_tile(W, H, Cin, Cout):
    """Largest even divisor of W (<= 64) whose VMEM estimate fits the budget."""
    Hp = H + 2 * PAD
    cands = [d for d in range(min(W, 64), 1, -1) if W % d == 0 and d % 2 == 0]
    if not cands:
        cands = [W]
    for Wt in cands:
        WtC = (Wt + 2 * PAD) * Cin
        Xh = (Wt // 2) * Cout
        g_bytes = 2 * KSIZE * WtC * Xh * 2                 # even/odd banded G, bf16
        x_bytes = Hp * _round_up(WtC, 128) * 2             # one input block, bf16
        o_bytes = (H // 2) * _round_up(Xh, 128) * 2        # one output block, bf16
        acc_bytes = 2 * H * _round_up(Xh, 128) * 4         # two f32 accumulators
        est = 2 * g_bytes + 4 * x_bytes + 2 * o_bytes + acc_bytes
        if est <= CONV_VMEM_BUDGET:
            return Wt
    return cands[-1]


def conv_bn_pool(x_nhwc, w_oihw, b, gamma, beta, mean, var, *, pool):
    """conv(11x11, pad 5) + bias -> ReLU -> BN(eval) -> 2x2 pool.

    x_nhwc: (N, H, W, Cin); w_oihw: torch layout (Cout, Cin, 11, 11).
    Returns (N, H//2, W//2, Cout) bf16 in NHWC.
    """
    N, H, W, Cin = x_nhwc.shape
    Cout = w_oihw.shape[0]
    assert H % 2 == 0 and W % 2 == 0, "spatial dims must be even for 2x2 pool"

    Wt = _pick_width_tile(W, H, Cin, Cout)   # VMEM-budgeted width tile
    nWt = W // Wt
    Hp, Win = H + 2 * PAD, Wt + 2 * PAD
    WtC = Win * Cin
    Xh = (Wt // 2) * Cout
    H2 = H // 2

    # --- activation: pad, width-tile with halo, flatten (W, Cin) into lanes ---
    xp = jnp.pad(x_nhwc, ((0, 0), (PAD, PAD), (PAD, PAD), (0, 0)))
    xt = jnp.stack([xp[:, :, t * Wt:t * Wt + Win, :] for t in range(nWt)], axis=1)
    xt = xt.reshape(N, nWt, Hp, WtC).astype(jnp.bfloat16)

    # --- banded (Toeplitz-over-width) weights, split by even/odd output cols ---
    w = jnp.transpose(w_oihw, (2, 3, 1, 0))                # (Kh, Kw, Cin, Cout)
    sel = np.zeros((KSIZE, Win, Wt), np.float32)
    for kw in range(KSIZE):
        for xo in range(Wt):
            sel[kw, xo + kw, xo] = 1.0
    g = jnp.einsum("kio,hkcd->hicod", jnp.asarray(sel), w)  # (Kh,Win,Cin,Wt,Cout)
    g = g.reshape(KSIZE, WtC, Wt, Cout)
    g = jnp.stack([g[:, :, 0::2, :], g[:, :, 1::2, :]], axis=0)
    g = g.reshape(2 * KSIZE, WtC, Xh).astype(jnp.bfloat16)  # [0:11]=even, [11:22]=odd

    # --- BN(eval) folded to per-channel scale/offset, tiled over Wt//2 ---
    scale = gamma * jax.lax.rsqrt(var + BN_EPS)
    offset = beta - mean * scale
    tilev = lambda v: jnp.tile(v.astype(jnp.float32), Wt // 2).reshape(1, Xh)

    kernel = _make_conv_kernel(H, Hp, WtC, Xh, pool)
    vec_spec = pl.BlockSpec((1, Xh), lambda n, t: (0, 0))

    out = pl.pallas_call(
        kernel,
        out_shape=jax.ShapeDtypeStruct((N, nWt, H2, Xh), jnp.bfloat16),
        grid=(N, nWt),
        in_specs=[
            pl.BlockSpec((1, 1, Hp, WtC), lambda n, t: (n, t, 0, 0)),
            pl.BlockSpec((2 * KSIZE, WtC, Xh), lambda n, t: (0, 0, 0)),  # resident
            vec_spec, vec_spec, vec_spec,
        ],
        out_specs=pl.BlockSpec((1, 1, H2, Xh), lambda n, t: (n, t, 0, 0)),
        compiler_params=pltpu.CompilerParams(
            dimension_semantics=("parallel", "parallel"),
            vmem_limit_bytes=VMEM_LIMIT),
    )(xt, g, tilev(b), tilev(scale), tilev(offset))

    # back to NHWC (small bf16 tensor; no-op when nWt == 1)
    out = out.reshape(N, nWt, H2, Wt // 2, Cout)
    return jnp.transpose(out, (0, 2, 1, 3, 4)).reshape(N, H2, W // 2, Cout)


# ---------------------------------------------------------------------------
# Head: linear1 (K-tiled) -> ReLU -> [BN1d + dropout folded] -> linear2 -> sigmoid
# ---------------------------------------------------------------------------
def _head_kernel(x_ref, w1_ref, b1_ref, w2_ref, b2_ref, o_ref, h_acc):
    f = pl.program_id(1)

    @pl.when(f == 0)
    def _():
        h_acc[...] = jnp.zeros_like(h_acc)

    h_acc[...] += jnp.dot(x_ref[...], w1_ref[...],
                          preferred_element_type=jnp.float32)

    @pl.when(f == pl.num_programs(1) - 1)
    def _():
        h = jnp.maximum(h_acc[...] + b1_ref[...], 0.0)
        # BN1d(eval) affine folded into w2/b2; dropout = identity (inference).
        logits = jnp.dot(h.astype(w2_ref.dtype), w2_ref[...],
                         preferred_element_type=jnp.float32) + b2_ref[...]
        o_ref[...] = 1.0 / (1.0 + jnp.exp(-logits))


def head(x_nhwc, lw1, lb1, gamma, beta, mean, var, lw2, lb2):
    """x_nhwc: (N, H4, W4, C) bf16.  lw1/lw2 in torch layout ((400, F_nchw), (7, 400))."""
    N, H4, W4, C = x_nhwc.shape
    F = H4 * W4 * C
    Hdim, Odim = lw1.shape[0], lw2.shape[0]

    # NHWC flatten of activations (no transpose); permute linear1's rows once so
    # it matches torch's NCHW x.view(len(x), -1) order exactly.
    xf = x_nhwc.reshape(N, F)
    w1 = lw1.reshape(Hdim, C, H4, W4).transpose(2, 3, 1, 0).reshape(F, Hdim)

    # Fold BN1d(eval) into linear2.
    scale = gamma * jax.lax.rsqrt(var + BN_EPS)
    offset = beta - mean * scale
    w2 = jnp.transpose(lw2)                                # (400, 7)
    w2f = w2 * scale[:, None]
    b2f = lb2 + offset @ w2

    tile_f = min(2048, _round_up(F, 128))
    F_pad = _round_up(F, tile_f)
    if N <= 8:
        # Block second-minor dim must be a multiple of 8 or the full dim, so tiny
        # batches run as one parallel step (the conv grids still feed both v7x TCs).
        tile_n, N_pad = N, N
    else:
        tile_n, N_pad = 8, _round_up(N, 8)

    x_pad = jnp.pad(xf.astype(jnp.bfloat16), ((0, N_pad - N), (0, F_pad - F)))
    w1p = jnp.pad(w1, ((0, F_pad - F), (0, HID_PAD - Hdim))).astype(jnp.bfloat16)
    b1p = jnp.pad(lb1, (0, HID_PAD - Hdim)).reshape(1, HID_PAD).astype(jnp.float32)
    w2p = jnp.pad(w2f, ((0, HID_PAD - Hdim), (0, OUT_PAD - Odim))).astype(jnp.bfloat16)
    b2p = jnp.pad(b2f, (0, OUT_PAD - Odim)).reshape(1, OUT_PAD).astype(jnp.float32)

    out = pl.pallas_call(
        _head_kernel,
        out_shape=jax.ShapeDtypeStruct((N_pad, OUT_PAD), jnp.float32),
        grid=(N_pad // tile_n, F_pad // tile_f),
        in_specs=[
            pl.BlockSpec((tile_n, tile_f), lambda n, f: (n, f)),
            pl.BlockSpec((tile_f, HID_PAD), lambda n, f: (f, 0)),
            pl.BlockSpec((1, HID_PAD), lambda n, f: (0, 0)),
            pl.BlockSpec((HID_PAD, OUT_PAD), lambda n, f: (0, 0)),
            pl.BlockSpec((1, OUT_PAD), lambda n, f: (0, 0)),
        ],
        out_specs=pl.BlockSpec((tile_n, OUT_PAD), lambda n, f: (n, 0)),
        scratch_shapes=[pltpu.VMEM((tile_n, HID_PAD), jnp.float32)],
        compiler_params=pltpu.CompilerParams(
            dimension_semantics=("parallel", "arbitrary"),
            vmem_limit_bytes=VMEM_LIMIT),
    )(x_pad, w1p, b1p, w2p, b2p)
    return out[:N, :Odim]


# ---------------------------------------------------------------------------
# Full forward pass (glue in plain JAX)
# ---------------------------------------------------------------------------
def cnn_forward(x_nchw, p):
    x = jnp.transpose(x_nchw, (0, 2, 3, 1))                # NCHW -> NHWC (input only)
    x = conv_bn_pool(x, p["conv1_w"], p["conv1_b"],
                     p["bn1_g"], p["bn1_b"], p["bn1_m"], p["bn1_v"], pool="max")
    x = conv_bn_pool(x, p["conv2_w"], p["conv2_b"],
                     p["bn2_g"], p["bn2_b"], p["bn2_m"], p["bn2_v"], pool="avg")
    return head(x, p["lin1_w"], p["lin1_b"],
                p["bn1d_g"], p["bn1d_b"], p["bn1d_m"], p["bn1d_v"],
                p["lin2_w"], p["lin2_b"])


# ---------------------------------------------------------------------------
# Deterministic parameter init (exact PyTorch layouts / default BN stats)
# ---------------------------------------------------------------------------
def init_params(key, H, W):
    ks = jax.random.split(key, 8)

    def u(k, shape, fan_in):
        bound = float(fan_in) ** -0.5
        return jax.random.uniform(k, shape, jnp.float32, -bound, bound)

    F = 36 * (H // 4) * (W // 4)                           # NCHW flatten features
    ones = lambda n: jnp.ones((n,), jnp.float32)
    zeros = lambda n: jnp.zeros((n,), jnp.float32)
    return dict(
        conv1_w=u(ks[0], (18, 3, KSIZE, KSIZE), 3 * KSIZE * KSIZE),
        conv1_b=u(ks[1], (18,), 3 * KSIZE * KSIZE),
        bn1_g=ones(18), bn1_b=zeros(18), bn1_m=zeros(18), bn1_v=ones(18),
        conv2_w=u(ks[2], (36, 18, KSIZE, KSIZE), 18 * KSIZE * KSIZE),
        conv2_b=u(ks[3], (36,), 18 * KSIZE * KSIZE),
        bn2_g=ones(36), bn2_b=zeros(36), bn2_m=zeros(36), bn2_v=ones(36),
        lin1_w=u(ks[4], (400, F), F),
        lin1_b=u(ks[5], (400,), F),
        bn1d_g=ones(400), bn1d_b=zeros(400), bn1d_m=zeros(400), bn1d_v=ones(400),
        lin2_w=u(ks[6], (7, 400), 400),
        lin2_b=u(ks[7], (7,), 400),
    )


if __name__ == "__main__":
    key = jax.random.PRNGKey(0)
    kx, kp = jax.random.split(key)
    N, H, W = 2, 16, 16
    x = jax.random.normal(kx, (N, 3, H, W), jnp.float32)   # NCHW, like torch
    params = init_params(kp, H, W)

    out = jax.jit(cnn_forward)(x, params)
    out = jax.block_until_ready(out)
    assert out.shape == (N, 7), out.shape
    assert bool(jnp.all(jnp.isfinite(out)))
    print("KERNEL_OK")
</pallas_src>

<mosaic_0001>
module attributes {stable_mosaic.version = 11 : i64} {
  func.func @kernel(%arg0: i32, %arg1: i32, %arg2: memref<1x1x26x78xbf16, #tpu.memory_space<vmem>>, %arg3: memref<22x78x144xbf16, #tpu.memory_space<vmem>>, %arg4: memref<1x144xf32, #tpu.memory_space<vmem>>, %arg5: memref<1x144xf32, #tpu.memory_space<vmem>>, %arg6: memref<1x144xf32, #tpu.memory_space<vmem>>, %arg7: memref<1x1x8x144xbf16, #tpu.memory_space<vmem>>) attributes {dimension_semantics = [#tpu.dimension_semantics<parallel>, #tpu.dimension_semantics<parallel>], iteration_bounds = array<i64: 2, 1>, scalar_prefetch = 0 : i64, scratch_operands = 0 : i64, tpu.core_type = #tpu.core_type<tc>, window_params = [{transform_indices = @transform_0, window_bounds = array<i64: 1, 1, 26, 78>}, {pipeline_mode = #tpu.pipeline_mode<synchronous>, transform_indices = @transform_1, window_bounds = array<i64: 22, 78, 144>}, {pipeline_mode = #tpu.pipeline_mode<synchronous>, transform_indices = @transform_2, window_bounds = array<i64: 1, 144>}, {pipeline_mode = #tpu.pipeline_mode<synchronous>, transform_indices = @transform_3, window_bounds = array<i64: 1, 144>}, {pipeline_mode = #tpu.pipeline_mode<synchronous>, transform_indices = @transform_4, window_bounds = array<i64: 1, 144>}, {transform_indices = @transform_5, window_bounds = array<i64: 1, 1, 8, 144>}]} {
    %c0 = arith.constant 0 : index
    %c0_0 = arith.constant 0 : index
    %c0_1 = arith.constant 0 : index
    %c0_2 = arith.constant 0 : index
    %0 = vector.load %arg2[%c0, %c0_0, %c0_1, %c0_2] : memref<1x1x26x78xbf16, #tpu.memory_space<vmem>>, vector<1x1x26x78xbf16>
    %1 = vector.shape_cast %0 : vector<1x1x26x78xbf16> to vector<26x78xbf16>
    %cst = arith.constant 0.000000e+00 : f32
    %2 = vector.broadcast %cst : f32 to vector<16x144xf32>
    %cst_3 = arith.constant 0.000000e+00 : f32
    %3 = vector.broadcast %cst_3 : f32 to vector<16x144xf32>
    %4 = vector.extract_strided_slice %1 {offsets = [0, 0], sizes = [16, 78], strides = [1, 1]} : vector<26x78xbf16> to vector<16x78xbf16>
    %c0_4 = arith.constant 0 : index
    %c0_5 = arith.constant 0 : index
    %c0_6 = arith.constant 0 : index
    %5 = vector.load %arg3[%c0_4, %c0_5, %c0_6] : memref<22x78x144xbf16, #tpu.memory_space<vmem>>, vector<1x78x144xbf16>
    %6 = vector.shape_cast %5 : vector<1x78x144xbf16> to vector<78x144xbf16>
    %cst_7 = arith.constant dense<0.000000e+00> : vector<16x144xf32>
    %7 = tpu.matmul %4, %6, %cst_7 {dimension_numbers = #tpu.dot_dimension_numbers<[1], [0], [0], [1], [0, 0, 1, 1], [], []>} : vector<16x78xbf16>, vector<78x144xbf16>, vector<16x144xf32> -> vector<16x144xf32>
    %8 = arith.addf %2, %7 : vector<16x144xf32>
    %c11 = arith.constant 11 : index
    %c0_8 = arith.constant 0 : index
    %c0_9 = arith.constant 0 : index
    %9 = vector.load %arg3[%c11, %c0_8, %c0_9] : memref<22x78x144xbf16, #tpu.memory_space<vmem>>, vector<1x78x144xbf16>
    %10 = vector.shape_cast %9 : vector<1x78x144xbf16> to vector<78x144xbf16>
    %cst_10 = arith.constant dense<0.000000e+00> : vector<16x144xf32>
    %11 = tpu.matmul %4, %10, %cst_10 {dimension_numbers = #tpu.dot_dimension_numbers<[1], [0], [0], [1], [0, 0, 1, 1], [], []>} : vector<16x78xbf16>, vector<78x144xbf16>, vector<16x144xf32> -> vector<16x144xf32>
    %12 = arith.addf %3, %11 : vector<16x144xf32>
    %13 = vector.extract_strided_slice %1 {offsets = [1, 0], sizes = [16, 78], strides = [1, 1]} : vector<26x78xbf16> to vector<16x78xbf16>
    %c1 = arith.constant 1 : index
    %c0_11 = arith.constant 0 : index
    %c0_12 = arith.constant 0 : index
    %14 = vector.load %arg3[%c1, %c0_11, %c0_12] : memref<22x78x144xbf16, #tpu.memory_space<vmem>>, vector<1x78x144xbf16>
    %15 = vector.shape_cast %14 : vector<1x78x144xbf16> to vector<78x144xbf16>
    %cst_13 = arith.constant dense<0.000000e+00> : vector<16x144xf32>
    %16 = tpu.matmul %13, %15, %cst_13 {dimension_numbers = #tpu.dot_dimension_numbers<[1], [0], [0], [1], [0, 0, 1, 1], [], []>} : vector<16x78xbf16>, vector<78x144xbf16>, vector<16x144xf32> -> vector<16x144xf32>
    %17 = arith.addf %8, %16 : vector<16x144xf32>
    %c12 = arith.constant 12 : index
    %c0_14 = arith.constant 0 : index
    %c0_15 = arith.constant 0 : index
    %18 = vector.load %arg3[%c12, %c0_14, %c0_15] : memref<22x78x144xbf16, #tpu.memory_space<vmem>>, vector<1x78x144xbf16>
    %19 = vector.shape_cast %18 : vector<1x78x144xbf16> to vector<78x144xbf16>
    %cst_16 = arith.constant dense<0.000000e+00> : vector<16x144xf32>
    %20 = tpu.matmul %13, %19, %cst_16 {dimension_numbers = #tpu.dot_dimension_numbers<[1], [0], [0], [1], [0, 0, 1, 1], [], []>} : vector<16x78xbf16>, vector<78x144xbf16>, vector<16x144xf32> -> vector<16x144xf32>
    %21 = arith.addf %12, %20 : vector<16x144xf32>
    %22 = vector.extract_strided_slice %1 {offsets = [2, 0], sizes = [16, 78], strides = [1, 1]} : vector<26x78xbf16> to vector<16x78xbf16>
    %c2 = arith.constant 2 : index
    %c0_17 = arith.constant 0 : index
    %c0_18 = arith.constant 0 : index
    %23 = vector.load %arg3[%c2, %c0_17, %c0_18] : memref<22x78x144xbf16, #tpu.memory_space<vmem>>, vector<1x78x144xbf16>
    %24 = vector.shape_cast %23 : vector<1x78x144xbf16> to vector<78x144xbf16>
    %cst_19 = arith.constant dense<0.000000e+00> : vector<16x144xf32>
    %25 = tpu.matmul %22, %24, %cst_19 {dimension_numbers = #tpu.dot_dimension_numbers<[1], [0], [0], [1], [0, 0, 1, 1], [], []>} : vector<16x78xbf16>, vector<78x144xbf16>, vector<16x144xf32> -> vector<16x144xf32>
    %26 = arith.addf %17, %25 : vector<16x144xf32>
    %c13 = arith.constant 13 : index
    %c0_20 = arith.constant 0 : index
    %c0_21 = arith.constant 0 : index
    %27 = vector.load %arg3[%c13, %c0_20, %c0_21] : memref<22x78x144xbf16, #tpu.memory_space<vmem>>, vector<1x78x144xbf16>
    %28 = vector.shape_cast %27 : vector<1x78x144xbf16> to vector<78x144xbf16>
    %cst_22 = arith.constant dense<0.000000e+00> : vector<16x144xf32>
    %29 = tpu.matmul %22, %28, %cst_22 {dimension_numbers = #tpu.dot_dimension_numbers<[1], [0], [0], [1], [0, 0, 1, 1], [], []>} : vector<16x78xbf16>, vector<78x144xbf16>, vector<16x144xf32> -> vector<16x144xf32>
    %30 = arith.addf %21, %29 : vector<16x144xf32>
    %31 = vector.extract_strided_slice %1 {offsets = [3, 0], sizes = [16, 78], strides = [1, 1]} : vector<26x78xbf16> to vector<16x78xbf16>
    %c3 = arith.constant 3 : index
    %c0_23 = arith.constant 0 : index
    %c0_24 = arith.constant 0 : index
    %32 = vector.load %arg3[%c3, %c0_23, %c0_24] : memref<22x78x144xbf16, #tpu.memory_space<vmem>>, vector<1x78x144xbf16>
    %33 = vector.shape_cast %32 : vector<1x78x144xbf16> to vector<78x144xbf16>
    %cst_25 = arith.constant dense<0.000000e+00> : vector<16x144xf32>
    %34 = tpu.matmul %31, %33, %cst_25 {dimension_numbers = #tpu.dot_dimension_numbers<[1], [0], [0], [1], [0, 0, 1, 1], [], []>} : vector<16x78xbf16>, vector<78x144xbf16>, vector<16x144xf32> -> vector<16x144xf32>
    %35 = arith.addf %26, %34 : vector<16x144xf32>
    %c14 = arith.constant 14 : index
    %c0_26 = arith.constant 0 : index
    %c0_27 = arith.constant 0 : index
    %36 = vector.load %arg3[%c14, %c0_26, %c0_27] : memref<22x78x144xbf16, #tpu.memory_space<vmem>>, vector<1x78x144xbf16>
    %37 = vector.shape_cast %36 : vector<1x78x144xbf16> to vector<78x144xbf16>
    %cst_28 = arith.constant dense<0.000000e+00> : vector<16x144xf32>
    %38 = tpu.matmul %31, %37, %cst_28 {dimension_numbers = #tpu.dot_dimension_numbers<[1], [0], [0], [1], [0, 0, 1, 1], [], []>} : vector<16x78xbf16>, vector<78x144xbf16>, vector<16x144xf32> -> vector<16x144xf32>
    %39 = arith.addf %30, %38 : vector<16x144xf32>
    %40 = vector.extract_strided_slice %1 {offsets = [4, 0], sizes = [16, 78], strides = [1, 1]} : vector<26x78xbf16> to vector<16x78xbf16>
    %c4 = arith.constant 4 : index
    %c0_29 = arith.constant 0 : index
    %c0_30 = arith.constant 0 : index
    %41 = vector.load %arg3[%c4, %c0_29, %c0_30] : memref<22x78x144xbf16, #tpu.memory_space<vmem>>, vector<1x78x144xbf16>
    %42 = vector.shape_cast %41 : vector<1x78x144xbf16> to vector<78x144xbf16>
    %cst_31 = arith.constant dense<0.000000e+00> : vector<16x144xf32>
    %43 = tpu.matmul %40, %42, %cst_31 {dimension_numbers = #tpu.dot_dimension_numbers<[1], [0], [0], [1], [0, 0, 1, 1], [], []>} : vector<16x78xbf16>, vector<78x144xbf16>, vector<16x144xf32> -> vector<16x144xf32>
    %44 = arith.addf %35, %43 : vector<16x144xf32>
    %c15 = arith.constant 15 : index
    %c0_32 = arith.constant 0 : index
    %c0_33 = arith.constant 0 : index
    %45 = vector.load %arg3[%c15, %c0_32, %c0_33] : memref<22x78x144xbf16, #tpu.memory_space<vmem>>, vector<1x78x144xbf16>
    %46 = vector.shape_cast %45 : vector<1x78x144xbf16> to vector<78x144xbf16>
    %cst_34 = arith.constant dense<0.000000e+00> : vector<16x144xf32>
    %47 = tpu.matmul %40, %46, %cst_34 {dimension_numbers = #tpu.dot_dimension_numbers<[1], [0], [0], [1], [0, 0, 1, 1], [], []>} : vector<16x78xbf16>, vector<78x144xbf16>, vector<16x144xf32> -> vector<16x144xf32>
    %48 = arith.addf %39, %47 : vector<16x144xf32>
    %49 = vector.extract_strided_slice %1 {offsets = [5, 0], sizes = [16, 78], strides = [1, 1]} : vector<26x78xbf16> to vector<16x78xbf16>
    %c5 = arith.constant 5 : index
    %c0_35 = arith.constant 0 : index
    %c0_36 = arith.constant 0 : index
    %50 = vector.load %arg3[%c5, %c0_35, %c0_36] : memref<22x78x144xbf16, #tpu.memory_space<vmem>>, vector<1x78x144xbf16>
    %51 = vector.shape_cast %50 : vector<1x78x144xbf16> to vector<78x144xbf16>
    %cst_37 = arith.constant dense<0.000000e+00> : vector<16x144xf32>
    %52 = tpu.matmul %49, %51, %cst_37 {dimension_numbers = #tpu.dot_dimension_numbers<[1], [0], [0], [1], [0, 0, 1, 1], [], []>} : vector<16x78xbf16>, vector<78x144xbf16>, vector<16x144xf32> -> vector<16x144xf32>
    %53 = arith.addf %44, %52 : vector<16x144xf32>
    %c16 = arith.constant 16 : index
    %c0_38 = arith.constant 0 : index
    %c0_39 = arith.constant 0 : index
    %54 = vector.load %arg3[%c16, %c0_38, %c0_39] : memref<22x78x144xbf16, #tpu.memory_space<vmem>>, vector<1x78x144xbf16>
    %55 = vector.shape_cast %54 : vector<1x78x144xbf16> to vector<78x144xbf16>
    %cst_40 = arith.constant dense<0.000000e+00> : vector<16x144xf32>
    %56 = tpu.matmul %49, %55, %cst_40 {dimension_numbers = #tpu.dot_dimension_numbers<[1], [0], [0], [1], [0, 0, 1, 1], [], []>} : vector<16x78xbf16>, vector<78x144xbf16>, vector<16x144xf32> -> vector<16x144xf32>
    %57 = arith.addf %48, %56 : vector<16x144xf32>
    %58 = vector.extract_strided_slice %1 {offsets = [6, 0], sizes = [16, 78], strides = [1, 1]} : vector<26x78xbf16> to vector<16x78xbf16>
    %c6 = arith.constant 6 : index
    %c0_41 = arith.constant 0 : index
    %c0_42 = arith.constant 0 : index
    %59 = vector.load %arg3[%c6, %c0_41, %c0_42] : memref<22x78x144xbf16, #tpu.memory_space<vmem>>, vector<1x78x144xbf16>
    %60 = vector.shape_cast %59 : vector<1x78x144xbf16> to vector<78x144xbf16>
    %cst_43 = arith.constant dense<0.000000e+00> : vector<16x144xf32>
    %61 = tpu.matmul %58, %60, %cst_43 {dimension_numbers = #tpu.dot_dimension_numbers<[1], [0], [0], [1], [0, 0, 1, 1], [], []>} : vector<16x78xbf16>, vector<78x144xbf16>, vector<16x144xf32> -> vector<16x144xf32>
    %62 = arith.addf %53, %61 : vector<16x144xf32>
    %c17 = arith.constant 17 : index
    %c0_44 = arith.constant 0 : index
    %c0_45 = arith.constant 0 : index
    %63 = vector.load %arg3[%c17, %c0_44, %c0_45] : memref<22x78x144xbf16, #tpu.memory_space<vmem>>, vector<1x78x144xbf16>
    %64 = vector.shape_cast %63 : vector<1x78x144xbf16> to vector<78x144xbf16>
    %cst_46 = arith.constant dense<0.000000e+00> : vector<16x144xf32>
    %65 = tpu.matmul %58, %64, %cst_46 {dimension_numbers = #tpu.dot_dimension_numbers<[1], [0], [0], [1], [0, 0, 1, 1], [], []>} : vector<16x78xbf16>, vector<78x144xbf16>, vector<16x144xf32> -> vector<16x144xf32>
    %66 = arith.addf %57, %65 : vector<16x144xf32>
    %67 = vector.extract_strided_slice %1 {offsets = [7, 0], sizes = [16, 78], strides = [1, 1]} : vector<26x78xbf16> to vector<16x78xbf16>
    %c7 = arith.constant 7 : index
    %c0_47 = arith.constant 0 : index
    %c0_48 = arith.constant 0 : index
    %68 = vector.load %arg3[%c7, %c0_47, %c0_48] : memref<22x78x144xbf16, #tpu.memory_space<vmem>>, vector<1x78x144xbf16>
    %69 = vector.shape_cast %68 : vector<1x78x144xbf16> to vector<78x144xbf16>
    %cst_49 = arith.constant dense<0.000000e+00> : vector<16x144xf32>
    %70 = tpu.matmul %67, %69, %cst_49 {dimension_numbers = #tpu.dot_dimension_numbers<[1], [0], [0], [1], [0, 0, 1, 1], [], []>} : vector<16x78xbf16>, vector<78x144xbf16>, vector<16x144xf32> -> vector<16x144xf32>
    %71 = arith.addf %62, %70 : vector<16x144xf32>
    %c18 = arith.constant 18 : index
    %c0_50 = arith.constant 0 : index
    %c0_51 = arith.constant 0 : index
    %72 = vector.load %arg3[%c18, %c0_50, %c0_51] : memref<22x78x144xbf16, #tpu.memory_space<vmem>>, vector<1x78x144xbf16>
    %73 = vector.shape_cast %72 : vector<1x78x144xbf16> to vector<78x144xbf16>
    %cst_52 = arith.constant dense<0.000000e+00> : vector<16x144xf32>
    %74 = tpu.matmul %67, %73, %cst_52 {dimension_numbers = #tpu.dot_dimension_numbers<[1], [0], [0], [1], [0, 0, 1, 1], [], []>} : vector<16x78xbf16>, vector<78x144xbf16>, vector<16x144xf32> -> vector<16x144xf32>
    %75 = arith.addf %66, %74 : vector<16x144xf32>
    %76 = vector.extract_strided_slice %1 {offsets = [8, 0], sizes = [16, 78], strides = [1, 1]} : vector<26x78xbf16> to vector<16x78xbf16>
    %c8 = arith.constant 8 : index
    %c0_53 = arith.constant 0 : index
    %c0_54 = arith.constant 0 : index
    %77 = vector.load %arg3[%c8, %c0_53, %c0_54] : memref<22x78x144xbf16, #tpu.memory_space<vmem>>, vector<1x78x144xbf16>
    %78 = vector.shape_cast %77 : vector<1x78x144xbf16> to vector<78x144xbf16>
    %cst_55 = arith.constant dense<0.000000e+00> : vector<16x144xf32>
    %79 = tpu.matmul %76, %78, %cst_55 {dimension_numbers = #tpu.dot_dimension_numbers<[1], [0], [0], [1], [0, 0, 1, 1], [], []>} : vector<16x78xbf16>, vector<78x144xbf16>, vector<16x144xf32> -> vector<16x144xf32>
    %80 = arith.addf %71, %79 : vector<16x144xf32>
    %c19 = arith.constant 19 : index
    %c0_56 = arith.constant 0 : index
    %c0_57 = arith.constant 0 : index
    %81 = vector.load %arg3[%c19, %c0_56, %c0_57] : memref<22x78x144xbf16, #tpu.memory_space<vmem>>, vector<1x78x144xbf16>
    %82 = vector.shape_cast %81 : vector<1x78x144xbf16> to vector<78x144xbf16>
    %cst_58 = arith.constant dense<0.000000e+00> : vector<16x144xf32>
    %83 = tpu.matmul %76, %82, %cst_58 {dimension_numbers = #tpu.dot_dimension_numbers<[1], [0], [0], [1], [0, 0, 1, 1], [], []>} : vector<16x78xbf16>, vector<78x144xbf16>, vector<16x144xf32> -> vector<16x144xf32>
    %84 = arith.addf %75, %83 : vector<16x144xf32>
    %85 = vector.extract_strided_slice %1 {offsets = [9, 0], sizes = [16, 78], strides = [1, 1]} : vector<26x78xbf16> to vector<16x78xbf16>
    %c9 = arith.constant 9 : index
    %c0_59 = arith.constant 0 : index
    %c0_60 = arith.constant 0 : index
    %86 = vector.load %arg3[%c9, %c0_59, %c0_60] : memref<22x78x144xbf16, #tpu.memory_space<vmem>>, vector<1x78x144xbf16>
    %87 = vector.shape_cast %86 : vector<1x78x144xbf16> to vector<78x144xbf16>
    %cst_61 = arith.constant dense<0.000000e+00> : vector<16x144xf32>
    %88 = tpu.matmul %85, %87, %cst_61 {dimension_numbers = #tpu.dot_dimension_numbers<[1], [0], [0], [1], [0, 0, 1, 1], [], []>} : vector<16x78xbf16>, vector<78x144xbf16>, vector<16x144xf32> -> vector<16x144xf32>
    %89 = arith.addf %80, %88 : vector<16x144xf32>
    %c20 = arith.constant 20 : index
    %c0_62 = arith.constant 0 : index
    %c0_63 = arith.constant 0 : index
    %90 = vector.load %arg3[%c20, %c0_62, %c0_63] : memref<22x78x144xbf16, #tpu.memory_space<vmem>>, vector<1x78x144xbf16>
    %91 = vector.shape_cast %90 : vector<1x78x144xbf16> to vector<78x144xbf16>
    %cst_64 = arith.constant dense<0.000000e+00> : vector<16x144xf32>
    %92 = tpu.matmul %85, %91, %cst_64 {dimension_numbers = #tpu.dot_dimension_numbers<[1], [0], [0], [1], [0, 0, 1, 1], [], []>} : vector<16x78xbf16>, vector<78x144xbf16>, vector<16x144xf32> -> vector<16x144xf32>
    %93 = arith.addf %84, %92 : vector<16x144xf32>
    %94 = vector.extract_strided_slice %1 {offsets = [10, 0], sizes = [16, 78], strides = [1, 1]} : vector<26x78xbf16> to vector<16x78xbf16>
    %c10 = arith.constant 10 : index
    %c0_65 = arith.constant 0 : index
    %c0_66 = arith.constant 0 : index
    %95 = vector.load %arg3[%c10, %c0_65, %c0_66] : memref<22x78x144xbf16, #tpu.memory_space<vmem>>, vector<1x78x144xbf16>
    %96 = vector.shape_cast %95 : vector<1x78x144xbf16> to vector<78x144xbf16>
    %cst_67 = arith.constant dense<0.000000e+00> : vector<16x144xf32>
    %97 = tpu.matmul %94, %96, %cst_67 {dimension_numbers = #tpu.dot_dimension_numbers<[1], [0], [0], [1], [0, 0, 1, 1], [], []>} : vector<16x78xbf16>, vector<78x144xbf16>, vector<16x144xf32> -> vector<16x144xf32>
    %98 = arith.addf %89, %97 : vector<16x144xf32>
    %c21 = arith.constant 21 : index
    %c0_68 = arith.constant 0 : index
    %c0_69 = arith.constant 0 : index
    %99 = vector.load %arg3[%c21, %c0_68, %c0_69] : memref<22x78x144xbf16, #tpu.memory_space<vmem>>, vector<1x78x144xbf16>
    %100 = vector.shape_cast %99 : vector<1x78x144xbf16> to vector<78x144xbf16>
    %cst_70 = arith.constant dense<0.000000e+00> : vector<16x144xf32>
    %101 = tpu.matmul %94, %100, %cst_70 {dimension_numbers = #tpu.dot_dimension_numbers<[1], [0], [0], [1], [0, 0, 1, 1], [], []>} : vector<16x78xbf16>, vector<78x144xbf16>, vector<16x144xf32> -> vector<16x144xf32>
    %102 = arith.addf %93, %101 : vector<16x144xf32>
    %c0_71 = arith.constant 0 : index
    %c0_72 = arith.constant 0 : index
    %103 = vector.load %arg4[%c0_71, %c0_72] : memref<1x144xf32, #tpu.memory_space<vmem>>, vector<1x144xf32>
    %c0_73 = arith.constant 0 : index
    %c0_74 = arith.constant 0 : index
    %104 = vector.load %arg5[%c0_73, %c0_74] : memref<1x144xf32, #tpu.memory_space<vmem>>, vector<1x144xf32>
    %c0_75 = arith.constant 0 : index
    %c0_76 = arith.constant 0 : index
    %105 = vector.load %arg6[%c0_75, %c0_76] : memref<1x144xf32, #tpu.memory_space<vmem>>, vector<1x144xf32>
    %106 = vector.broadcast %103 : vector<1x144xf32> to vector<16x144xf32>
    %107 = arith.addf %98, %106 : vector<16x144xf32>
    %cst_77 = arith.constant 0.000000e+00 : f32
    %108 = vector.broadcast %cst_77 : f32 to vector<16x144xf32>
    %109 = arith.maximumf %107, %108 : vector<16x144xf32>
    %110 = vector.broadcast %104 : vector<1x144xf32> to vector<16x144xf32>
    %111 = arith.mulf %109, %110 : vector<16x144xf32>
    %112 = vector.broadcast %105 : vector<1x144xf32> to vector<16x144xf32>
    %113 = arith.addf %111, %112 : vector<16x144xf32>
    %114 = vector.broadcast %103 : vector<1x144xf32> to vector<16x144xf32>
    %115 = arith.addf %102, %114 : vector<16x144xf32>
    %cst_78 = arith.constant 0.000000e+00 : f32
    %116 = vector.broadcast %cst_78 : f32 to vector<16x144xf32>
    %117 = arith.maximumf %115, %116 : vector<16x144xf32>
    %118 = vector.broadcast %104 : vector<1x144xf32> to vector<16x144xf32>
    %119 = arith.mulf %117, %118 : vector<16x144xf32>
    %120 = vector.broadcast %105 : vector<1x144xf32> to vector<16x144xf32>
    %121 = arith.addf %119, %120 : vector<16x144xf32>
    %122 = arith.maximumf %113, %121 : vector<16x144xf32>
    %123 = vector.shape_cast %122 : vector<16x144xf32> to vector<8x2x144xf32>
    %cst_79 = arith.constant dense<0xFF800000> : vector<8x144xf32>
    %124 = vector.multi_reduction <maximumf>, %123, %cst_79 [1] : vector<8x2x144xf32> to vector<8x144xf32>
    %125 = vector.shape_cast %124 : vector<8x144xf32> to vector<1x1x8x144xf32>
    %126 = arith.truncf %125 : vector<1x1x8x144xf32> to vector<1x1x8x144xbf16>
    %c0_80 = arith.constant 0 : index
    %c0_81 = arith.constant 0 : index
    %c0_82 = arith.constant 0 : index
    %c0_83 = arith.constant 0 : index
    %127 = vector.load %arg7[%c0_80, %c0_81, %c0_82, %c0_83] : memref<1x1x8x144xbf16, #tpu.memory_space<vmem>>, vector<1x1x8x144xbf16>
    tpu.vector_store %arg7[%c0_80, %c0_81, %c0_82, %c0_83], %126 {strides = array<i32>} : memref<1x1x8x144xbf16, #tpu.memory_space<vmem>>, vector<1x1x8x144xbf16>,
    return
  }
  func.func @transform_0(%arg0: i32, %arg1: i32) -> (i32, i32, i32, i32) {
    %c0_i32 = arith.constant 0 : i32
    %c0_i32_0 = arith.constant 0 : i32
    %c0_i32_1 = arith.constant 0 : i32
    return %arg0, %arg1, %c0_i32, %c0_i32_0 : i32, i32, i32, i32
  }
  func.func @transform_1(%arg0: i32, %arg1: i32) -> (i32, i32, i32) {
    %c0_i32 = arith.constant 0 : i32
    %c0_i32_0 = arith.constant 0 : i32
    %c0_i32_1 = arith.constant 0 : i32
    %c0_i32_2 = arith.constant 0 : i32
    return %c0_i32, %c0_i32_0, %c0_i32_1 : i32, i32, i32
  }
  func.func @transform_2(%arg0: i32, %arg1: i32) -> (i32, i32) {
    %c0_i32 = arith.constant 0 : i32
    %c0_i32_0 = arith.constant 0 : i32
    %c0_i32_1 = arith.constant 0 : i32
    return %c0_i32, %c0_i32_0 : i32, i32
  }
  func.func @transform_3(%arg0: i32, %arg1: i32) -> (i32, i32) {
    %c0_i32 = arith.constant 0 : i32
    %c0_i32_0 = arith.constant 0 : i32
    %c0_i32_1 = arith.constant 0 : i32
    return %c0_i32, %c0_i32_0 : i32, i32
  }
  func.func @transform_4(%arg0: i32, %arg1: i32) -> (i32, i32) {
    %c0_i32 = arith.constant 0 : i32
    %c0_i32_0 = arith.constant 0 : i32
    %c0_i32_1 = arith.constant 0 : i32
    return %c0_i32, %c0_i32_0 : i32, i32
  }
  func.func @transform_5(%arg0: i32, %arg1: i32) -> (i32, i32, i32, i32) {
    %c0_i32 = arith.constant 0 : i32
    %c0_i32_0 = arith.constant 0 : i32
    %c0_i32_1 = arith.constant 0 : i32
    return %arg0, %arg1, %c0_i32, %c0_i32_0 : i32, i32, i32, i32
  }
}

module attributes {stable_mosaic.version = 11 : i64} {
  func.func @kernel(%arg0: i32, %arg1: i32, %arg2: memref<1x1x18x324xbf16, #tpu.memory_space<vmem>>, %arg3: memref<22x324x144xbf16, #tpu.memory_space<vmem>>, %arg4: memref<1x144xf32, #tpu.memory_space<vmem>>, %arg5: memref<1x144xf32, #tpu.memory_space<vmem>>, %arg6: memref<1x144xf32, #tpu.memory_space<vmem>>, %arg7: memref<1x1x4x144xbf16, #tpu.memory_space<vmem>>) attributes {dimension_semantics = [#tpu.dimension_semantics<parallel>, #tpu.dimension_semantics<parallel>], iteration_bounds = array<i64: 2, 1>, scalar_prefetch = 0 : i64, scratch_operands = 0 : i64, tpu.core_type = #tpu.core_type<tc>, window_params = [{transform_indices = @transform_0, window_bounds = array<i64: 1, 1, 18, 324>}, {pipeline_mode = #tpu.pipeline_mode<synchronous>, transform_indices = @transform_1, window_bounds = array<i64: 22, 324, 144>}, {pipeline_mode = #tpu.pipeline_mode<synchronous>, transform_indices = @transform_2, window_bounds = array<i64: 1, 144>}, {pipeline_mode = #tpu.pipeline_mode<synchronous>, transform_indices = @transform_3, window_bounds = array<i64: 1, 144>}, {pipeline_mode = #tpu.pipeline_mode<synchronous>, transform_indices = @transform_4, window_bounds = array<i64: 1, 144>}, {transform_indices = @transform_5, window_bounds = array<i64: 1, 1, 4, 144>}]} {
    %c0 = arith.constant 0 : index
    %c0_0 = arith.constant 0 : index
    %c0_1 = arith.constant 0 : index
    %c0_2 = arith.constant 0 : index
    %0 = vector.load %arg2[%c0, %c0_0, %c0_1, %c0_2] : memref<1x1x18x324xbf16, #tpu.memory_space<vmem>>, vector<1x1x18x324xbf16>
    %1 = vector.shape_cast %0 : vector<1x1x18x324xbf16> to vector<18x324xbf16>
    %cst = arith.constant 0.000000e+00 : f32
    %2 = vector.broadcast %cst : f32 to vector<8x144xf32>
    %cst_3 = arith.constant 0.000000e+00 : f32
    %3 = vector.broadcast %cst_3 : f32 to vector<8x144xf32>
    %4 = vector.extract_strided_slice %1 {offsets = [0, 0], sizes = [8, 324], strides = [1, 1]} : vector<18x324xbf16> to vector<8x324xbf16>
    %c0_4 = arith.constant 0 : index
    %c0_5 = arith.constant 0 : index
    %c0_6 = arith.constant 0 : index
    %5 = vector.load %arg3[%c0_4, %c0_5, %c0_6] : memref<22x324x144xbf16, #tpu.memory_space<vmem>>, vector<1x324x144xbf16>
    %6 = vector.shape_cast %5 : vector<1x324x144xbf16> to vector<324x144xbf16>
    %cst_7 = arith.constant dense<0.000000e+00> : vector<8x144xf32>
    %7 = tpu.matmul %4, %6, %cst_7 {dimension_numbers = #tpu.dot_dimension_numbers<[1], [0], [0], [1], [0, 0, 1, 1], [], []>} : vector<8x324xbf16>, vector<324x144xbf16>, vector<8x144xf32> -> vector<8x144xf32>
    %8 = arith.addf %2, %7 : vector<8x144xf32>
    %c11 = arith.constant 11 : index
    %c0_8 = arith.constant 0 : index
    %c0_9 = arith.constant 0 : index
    %9 = vector.load %arg3[%c11, %c0_8, %c0_9] : memref<22x324x144xbf16, #tpu.memory_space<vmem>>, vector<1x324x144xbf16>
    %10 = vector.shape_cast %9 : vector<1x324x144xbf16> to vector<324x144xbf16>
    %cst_10 = arith.constant dense<0.000000e+00> : vector<8x144xf32>
    %11 = tpu.matmul %4, %10, %cst_10 {dimension_numbers = #tpu.dot_dimension_numbers<[1], [0], [0], [1], [0, 0, 1, 1], [], []>} : vector<8x324xbf16>, vector<324x144xbf16>, vector<8x144xf32> -> vector<8x144xf32>
    %12 = arith.addf %3, %11 : vector<8x144xf32>
    %13 = vector.extract_strided_slice %1 {offsets = [1, 0], sizes = [8, 324], strides = [1, 1]} : vector<18x324xbf16> to vector<8x324xbf16>
    %c1 = arith.constant 1 : index
    %c0_11 = arith.constant 0 : index
    %c0_12 = arith.constant 0 : index
    %14 = vector.load %arg3[%c1, %c0_11, %c0_12] : memref<22x324x144xbf16, #tpu.memory_space<vmem>>, vector<1x324x144xbf16>
    %15 = vector.shape_cast %14 : vector<1x324x144xbf16> to vector<324x144xbf16>
    %cst_13 = arith.constant dense<0.000000e+00> : vector<8x144xf32>
    %16 = tpu.matmul %13, %15, %cst_13 {dimension_numbers = #tpu.dot_dimension_numbers<[1], [0], [0], [1], [0, 0, 1, 1], [], []>} : vector<8x324xbf16>, vector<324x144xbf16>, vector<8x144xf32> -> vector<8x144xf32>
    %17 = arith.addf %8, %16 : vector<8x144xf32>
    %c12 = arith.constant 12 : index
    %c0_14 = arith.constant 0 : index
    %c0_15 = arith.constant 0 : index
    %18 = vector.load %arg3[%c12, %c0_14, %c0_15] : memref<22x324x144xbf16, #tpu.memory_space<vmem>>, vector<1x324x144xbf16>
    %19 = vector.shape_cast %18 : vector<1x324x144xbf16> to vector<324x144xbf16>
    %cst_16 = arith.constant dense<0.000000e+00> : vector<8x144xf32>
    %20 = tpu.matmul %13, %19, %cst_16 {dimension_numbers = #tpu.dot_dimension_numbers<[1], [0], [0], [1], [0, 0, 1, 1], [], []>} : vector<8x324xbf16>, vector<324x144xbf16>, vector<8x144xf32> -> vector<8x144xf32>
    %21 = arith.addf %12, %20 : vector<8x144xf32>
    %22 = vector.extract_strided_slice %1 {offsets = [2, 0], sizes = [8, 324], strides = [1, 1]} : vector<18x324xbf16> to vector<8x324xbf16>
    %c2 = arith.constant 2 : index
    %c0_17 = arith.constant 0 : index
    %c0_18 = arith.constant 0 : index
    %23 = vector.load %arg3[%c2, %c0_17, %c0_18] : memref<22x324x144xbf16, #tpu.memory_space<vmem>>, vector<1x324x144xbf16>
    %24 = vector.shape_cast %23 : vector<1x324x144xbf16> to vector<324x144xbf16>
    %cst_19 = arith.constant dense<0.000000e+00> : vector<8x144xf32>
    %25 = tpu.matmul %22, %24, %cst_19 {dimension_numbers = #tpu.dot_dimension_numbers<[1], [0], [0], [1], [0, 0, 1, 1], [], []>} : vector<8x324xbf16>, vector<324x144xbf16>, vector<8x144xf32> -> vector<8x144xf32>
    %26 = arith.addf %17, %25 : vector<8x144xf32>
    %c13 = arith.constant 13 : index
    %c0_20 = arith.constant 0 : index
    %c0_21 = arith.constant 0 : index
    %27 = vector.load %arg3[%c13, %c0_20, %c0_21] : memref<22x324x144xbf16, #tpu.memory_space<vmem>>, vector<1x324x144xbf16>
    %28 = vector.shape_cast %27 : vector<1x324x144xbf16> to vector<324x144xbf16>
    %cst_22 = arith.constant dense<0.000000e+00> : vector<8x144xf32>
    %29 = tpu.matmul %22, %28, %cst_22 {dimension_numbers = #tpu.dot_dimension_numbers<[1], [0], [0], [1], [0, 0, 1, 1], [], []>} : vector<8x324xbf16>, vector<324x144xbf16>, vector<8x144xf32> -> vector<8x144xf32>
    %30 = arith.addf %21, %29 : vector<8x144xf32>
    %31 = vector.extract_strided_slice %1 {offsets = [3, 0], sizes = [8, 324], strides = [1, 1]} : vector<18x324xbf16> to vector<8x324xbf16>
    %c3 = arith.constant 3 : index
    %c0_23 = arith.constant 0 : index
    %c0_24 = arith.constant 0 : index
    %32 = vector.load %arg3[%c3, %c0_23, %c0_24] : memref<22x324x144xbf16, #tpu.memory_space<vmem>>, vector<1x324x144xbf16>
    %33 = vector.shape_cast %32 : vector<1x324x144xbf16> to vector<324x144xbf16>
    %cst_25 = arith.constant dense<0.000000e+00> : vector<8x144xf32>
    %34 = tpu.matmul %31, %33, %cst_25 {dimension_numbers = #tpu.dot_dimension_numbers<[1], [0], [0], [1], [0, 0, 1, 1], [], []>} : vector<8x324xbf16>, vector<324x144xbf16>, vector<8x144xf32> -> vector<8x144xf32>
    %35 = arith.addf %26, %34 : vector<8x144xf32>
    %c14 = arith.constant 14 : index
    %c0_26 = arith.constant 0 : index
    %c0_27 = arith.constant 0 : index
    %36 = vector.load %arg3[%c14, %c0_26, %c0_27] : memref<22x324x144xbf16, #tpu.memory_space<vmem>>, vector<1x324x144xbf16>
    %37 = vector.shape_cast %36 : vector<1x324x144xbf16> to vector<324x144xbf16>
    %cst_28 = arith.constant dense<0.000000e+00> : vector<8x144xf32>
    %38 = tpu.matmul %31, %37, %cst_28 {dimension_numbers = #tpu.dot_dimension_numbers<[1], [0], [0], [1], [0, 0, 1, 1], [], []>} : vector<8x324xbf16>, vector<324x144xbf16>, vector<8x144xf32> -> vector<8x144xf32>
    %39 = arith.addf %30, %38 : vector<8x144xf32>
    %40 = vector.extract_strided_slice %1 {offsets = [4, 0], sizes = [8, 324], strides = [1, 1]} : vector<18x324xbf16> to vector<8x324xbf16>
    %c4 = arith.constant 4 : index
    %c0_29 = arith.constant 0 : index
    %c0_30 = arith.constant 0 : index
    %41 = vector.load %arg3[%c4, %c0_29, %c0_30] : memref<22x324x144xbf16, #tpu.memory_space<vmem>>, vector<1x324x144xbf16>
    %42 = vector.shape_cast %41 : vector<1x324x144xbf16> to vector<324x144xbf16>
    %cst_31 = arith.constant dense<0.000000e+00> : vector<8x144xf32>
    %43 = tpu.matmul %40, %42, %cst_31 {dimension_numbers = #tpu.dot_dimension_numbers<[1], [0], [0], [1], [0, 0, 1, 1], [], []>} : vector<8x324xbf16>, vector<324x144xbf16>, vector<8x144xf32> -> vector<8x144xf32>
    %44 = arith.addf %35, %43 : vector<8x144xf32>
    %c15 = arith.constant 15 : index
    %c0_32 = arith.constant 0 : index
    %c0_33 = arith.constant 0 : index
    %45 = vector.load %arg3[%c15, %c0_32, %c0_33] : memref<22x324x144xbf16, #tpu.memory_space<vmem>>, vector<1x324x144xbf16>
    %46 = vector.shape_cast %45 : vector<1x324x144xbf16> to vector<324x144xbf16>
    %cst_34 = arith.constant dense<0.000000e+00> : vector<8x144xf32>
    %47 = tpu.matmul %40, %46, %cst_34 {dimension_numbers = #tpu.dot_dimension_numbers<[1], [0], [0], [1], [0, 0, 1, 1], [], []>} : vector<8x324xbf16>, vector<324x144xbf16>, vector<8x144xf32> -> vector<8x144xf32>
    %48 = arith.addf %39, %47 : vector<8x144xf32>
    %49 = vector.extract_strided_slice %1 {offsets = [5, 0], sizes = [8, 324], strides = [1, 1]} : vector<18x324xbf16> to vector<8x324xbf16>
    %c5 = arith.constant 5 : index
    %c0_35 = arith.constant 0 : index
    %c0_36 = arith.constant 0 : index
    %50 = vector.load %arg3[%c5, %c0_35, %c0_36] : memref<22x324x144xbf16, #tpu.memory_space<vmem>>, vector<1x324x144xbf16>
    %51 = vector.shape_cast %50 : vector<1x324x144xbf16> to vector<324x144xbf16>
    %cst_37 = arith.constant dense<0.000000e+00> : vector<8x144xf32>
    %52 = tpu.matmul %49, %51, %cst_37 {dimension_numbers = #tpu.dot_dimension_numbers<[1], [0], [0], [1], [0, 0, 1, 1], [], []>} : vector<8x324xbf16>, vector<324x144xbf16>, vector<8x144xf32> -> vector<8x144xf32>
    %53 = arith.addf %44, %52 : vector<8x144xf32>
    %c16 = arith.constant 16 : index
    %c0_38 = arith.constant 0 : index
    %c0_39 = arith.constant 0 : index
    %54 = vector.load %arg3[%c16, %c0_38, %c0_39] : memref<22x324x144xbf16, #tpu.memory_space<vmem>>, vector<1x324x144xbf16>
    %55 = vector.shape_cast %54 : vector<1x324x144xbf16> to vector<324x144xbf16>
    %cst_40 = arith.constant dense<0.000000e+00> : vector<8x144xf32>
    %56 = tpu.matmul %49, %55, %cst_40 {dimension_numbers = #tpu.dot_dimension_numbers<[1], [0], [0], [1], [0, 0, 1, 1], [], []>} : vector<8x324xbf16>, vector<324x144xbf16>, vector<8x144xf32> -> vector<8x144xf32>
    %57 = arith.addf %48, %56 : vector<8x144xf32>
    %58 = vector.extract_strided_slice %1 {offsets = [6, 0], sizes = [8, 324], strides = [1, 1]} : vector<18x324xbf16> to vector<8x324xbf16>
    %c6 = arith.constant 6 : index
    %c0_41 = arith.constant 0 : index
    %c0_42 = arith.constant 0 : index
    %59 = vector.load %arg3[%c6, %c0_41, %c0_42] : memref<22x324x144xbf16, #tpu.memory_space<vmem>>, vector<1x324x144xbf16>
    %60 = vector.shape_cast %59 : vector<1x324x144xbf16> to vector<324x144xbf16>
    %cst_43 = arith.constant dense<0.000000e+00> : vector<8x144xf32>
    %61 = tpu.matmul %58, %60, %cst_43 {dimension_numbers = #tpu.dot_dimension_numbers<[1], [0], [0], [1], [0, 0, 1, 1], [], []>} : vector<8x324xbf16>, vector<324x144xbf16>, vector<8x144xf32> -> vector<8x144xf32>
    %62 = arith.addf %53, %61 : vector<8x144xf32>
    %c17 = arith.constant 17 : index
    %c0_44 = arith.constant 0 : index
    %c0_45 = arith.constant 0 : index
    %63 = vector.load %arg3[%c17, %c0_44, %c0_45] : memref<22x324x144xbf16, #tpu.memory_space<vmem>>, vector<1x324x144xbf16>
    %64 = vector.shape_cast %63 : vector<1x324x144xbf16> to vector<324x144xbf16>
    %cst_46 = arith.constant dense<0.000000e+00> : vector<8x144xf32>
    %65 = tpu.matmul %58, %64, %cst_46 {dimension_numbers = #tpu.dot_dimension_numbers<[1], [0], [0], [1], [0, 0, 1, 1], [], []>} : vector<8x324xbf16>, vector<324x144xbf16>, vector<8x144xf32> -> vector<8x144xf32>
    %66 = arith.addf %57, %65 : vector<8x144xf32>
    %67 = vector.extract_strided_slice %1 {offsets = [7, 0], sizes = [8, 324], strides = [1, 1]} : vector<18x324xbf16> to vector<8x324xbf16>
    %c7 = arith.constant 7 : index
    %c0_47 = arith.constant 0 : index
    %c0_48 = arith.constant 0 : index
    %68 = vector.load %arg3[%c7, %c0_47, %c0_48] : memref<22x324x144xbf16, #tpu.memory_space<vmem>>, vector<1x324x144xbf16>
    %69 = vector.shape_cast %68 : vector<1x324x144xbf16> to vector<324x144xbf16>
    %cst_49 = arith.constant dense<0.000000e+00> : vector<8x144xf32>
    %70 = tpu.matmul %67, %69, %cst_49 {dimension_numbers = #tpu.dot_dimension_numbers<[1], [0], [0], [1], [0, 0, 1, 1], [], []>} : vector<8x324xbf16>, vector<324x144xbf16>, vector<8x144xf32> -> vector<8x144xf32>
    %71 = arith.addf %62, %70 : vector<8x144xf32>
    %c18 = arith.constant 18 : index
    %c0_50 = arith.constant 0 : index
    %c0_51 = arith.constant 0 : index
    %72 = vector.load %arg3[%c18, %c0_50, %c0_51] : memref<22x324x144xbf16, #tpu.memory_space<vmem>>, vector<1x324x144xbf16>
    %73 = vector.shape_cast %72 : vector<1x324x144xbf16> to vector<324x144xbf16>
    %cst_52 = arith.constant dense<0.000000e+00> : vector<8x144xf32>
    %74 = tpu.matmul %67, %73, %cst_52 {dimension_numbers = #tpu.dot_dimension_numbers<[1], [0], [0], [1], [0, 0, 1, 1], [], []>} : vector<8x324xbf16>, vector<324x144xbf16>, vector<8x144xf32> -> vector<8x144xf32>
    %75 = arith.addf %66, %74 : vector<8x144xf32>
    %76 = vector.extract_strided_slice %1 {offsets = [8, 0], sizes = [8, 324], strides = [1, 1]} : vector<18x324xbf16> to vector<8x324xbf16>
    %c8 = arith.constant 8 : index
    %c0_53 = arith.constant 0 : index
    %c0_54 = arith.constant 0 : index
    %77 = vector.load %arg3[%c8, %c0_53, %c0_54] : memref<22x324x144xbf16, #tpu.memory_space<vmem>>, vector<1x324x144xbf16>
    %78 = vector.shape_cast %77 : vector<1x324x144xbf16> to vector<324x144xbf16>
    %cst_55 = arith.constant dense<0.000000e+00> : vector<8x144xf32>
    %79 = tpu.matmul %76, %78, %cst_55 {dimension_numbers = #tpu.dot_dimension_numbers<[1], [0], [0], [1], [0, 0, 1, 1], [], []>} : vector<8x324xbf16>, vector<324x144xbf16>, vector<8x144xf32> -> vector<8x144xf32>
    %80 = arith.addf %71, %79 : vector<8x144xf32>
    %c19 = arith.constant 19 : index
    %c0_56 = arith.constant 0 : index
    %c0_57 = arith.constant 0 : index
    %81 = vector.load %arg3[%c19, %c0_56, %c0_57] : memref<22x324x144xbf16, #tpu.memory_space<vmem>>, vector<1x324x144xbf16>
    %82 = vector.shape_cast %81 : vector<1x324x144xbf16> to vector<324x144xbf16>
    %cst_58 = arith.constant dense<0.000000e+00> : vector<8x144xf32>
    %83 = tpu.matmul %76, %82, %cst_58 {dimension_numbers = #tpu.dot_dimension_numbers<[1], [0], [0], [1], [0, 0, 1, 1], [], []>} : vector<8x324xbf16>, vector<324x144xbf16>, vector<8x144xf32> -> vector<8x144xf32>
    %84 = arith.addf %75, %83 : vector<8x144xf32>
    %85 = vector.extract_strided_slice %1 {offsets = [9, 0], sizes = [8, 324], strides = [1, 1]} : vector<18x324xbf16> to vector<8x324xbf16>
    %c9 = arith.constant 9 : index
    %c0_59 = arith.constant 0 : index
    %c0_60 = arith.constant 0 : index
    %86 = vector.load %arg3[%c9, %c0_59, %c0_60] : memref<22x324x144xbf16, #tpu.memory_space<vmem>>, vector<1x324x144xbf16>
    %87 = vector.shape_cast %86 : vector<1x324x144xbf16> to vector<324x144xbf16>
    %cst_61 = arith.constant dense<0.000000e+00> : vector<8x144xf32>
    %88 = tpu.matmul %85, %87, %cst_61 {dimension_numbers = #tpu.dot_dimension_numbers<[1], [0], [0], [1], [0, 0, 1, 1], [], []>} : vector<8x324xbf16>, vector<324x144xbf16>, vector<8x144xf32> -> vector<8x144xf32>
    %89 = arith.addf %80, %88 : vector<8x144xf32>
    %c20 = arith.constant 20 : index
    %c0_62 = arith.constant 0 : index
    %c0_63 = arith.constant 0 : index
    %90 = vector.load %arg3[%c20, %c0_62, %c0_63] : memref<22x324x144xbf16, #tpu.memory_space<vmem>>, vector<1x324x144xbf16>
    %91 = vector.shape_cast %90 : vector<1x324x144xbf16> to vector<324x144xbf16>
    %cst_64 = arith.constant dense<0.000000e+00> : vector<8x144xf32>
    %92 = tpu.matmul %85, %91, %cst_64 {dimension_numbers = #tpu.dot_dimension_numbers<[1], [0], [0], [1], [0, 0, 1, 1], [], []>} : vector<8x324xbf16>, vector<324x144xbf16>, vector<8x144xf32> -> vector<8x144xf32>
    %93 = arith.addf %84, %92 : vector<8x144xf32>
    %94 = vector.extract_strided_slice %1 {offsets = [10, 0], sizes = [8, 324], strides = [1, 1]} : vector<18x324xbf16> to vector<8x324xbf16>
    %c10 = arith.constant 10 : index
    %c0_65 = arith.constant 0 : index
    %c0_66 = arith.constant 0 : index
    %95 = vector.load %arg3[%c10, %c0_65, %c0_66] : memref<22x324x144xbf16, #tpu.memory_space<vmem>>, vector<1x324x144xbf16>
    %96 = vector.shape_cast %95 : vector<1x324x144xbf16> to vector<324x144xbf16>
    %cst_67 = arith.constant dense<0.000000e+00> : vector<8x144xf32>
    %97 = tpu.matmul %94, %96, %cst_67 {dimension_numbers = #tpu.dot_dimension_numbers<[1], [0], [0], [1], [0, 0, 1, 1], [], []>} : vector<8x324xbf16>, vector<324x144xbf16>, vector<8x144xf32> -> vector<8x144xf32>
    %98 = arith.addf %89, %97 : vector<8x144xf32>
    %c21 = arith.constant 21 : index
    %c0_68 = arith.constant 0 : index
    %c0_69 = arith.constant 0 : index
    %99 = vector.load %arg3[%c21, %c0_68, %c0_69] : memref<22x324x144xbf16, #tpu.memory_space<vmem>>, vector<1x324x144xbf16>
    %100 = vector.shape_cast %99 : vector<1x324x144xbf16> to vector<324x144xbf16>
    %cst_70 = arith.constant dense<0.000000e+00> : vector<8x144xf32>
    %101 = tpu.matmul %94, %100, %cst_70 {dimension_numbers = #tpu.dot_dimension_numbers<[1], [0], [0], [1], [0, 0, 1, 1], [], []>} : vector<8x324xbf16>, vector<324x144xbf16>, vector<8x144xf32> -> vector<8x144xf32>
    %102 = arith.addf %93, %101 : vector<8x144xf32>
    %c0_71 = arith.constant 0 : index
    %c0_72 = arith.constant 0 : index
    %103 = vector.load %arg4[%c0_71, %c0_72] : memref<1x144xf32, #tpu.memory_space<vmem>>, vector<1x144xf32>
    %c0_73 = arith.constant 0 : index
    %c0_74 = arith.constant 0 : index
    %104 = vector.load %arg5[%c0_73, %c0_74] : memref<1x144xf32, #tpu.memory_space<vmem>>, vector<1x144xf32>
    %c0_75 = arith.constant 0 : index
    %c0_76 = arith.constant 0 : index
    %105 = vector.load %arg6[%c0_75, %c0_76] : memref<1x144xf32, #tpu.memory_space<vmem>>, vector<1x144xf32>
    %106 = vector.broadcast %103 : vector<1x144xf32> to vector<8x144xf32>
    %107 = arith.addf %98, %106 : vector<8x144xf32>
    %cst_77 = arith.constant 0.000000e+00 : f32
    %108 = vector.broadcast %cst_77 : f32 to vector<8x144xf32>
    %109 = arith.maximumf %107, %108 : vector<8x144xf32>
    %110 = vector.broadcast %104 : vector<1x144xf32> to vector<8x144xf32>
    %111 = arith.mulf %109, %110 : vector<8x144xf32>
    %112 = vector.broadcast %105 : vector<1x144xf32> to vector<8x144xf32>
    %113 = arith.addf %111, %112 : vector<8x144xf32>
    %114 = vector.broadcast %103 : vector<1x144xf32> to vector<8x144xf32>
    %115 = arith.addf %102, %114 : vector<8x144xf32>
    %cst_78 = arith.constant 0.000000e+00 : f32
    %116 = vector.broadcast %cst_78 : f32 to vector<8x144xf32>
    %117 = arith.maximumf %115, %116 : vector<8x144xf32>
    %118 = vector.broadcast %104 : vector<1x144xf32> to vector<8x144xf32>
    %119 = arith.mulf %117, %118 : vector<8x144xf32>
    %120 = vector.broadcast %105 : vector<1x144xf32> to vector<8x144xf32>
    %121 = arith.addf %119, %120 : vector<8x144xf32>
    %122 = arith.addf %113, %121 : vector<8x144xf32>
    %cst_79 = arith.constant 5.000000e-01 : f32
    %123 = vector.broadcast %cst_79 : f32 to vector<8x144xf32>
    %124 = arith.mulf %122, %123 : vector<8x144xf32>
    %125 = vector.shape_cast %124 : vector<8x144xf32> to vector<4x2x144xf32>
    %cst_80 = arith.constant dense<0.000000e+00> : vector<4x144xf32>
    %126 = vector.multi_reduction <add>, %125, %cst_80 [1] : vector<4x2x144xf32> to vector<4x144xf32>
    %cst_81 = arith.constant 5.000000e-01 : f32
    %127 = vector.broadcast %cst_81 : f32 to vector<4x144xf32>
    %128 = arith.mulf %126, %127 : vector<4x144xf32>
    %129 = vector.shape_cast %128 : vector<4x144xf32> to vector<1x1x4x144xf32>
    %130 = arith.truncf %129 : vector<1x1x4x144xf32> to vector<1x1x4x144xbf16>
    %c0_82 = arith.constant 0 : index
    %c0_83 = arith.constant 0 : index
    %c0_84 = arith.constant 0 : index
    %c0_85 = arith.constant 0 : index
    %131 = vector.load %arg7[%c0_82, %c0_83, %c0_84, %c0_85] : memref<1x1x4x144xbf16, #tpu.memory_space<vmem>>, vector<1x1x4x144xbf16>
    tpu.vector_store %arg7[%c0_82, %c0_83, %c0_84, %c0_85], %130 {strides = array<i32>} : memref<1x1x4x144xbf16, #tpu.memory_space<vmem>>, vector<1x1x4x144xbf16>,
    return
  }
  func.func @transform_0(%arg0: i32, %arg1: i32) -> (i32, i32, i32, i32) {
    %c0_i32 = arith.constant 0 : i32
    %c0_i32_0 = arith.constant 0 : i32
    %c0_i32_1 = arith.constant 0 : i32
    return %arg0, %arg1, %c0_i32, %c0_i32_0 : i32, i32, i32, i32
  }
  func.func @transform_1(%arg0: i32, %arg1: i32) -> (i32, i32, i32) {
    %c0_i32 = arith.constant 0 : i32
    %c0_i32_0 = arith.constant 0 : i32
    %c0_i32_1 = arith.constant 0 : i32
    %c0_i32_2 = arith.constant 0 : i32
    return %c0_i32, %c0_i32_0, %c0_i32_1 : i32, i32, i32
  }
  func.func @transform_2(%arg0: i32, %arg1: i32) -> (i32, i32) {
    %c0_i32 = arith.constant 0 : i32
    %c0_i32_0 = arith.constant 0 : i32
    %c0_i32_1 = arith.constant 0 : i32
    return %c0_i32, %c0_i32_0 : i32, i32
  }
  func.func @transform_3(%arg0: i32, %arg1: i32) -> (i32, i32) {
    %c0_i32 = arith.constant 0 : i32
    %c0_i32_0 = arith.constant 0 : i32
    %c0_i32_1 = arith.constant 0 : i32
    return %c0_i32, %c0_i32_0 : i32, i32
  }
  func.func @transform_4(%arg0: i32, %arg1: i32) -> (i32, i32) {
    %c0_i32 = arith.constant 0 : i32
    %c0_i32_0 = arith.constant 0 : i32
    %c0_i32_1 = arith.constant 0 : i32
    return %c0_i32, %c0_i32_0 : i32, i32
  }
  func.func @transform_5(%arg0: i32, %arg1: i32) -> (i32, i32, i32, i32) {
    %c0_i32 = arith.constant 0 : i32
    %c0_i32_0 = arith.constant 0 : i32
    %c0_i32_1 = arith.constant 0 : i32
    return %arg0, %arg1, %c0_i32, %c0_i32_0 : i32, i32, i32, i32
  }
}

module attributes {stable_mosaic.version = 11 : i64} {
  func.func @_head_kernel(%arg0: i32, %arg1: i32, %arg2: memref<2x640xbf16, #tpu.memory_space<vmem>>, %arg3: memref<640x512xbf16, #tpu.memory_space<vmem>>, %arg4: memref<1x512xf32, #tpu.memory_space<vmem>>, %arg5: memref<512x128xbf16, #tpu.memory_space<vmem>>, %arg6: memref<1x128xf32, #tpu.memory_space<vmem>>, %arg7: memref<2x128xf32, #tpu.memory_space<vmem>>, %arg8: memref<2x512xf32, #tpu.memory_space<vmem>>) attributes {dimension_semantics = [#tpu.dimension_semantics<parallel>, #tpu.dimension_semantics<arbitrary>], iteration_bounds = array<i64: 1, 1>, scalar_prefetch = 0 : i64, scratch_operands = 1 : i64, tpu.core_type = #tpu.core_type<tc>, window_params = [{transform_indices = @transform_0, window_bounds = array<i64: 2, 640>}, {transform_indices = @transform_1, window_bounds = array<i64: 640, 512>}, {pipeline_mode = #tpu.pipeline_mode<synchronous>, transform_indices = @transform_2, window_bounds = array<i64: 1, 512>}, {pipeline_mode = #tpu.pipeline_mode<synchronous>, transform_indices = @transform_3, window_bounds = array<i64: 512, 128>}, {pipeline_mode = #tpu.pipeline_mode<synchronous>, transform_indices = @transform_4, window_bounds = array<i64: 1, 128>}, {transform_indices = @transform_5, window_bounds = array<i64: 2, 128>}]} {
    %c0_i32 = arith.constant 0 : i32
    %0 = arith.cmpi eq, %arg1, %c0_i32 : i32
    %1 = arith.extui %0 : i1 to i32
    %c0_i32_0 = arith.constant 0 : i32
    %2 = arith.cmpi ne, %1, %c0_i32_0 : i32
    scf.if %2 {
      %cst_10 = arith.constant 0.000000e+00 : f32
      %12 = vector.broadcast %cst_10 : f32 to vector<2x512xf32>
      %c0_11 = arith.constant 0 : index
      %c0_12 = arith.constant 0 : index
      %13 = vector.load %arg8[%c0_11, %c0_12] : memref<2x512xf32, #tpu.memory_space<vmem>>, vector<2x512xf32>
      tpu.vector_store %arg8[%c0_11, %c0_12], %12 {strides = array<i32>} : memref<2x512xf32, #tpu.memory_space<vmem>>, vector<2x512xf32>,
    } else {
    }
    %c0 = arith.constant 0 : index
    %c0_1 = arith.constant 0 : index
    %3 = vector.load %arg8[%c0, %c0_1] : memref<2x512xf32, #tpu.memory_space<vmem>>, vector<2x512xf32>
    %c0_2 = arith.constant 0 : index
    %c0_3 = arith.constant 0 : index
    %4 = vector.load %arg2[%c0_2, %c0_3] : memref<2x640xbf16, #tpu.memory_space<vmem>>, vector<2x640xbf16>
    %c0_4 = arith.constant 0 : index
    %c0_5 = arith.constant 0 : index
    %5 = vector.load %arg3[%c0_4, %c0_5] : memref<640x512xbf16, #tpu.memory_space<vmem>>, vector<640x512xbf16>
    %cst = arith.constant dense<0.000000e+00> : vector<2x512xf32>
    %6 = tpu.matmul %4, %5, %cst {dimension_numbers = #tpu.dot_dimension_numbers<[1], [0], [0], [1], [0, 0, 1, 1], [], []>} : vector<2x640xbf16>, vector<640x512xbf16>, vector<2x512xf32> -> vector<2x512xf32>
    %7 = arith.addf %3, %6 : vector<2x512xf32>
    %c0_6 = arith.constant 0 : index
    %c0_7 = arith.constant 0 : index
    %8 = vector.load %arg8[%c0_6, %c0_7] : memref<2x512xf32, #tpu.memory_space<vmem>>, vector<2x512xf32>
    tpu.vector_store %arg8[%c0_6, %c0_7], %7 {strides = array<i32>} : memref<2x512xf32, #tpu.memory_space<vmem>>, vector<2x512xf32>,
    %c0_i32_8 = arith.constant 0 : i32
    %9 = arith.cmpi eq, %arg1, %c0_i32_8 : i32
    %10 = arith.extui %9 : i1 to i32
    %c0_i32_9 = arith.constant 0 : i32
    %11 = arith.cmpi ne, %10, %c0_i32_9 : i32
    scf.if %11 {
      %c0_10 = arith.constant 0 : index
      %c0_11 = arith.constant 0 : index
      %12 = vector.load %arg8[%c0_10, %c0_11] : memref<2x512xf32, #tpu.memory_space<vmem>>, vector<2x512xf32>
      %c0_12 = arith.constant 0 : index
      %c0_13 = arith.constant 0 : index
      %13 = vector.load %arg4[%c0_12, %c0_13] : memref<1x512xf32, #tpu.memory_space<vmem>>, vector<1x512xf32>
      %14 = vector.broadcast %13 : vector<1x512xf32> to vector<2x512xf32>
      %15 = arith.addf %12, %14 : vector<2x512xf32>
      %cst_14 = arith.constant 0.000000e+00 : f32
      %16 = vector.broadcast %cst_14 : f32 to vector<2x512xf32>
      %17 = arith.maximumf %15, %16 : vector<2x512xf32>
      %18 = arith.truncf %17 : vector<2x512xf32> to vector<2x512xbf16>
      %c0_15 = arith.constant 0 : index
      %c0_16 = arith.constant 0 : index
      %19 = vector.load %arg5[%c0_15, %c0_16] : memref<512x128xbf16, #tpu.memory_space<vmem>>, vector<512x128xbf16>
      %cst_17 = arith.constant dense<0.000000e+00> : vector<2x128xf32>
      %20 = tpu.matmul %18, %19, %cst_17 {dimension_numbers = #tpu.dot_dimension_numbers<[1], [0], [0], [1], [0, 0, 1, 1], [], []>} : vector<2x512xbf16>, vector<512x128xbf16>, vector<2x128xf32> -> vector<2x128xf32>
      %c0_18 = arith.constant 0 : index
      %c0_19 = arith.constant 0 : index
      %21 = vector.load %arg6[%c0_18, %c0_19] : memref<1x128xf32, #tpu.memory_space<vmem>>, vector<1x128xf32>
      %22 = vector.broadcast %21 : vector<1x128xf32> to vector<2x128xf32>
      %23 = arith.addf %20, %22 : vector<2x128xf32>
      %cst_20 = arith.constant 0.000000e+00 : f32
      %24 = vector.broadcast %cst_20 : f32 to vector<2x128xf32>
      %25 = arith.subf %24, %23 : vector<2x128xf32>
      %26 = math.exp %25 : vector<2x128xf32>
      %cst_21 = arith.constant 1.000000e+00 : f32
      %27 = vector.broadcast %cst_21 : f32 to vector<2x128xf32>
      %28 = arith.addf %27, %26 : vector<2x128xf32>
      %cst_22 = arith.constant 1.000000e+00 : f32
      %29 = vector.broadcast %cst_22 : f32 to vector<2x128xf32>
      %30 = arith.divf %29, %28 : vector<2x128xf32>
      %c0_23 = arith.constant 0 : index
      %c0_24 = arith.constant 0 : index
      %31 = vector.load %arg7[%c0_23, %c0_24] : memref<2x128xf32, #tpu.memory_space<vmem>>, vector<2x128xf32>
      tpu.vector_store %arg7[%c0_23, %c0_24], %30 {strides = array<i32>} : memref<2x128xf32, #tpu.memory_space<vmem>>, vector<2x128xf32>,
    } else {
    }
    return
  }
  func.func @transform_0(%arg0: i32, %arg1: i32) -> (i32, i32) {
    %c0_i32 = arith.constant 0 : i32
    return %arg0, %arg1 : i32, i32
  }
  func.func @transform_1(%arg0: i32, %arg1: i32) -> (i32, i32) {
    %c0_i32 = arith.constant 0 : i32
    %c0_i32_0 = arith.constant 0 : i32
    return %arg1, %c0_i32 : i32, i32
  }
  func.func @transform_2(%arg0: i32, %arg1: i32) -> (i32, i32) {
    %c0_i32 = arith.constant 0 : i32
    %c0_i32_0 = arith.constant 0 : i32
    %c0_i32_1 = arith.constant 0 : i32
    return %c0_i32, %c0_i32_0 : i32, i32
  }
  func.func @transform_3(%arg0: i32, %arg1: i32) -> (i32, i32) {
    %c0_i32 = arith.constant 0 : i32
    %c0_i32_0 = arith.constant 0 : i32
    %c0_i32_1 = arith.constant 0 : i32
    return %c0_i32, %c0_i32_0 : i32, i32
  }
  func.func @transform_4(%arg0: i32, %arg1: i32) -> (i32, i32) {
    %c0_i32 = arith.constant 0 : i32
    %c0_i32_0 = arith.constant 0 : i32
    %c0_i32_1 = arith.constant 0 : i32
    return %c0_i32, %c0_i32_0 : i32, i32
  }
  func.func @transform_5(%arg0: i32, %arg1: i32) -> (i32, i32) {
    %c0_i32 = arith.constant 0 : i32
    %c0_i32_0 = arith.constant 0 : i32
    return %arg0, %c0_i32 : i32, i32
  }
}

</mosaic_0001>

<bundles_post_ra>
// kernel: tile.38
= control target key start
LH: loop header
LB: loop body
LE: loop exit
PB: predicated region body
PF: predicated region fallthrough
CT: control target
= control target key end

     0   :  { %s22_s0 = inlined_call_operand.vmem [shape: f32[18], index: 0, kind: input, shape index: {}]   ;;  %s23_s1 = inlined_call_operand.vmem [shape: f32[8,18], index: 1, kind: output, shape index: {}]  }
   0x1   :  { %v4_v0 = vld [vmem:[%s22_s0] ss:$0 sm:$0xff] }
   0x2   :  { %5 = vst [vmem:[%s23_s1] sm:$0xff] %v4_v0 }

// kernel: tile.39
= control target key start
LH: loop header
LB: loop body
LE: loop exit
PB: predicated region body
PF: predicated region fallthrough
CT: control target
= control target key end

     0   :  { %vm9_vm0 = vcmask 15360   ;;  %s81_s12 = smov 126   ;;  %s82_s13 = smov 90   ;;  %vm3_vm1 = vcmask 146432   ;;  %vm13_vm2 = vcmask 130048   ;;  %vm16_vm3 = vcmask 1048560   ;;  %s131_s0 = inlined_call_operand.vmem [shape: f32[8,18], index: 0, kind: input, shape index: {}]   ;;  %s132_s1 = inlined_call_operand.vmem [shape: f32[1,144], index: 1, kind: output, shape index: {}]  }
   0x1   :  { %v65_v0 = vld [vmem:[%s131_s0 + $0x7] sm:$0x1]   ;;  %v68_v3 = vld [vmem:[%s131_s0 + $0x5] sm:$0x1]   ;;  %v67_v4 = vld [vmem:[%s131_s0 + $0x6] sm:$0x1]  }
   0x2   :  { %v66_v1 = vld [vmem:[%s131_s0 + $0x7] sm:$0x1]   ;;  %26 = vrot.lane.b32.xlu1 %v68_v3, %s82_s13  ;;  %v69_v5 = vld [vmem:[%s131_s0 + $0x4] sm:$0x1]   ;;  %v2_v6 = vld [vmem:[%s131_s0] sm:$0x1]  }
   0x3   :  { %v10_v2 = vsel %vm9_vm0, %v66_v1, %v65_v0  ;;  %4 = vst.msk [vmem:[#allocation0] sm:$0x1] %vm3_vm1, %v2_v6   ;;  %s83_s20 = smov 108   ;;  %s84_s21 = smov 72   ;;  %v70_v7 = vld [vmem:[%s131_s0 + $0x3] sm:$0x1]  }
   0x4   :  { %11 = vrot.lane.b32.xlu0 %v10_v2, %s81_s12  ;;  %v71_v8 = vld [vmem:[%s131_s0 + $0x2] sm:$0x1]   ;;  %s85_s26 = smov 54   ;;  %s86_s27 = smov 36   ;;  %v72_v9 = vld [vmem:[%s131_s0 + $0x1] sm:$0x1]  }
   0x5   :  { %s87_s0 = smov 18   ;;  %vm22_vm4 = vcmask 1032032   ;;  %vm28_vm5 = vcmask 884432   ;;  %vm34_vm6 = vcmask 736832   ;;  %vm40_vm7 = vcmask 589232  }
   0x6   :  { %32 = vrot.lane.b32.xlu1 %v69_v5, %s84_s21  ;;  %vm46_vm8 = vcmask 441632   ;;  %vm52_vm9 = vcmask 294032  }
   0x8   :  { %20 = vrot.lane.b32.xlu0 %v67_v4, %s83_s20 }
   0xa   :  { %44 = vrot.lane.b32.xlu1 %v71_v8, %s86_s27 }
   0xc   :  { %38 = vrot.lane.b32.xlu0 %v70_v7, %s85_s26 }
  0x10   :  { %50 = vrot.lane.b32.xlu0 %v72_v9, %s87_s0 }
  0x74   :  { %v27_v11 = vpop.permute.xlu1 %26  }
  0x76   :  { %v12_v10 = vpop.permute.xlu0 %11  }
  0x77   :  { %15 = vst.msk [vmem:[#allocation0 + $0x8] sm:$0x1] %vm13_vm2, %v12_v10  }
  0x78   :  { %17 = vst.msk [vmem:[#allocation0] sm:$0x1] %vm16_vm3, %v12_v10   ;;  %v33_v13 = vpop.permute.xlu1 %32  }
  0x7a   :  { %v21_v12 = vpop.permute.xlu0 %20  }
  0x7b   :  { %23 = vst.msk [vmem:[#allocation0] sm:$0x1] %vm22_vm4, %v21_v12  }
  0x7c   :  { %29 = vst.msk [vmem:[#allocation0] sm:$0x1] %vm28_vm5, %v27_v11   ;;  %v45_v16 = vpop.permute.xlu1 %44  }
  0x7d   :  { %35 = vst.msk [vmem:[#allocation0] sm:$0x1] %vm34_vm6, %v33_v13  }
  0x7e   :  { %v61_v14 = vld [vmem:[#allocation0 + $0x8] sm:$0x1]  ;;  %v39_v15 = vpop.permute.xlu0 %38  }
  0x7f   :  { %73 = vst [vmem:[%s132_s1 + $0x1] sm:$0x1] %v61_v14  ;;  %41 = vst.msk [vmem:[#allocation0] sm:$0x1] %vm40_vm7, %v39_v15  }
  0x80   :  { %47 = vst.msk [vmem:[#allocation0] sm:$0x1] %vm46_vm8, %v45_v16  }
  0x82   :  { %v51_v17 = vpop.permute.xlu0 %50  }
  0x83   :  { %53 = vst.msk [vmem:[#allocation0] sm:$0x1] %vm52_vm9, %v51_v17  }
  0x8a   :  { %v57_v18 = vld [vmem:[#allocation0] sm:$0x1] }
  0x8b   :  { %59 = vst [vmem:[%s132_s1] sm:$0x1] %v57_v18 }

// kernel: cnn_forward.3
= control target key start
LH: loop header
LB: loop body
LE: loop exit
PB: predicated region body
PF: predicated region fallthrough
CT: control target
= control target key end

     0   :  { %s4324_s18 = smov 0   ;;  %s4326_s19 = smov 0   ;;  %s5256_s0 = inlined_call_operand.vmem [shape: bf16[2,1,26,78], index: 0, kind: input, shape index: {}]   ;;  %s5257_s1 = inlined_call_operand.vmem [shape: bf16[22,78,144], index: 1, kind: input, shape index: {}]   ;;  %s5258_s2 = inlined_call_operand.vmem [shape: f32[1,144], index: 2, kind: input, shape index: {}]   ;;  %s5259_s3 = inlined_call_operand.vmem [shape: f32[1,144], index: 3, kind: input, shape index: {}]   ;;  %s5260_s4 = inlined_call_operand.vmem [shape: f32[1,144], index: 4, kind: input, shape index: {}]   ;;  %s5261_s5 = inlined_call_operand.vmem [shape: bf16[2,1,8,144], index: 5, kind: output, shape index: {}]  }
   0x1   :  { %s4328_s20 = smov 0  }
   0x2 LB: > { %s27_s21 = sadd.s32 1, %s4286_s19  ;;  %p3325_p0 = scmp.ge.s32.totalorder %s4290_s20, 1  ;;  %s4290_s20 = sphi %s4328_s20, %s15_s20   ;;  %s4286_s19 = sphi %s4326_s19, %s5263_s19   ;;  %s4282_s18 = sphi %s4324_s18, %s5262_s18  }
   0x3   : > { %p29_p1 = scmp.ge.s32.totalorder %s27_s21, 2  ;;  %p207_p2 = scmp.lt.s32.totalorder %s4290_s20, 3 }
   0x5   : > { %s5265_s21 = smov (%p29_p1, %s27_s21), 0  ;;  %p208_p3 = pnand %p3325_p0, %p207_p2 }
   0x6   : > { %v3934_v0 = vld [vmem:[%s5257_s1 + $0x54] ss:$8 sps:$4 sm:$0xff] (!%p208_p3)   ;;  %v3936_v1 = vld [vmem:[%s5257_s1 + $0x3c4] ss:$8 sps:$4 sm:$0xff] (!%p208_p3)   ;;  %v4292_v2 = vmov (!%p208_p3), 0   ;;  %p243_p4 = scmp.lt.s32.totalorder (!%p208_p3), %s4282_s18, 1 }
   0x7   : > { %211 = sbr.rel (%p208_p3) target bundleno = 506 (0x1fa), region = 40  ;;  %410 = vmatprep.mubr.bf16.mxu0 (!%p208_p3), %v4292_v2  ;;  %617 = vmatprep.mubr.bf16.mxu1 (!%p208_p3), %v4292_v2  ;;  %v3938_v3 = vld [vmem:[%s5257_s1 + $0x50] ss:$8 sps:$4 sm:$0xff] (!%p208_p3)   ;;  %v3939_v4 = vld [vmem:[%s5257_s1 + $0x3c0] ss:$8 sps:$4 sm:$0xff] (!%p208_p3)   ;;  %vm371_vm0 = vcmask (!%p208_p3), 1046528  }
   0x8   : > { %378 = vmatprep.subr.bf16.mxu0 (!%p208_p3), %v3934_v0  ;;  %585 = vmatprep.subr.bf16.mxu1 (!%p208_p3), %v3936_v1  ;;  %v3940_v5 = vld [vmem:[%s5257_s1 + $0x64] ss:$8 sps:$4 sm:$0xff] (!%p208_p3)   ;;  %v3942_v6 = vld [vmem:[%s5257_s1 + $0x3d4] ss:$8 sps:$4 sm:$0xff] (!%p208_p3)   ;;  %v3944_v7 = vld [vmem:[%s5257_s1 + $0x60] ss:$8 sps:$4 sm:$0xff] (!%p208_p3)  }
   0x9   : > { %379 = vmatpush1.bf16.msra.mxu0 (!%p208_p3), %v3938_v3  ;;  %586 = vmatpush1.bf16.msra.mxu1 (!%p208_p3), %v3939_v4  ;;  %v3945_v8 = vld [vmem:[%s5257_s1 + $0x3d0] ss:$8 sps:$4 sm:$0xff] (!%p208_p3)   ;;  %v3946_v9 = vld [vmem:[%s5257_s1 + $0x74] ss:$8 sps:$4 sm:$0xff] (!%p208_p3)   ;;  %v3948_v10 = vld [vmem:[%s5257_s1 + $0x3e4] ss:$8 sps:$4 sm:$0xff] (!%p208_p3)  }
   0xa   : > { %380 = vmatprep.subr.bf16.mxu0 (!%p208_p3), %v3940_v5  ;;  %587 = vmatprep.subr.bf16.mxu1 (!%p208_p3), %v3942_v6  ;;  %v3950_v11 = vld [vmem:[%s5257_s1 + $0x70] ss:$8 sps:$4 sm:$0xff] (!%p208_p3)   ;;  %v3951_v12 = vld [vmem:[%s5257_s1 + $0x3e0] ss:$8 sps:$4 sm:$0xff] (!%p208_p3)   ;;  %v3952_v13 = vld [vmem:[%s5257_s1 + $0x84] ss:$8 sps:$4 sm:$0xff] (!%p208_p3)  }
   0xb   : > { %v3954_v14 = vld [vmem:[%s5257_s1 + $0x3f4] ss:$8 sps:$4 sm:$0xff] (!%p208_p3)   ;;  %v3956_v15 = vld [vmem:[%s5257_s1 + $0x80] ss:$8 sps:$4 sm:$0xff] (!%p208_p3)   ;;  %v3957_v16 = vld [vmem:[%s5257_s1 + $0x3f0] ss:$8 sps:$4 sm:$0xff] (!%p208_p3)  }
   0xc   : > { %v3958_v17 = vld [vmem:[%s5257_s1 + $0x94] ss:$8 sps:$4 sm:$0x7f] (!%p208_p3)   ;;  %v3960_v18 = vld [vmem:[%s5257_s1 + $0x404] ss:$8 sps:$4 sm:$0x7f] (!%p208_p3)  }
   0xd   : > { %381 = vmatpush1.bf16.msra.mxu0 (!%p208_p3), %v3944_v7  ;;  %588 = vmatpush1.bf16.msra.mxu1 (!%p208_p3), %v3945_v8  ;;  %v3962_v19 = vld [vmem:[%s5257_s1 + $0x90] ss:$8 sps:$4 sm:$0x7f] (!%p208_p3)   ;;  %v3963_v20 = vld [vmem:[%s5257_s1 + $0x400] ss:$8 sps:$4 sm:$0x7f] (!%p208_p3)  }
   0xe   : > { %s5267_s18 = smov (!%p243_p4, %s4282_s18), 1  ;;  %382 = vmatprep.subr.bf16.mxu0 %v3946_v9  ;;  %589 = vmatprep.subr.bf16.mxu1 %v3948_v10  ;;  %v3966_v21 = vld [vmem:[%s5257_s1 + $0x4] ss:$8 sps:$4 sm:$0xff]   ;;  %v3969_v22 = vld [vmem:[%s5257_s1 + $0x374] ss:$8 sps:$4 sm:$0xff]   ;;  %v373_v25 = vsel %vm371_vm0, %v3962_v19, 0 }
   0xf   : > { %s3818_s8 = sshll.u32 %s5267_s18, 4  ;;  %v580_v26 = vsel %vm371_vm0, %v3963_v20, 0  ;;  %v3964_v34 = vld [vmem:[%s5257_s1] ss:$8 sps:$4 sm:$0xff]   ;;  %vm306_vm1 = vsmask.f32 7424 }
  0x10   : > { %s4410_s23 = scalar_lea.vmem %s5256_s0, %s3818_s8  ;;  %v3967_v36 = vld [vmem:[%s5257_s1 + $0x370] ss:$8 sps:$4 sm:$0xff]   ;;  %vm367_vm2 = vcmask 637952   ;;  %v3974_v38 = vld [vmem:[%s5257_s1 + $0x14] ss:$8 sps:$4 sm:$0xff]   ;;  %vm1204_vm3 = vcmask 1045504  }
  0x11   : > { %383 = vmatpush1.bf16.msra.mxu0 %v3950_v11  ;;  %590 = vmatpush1.bf16.msra.mxu1 %v3951_v12  ;;  %v262_v23 = vld [vmem:[%s4410_s23] sm:$0xf]  ;;  %v4420_v24 = vld [vmem:[%s4410_s23 + $0x4] sm:$0xf]  ;;  %v4427_v27 = vld [vmem:[%s4410_s23 + $0x8] sm:$0xf] }
  0x12   : > { %384 = vmatprep.subr.bf16.mxu0 %v3952_v13  ;;  %591 = vmatprep.subr.bf16.mxu1 %v3954_v14  ;;  %v4430_v28 = vcombine.low %v262_v23, %v4420_v24  ;;  %v4434_v29 = vcombine.low %v4427_v27, %v4427_v27  ;;  %v3977_v39 = vld [vmem:[%s5257_s1 + $0x384] ss:$8 sps:$4 sm:$0xff]   ;;  %v3972_v41 = vld [vmem:[%s5257_s1 + $0x10] ss:$8 sps:$4 sm:$0xff]   ;;  %v3975_v42 = vld [vmem:[%s5257_s1 + $0x380] ss:$8 sps:$4 sm:$0xff]  }
  0x13   : > { %v3980_v43 = vld [vmem:[%s5257_s1 + $0x24] ss:$8 sps:$4 sm:$0xff]   ;;  %v3983_v44 = vld [vmem:[%s5257_s1 + $0x394] ss:$8 sps:$4 sm:$0xff]   ;;  %v3978_v45 = vld [vmem:[%s5257_s1 + $0x20] ss:$8 sps:$4 sm:$0xff]  }
  0x14   : > { %v4437_v30 = vshrl.u32 %v4430_v28, 16  ;;  %v4440_v31 = vshll.u32 %v4430_v28, 16  ;;  %v4443_v32 = vshll.u32 %v4434_v29, 16  ;;  %v3981_v46 = vld [vmem:[%s5257_s1 + $0x390] ss:$8 sps:$4 sm:$0xff]   ;;  %v1205_v49 = vrot.slane %v4430_v28, 2 }
  0x15   : > { %385 = vmatpush1.bf16.msra.mxu0 %v3956_v15  ;;  %592 = vmatpush1.bf16.msra.mxu1 %v3957_v16  ;;  %v3986_v47 = vld [vmem:[%s5257_s1 + $0x34] ss:$8 sps:$4 sm:$0xff]   ;;  %v3989_v48 = vld [vmem:[%s5257_s1 + $0x3a4] ss:$8 sps:$4 sm:$0xff]   ;;  %v4491_v50 = vshrl.u32 %v4434_v29, 16  ;;  %v1206_v51 = vrot.slane %v4434_v29, 2 }
  0x16   : > { %3362 = vmatprep.subr.msk.bf16.mxu0 %vm371_vm0, %v3958_v17  ;;  %3396 = vmatprep.subr.msk.bf16.mxu1 %vm371_vm0, %v3960_v18  ;;  %v312_v33 = vrot.slane %v4440_v31, 1  ;;  %v317_v35 = vrot.slane %v4443_v32, 1  ;;  %v1436_v52 = vrot.slane %v4437_v30, 2  ;;  %v3984_v53 = vld [vmem:[%s5257_s1 + $0x30] ss:$8 sps:$4 sm:$0xff]   ;;  %v1437_v55 = vrot.slane %v4440_v31, 3 }
  0x17   : > { %v3994_v54 = vld [vmem:[%s5257_s1 + $0x40] ss:$8 sps:$4 sm:$0x7f]   ;;  %v3990_v56 = vld [vmem:[%s5257_s1 + $0x44] ss:$8 sps:$4 sm:$0x7f]   ;;  %v4511_v59 = vsel %vm1204_vm3, %v1205_v49, %v1206_v51 }
  0x18   : > { %v313_v37 = vor.u32 %v312_v33, %v4437_v30  ;;  %v3992_v57 = vld [vmem:[%s5257_s1 + $0x3b4] ss:$8 sps:$4 sm:$0x7f]   ;;  %v3995_v58 = vld [vmem:[%s5257_s1 + $0x3b0] ss:$8 sps:$4 sm:$0x7f]   ;;  %v1438_v62 = vor.u32 %v1437_v55, %v1436_v52 }
  0x19   : > { %387 = vmatpush1.bf16.msra.mxu0 %v373_v25  ;;  %594 = vmatpush1.bf16.msra.mxu1 %v580_v26  ;;  %v1439_v60 = vrot.slane %v4491_v50, 2  ;;  %vm1670_vm4 = vcmask 1044480   ;;  %v3987_v61 = vld [vmem:[%s5257_s1 + $0x3a0] ss:$8 sps:$4 sm:$0xff]   ;;  %v1440_v63 = vrot.slane %v4443_v32, 3  ;;  %v1671_v0 = vrot.slane %v4430_v28, 3 }
  0x1a   : > { %477 = vmatprep.subr.bf16.mxu0 %v3966_v21  ;;  %682 = vmatprep.subr.bf16.mxu1 %v3969_v22  ;;  %v318_v40 = vsel %vm306_vm1, %v313_v37, %v317_v35  ;;  %vm1435_vm5 = vsmask.f32 5376  ;;  %v1672_v1 = vrot.slane %v4434_v29, 3  ;;  %v1902_v3 = vrot.slane %v4437_v30, 3  ;;  %v3998_v8 = vld [vmem:[%s5257_s1 + $0xa4] ss:$8 sps:$4 sm:$0xff]  }
  0x1b   : > { %v1441_v4 = vor.u32 %v1440_v63, %v1439_v60  ;;  %v1903_v5 = vrot.slane %v4440_v31, 4  ;;  %v472_v7 = vsel %vm371_vm0, %v3994_v54, 0  ;;  %v677_v11 = vsel %vm371_vm0, %v3995_v58, 0  ;;  %v4001_v12 = vld [vmem:[%s5257_s1 + $0x414] ss:$8 sps:$4 sm:$0xff]   ;;  %s3819_s27 = sshll.u32 %s5267_s18, 3 }
  0x1c   : > { %3363 = vmatmul.mubr.msk.bf16.vlgmr.msra.gmra.mrb[0].mxu0 %vm367_vm2, %v318_v40  ;;  %3397 = vmatmul.mubr.msk.bf16.vlgmr.msra.gmra.mrb[0].mxu1 %vm367_vm2, %v318_v40  ;;  %v4522_v6 = vsel %vm1670_vm4, %v1671_v0, %v1672_v1  ;;  %v3996_v13 = vld [vmem:[%s5257_s1 + $0xa0] ss:$8 sps:$4 sm:$0xff]   ;;  %v1905_v14 = vrot.slane %v4491_v50, 3  ;;  %v3999_v15 = vld [vmem:[%s5257_s1 + $0x410] ss:$8 sps:$4 sm:$0xff]   ;;  %v1906_v18 = vrot.slane %v4443_v32, 4  ;;  %s260_s30 = scalar_lea.vmem %s5261_s5, %s3819_s27 }
  0x1d   : > { %478 = vmatpush1.bf16.msra.mxu0 %v3964_v34  ;;  %683 = vmatpush1.bf16.msra.mxu1 %v3967_v36  ;;  %v4528_v9 = vsel %vm1435_vm5, %v1438_v62, %v1441_v4  ;;  %v1904_v10 = vor.u32 %v1903_v5, %v1902_v3  ;;  %v4004_v16 = vld [vmem:[%s5257_s1 + $0xb4] ss:$8 sps:$4 sm:$0xff]   ;;  %v4007_v17 = vld [vmem:[%s5257_s1 + $0x424] ss:$8 sps:$4 sm:$0xff]   ;;  %vm1901_vm6 = vsmask.f32 4352 }
  0x1e   : > { %479 = vmatprep.subr.bf16.mxu0 %v3974_v38  ;;  %684 = vmatprep.subr.bf16.mxu1 %v3977_v39  ;;  %v4002_v19 = vld [vmem:[%s5257_s1 + $0xb0] ss:$8 sps:$4 sm:$0xff]   ;;  %v1907_v20 = vor.u32 %v1906_v18, %v1905_v14  ;;  %v4005_v21 = vld [vmem:[%s5257_s1 + $0x420] ss:$8 sps:$4 sm:$0xff]   ;;  %v4010_v22 = vld [vmem:[%s5257_s1 + $0xc4] ss:$8 sps:$4 sm:$0xff]  }
  0x1f   : > { %509 = vmatprep.mubr.bf16.mxu0 %v4292_v2  ;;  %714 = vmatprep.mubr.bf16.mxu1 %v4292_v2  ;;  %v4013_v23 = vld [vmem:[%s5257_s1 + $0x434] ss:$8 sps:$4 sm:$0xff]   ;;  %v4008_v26 = vld [vmem:[%s5257_s1 + $0xc0] ss:$8 sps:$4 sm:$0xff]   ;;  %v4011_v33 = vld [vmem:[%s5257_s1 + $0x430] ss:$8 sps:$4 sm:$0xff]  }
  0x20   : > { %v4566_v25 = vsel %vm1901_vm6, %v1904_v10, %v1907_v20  ;;  %v4016_v34 = vld [vmem:[%s5257_s1 + $0xd4] ss:$8 sps:$4 sm:$0xff]   ;;  %v4019_v35 = vld [vmem:[%s5257_s1 + $0x444] ss:$8 sps:$4 sm:$0xff]   ;;  %v4014_v36 = vld [vmem:[%s5257_s1 + $0xd0] ss:$8 sps:$4 sm:$0xff]  }
  0x21   : > { %480 = vmatpush1.bf16.msra.mxu0 %v3972_v41  ;;  %685 = vmatpush1.bf16.msra.mxu1 %v3975_v42  ;;  %v4017_v37 = vld [vmem:[%s5257_s1 + $0x440] ss:$8 sps:$4 sm:$0xff]   ;;  %v4020_v38 = vld [vmem:[%s5257_s1 + $0xe4] ss:$8 sps:$4 sm:$0x7f]   ;;  %v4602_v42 = vcombine.low %v4420_v24, %v4427_v27  ;;  %v968_v60 = vrot.slane %v4437_v30, 1 }
  0x22   : > { %481 = vmatprep.subr.bf16.mxu0 %v3980_v43  ;;  %686 = vmatprep.subr.bf16.mxu1 %v3983_v44  ;;  %v4022_v39 = vld [vmem:[%s5257_s1 + $0x454] ss:$8 sps:$4 sm:$0x7f]   ;;  %v4024_v40 = vld [vmem:[%s5257_s1 + $0xe0] ss:$8 sps:$4 sm:$0x7f]  }
  0x23   : > { %v4025_v41 = vld [vmem:[%s5257_s1 + $0x450] ss:$8 sps:$4 sm:$0x7f]   ;;  %v792_v43 = vsel %vm371_vm0, %v4024_v40, 0  ;;  %v737_v44 = vrot.slane %v4430_v28, 1  ;;  %v973_v62 = vrot.slane %v4491_v50, 1 }
  0x24   : > { %v4031_v24 = vld [vmem:[%s5257_s1 + $0x464] ss:$8 sps:$4 sm:$0xff]   ;;  %v4026_v27 = vld [vmem:[%s5257_s1 + $0xf0] ss:$8 sps:$4 sm:$0xff]   ;;  %v4037_v49 = vld [vmem:[%s5257_s1 + $0x474] ss:$8 sps:$4 sm:$0xff]  }
  0x25   : > { %482 = vmatpush1.bf16.msra.mxu0 %v3978_v45  ;;  %687 = vmatpush1.bf16.msra.mxu1 %v3981_v46  ;;  %v738_v45 = vrot.slane %v4434_v29, 1  ;;  %v904_v46 = vsel %vm371_vm0, %v4025_v41, 0  ;;  %v4032_v51 = vld [vmem:[%s5257_s1 + $0x100] ss:$8 sps:$4 sm:$0xff]   ;;  %v4035_v52 = vld [vmem:[%s5257_s1 + $0x470] ss:$8 sps:$4 sm:$0xff]  }
  0x26   : > { %483 = vmatprep.subr.bf16.mxu0 %v3986_v47  ;;  %688 = vmatprep.subr.bf16.mxu1 %v3989_v48  ;;  %v4028_v47 = vld [vmem:[%s5257_s1 + $0xf4] ss:$8 sps:$4 sm:$0xff]   ;;  %v4034_v48 = vld [vmem:[%s5257_s1 + $0x104] ss:$8 sps:$4 sm:$0xff]   ;;  %v4038_v55 = vld [vmem:[%s5257_s1 + $0x110] ss:$8 sps:$4 sm:$0xff]  }
  0x27   : > { %v739_v29 = vsel %vm371_vm0, %v737_v44, %v738_v45  ;;  %v4043_v54 = vld [vmem:[%s5257_s1 + $0x484] ss:$8 sps:$4 sm:$0xff]   ;;  %v4049_v58 = vld [vmem:[%s5257_s1 + $0x494] ss:$8 sps:$4 sm:$0xff]   ;;  %v974_v63 = vrot.slane %v4443_v32, 2  ;;  %vm3016_vm8 = vcmask 1041408  }
  0x28   : > { %v4044_v0 = vld [vmem:[%s5257_s1 + $0x120] ss:$8 sps:$4 sm:$0xff]   ;;  %v4050_v1 = vld [vmem:[%s5257_s1 + $0x134] ss:$8 sps:$4 sm:$0x7f]   ;;  %vm3024_vm9 = vcmask 123904  }
  0x29   : > { %484 = vmatpush1.bf16.msra.mxu0 %v3984_v53  ;;  %689 = vmatpush1.bf16.msra.mxu1 %v3987_v61  ;;  %v4040_v53 = vld [vmem:[%s5257_s1 + $0x114] ss:$8 sps:$4 sm:$0xff]   ;;  %v969_v61 = vrot.slane %v4440_v31, 2  ;;  %v4052_v3 = vld [vmem:[%s5257_s1 + $0x4a4] ss:$8 sps:$4 sm:$0x7f]  }
  0x2a   : > { %3374 = vmatprep.subr.msk.bf16.mxu0 %vm371_vm0, %v3990_v56  ;;  %3408 = vmatprep.subr.msk.bf16.mxu1 %vm371_vm0, %v3992_v57  ;;  %v4041_v56 = vld [vmem:[%s5257_s1 + $0x480] ss:$8 sps:$4 sm:$0xff]   ;;  %v4046_v57 = vld [vmem:[%s5257_s1 + $0x124] ss:$8 sps:$4 sm:$0xff]   ;;  %v4047_v30 = vld [vmem:[%s5257_s1 + $0x490] ss:$8 sps:$4 sm:$0xff]  }
  0x2b   : > { %v4054_v31 = vld [vmem:[%s5257_s1 + $0x130] ss:$8 sps:$4 sm:$0x7f]   ;;  %v4055_v32 = vld [vmem:[%s5257_s1 + $0x4a0] ss:$8 sps:$4 sm:$0x7f]   ;;  %v970_v5 = vor.u32 %v969_v61, %v968_v60 }
  0x2c   : > { %v1029_v50 = vsel %vm371_vm0, %v4054_v31, 0  ;;  %v4058_v4 = vld [vmem:[%s5257_s1 + $0x144] ss:$8 sps:$4 sm:$0xff]   ;;  %vm967_vm7 = vsmask.f32 6400  ;;  %vm3202_vm10 = vcmask 1041409  }
  0x2d   : > { %486 = vmatpush1.bf16.msra.mxu0 %v472_v7  ;;  %691 = vmatpush1.bf16.msra.mxu1 %v677_v11  ;;  %v975_v7 = vor.u32 %v974_v63, %v973_v62  ;;  %v4061_v10 = vld [vmem:[%s5257_s1 + $0x4b4] ss:$8 sps:$4 sm:$0xff]   ;;  %v4056_v11 = vld [vmem:[%s5257_s1 + $0x140] ss:$8 sps:$4 sm:$0xff]   ;;  %v4070_v18 = vld [vmem:[%s5257_s1 + $0x164] ss:$8 sps:$4 sm:$0xff]  }
  0x2e   : > { %797 = vmatprep.subr.bf16.mxu0 %v3998_v8  ;;  %909 = vmatprep.subr.bf16.mxu1 %v4001_v12  ;;  %v1141_v8 = vsel %vm371_vm0, %v4055_v32, 0  ;;  %v4059_v12 = vld [vmem:[%s5257_s1 + $0x4b0] ss:$8 sps:$4 sm:$0xff]   ;;  %v4064_v14 = vld [vmem:[%s5257_s1 + $0x154] ss:$8 sps:$4 sm:$0xff]   ;;  %vm3204_vm11 = vcmask 1042434  }
  0x2f   : > { %v4068_v20 = vld [vmem:[%s5257_s1 + $0x160] ss:$8 sps:$4 sm:$0xff]   ;;  %v4088_v40 = vld [vmem:[%s5257_s1 + $0x194] ss:$8 sps:$4 sm:$0xff]   ;;  %v4091_v41 = vld [vmem:[%s5257_s1 + $0x504] ss:$8 sps:$4 sm:$0xff]  }
  0x30   : > { %3375 = vmatmul.mubr.msk.bf16.vlgmr.msra.gmra.mrb[0].mxu0 %vm367_vm2, %v4430_v28  ;;  %3409 = vmatmul.mubr.msk.bf16.vlgmr.msra.gmra.mrb[0].mxu1 %vm367_vm2, %v4430_v28  ;;  %v4029_v28 = vld [vmem:[%s5257_s1 + $0x460] ss:$8 sps:$4 sm:$0xff]   ;;  %v4094_v45 = vld [vmem:[%s5257_s1 + $0x1a4] ss:$8 sps:$4 sm:$0xff]   ;;  %v4121_v61 = vld [vmem:[%s5257_s1 + $0x554] ss:$8 sps:$4 sm:$0xff]  }
  0x31   : > { %798 = vmatpush1.bf16.msra.mxu0 %v3996_v13  ;;  %910 = vmatpush1.bf16.msra.mxu1 %v3999_v15  ;;  %v976_v13 = vsel %vm967_vm7, %v970_v5, %v975_v7  ;;  %v4067_v15 = vld [vmem:[%s5257_s1 + $0x4c4] ss:$8 sps:$4 sm:$0xff]   ;;  %v4089_v44 = vld [vmem:[%s5257_s1 + $0x500] ss:$8 sps:$4 sm:$0xff]   ;;  %v4119_v63 = vld [vmem:[%s5257_s1 + $0x550] ss:$8 sps:$4 sm:$0xff]  }
  0x32   : > { %799 = vmatprep.subr.bf16.mxu0 %v4004_v16  ;;  %911 = vmatprep.subr.bf16.mxu1 %v4007_v17  ;;  %v4062_v16 = vld [vmem:[%s5257_s1 + $0x150] ss:$8 sps:$4 sm:$0xff]   ;;  %v4065_v17 = vld [vmem:[%s5257_s1 + $0x4c0] ss:$8 sps:$4 sm:$0xff]   ;;  %v4118_v60 = vld [vmem:[%s5257_s1 + $0x1e4] ss:$8 sps:$4 sm:$0xff]  }
  0x33   : > { %829 = vmatprep.mubr.bf16.mxu0 %v4292_v2  ;;  %941 = vmatprep.mubr.bf16.mxu1 %v4292_v2  ;;  %v4116_v62 = vld [vmem:[%s5257_s1 + $0x1e0] ss:$8 sps:$4 sm:$0xff]   ;;  %v4130_v31 = vld [vmem:[%s5257_s1 + $0x204] ss:$8 sps:$4 sm:$0xff]   ;;  %v4134_v7 = vld [vmem:[%s5257_s1 + $0x210] ss:$8 sps:$4 sm:$0xff]  }
  0x34   : > { %v4128_v32 = vld [vmem:[%s5257_s1 + $0x200] ss:$8 sps:$4 sm:$0xff]   ;;  %v4139_v5 = vld [vmem:[%s5257_s1 + $0x584] ss:$8 sps:$4 sm:$0xff]   ;;  %vm3206_vm12 = vcmask 1043459   ;;  %vm3208_vm13 = vcmask 1044484  }
  0x35   : > { %800 = vmatpush1.bf16.msra.mxu0 %v4002_v19  ;;  %912 = vmatpush1.bf16.msra.mxu1 %v4005_v21  ;;  %v4073_v19 = vld [vmem:[%s5257_s1 + $0x4d4] ss:$8 sps:$4 sm:$0xff]   ;;  %v4071_v21 = vld [vmem:[%s5257_s1 + $0x4d0] ss:$8 sps:$4 sm:$0xff]   ;;  %vm3210_vm14 = vcmask 1045509   ;;  %vm3212_vm15 = vcmask 1046534  }
  0x36   : > { %801 = vmatprep.subr.bf16.mxu0 %v4010_v22  ;;  %913 = vmatprep.subr.bf16.mxu1 %v4013_v23  ;;  %v4076_v22 = vld [vmem:[%s5257_s1 + $0x174] ss:$8 sps:$4 sm:$0xff]   ;;  %v4079_v23 = vld [vmem:[%s5257_s1 + $0x4e4] ss:$8 sps:$4 sm:$0xff]  }
  0x39   : > { %802 = vmatpush1.bf16.msra.mxu0 %v4008_v26  ;;  %914 = vmatpush1.bf16.msra.mxu1 %v4011_v33  ;;  %v4074_v26 = vld [vmem:[%s5257_s1 + $0x170] ss:$8 sps:$4 sm:$0xff]   ;;  %v4077_v33 = vld [vmem:[%s5257_s1 + $0x4e0] ss:$8 sps:$4 sm:$0xff]  }
  0x3a   : > { %803 = vmatprep.subr.bf16.mxu0 %v4016_v34  ;;  %915 = vmatprep.subr.bf16.mxu1 %v4019_v35  ;;  %v4080_v34 = vld [vmem:[%s5257_s1 + $0x184] ss:$8 sps:$4 sm:$0x7f]   ;;  %v4084_v35 = vld [vmem:[%s5257_s1 + $0x180] ss:$8 sps:$4 sm:$0x7f]  }
  0x3d   : > { %804 = vmatpush1.bf16.msra.mxu0 %v4014_v36  ;;  %916 = vmatpush1.bf16.msra.mxu1 %v4017_v37  ;;  %v4082_v36 = vld [vmem:[%s5257_s1 + $0x4f4] ss:$8 sps:$4 sm:$0x7f]   ;;  %v4085_v37 = vld [vmem:[%s5257_s1 + $0x4f0] ss:$8 sps:$4 sm:$0x7f]  }
  0x3e   : > { %3430 = vmatprep.subr.msk.bf16.mxu0 %vm371_vm0, %v4020_v38  ;;  %3452 = vmatprep.subr.msk.bf16.mxu1 %vm371_vm0, %v4022_v39  ;;  %v1260_v38 = vsel %vm371_vm0, %v4084_v35, 0  ;;  %v1372_v39 = vsel %vm371_vm0, %v4085_v37, 0  ;;  %v4166_v35 = vld [vmem:[%s5257_s1 + $0x264] ss:$8 sps:$4 sm:$0xff]   ;;  %v4164_v37 = vld [vmem:[%s5257_s1 + $0x260] ss:$8 sps:$4 sm:$0xff]  }
  0x41   : > { %806 = vmatpush1.bf16.msra.mxu0 %v792_v43  ;;  %918 = vmatpush1.bf16.msra.mxu1 %v904_v46  ;;  %v4086_v43 = vld [vmem:[%s5257_s1 + $0x190] ss:$8 sps:$4 sm:$0xff]   ;;  %v4097_v46 = vld [vmem:[%s5257_s1 + $0x514] ss:$8 sps:$4 sm:$0xff]  }
  0x42   : > { %1034 = vmatprep.subr.bf16.mxu0 %v4028_v47  ;;  %1146 = vmatprep.subr.bf16.mxu1 %v4031_v24  ;;  %v4092_v47 = vld [vmem:[%s5257_s1 + $0x1a0] ss:$8 sps:$4 sm:$0xff]   ;;  %v4095_v24 = vld [vmem:[%s5257_s1 + $0x510] ss:$8 sps:$4 sm:$0xff]  }
  0x44   : > { %3431 = vmatmul.mubr.msk.bf16.vlgmr.msra.gmra.mrb[0].mxu0 %vm367_vm2, %v739_v29  ;;  %3453 = vmatmul.mubr.msk.bf16.vlgmr.msra.gmra.mrb[0].mxu1 %vm367_vm2, %v739_v29  ;;  %v4101_v29 = vld [vmem:[%s5257_s1 + $0x520] ss:$8 sps:$4 sm:$0xff]  }
  0x45   : > { %1035 = vmatpush1.bf16.msra.mxu0 %v4026_v27  ;;  %1147 = vmatpush1.bf16.msra.mxu1 %v4029_v28  ;;  %v4100_v27 = vld [vmem:[%s5257_s1 + $0x1b4] ss:$8 sps:$4 sm:$0xff]   ;;  %v4103_v28 = vld [vmem:[%s5257_s1 + $0x524] ss:$8 sps:$4 sm:$0xff]  }
  0x46   : > { %1036 = vmatprep.subr.bf16.mxu0 %v4034_v48  ;;  %1148 = vmatprep.subr.bf16.mxu1 %v4037_v49  ;;  %v4106_v48 = vld [vmem:[%s5257_s1 + $0x1c4] ss:$8 sps:$4 sm:$0xff]   ;;  %v4109_v49 = vld [vmem:[%s5257_s1 + $0x534] ss:$8 sps:$4 sm:$0xff]  }
  0x47   : > { %1066 = vmatprep.mubr.bf16.mxu0 %v4292_v2  ;;  %1178 = vmatprep.mubr.bf16.mxu1 %v4292_v2 }
  0x49   : > { %1037 = vmatpush1.bf16.msra.mxu0 %v4032_v51  ;;  %1149 = vmatpush1.bf16.msra.mxu1 %v4035_v52  ;;  %v4104_v51 = vld [vmem:[%s5257_s1 + $0x1c0] ss:$8 sps:$4 sm:$0xff]   ;;  %v4110_v52 = vld [vmem:[%s5257_s1 + $0x1d4] ss:$8 sps:$4 sm:$0x7f]  }
  0x4a   : > { %1038 = vmatprep.subr.bf16.mxu0 %v4040_v53  ;;  %1150 = vmatprep.subr.bf16.mxu1 %v4043_v54  ;;  %v4112_v53 = vld [vmem:[%s5257_s1 + $0x544] ss:$8 sps:$4 sm:$0x7f]   ;;  %v4107_v54 = vld [vmem:[%s5257_s1 + $0x530] ss:$8 sps:$4 sm:$0xff]  }
  0x4d   : > { %1039 = vmatpush1.bf16.msra.mxu0 %v4038_v55  ;;  %1151 = vmatpush1.bf16.msra.mxu1 %v4041_v56  ;;  %v4114_v55 = vld [vmem:[%s5257_s1 + $0x1d0] ss:$8 sps:$4 sm:$0x7f]   ;;  %v4115_v56 = vld [vmem:[%s5257_s1 + $0x540] ss:$8 sps:$4 sm:$0x7f]  }
  0x4e   : > { %1040 = vmatprep.subr.bf16.mxu0 %v4046_v57  ;;  %1152 = vmatprep.subr.bf16.mxu1 %v4049_v58  ;;  %v1495_v57 = vsel %vm371_vm0, %v4114_v55, 0  ;;  %v1607_v58 = vsel %vm371_vm0, %v4115_v56, 0  ;;  %v4194_v55 = vld [vmem:[%s5257_s1 + $0x2b0] ss:$8 sps:$4 sm:$0xff]   ;;  %v4197_v56 = vld [vmem:[%s5257_s1 + $0x620] ss:$8 sps:$4 sm:$0xff]  }
  0x51   : > { %1041 = vmatpush1.bf16.msra.mxu0 %v4044_v0  ;;  %1153 = vmatpush1.bf16.msra.mxu1 %v4047_v30  ;;  %v4124_v0 = vld [vmem:[%s5257_s1 + $0x1f4] ss:$8 sps:$4 sm:$0xff]   ;;  %v4125_v30 = vld [vmem:[%s5257_s1 + $0x560] ss:$8 sps:$4 sm:$0xff]  }
  0x52   : > { %3474 = vmatprep.subr.msk.bf16.mxu0 %vm371_vm0, %v4050_v1  ;;  %3496 = vmatprep.subr.msk.bf16.mxu1 %vm371_vm0, %v4052_v3  ;;  %v4127_v1 = vld [vmem:[%s5257_s1 + $0x564] ss:$8 sps:$4 sm:$0xff]   ;;  %v4122_v3 = vld [vmem:[%s5257_s1 + $0x1f0] ss:$8 sps:$4 sm:$0xff]  }
  0x55   : > { %1043 = vmatpush1.bf16.msra.mxu0 %v1029_v50  ;;  %1155 = vmatpush1.bf16.msra.mxu1 %v1141_v8  ;;  %v4131_v50 = vld [vmem:[%s5257_s1 + $0x570] ss:$8 sps:$4 sm:$0xff]   ;;  %v4137_v8 = vld [vmem:[%s5257_s1 + $0x580] ss:$8 sps:$4 sm:$0xff]  }
  0x56   : > { %1265 = vmatprep.subr.bf16.mxu0 %v4058_v4  ;;  %1377 = vmatprep.subr.bf16.mxu1 %v4061_v10  ;;  %v4136_v4 = vld [vmem:[%s5257_s1 + $0x214] ss:$8 sps:$4 sm:$0xff]   ;;  %v4140_v10 = vld [vmem:[%s5257_s1 + $0x224] ss:$8 sps:$4 sm:$0x7f]  }
  0x58   : > { %3475 = vmatmul.mubr.msk.bf16.vlgmr.msra.gmra.mrb[0].mxu0 %vm367_vm2, %v976_v13  ;;  %3497 = vmatmul.mubr.msk.bf16.vlgmr.msra.gmra.mrb[0].mxu1 %vm367_vm2, %v976_v13  ;;  %v4145_v13 = vld [vmem:[%s5257_s1 + $0x590] ss:$8 sps:$4 sm:$0x7f]  }
  0x59   : > { %1266 = vmatpush1.bf16.msra.mxu0 %v4056_v11  ;;  %1378 = vmatpush1.bf16.msra.mxu1 %v4059_v12  ;;  %v4142_v11 = vld [vmem:[%s5257_s1 + $0x594] ss:$8 sps:$4 sm:$0x7f]   ;;  %v4144_v12 = vld [vmem:[%s5257_s1 + $0x220] ss:$8 sps:$4 sm:$0x7f]  }
  0x5a   : > { %1267 = vmatprep.subr.bf16.mxu0 %v4064_v14  ;;  %1379 = vmatprep.subr.bf16.mxu1 %v4067_v15  ;;  %v1726_v14 = vsel %vm371_vm0, %v4144_v12, 0  ;;  %v4148_v15 = vld [vmem:[%s5257_s1 + $0x234] ss:$8 sps:$4 sm:$0xff]   ;;  %v4227_v12 = vld [vmem:[%s5257_s1 + $0x304] ss:$8 sps:$4 sm:$0xff]  }
  0x5b   : > { %1297 = vmatprep.mubr.bf16.mxu0 %v4292_v2  ;;  %1409 = vmatprep.mubr.bf16.mxu1 %v4292_v2 }
  0x5d   : > { %1268 = vmatpush1.bf16.msra.mxu0 %v4062_v16  ;;  %1380 = vmatpush1.bf16.msra.mxu1 %v4065_v17  ;;  %v1838_v16 = vsel %vm371_vm0, %v4145_v13, 0  ;;  %v4151_v17 = vld [vmem:[%s5257_s1 + $0x5a4] ss:$8 sps:$4 sm:$0xff]   ;;  %v4230_v13 = vld [vmem:[%s5257_s1 + $0x674] ss:$8 sps:$4 sm:$0xff]  }
  0x5e   : > { %1269 = vmatprep.subr.bf16.mxu0 %v4070_v18  ;;  %1381 = vmatprep.subr.bf16.mxu1 %v4073_v19  ;;  %v4146_v18 = vld [vmem:[%s5257_s1 + $0x230] ss:$8 sps:$4 sm:$0xff]   ;;  %v4149_v19 = vld [vmem:[%s5257_s1 + $0x5a0] ss:$8 sps:$4 sm:$0xff]  }
  0x61   : > { %1270 = vmatpush1.bf16.msra.mxu0 %v4068_v20  ;;  %1382 = vmatpush1.bf16.msra.mxu1 %v4071_v21  ;;  %v4154_v20 = vld [vmem:[%s5257_s1 + $0x244] ss:$8 sps:$4 sm:$0xff]   ;;  %v4157_v21 = vld [vmem:[%s5257_s1 + $0x5b4] ss:$8 sps:$4 sm:$0xff]  }
  0x62   : > { %1271 = vmatprep.subr.bf16.mxu0 %v4076_v22  ;;  %1383 = vmatprep.subr.bf16.mxu1 %v4079_v23  ;;  %v4152_v22 = vld [vmem:[%s5257_s1 + $0x240] ss:$8 sps:$4 sm:$0xff]   ;;  %v4155_v23 = vld [vmem:[%s5257_s1 + $0x5b0] ss:$8 sps:$4 sm:$0xff]  }
  0x65   : > { %1272 = vmatpush1.bf16.msra.mxu0 %v4074_v26  ;;  %1384 = vmatpush1.bf16.msra.mxu1 %v4077_v33  ;;  %v4160_v26 = vld [vmem:[%s5257_s1 + $0x254] ss:$8 sps:$4 sm:$0xff]   ;;  %v4158_v33 = vld [vmem:[%s5257_s1 + $0x250] ss:$8 sps:$4 sm:$0xff]  }
  0x66   : > { %3518 = vmatprep.subr.msk.bf16.mxu0 %vm371_vm0, %v4080_v34  ;;  %3540 = vmatprep.subr.msk.bf16.mxu1 %vm371_vm0, %v4082_v36  ;;  %v4161_v34 = vld [vmem:[%s5257_s1 + $0x5c0] ss:$8 sps:$4 sm:$0xff]   ;;  %v4169_v36 = vld [vmem:[%s5257_s1 + $0x5d4] ss:$8 sps:$4 sm:$0xff]  }
  0x69   : > { %1274 = vmatpush1.bf16.msra.mxu0 %v1260_v38  ;;  %1386 = vmatpush1.bf16.msra.mxu1 %v1372_v39  ;;  %v4167_v38 = vld [vmem:[%s5257_s1 + $0x5d0] ss:$8 sps:$4 sm:$0xff]   ;;  %v4170_v39 = vld [vmem:[%s5257_s1 + $0x274] ss:$8 sps:$4 sm:$0x7f]  }
  0x6a   : > { %1500 = vmatprep.subr.bf16.mxu0 %v4088_v40  ;;  %1612 = vmatprep.subr.bf16.mxu1 %v4091_v41  ;;  %v4172_v40 = vld [vmem:[%s5257_s1 + $0x5e4] ss:$8 sps:$4 sm:$0x7f]   ;;  %v4174_v41 = vld [vmem:[%s5257_s1 + $0x270] ss:$8 sps:$4 sm:$0x7f]  }
  0x6c   : > { %3519 = vmatmul.mubr.msk.bf16.vlgmr.msra.gmra.mrb[0].mxu0 %vm367_vm2, %v4511_v59  ;;  %3541 = vmatmul.mubr.msk.bf16.vlgmr.msra.gmra.mrb[0].mxu1 %vm367_vm2, %v4511_v59  ;;  %v4098_v59 = vld [vmem:[%s5257_s1 + $0x1b0] ss:$8 sps:$4 sm:$0xff]  }
  0x6d   : > { %1501 = vmatpush1.bf16.msra.mxu0 %v4086_v43  ;;  %1613 = vmatpush1.bf16.msra.mxu1 %v4089_v44  ;;  %v4175_v43 = vld [vmem:[%s5257_s1 + $0x5e0] ss:$8 sps:$4 sm:$0x7f]   ;;  %v1961_v44 = vsel %vm371_vm0, %v4174_v41, 0  ;;  %v4244_v41 = vld [vmem:[%s5257_s1 + $0x330] ss:$8 sps:$4 sm:$0xff]  }
  0x6e   : > { %1502 = vmatprep.subr.bf16.mxu0 %v4094_v45  ;;  %1614 = vmatprep.subr.bf16.mxu1 %v4097_v46  ;;  %v2073_v45 = vsel %vm371_vm0, %v4175_v43, 0  ;;  %v4178_v46 = vld [vmem:[%s5257_s1 + $0x284] ss:$8 sps:$4 sm:$0xff]   ;;  %v4247_v43 = vld [vmem:[%s5257_s1 + $0x6a0] ss:$8 sps:$4 sm:$0xff]  }
  0x6f   : > { %1532 = vmatprep.mubr.bf16.mxu0 %v4292_v2  ;;  %1644 = vmatprep.mubr.bf16.mxu1 %v4292_v2 }
  0x71   : > { %1503 = vmatpush1.bf16.msra.mxu0 %v4092_v47  ;;  %1615 = vmatpush1.bf16.msra.mxu1 %v4095_v24  ;;  %v4181_v47 = vld [vmem:[%s5257_s1 + $0x5f4] ss:$8 sps:$4 sm:$0xff]   ;;  %v4176_v24 = vld [vmem:[%s5257_s1 + $0x280] ss:$8 sps:$4 sm:$0xff]  }
  0x72   : > { %1504 = vmatprep.subr.bf16.mxu0 %v4100_v27  ;;  %1616 = vmatprep.subr.bf16.mxu1 %v4103_v28  ;;  %v4179_v27 = vld [vmem:[%s5257_s1 + $0x5f0] ss:$8 sps:$4 sm:$0xff]   ;;  %v4184_v28 = vld [vmem:[%s5257_s1 + $0x294] ss:$8 sps:$4 sm:$0xff]  }
  0x75   : > { %1505 = vmatpush1.bf16.msra.mxu0 %v4098_v59  ;;  %1617 = vmatpush1.bf16.msra.mxu1 %v4101_v29  ;;  %v4187_v59 = vld [vmem:[%s5257_s1 + $0x604] ss:$8 sps:$4 sm:$0xff]   ;;  %v4182_v29 = vld [vmem:[%s5257_s1 + $0x290] ss:$8 sps:$4 sm:$0xff]  }
  0x76   : > { %1506 = vmatprep.subr.bf16.mxu0 %v4106_v48  ;;  %1618 = vmatprep.subr.bf16.mxu1 %v4109_v49  ;;  %v4185_v48 = vld [vmem:[%s5257_s1 + $0x600] ss:$8 sps:$4 sm:$0xff]   ;;  %v4190_v49 = vld [vmem:[%s5257_s1 + $0x2a4] ss:$8 sps:$4 sm:$0xff]  }
  0x79   : > { %1507 = vmatpush1.bf16.msra.mxu0 %v4104_v51  ;;  %1619 = vmatpush1.bf16.msra.mxu1 %v4107_v54  ;;  %v4188_v51 = vld [vmem:[%s5257_s1 + $0x2a0] ss:$8 sps:$4 sm:$0xff]   ;;  %v4199_v54 = vld [vmem:[%s5257_s1 + $0x624] ss:$8 sps:$4 sm:$0xff]  }
  0x7a   : > { %3562 = vmatprep.subr.msk.bf16.mxu0 %vm371_vm0, %v4110_v52  ;;  %3584 = vmatprep.subr.msk.bf16.mxu1 %vm371_vm0, %v4112_v53  ;;  %v4191_v52 = vld [vmem:[%s5257_s1 + $0x610] ss:$8 sps:$4 sm:$0xff]   ;;  %v4196_v53 = vld [vmem:[%s5257_s1 + $0x2b4] ss:$8 sps:$4 sm:$0xff]  }
  0x7d   : > { %1509 = vmatpush1.bf16.msra.mxu0 %v1495_v57  ;;  %1621 = vmatpush1.bf16.msra.mxu1 %v1607_v58  ;;  %v4200_v57 = vld [vmem:[%s5257_s1 + $0x2c4] ss:$8 sps:$4 sm:$0x7f]   ;;  %v4202_v58 = vld [vmem:[%s5257_s1 + $0x634] ss:$8 sps:$4 sm:$0x7f]  }
  0x7e   : > { %1731 = vmatprep.subr.bf16.mxu0 %v4118_v60  ;;  %1843 = vmatprep.subr.bf16.mxu1 %v4121_v61  ;;  %v4204_v60 = vld [vmem:[%s5257_s1 + $0x2c0] ss:$8 sps:$4 sm:$0x7f]   ;;  %v4205_v61 = vld [vmem:[%s5257_s1 + $0x630] ss:$8 sps:$4 sm:$0x7f]  }
  0x80   : > { %3563 = vmatmul.mubr.msk.bf16.vlgmr.msra.gmra.mrb[0].mxu0 %vm367_vm2, %v4528_v9  ;;  %3585 = vmatmul.mubr.msk.bf16.vlgmr.msra.gmra.mrb[0].mxu1 %vm367_vm2, %v4528_v9  ;;  %v4133_v9 = vld [vmem:[%s5257_s1 + $0x574] ss:$8 sps:$4 sm:$0xff]  }
  0x81   : > { %1732 = vmatpush1.bf16.msra.mxu0 %v4116_v62  ;;  %1844 = vmatpush1.bf16.msra.mxu1 %v4119_v63  ;;  %v2189_v62 = vsel %vm371_vm0, %v4204_v60, 0  ;;  %v2301_v63 = vsel %vm371_vm0, %v4205_v61, 0  ;;  %v2825_v60 = vld [vmem:[%s5259_s3] sm:$0x3] }
  0x82   : > { %1733 = vmatprep.subr.bf16.mxu0 %v4124_v0  ;;  %1845 = vmatprep.subr.bf16.mxu1 %v4127_v1  ;;  %v4208_v0 = vld [vmem:[%s5257_s1 + $0x2d4] ss:$8 sps:$4 sm:$0xff]   ;;  %v4211_v1 = vld [vmem:[%s5257_s1 + $0x644] ss:$8 sps:$4 sm:$0xff]  }
  0x83   : > { %1763 = vmatprep.mubr.bf16.mxu0 %v4292_v2  ;;  %1875 = vmatprep.mubr.bf16.mxu1 %v4292_v2 }
  0x85   : > { %1734 = vmatpush1.bf16.msra.mxu0 %v4122_v3  ;;  %1846 = vmatpush1.bf16.msra.mxu1 %v4125_v30  ;;  %v4206_v3 = vld [vmem:[%s5257_s1 + $0x2d0] ss:$8 sps:$4 sm:$0xff]   ;;  %v4209_v30 = vld [vmem:[%s5257_s1 + $0x640] ss:$8 sps:$4 sm:$0xff]  }
  0x86   : > { %1735 = vmatprep.subr.bf16.mxu0 %v4130_v31  ;;  %1847 = vmatprep.subr.bf16.mxu1 %v4133_v9  ;;  %v4215_v31 = vld [vmem:[%s5257_s1 + $0x2e4] ss:$8 sps:$4 sm:$0xff]   ;;  %v4218_v9 = vld [vmem:[%s5257_s1 + $0x654] ss:$8 sps:$4 sm:$0xff]  }
  0x89   : > { %1736 = vmatpush1.bf16.msra.mxu0 %v4128_v32  ;;  %1848 = vmatpush1.bf16.msra.mxu1 %v4131_v50  ;;  %v4213_v32 = vld [vmem:[%s5257_s1 + $0x2e0] ss:$8 sps:$4 sm:$0xff]   ;;  %v4216_v50 = vld [vmem:[%s5257_s1 + $0x650] ss:$8 sps:$4 sm:$0xff]  }
  0x8a   : > { %1737 = vmatprep.subr.bf16.mxu0 %v4136_v4  ;;  %1849 = vmatprep.subr.bf16.mxu1 %v4139_v5  ;;  %v4221_v4 = vld [vmem:[%s5257_s1 + $0x2f4] ss:$8 sps:$4 sm:$0xff]   ;;  %v4224_v5 = vld [vmem:[%s5257_s1 + $0x664] ss:$8 sps:$4 sm:$0xff]  }
  0x8d   : > { %1738 = vmatpush1.bf16.msra.mxu0 %v4134_v7  ;;  %1850 = vmatpush1.bf16.msra.mxu1 %v4137_v8  ;;  %v4219_v7 = vld [vmem:[%s5257_s1 + $0x2f0] ss:$8 sps:$4 sm:$0xff]   ;;  %v2369_v8 = vshll.u32 %v4602_v42, 16 }
  0x8e   : > { %3606 = vmatprep.subr.msk.bf16.mxu0 %vm371_vm0, %v4140_v10  ;;  %3628 = vmatprep.subr.msk.bf16.mxu1 %vm371_vm0, %v4142_v11  ;;  %v4222_v10 = vld [vmem:[%s5257_s1 + $0x660] ss:$8 sps:$4 sm:$0xff]   ;;  %v5075_v11 = vld [vmem:[%s4410_s23 + $0xc] ss:$0 sps:$4 sm:$0x11]  }
  0x91   : > { %1740 = vmatpush1.bf16.msra.mxu0 %v1726_v14  ;;  %1852 = vmatpush1.bf16.msra.mxu1 %v1838_v16  ;;  %v2367_v14 = vshrl.u32 %v4602_v42, 16  ;;  %v4231_v16 = vld [vmem:[%s5257_s1 + $0x314] ss:$8 sps:$4 sm:$0x7f]  }
  0x92   : > { %1966 = vmatprep.subr.bf16.mxu0 %v4148_v15  ;;  %2078 = vmatprep.subr.bf16.mxu1 %v4151_v17  ;;  %v4225_v15 = vld [vmem:[%s5257_s1 + $0x300] ss:$8 sps:$4 sm:$0xff]   ;;  %v2371_v17 = vrot.slane %v2369_v8, 1 }
  0x94   : > { %3607 = vmatmul.mubr.msk.bf16.vlgmr.msra.gmra.mrb[0].mxu0 %vm367_vm2, %v4522_v6  ;;  %3629 = vmatmul.mubr.msk.bf16.vlgmr.msra.gmra.mrb[0].mxu1 %vm367_vm2, %v4522_v6  ;;  %v4163_v6 = vld [vmem:[%s5257_s1 + $0x5c4] ss:$8 sps:$4 sm:$0xff]  }
  0x95   : > { %1967 = vmatpush1.bf16.msra.mxu0 %v4146_v18  ;;  %2079 = vmatpush1.bf16.msra.mxu1 %v4149_v19  ;;  %v4228_v18 = vld [vmem:[%s5257_s1 + $0x670] ss:$8 sps:$4 sm:$0xff]   ;;  %v4233_v19 = vld [vmem:[%s5257_s1 + $0x684] ss:$8 sps:$4 sm:$0x7f]  }
  0x96   : > { %1968 = vmatprep.subr.bf16.mxu0 %v4154_v20  ;;  %2080 = vmatprep.subr.bf16.mxu1 %v4157_v21  ;;  %v2374_v20 = vshll.u32 %v5075_v11, 16  ;;  %v4235_v21 = vld [vmem:[%s5257_s1 + $0x310] ss:$8 sps:$4 sm:$0x7f]  }
  0x97   : > { %1998 = vmatprep.mubr.bf16.mxu0 %v4292_v2  ;;  %2110 = vmatprep.mubr.bf16.mxu1 %v4292_v2 }
  0x99   : > { %1969 = vmatpush1.bf16.msra.mxu0 %v4152_v22  ;;  %2081 = vmatpush1.bf16.msra.mxu1 %v4155_v23  ;;  %v4236_v22 = vld [vmem:[%s5257_s1 + $0x680] ss:$8 sps:$4 sm:$0x7f]   ;;  %v2372_v23 = vor.u32 %v2371_v17, %v2367_v14 }
  0x9a   : > { %1970 = vmatprep.subr.bf16.mxu0 %v4160_v26  ;;  %2082 = vmatprep.subr.bf16.mxu1 %v4163_v6  ;;  %v2376_v26 = vrot.slane %v2374_v20, 1  ;;  %v2430_v6 = vsel %vm371_vm0, %v4235_v21, 0 }
  0x9d   : > { %1971 = vmatpush1.bf16.msra.mxu0 %v4158_v33  ;;  %2083 = vmatpush1.bf16.msra.mxu1 %v4161_v34  ;;  %v2542_v33 = vsel %vm371_vm0, %v4236_v22, 0  ;;  %v4239_v34 = vld [vmem:[%s5257_s1 + $0x324] ss:$8 sps:$4 sm:$0xff]  }
  0x9e   : > { %1972 = vmatprep.subr.bf16.mxu0 %v4166_v35  ;;  %2084 = vmatprep.subr.bf16.mxu1 %v4169_v36  ;;  %v4242_v35 = vld [vmem:[%s5257_s1 + $0x694] ss:$8 sps:$4 sm:$0xff]   ;;  %v4237_v36 = vld [vmem:[%s5257_s1 + $0x320] ss:$8 sps:$4 sm:$0xff]  }
  0xa1   : > { %1973 = vmatpush1.bf16.msra.mxu0 %v4164_v37  ;;  %2085 = vmatpush1.bf16.msra.mxu1 %v4167_v38  ;;  %v4240_v37 = vld [vmem:[%s5257_s1 + $0x690] ss:$8 sps:$4 sm:$0xff]   ;;  %v2377_v38 = vsel %vm306_vm1, %v2372_v23, %v2376_v26  ;;  %vm3225_vm1 = vcmask 1043456  }
  0xa2   : > { %3650 = vmatprep.subr.msk.bf16.mxu0 %vm371_vm0, %v4170_v39  ;;  %3672 = vmatprep.subr.msk.bf16.mxu1 %vm371_vm0, %v4172_v40  ;;  %v4246_v39 = vld [vmem:[%s5257_s1 + $0x334] ss:$8 sps:$4 sm:$0xff]   ;;  %v4249_v40 = vld [vmem:[%s5257_s1 + $0x6a4] ss:$8 sps:$4 sm:$0xff]  }
  0xa5   : > { %1975 = vmatpush1.bf16.msra.mxu0 %v1961_v44  ;;  %2087 = vmatpush1.bf16.msra.mxu1 %v2073_v45  ;;  %v4252_v44 = vld [vmem:[%s5257_s1 + $0x344] ss:$8 sps:$4 sm:$0xff]   ;;  %v4255_v45 = vld [vmem:[%s5257_s1 + $0x6b4] ss:$8 sps:$4 sm:$0xff]  }
  0xa6   : > { %2194 = vmatprep.subr.bf16.mxu0 %v4178_v46  ;;  %2306 = vmatprep.subr.bf16.mxu1 %v4181_v47  ;;  %v4250_v46 = vld [vmem:[%s5257_s1 + $0x340] ss:$8 sps:$4 sm:$0xff]   ;;  %v4253_v47 = vld [vmem:[%s5257_s1 + $0x6b0] ss:$8 sps:$4 sm:$0xff]  }
  0xa8   : > { %3651 = vmatmul.mubr.msk.bf16.vlgmr.msra.gmra.mrb[0].mxu0 %vm367_vm2, %v4566_v25  ;;  %3673 = vmatmul.mubr.msk.bf16.vlgmr.msra.gmra.mrb[0].mxu1 %vm367_vm2, %v4566_v25  ;;  %v4193_v25 = vld [vmem:[%s5257_s1 + $0x614] ss:$8 sps:$4 sm:$0xff]  }
  0xa9   : > { %2195 = vmatpush1.bf16.msra.mxu0 %v4176_v24  ;;  %2307 = vmatpush1.bf16.msra.mxu1 %v4179_v27  ;;  %v4258_v24 = vld [vmem:[%s5257_s1 + $0x354] ss:$8 sps:$4 sm:$0xff]   ;;  %v4256_v27 = vld [vmem:[%s5257_s1 + $0x350] ss:$8 sps:$4 sm:$0xff]  }
  0xaa   : > { %2196 = vmatprep.subr.bf16.mxu0 %v4184_v28  ;;  %2308 = vmatprep.subr.bf16.mxu1 %v4187_v59  ;;  %v4259_v28 = vld [vmem:[%s5257_s1 + $0x6c0] ss:$8 sps:$4 sm:$0xff]   ;;  %v4262_v59 = vld [vmem:[%s5257_s1 + $0x364] ss:$8 sps:$4 sm:$0x7f]  }
  0xab   : > { %2226 = vmatprep.mubr.bf16.mxu0 %v4292_v2  ;;  %2338 = vmatprep.mubr.bf16.mxu1 %v4292_v2 }
  0xad   : > { %2197 = vmatpush1.bf16.msra.mxu0 %v4182_v29  ;;  %2309 = vmatpush1.bf16.msra.mxu1 %v4185_v48  ;;  %v4264_v29 = vld [vmem:[%s5257_s1 + $0x6d4] ss:$8 sps:$4 sm:$0x7f]   ;;  %v4266_v48 = vld [vmem:[%s5257_s1 + $0x360] ss:$8 sps:$4 sm:$0x7f]  }
  0xae   : > { %2198 = vmatprep.subr.bf16.mxu0 %v4190_v49  ;;  %2310 = vmatprep.subr.bf16.mxu1 %v4193_v25  ;;  %v4267_v49 = vld [vmem:[%s5257_s1 + $0x6d0] ss:$8 sps:$4 sm:$0x7f]   ;;  %v2605_v25 = vrot.slane %v4602_v42, 1 }
  0xb1   : > { %2199 = vmatpush1.bf16.msra.mxu0 %v4188_v51  ;;  %2311 = vmatpush1.bf16.msra.mxu1 %v4191_v52  ;;  %v2606_v51 = vrot.slane %v5075_v11, 1  ;;  %v2660_v52 = vsel %vm371_vm0, %v4266_v48, 0 }
  0xb2   : > { %2200 = vmatprep.subr.bf16.mxu0 %v4196_v53  ;;  %2312 = vmatprep.subr.bf16.mxu1 %v4199_v54  ;;  %v2772_v53 = vsel %vm371_vm0, %v4267_v49, 0 }
  0xb3   : > { %v2607_v54 = vsel %vm371_vm0, %v2605_v25, %v2606_v51 }
  0xb5   : > { %2201 = vmatpush1.bf16.msra.mxu0 %v4194_v55  ;;  %2313 = vmatpush1.bf16.msra.mxu1 %v4197_v56  ;;  %v2828_v55 = vlaneseq }
  0xb6   : > { %3695 = vmatprep.subr.msk.bf16.mxu0 %vm371_vm0, %v4200_v57  ;;  %3717 = vmatprep.subr.msk.bf16.mxu1 %vm371_vm0, %v4202_v58  ;;  %v2824_v57 = vld [vmem:[%s5258_s2] sm:$0x3] }
  0xb9   : > { %2203 = vmatpush1.bf16.msra.mxu0 %v2189_v62  ;;  %2315 = vmatpush1.bf16.msra.mxu1 %v2301_v63  ;;  %v2826_v62 = vld [vmem:[%s5260_s4] sm:$0x3]  ;;  %v4293_v63 = vmov 1983009808  }
  0xba   : > { %2435 = vmatprep.subr.bf16.mxu0 %v4208_v0  ;;  %2547 = vmatprep.subr.bf16.mxu1 %v4211_v1  ;;  %v2903_v0 = vunpack.c.l.s4 %v4293_v63 }
  0xbc   : > { %3696 = vmatmul.mubr.msk.bf16.vlgmr.msra.gmra.mrb[0].mxu0 %vm367_vm2, %v4602_v42  ;;  %3718 = vmatmul.mubr.msk.bf16.vlgmr.msra.gmra.mrb[0].mxu1 %vm367_vm2, %v4602_v42  ;;  %v2829_v42 = vshrl.u32 %v2828_v55, 7  ;;  %v2904_v8 = vunpack.c.0.s8 %v2903_v0 }
  0xbd   : > { %2436 = vmatpush1.bf16.msra.mxu0 %v4206_v3  ;;  %2548 = vmatpush1.bf16.msra.mxu1 %v4209_v30 }
  0xbe   : > { %2437 = vmatprep.subr.bf16.mxu0 %v4215_v31  ;;  %2549 = vmatprep.subr.bf16.mxu1 %v4218_v9  ;;  %v2830_v56 = vsub.s32 0, %v2829_v42  ;;  %v2834_v58 = vsub.s32 1, %v2829_v42 }
  0xbf   : > { %2467 = vmatprep.mubr.bf16.mxu0 %v4292_v2  ;;  %2579 = vmatprep.mubr.bf16.mxu1 %v4292_v2 }
  0xc0   : > { %v2831_v61 = vrot.slane %v2824_v57, %v2830_v56  ;;  %v2835_v1 = vrot.slane %v2824_v57, %v2834_v58  ;;  %v2850_v30 = vrot.slane %v2825_v60, %v2830_v56  ;;  %v2869_v11 = vrot.slane %v2826_v62, %v2834_v58 }
  0xc1   : > { %2438 = vmatpush1.bf16.msra.mxu0 %v4213_v32  ;;  %2550 = vmatpush1.bf16.msra.mxu1 %v4216_v50  ;;  %v2865_v32 = vrot.slane %v2826_v62, %v2830_v56 }
  0xc2   : > { %2439 = vmatprep.subr.bf16.mxu0 %v4221_v4  ;;  %2551 = vmatprep.subr.bf16.mxu1 %v4224_v5  ;;  %v2854_v5 = vrot.slane %v2825_v60, %v2834_v58 }
  0xc5   : > { %2440 = vmatpush1.bf16.msra.mxu0 %v4219_v7  ;;  %2552 = vmatpush1.bf16.msra.mxu1 %v4222_v10 }
  0xc6   : > { %2441 = vmatprep.subr.bf16.mxu0 %v4227_v12  ;;  %2553 = vmatprep.subr.bf16.mxu1 %v4230_v13 }
  0xc9   : > { %2442 = vmatpush1.bf16.msra.mxu0 %v4225_v15  ;;  %2554 = vmatpush1.bf16.msra.mxu1 %v4228_v18 }
  0xca   : > { %3740 = vmatprep.subr.msk.bf16.mxu0 %vm371_vm0, %v4231_v16  ;;  %3762 = vmatprep.subr.msk.bf16.mxu1 %vm371_vm0, %v4233_v19 }
  0xcd   : > { %2444 = vmatpush1.bf16.msra.mxu0 %v2430_v6  ;;  %2556 = vmatpush1.bf16.msra.mxu1 %v2542_v33 }
  0xce   : > { %2665 = vmatprep.subr.bf16.mxu0 %v4239_v34  ;;  %2777 = vmatprep.subr.bf16.mxu1 %v4242_v35 }
  0xd0   : > { %3741 = vmatmul.mubr.msk.bf16.vlgmr.msra.gmra.mrb[0].mxu0 %vm367_vm2, %v2377_v38  ;;  %3763 = vmatmul.mubr.msk.bf16.vlgmr.msra.gmra.mrb[0].mxu1 %vm367_vm2, %v2377_v38 }
  0xd1   : > { %2666 = vmatpush1.bf16.msra.mxu0 %v4237_v36  ;;  %2778 = vmatpush1.bf16.msra.mxu1 %v4240_v37 }
  0xd2   : > { %2667 = vmatprep.subr.bf16.mxu0 %v4246_v39  ;;  %2779 = vmatprep.subr.bf16.mxu1 %v4249_v40 }
  0xd3   : > { %2697 = vmatprep.mubr.bf16.mxu0 %v4292_v2  ;;  %2809 = vmatprep.mubr.bf16.mxu1 %v4292_v2  ;;  %v4261_v2 = vld [vmem:[%s5257_s1 + $0x6c4] ss:$8 sps:$4 sm:$0xff]  }
  0xd5   : > { %2668 = vmatpush1.bf16.msra.mxu0 %v4244_v41  ;;  %2780 = vmatpush1.bf16.msra.mxu1 %v4247_v43 }
  0xd6   : > { %2669 = vmatprep.subr.bf16.mxu0 %v4252_v44  ;;  %2781 = vmatprep.subr.bf16.mxu1 %v4255_v45 }
  0xd9   : > { %2670 = vmatpush1.bf16.msra.mxu0 %v4250_v46  ;;  %2782 = vmatpush1.bf16.msra.mxu1 %v4253_v47 }
  0xda   : > { %2671 = vmatprep.subr.bf16.mxu0 %v4258_v24  ;;  %2783 = vmatprep.subr.bf16.mxu1 %v4261_v2 }
  0xdd   : > { %2672 = vmatpush1.bf16.msra.mxu0 %v4256_v27  ;;  %2784 = vmatpush1.bf16.msra.mxu1 %v4259_v28 }
  0xde   : > { %3784 = vmatprep.subr.msk.bf16.mxu0 %vm371_vm0, %v4262_v59  ;;  %3806 = vmatprep.subr.msk.bf16.mxu1 %vm371_vm0, %v4264_v29  ;;  %v5190_v59 = vsub.s32 %v2904_v8, %v2829_v42  ;;  %vm3214_vm0 = vcmask 1047559  }
  0xe1   : > { %2674 = vmatpush1.bf16.msra.mxu0 %v2660_v52  ;;  %2786 = vmatpush1.bf16.msra.mxu1 %v2772_v53 }
  0xe4   : > { %3785 = vmatmul.mubr.msk.bf16.vlgmr.msra.gmra.mrb[0].mxu0 %vm367_vm2, %v2607_v54  ;;  %3807 = vmatmul.mubr.msk.bf16.vlgmr.msra.gmra.mrb[0].mxu1 %vm367_vm2, %v2607_v54  ;;  %vm3226_vm2 = vcmask 130052  }
  0xe5   : > { %vm3227_vm3 = vmor %vm3226_vm2, %vm3225_vm1 }
 0x1b7   : > { %v2699_v3 = vpop.f32.mrb[0].mxu0  ;;  %v2811_v31 = vpop.f32.mrb[0].mxu1 }
 0x1b8   : > { %v2838_v9 = vadd.f32 %v2831_v61, %v2699_v3  ;;  %v2876_v50 = vadd.f32 %v2831_v61, %v2811_v31  ;;  %v2701_v4 = vpop.f32.mrb[1].mxu0  ;;  %v2813_v7 = vpop.f32.mrb[1].mxu1 }
 0x1b9   : > { %v2839_v10 = vadd.f32 %v2835_v1, %v2701_v4  ;;  %v2877_v12 = vadd.f32 %v2835_v1, %v2813_v7  ;;  %v2703_v13 = vpop.f32.mrb[2].mxu0  ;;  %v2815_v14 = vpop.f32.mrb[2].mxu1 }
 0x1ba   : > { %v2842_v15 = vmax.f32 %v2838_v9, 0.0  ;;  %v2880_v16 = vmax.f32 %v2876_v50, 0.0  ;;  %v2840_v17 = vadd.f32 %v2831_v61, %v2703_v13  ;;  %v2878_v18 = vadd.f32 %v2831_v61, %v2815_v14  ;;  %v2705_v19 = vpop.f32.mrb[3].mxu0  ;;  %v2817_v20 = vpop.f32.mrb[3].mxu1 }
 0x1bb   : > { %v2843_v21 = vmax.f32 %v2839_v10, 0.0  ;;  %v2881_v22 = vmax.f32 %v2877_v12, 0.0  ;;  %v2841_v23 = vadd.f32 %v2835_v1, %v2705_v19  ;;  %v2879_v26 = vadd.f32 %v2835_v1, %v2817_v20 }
 0x1bc   : > { %v2857_v6 = vmul.f32 %v2850_v30, %v2842_v15  ;;  %v2884_v33 = vmul.f32 %v2880_v16, %v2850_v30  ;;  %v2844_v34 = vmax.f32 %v2840_v17, 0.0  ;;  %v2882_v35 = vmax.f32 %v2878_v18, 0.0 }
 0x1bd   : > { %v2858_v36 = vmul.f32 %v2854_v5, %v2843_v21  ;;  %v2885_v37 = vmul.f32 %v2881_v22, %v2854_v5  ;;  %v2845_v38 = vmax.f32 %v2841_v23, 0.0  ;;  %v2883_v39 = vmax.f32 %v2879_v26, 0.0 }
 0x1be   : > { %v2872_v40 = vadd.f32 %v2865_v32, %v2857_v6  ;;  %v2888_v41 = vadd.f32 %v2884_v33, %v2865_v32  ;;  %v2859_v43 = vmul.f32 %v2850_v30, %v2844_v34  ;;  %v2886_v44 = vmul.f32 %v2882_v35, %v2850_v30 }
 0x1bf   : > { %v2873_v45 = vadd.f32 %v2869_v11, %v2858_v36  ;;  %v2889_v46 = vadd.f32 %v2885_v37, %v2869_v11  ;;  %v2860_v47 = vmul.f32 %v2854_v5, %v2845_v38  ;;  %v2887_v24 = vmul.f32 %v2883_v39, %v2854_v5 }
 0x1c0   : > { %v2892_v2 = vmax.f32 %v2872_v40, %v2888_v41  ;;  %v2874_v27 = vadd.f32 %v2865_v32, %v2859_v43  ;;  %v2890_v28 = vadd.f32 %v2886_v44, %v2865_v32 }
 0x1c1   : > { %v2893_v29 = vmax.f32 %v2873_v45, %v2889_v46  ;;  %v2875_v48 = vadd.f32 %v2869_v11, %v2860_v47  ;;  %v2891_v49 = vadd.f32 %v2887_v24, %v2869_v11 }
 0x1c2   : > { %v2894_v25 = vmax.f32 %v2874_v27, %v2890_v28 }
 0x1c3   : > { %v2900_v51 = vcombine.low %v2892_v2, %v2893_v29  ;;  %v2901_v52 = vcombine.high %v2892_v2, %v2893_v29  ;;  %v2895_v53 = vmax.f32 %v2875_v48, %v2891_v49 }
 0x1c5   : > { %v2908_v54 = vrot.slane %v2900_v51, %v5190_v59  ;;  %v2915_v55 = vrot.slane %v2901_v52, %v5190_v59  ;;  %v2918_v56 = vcombine.low %v2894_v25, %v2895_v53  ;;  %v2919_v57 = vcombine.high %v2894_v25, %v2895_v53 }
 0x1c7   : > { %v2916_v58 = vcombine.high %v2908_v54, %v2908_v54  ;;  %v2917_v60 = vcombine.high %v2915_v55, %v2915_v55  ;;  %v2942_v61 = vrot.slane %v2908_v54, %v5190_v59  ;;  %v2958_v42 = vrot.slane %v2915_v55, %v5190_v59 }
 0x1c8   : > { %v5197_v62 = vrot.slane %v2918_v56, %v5190_v59  ;;  %v5200_v63 = vrot.slane %v2919_v57, %v5190_v59 }
 0x1c9   : > { %v2943_v0 = vcombine.high %v2942_v61, %v2942_v61  ;;  %v2950_v1 = vrot.slane %v2916_v58, %v5190_v59  ;;  %v2959_v3 = vcombine.high %v2958_v42, %v2958_v42  ;;  %v2966_v30 = vrot.slane %v2917_v60, %v5190_v59 }
 0x1ca   : > { %v3017_v31 = vsel %vm3016_vm8, %v2942_v61, -inf  ;;  %v3046_v9 = vsel %vm3016_vm8, %v2958_v42, -inf  ;;  %v2934_v32 = vcombine.high %v5197_v62, %v5197_v62  ;;  %v2935_v50 = vcombine.high %v5200_v63, %v5200_v63 }
 0x1cb   : > { %v2951_v4 = vcombine.high %v2950_v1, %v2950_v1  ;;  %v2967_v5 = vcombine.high %v2966_v30, %v2966_v30  ;;  %v3018_v7 = vrot.slane %v3017_v31, 4  ;;  %v3025_v8 = vsel %vm3024_vm9, %v2943_v0, -inf }
 0x1cc   : > { %v3026_v10 = vrot.slane %v3025_v8, 4  ;;  %v3032_v11 = vsel %vm3016_vm8, %v2950_v1, -inf  ;;  %v3047_v12 = vrot.slane %v3046_v9, 4  ;;  %v3053_v13 = vsel %vm3024_vm9, %v2959_v3, -inf }
 0x1cd   : > { %v3019_v14 = vmax.f32 %v3017_v31, %v3018_v7  ;;  %v3033_v15 = vrot.slane %v3032_v11, 4  ;;  %v3039_v16 = vsel %vm3024_vm9, %v2951_v4, -inf  ;;  %v3054_v17 = vrot.slane %v3053_v13, 4 }
 0x1ce   : > { %v3027_v18 = vmax.f32 %v3025_v8, %v3026_v10  ;;  %v3040_v19 = vrot.slane %v3039_v16, 4  ;;  %v3048_v20 = vmax.f32 %v3046_v9, %v3047_v12  ;;  %v3060_v21 = vsel %vm3016_vm8, %v2966_v30, -inf }
 0x1cf   : > { %v3020_v22 = vrot.slane %v3019_v14, 2  ;;  %v3034_v23 = vmax.f32 %v3032_v11, %v3033_v15  ;;  %v3055_v26 = vmax.f32 %v3053_v13, %v3054_v17  ;;  %v3061_v6 = vrot.slane %v3060_v21, 4 }
 0x1d0   : > { %v3028_v33 = vrot.slane %v3027_v18, 2  ;;  %v3041_v34 = vmax.f32 %v3039_v16, %v3040_v19  ;;  %v3049_v35 = vrot.slane %v3048_v20, 2  ;;  %v3067_v36 = vsel %vm3024_vm9, %v2967_v5, -inf }
 0x1d1   : > { %v3021_v37 = vmax.f32 %v3019_v14, %v3020_v22  ;;  %v3035_v38 = vrot.slane %v3034_v23, 2  ;;  %v3056_v39 = vrot.slane %v3055_v26, 2  ;;  %v3062_v40 = vmax.f32 %v3060_v21, %v3061_v6 }
 0x1d2   : > { %v3029_v41 = vmax.f32 %v3027_v18, %v3028_v33  ;;  %v3042_v43 = vrot.slane %v3041_v34, 2  ;;  %v3050_v44 = vmax.f32 %v3048_v20, %v3049_v35  ;;  %v3068_v45 = vrot.slane %v3067_v36, 4 }
 0x1d3   : > { %v3022_v46 = vrot.slane %v3021_v37, 1  ;;  %v3036_v47 = vmax.f32 %v3034_v23, %v3035_v38  ;;  %v3057_v24 = vmax.f32 %v3055_v26, %v3056_v39  ;;  %v3063_v2 = vrot.slane %v3062_v40, 2 }
 0x1d4   : > { %v3030_v27 = vrot.slane %v3029_v41, 1  ;;  %v3043_v28 = vmax.f32 %v3041_v34, %v3042_v43  ;;  %v3051_v29 = vrot.slane %v3050_v44, 1  ;;  %v3069_v48 = vmax.f32 %v3067_v36, %v3068_v45 }
 0x1d5   : > { %v3023_v49 = vmax.f32 %v3021_v37, %v3022_v46  ;;  %v3037_v25 = vrot.slane %v3036_v47, 1  ;;  %v3058_v51 = vrot.slane %v3057_v24, 1  ;;  %v3064_v52 = vmax.f32 %v3062_v40, %v3063_v2 }
 0x1d6   : > { %v3031_v53 = vmax.f32 %v3029_v41, %v3030_v27  ;;  %v3044_v54 = vrot.slane %v3043_v28, 1  ;;  %v3052_v55 = vmax.f32 %v3050_v44, %v3051_v29  ;;  %v3070_v56 = vrot.slane %v3069_v48, 2 }
 0x1d7   : > { %v3038_v57 = vmax.f32 %v3036_v47, %v3037_v25  ;;  %v3059_v58 = vmax.f32 %v3057_v24, %v3058_v51  ;;  %v3065_v60 = vrot.slane %v3064_v52, 1  ;;  %v2974_v61 = vrot.slane %v5197_v62, %v5190_v59 }
 0x1d8   : > { %v3045_v42 = vmax.f32 %v3043_v28, %v3044_v54  ;;  %v3071_v0 = vmax.f32 %v3069_v48, %v3070_v56  ;;  %v3820_v1 = vpack.c.bf16 %v3031_v53, %v3023_v49  ;;  %v2982_v3 = vrot.slane %v2934_v32, %v5190_v59 }
 0x1d9   : > { %v3066_v30 = vmax.f32 %v3064_v52, %v3065_v60  ;;  %v3822_v31 = vpack.c.bf16 %v3059_v58, %v3052_v55  ;;  %v2975_v9 = vcombine.high %v2974_v61, %v2974_v61  ;;  %v2990_v4 = vrot.slane %v5200_v63, %v5190_v59 }
 0x1da   : > { %v3072_v5 = vrot.slane %v3071_v0, 1  ;;  %v3821_v7 = vpack.c.bf16 %v3045_v42, %v3038_v57  ;;  %v3186_v8 = vunpack.c.l.b16 %v3820_v1  ;;  %v3187_v10 = vunpack.c.h.b16 %v3820_v1 }
 0x1db   : > { %v3190_v11 = vunpack.c.l.b16 %v3822_v31  ;;  %v3191_v12 = vunpack.c.h.b16 %v3822_v31  ;;  %v2983_v13 = vcombine.high %v2982_v3, %v2982_v3  ;;  %v2991_v14 = vcombine.high %v2990_v4, %v2990_v4 }
 0x1dc   : > { %v3073_v62 = vmax.f32 %v3071_v0, %v3072_v5  ;;  %v3188_v15 = vunpack.c.l.b16 %v3821_v7  ;;  %v3189_v16 = vunpack.c.h.b16 %v3821_v7  ;;  %v2998_v32 = vrot.slane %v2935_v50, %v5190_v59 }
 0x1dd   : > { %v3074_v17 = vsel %vm3016_vm8, %v2974_v61, -inf  ;;  %v3081_v18 = vsel %vm3024_vm9, %v2975_v9, -inf  ;;  %v3088_v19 = vsel %vm3016_vm8, %v2982_v3, -inf  ;;  %v3095_v20 = vsel %vm3024_vm9, %v2983_v13, -inf }
 0x1de   : > { %v3823_v21 = vpack.c.bf16 %v3073_v62, %v3066_v30  ;;  %v3203_v22 = vsel %vm3202_vm10, %v3188_v15, %v3186_v8  ;;  %v3216_v23 = vsel %vm3202_vm10, %v3189_v16, %v3187_v10  ;;  %v2999_v26 = vcombine.high %v2998_v32, %v2998_v32 }
 0x1df   : > { %v3205_v6 = vsel %vm3204_vm11, %v3190_v11, %v3203_v22  ;;  %v3217_v33 = vsel %vm3204_vm11, %v3191_v12, %v3216_v23  ;;  %v3075_v63 = vrot.slane %v3074_v17, 4  ;;  %v3082_v59 = vrot.slane %v3081_v18, 4 }
 0x1e0   : > { %v3192_v50 = vunpack.c.l.b16 %v3823_v21  ;;  %v3193_v34 = vunpack.c.h.b16 %v3823_v21  ;;  %v3089_v35 = vrot.slane %v3088_v19, 4  ;;  %v3096_v36 = vrot.slane %v3095_v20, 4 }
 0x1e1   : > { %v3076_v37 = vmax.f32 %v3074_v17, %v3075_v63  ;;  %v3083_v38 = vmax.f32 %v3081_v18, %v3082_v59  ;;  %v3102_v39 = vsel %vm3016_vm8, %v2990_v4, -inf  ;;  %v3109_v40 = vsel %vm3024_vm9, %v2991_v14, -inf }
 0x1e2   : > { %v3207_v41 = vsel %vm3206_vm12, %v3192_v50, %v3205_v6  ;;  %v3218_v43 = vsel %vm3206_vm12, %v3193_v34, %v3217_v33  ;;  %v3090_v44 = vmax.f32 %v3088_v19, %v3089_v35  ;;  %v3097_v45 = vmax.f32 %v3095_v20, %v3096_v36 }
 0x1e3   : > { %v3077_v46 = vrot.slane %v3076_v37, 2  ;;  %v3084_v47 = vrot.slane %v3083_v38, 2  ;;  %v3103_v24 = vrot.slane %v3102_v39, 4  ;;  %v3110_v2 = vrot.slane %v3109_v40, 4 }
 0x1e4   : > { %v3091_v27 = vrot.slane %v3090_v44, 2  ;;  %v3098_v28 = vrot.slane %v3097_v45, 2  ;;  %v3116_v29 = vsel %vm3016_vm8, %v2998_v32, -inf  ;;  %v3123_v48 = vsel %vm3024_vm9, %v2999_v26, -inf }
 0x1e5   : > { %v3078_v49 = vmax.f32 %v3076_v37, %v3077_v46  ;;  %v3085_v25 = vmax.f32 %v3083_v38, %v3084_v47  ;;  %v3104_v51 = vmax.f32 %v3102_v39, %v3103_v24  ;;  %v3111_v52 = vmax.f32 %v3109_v40, %v3110_v2 }
 0x1e6   : > { %v3092_v53 = vmax.f32 %v3090_v44, %v3091_v27  ;;  %v3099_v54 = vmax.f32 %v3097_v45, %v3098_v28  ;;  %v3117_v55 = vrot.slane %v3116_v29, 4  ;;  %v3124_v56 = vrot.slane %v3123_v48, 4 }
 0x1e7   : > { %v3079_v57 = vrot.slane %v3078_v49, 1  ;;  %v3086_v58 = vrot.slane %v3085_v25, 1  ;;  %v3105_v60 = vrot.slane %v3104_v51, 2  ;;  %v3112_v61 = vrot.slane %v3111_v52, 2 }
 0x1e8   : > { %v3093_v42 = vrot.slane %v3092_v53, 1  ;;  %v3100_v0 = vrot.slane %v3099_v54, 1  ;;  %v3118_v1 = vmax.f32 %v3116_v29, %v3117_v55  ;;  %v3125_v3 = vmax.f32 %v3123_v48, %v3124_v56 }
 0x1e9   : > { %v3080_v30 = vmax.f32 %v3078_v49, %v3079_v57  ;;  %v3087_v31 = vmax.f32 %v3085_v25, %v3086_v58  ;;  %v3106_v9 = vmax.f32 %v3104_v51, %v3105_v60  ;;  %v3113_v4 = vmax.f32 %v3111_v52, %v3112_v61 }
 0x1ea   : > { %v3094_v5 = vmax.f32 %v3092_v53, %v3093_v42  ;;  %v3101_v7 = vmax.f32 %v3099_v54, %v3100_v0  ;;  %v3119_v8 = vrot.slane %v3118_v1, 2  ;;  %v3126_v10 = vrot.slane %v3125_v3, 2 }
 0x1eb   : > { %v3107_v11 = vrot.slane %v3106_v9, 1  ;;  %v3114_v12 = vrot.slane %v3113_v4, 1  ;;  %v3824_v13 = vpack.c.bf16 %v3087_v31, %v3080_v30 }
 0x1ec   : > { %v3120_v14 = vmax.f32 %v3118_v1, %v3119_v8  ;;  %v3127_v62 = vmax.f32 %v3125_v3, %v3126_v10  ;;  %v3825_v15 = vpack.c.bf16 %v3101_v7, %v3094_v5 }
 0x1ed   : > { %v3108_v16 = vmax.f32 %v3106_v9, %v3107_v11  ;;  %v3115_v32 = vmax.f32 %v3113_v4, %v3114_v12  ;;  %v3194_v17 = vunpack.c.l.b16 %v3824_v13  ;;  %v3195_v18 = vunpack.c.h.b16 %v3824_v13 }
 0x1ee   : > { %v3121_v19 = vrot.slane %v3120_v14, 1  ;;  %v3128_v20 = vrot.slane %v3127_v62, 1  ;;  %v3196_v21 = vunpack.c.l.b16 %v3825_v15  ;;  %v3197_v22 = vunpack.c.h.b16 %v3825_v15 }
 0x1ef   : > { %v3826_v23 = vpack.c.bf16 %v3115_v32, %v3108_v16  ;;  %v3209_v26 = vsel %vm3208_vm13, %v3194_v17, %v3207_v41  ;;  %v3219_v6 = vsel %vm3208_vm13, %v3195_v18, %v3218_v43 }
 0x1f0   : > { %v3122_v33 = vmax.f32 %v3120_v14, %v3121_v19  ;;  %v3129_v63 = vmax.f32 %v3127_v62, %v3128_v20  ;;  %v3211_v59 = vsel %vm3210_vm14, %v3196_v21, %v3209_v26  ;;  %v3220_v50 = vsel %vm3210_vm14, %v3197_v22, %v3219_v6 }
 0x1f1   : > { %v3198_v34 = vunpack.c.l.b16 %v3826_v23  ;;  %v3199_v35 = vunpack.c.h.b16 %v3826_v23 }
 0x1f2   : > { %v3827_v36 = vpack.c.bf16 %v3129_v63, %v3122_v33 }
 0x1f3   : > { %v3213_v37 = vsel %vm3212_vm15, %v3198_v34, %v3211_v59  ;;  %v3221_v38 = vsel %vm3212_vm15, %v3199_v35, %v3220_v50 }
 0x1f4   : > { %v3200_v39 = vunpack.c.l.b16 %v3827_v36  ;;  %v3201_v40 = vunpack.c.h.b16 %v3827_v36 }
 0x1f6   : > { %v3215_v41 = vsel %vm3214_vm0, %v3200_v39, %v3213_v37  ;;  %v3222_v43 = vsel %vm3214_vm0, %v3201_v40, %v3221_v38 }
 0x1f7   : > { %v3223_v44 = vpack.c.b16 %v3222_v43, %v3215_v41 }
 0x1f9   : > { %3228 = vst.msk [vmem:[%s260_s30] sm:$0xff] %vm3227_vm3, %v3223_v44 }
 0x1fa PF: > { %s15_s20 = sadd.s32 1, %s4290_s20   ;;  %s5262_s18 = smov %s4286_s19 }
 0x1fb   : > { %p12_p5 = scmp.ge.s32.totalorder %s15_s20, 4   ;;  %s5263_s19 = smov %s5265_s21 }
 0x1fd   :  { %14 = sbr.rel (!%p12_p5) target bundleno = 2 (0x2), region = 91 }

// kernel: tile.53
= control target key start
LH: loop header
LB: loop body
LE: loop exit
PB: predicated region body
PF: predicated region fallthrough
CT: control target
= control target key end

     0   :  { %s22_s0 = inlined_call_operand.vmem [shape: f32[36], index: 0, kind: input, shape index: {}]   ;;  %s23_s1 = inlined_call_operand.vmem [shape: f32[4,36], index: 1, kind: output, shape index: {}]  }
   0x1   :  { %v4_v0 = vld [vmem:[%s22_s0] ss:$0 sm:$0xff] }
   0x2   :  { %5 = vst [vmem:[%s23_s1] sm:$0xf] %v4_v0 }

// kernel: tile.54
= control target key start
LH: loop header
LB: loop body
LE: loop exit
PB: predicated region body
PF: predicated region fallthrough
CT: control target
= control target key end

     0   :  { %vm13_vm0 = vcmask 162816   ;;  %vm7_vm1 = vcmask 293888   ;;  %s50_s8 = smov 36   ;;  %s51_s9 = smov 72   ;;  %vm17_vm2 = vcmask 130048   ;;  %vm20_vm3 = vcmask 1048416   ;;  %s71_s0 = inlined_call_operand.vmem [shape: f32[4,36], index: 0, kind: input, shape index: {}]   ;;  %s72_s1 = inlined_call_operand.vmem [shape: f32[1,144], index: 1, kind: output, shape index: {}]  }
   0x1   :  { %v4_v0 = vld [vmem:[%s71_s0] sm:$0xf]  ;;  %s49_s0 = smov 108   ;;  %vm26_vm4 = vcmask 884288   ;;  %vm32_vm5 = vcmask 589088  }
   0x2   :  { %5 = vst [vmem:[#allocation1] sm:$0xf] %v4_v0 }
   0x9   :  { %v10_v1 = vld [vmem:[#allocation1 + $0x3] sm:$0x1]   ;;  %v29_v4 = vld [vmem:[#allocation1 + $0x1] sm:$0x1]   ;;  %v6_v5 = vld [vmem:[#allocation1] sm:$0x1]  }
   0xa   :  { %v12_v2 = vld [vmem:[#allocation1 + $0x3] sm:$0x1]   ;;  %30 = vrot.lane.b32.xlu1 %v29_v4, %s50_s8  ;;  %8 = vst.msk [vmem:[#allocation0] sm:$0x1] %vm7_vm1, %v6_v5   ;;  %v23_v6 = vld [vmem:[#allocation1 + $0x2] sm:$0x1]  }
   0xb   :  { %v14_v3 = vsel %vm13_vm0, %v12_v2, %v10_v1 }
   0xc   :  { %15 = vrot.lane.b32.xlu0 %v14_v3, %s49_s0 }
  0x10   :  { %24 = vrot.lane.b32.xlu0 %v23_v6, %s51_s9 }
  0x7c   :  { %v31_v8 = vpop.permute.xlu1 %30  }
  0x7e   :  { %v16_v7 = vpop.permute.xlu0 %15  }
  0x7f   :  { %19 = vst.msk [vmem:[#allocation0 + $0x8] sm:$0x1] %vm17_vm2, %v16_v7  }
  0x80   :  { %21 = vst.msk [vmem:[#allocation0] sm:$0x1] %vm20_vm3, %v16_v7  }
  0x82   :  { %v25_v9 = vpop.permute.xlu0 %24  }
  0x83   :  { %27 = vst.msk [vmem:[#allocation0] sm:$0x1] %vm26_vm4, %v25_v9  }
  0x84   :  { %33 = vst.msk [vmem:[#allocation0] sm:$0x1] %vm32_vm5, %v31_v8  }
  0x86   :  { %v41_v10 = vld [vmem:[#allocation0 + $0x8] sm:$0x1] }
  0x87   :  { %45 = vst [vmem:[%s72_s1 + $0x1] sm:$0x1] %v41_v10 }
  0x8b   :  { %v37_v11 = vld [vmem:[#allocation0] sm:$0x1] }
  0x8c   :  { %39 = vst [vmem:[%s72_s1] sm:$0x1] %v37_v11 }

// kernel: cnn_forward.4
= control target key start
LH: loop header
LB: loop body
LE: loop exit
PB: predicated region body
PF: predicated region fallthrough
CT: control target
= control target key end

     0   :  { %s11539_s18 = smov 0   ;;  %s11541_s19 = smov 0   ;;  %s14713_s0 = inlined_call_operand.vmem [shape: bf16[2,1,18,324], index: 0, kind: input, shape index: {}]   ;;  %s14714_s1 = inlined_call_operand.vmem [shape: bf16[22,324,144], index: 1, kind: input, shape index: {}]   ;;  %s14715_s2 = inlined_call_operand.vmem [shape: f32[1,144], index: 2, kind: input, shape index: {}]   ;;  %s14716_s3 = inlined_call_operand.vmem [shape: f32[1,144], index: 3, kind: input, shape index: {}]   ;;  %s14717_s4 = inlined_call_operand.vmem [shape: f32[1,144], index: 4, kind: input, shape index: {}]   ;;  %s14718_s5 = inlined_call_operand.vmem [shape: bf16[2,1,4,144], index: 5, kind: output, shape index: {}]  }
   0x1   :  { %s11543_s20 = smov 0  }
   0x2 LB: > { %s27_s21 = sadd.s32 1, %s11501_s19  ;;  %p8226_p0 = scmp.ge.s32.totalorder %s11505_s20, 1  ;;  %s11505_s20 = sphi %s11543_s20, %s15_s20   ;;  %s11501_s19 = sphi %s11541_s19, %s14720_s19   ;;  %s11497_s18 = sphi %s11539_s18, %s14719_s18  }
   0x3   : > { %p29_p1 = scmp.ge.s32.totalorder %s27_s21, 2  ;;  %p207_p2 = scmp.lt.s32.totalorder %s11505_s20, 3 }
   0x5   : > { %s14722_s21 = smov (%p29_p1, %s27_s21), 0  ;;  %p208_p3 = pnand %p8226_p0, %p207_p2 }
   0x6   : > { %v10105_v0 = vld [vmem:[%s14714_s1 + $0x14c] ss:$8 sps:$4 sm:$0xff] (!%p208_p3)   ;;  %v11507_v2 = vmov (!%p208_p3), 0   ;;  %p243_p4 = scmp.lt.s32.totalorder (!%p208_p3), %s11497_s18, 1  ;;  %v10109_v3 = vld [vmem:[%s14714_s1 + $0x148] ss:$8 sps:$4 sm:$0xff] (!%p208_p3)  }
   0x7   : > { %211 = sbr.rel (%p208_p3) target bundleno = 1206 (0x4b6), region = 40  ;;  %v10107_v1 = vld [vmem:[%s14714_s1 + $0x24c] ss:$8 sps:$4 sm:$0xff] (!%p208_p3)   ;;  %718 = vmatprep.mubr.bf16.mxu1 (!%p208_p3), %v11507_v2  ;;  %645 = vmatprep.subr.bf16.mxu0 (!%p208_p3), %v10105_v0  ;;  %v10110_v4 = vld [vmem:[%s14714_s1 + $0x248] ss:$8 sps:$4 sm:$0xff] (!%p208_p3)   ;;  %vm638_vm0 = vcmask (!%p208_p3), 1041408  }
   0x8   : > { %686 = vmatprep.subr.bf16.mxu1 (!%p208_p3), %v10107_v1  ;;  %v10111_v5 = vld [vmem:[%s14714_s1 + $0x15c] ss:$8 sps:$4 sm:$0xff] (!%p208_p3)   ;;  %646 = vmatpush1.bf16.msra.mxu0 (!%p208_p3), %v10109_v3  ;;  %v10115_v7 = vld [vmem:[%s14714_s1 + $0x158] ss:$8 sps:$4 sm:$0xff] (!%p208_p3)   ;;  %v10117_v9 = vld [vmem:[%s14714_s1 + $0x16c] ss:$8 sps:$4 sm:$0xff] (!%p208_p3)  }
   0x9   : > { %687 = vmatpush1.bf16.msra.mxu1 (!%p208_p3), %v10110_v4  ;;  %v10113_v6 = vld [vmem:[%s14714_s1 + $0x25c] ss:$8 sps:$4 sm:$0xff] (!%p208_p3)   ;;  %647 = vmatprep.subr.bf16.mxu0 (!%p208_p3), %v10111_v5  ;;  %v10116_v8 = vld [vmem:[%s14714_s1 + $0x258] ss:$8 sps:$4 sm:$0xff] (!%p208_p3)   ;;  %v10119_v10 = vld [vmem:[%s14714_s1 + $0x26c] ss:$8 sps:$4 sm:$0xff] (!%p208_p3)  }
   0xa   : > { %688 = vmatprep.subr.bf16.mxu1 (!%p208_p3), %v10113_v6  ;;  %v10121_v11 = vld [vmem:[%s14714_s1 + $0x168] ss:$8 sps:$4 sm:$0xff] (!%p208_p3)   ;;  %v10123_v13 = vld [vmem:[%s14714_s1 + $0x17c] ss:$8 sps:$4 sm:$0xff] (!%p208_p3)   ;;  %v10127_v15 = vld [vmem:[%s14714_s1 + $0x178] ss:$8 sps:$4 sm:$0xff] (!%p208_p3)  }
   0xb   : > { %v10122_v12 = vld [vmem:[%s14714_s1 + $0x268] ss:$8 sps:$4 sm:$0xff] (!%p208_p3)   ;;  %v10125_v14 = vld [vmem:[%s14714_s1 + $0x27c] ss:$8 sps:$4 sm:$0xff] (!%p208_p3)   ;;  %v10128_v17 = vld [vmem:[%s14714_s1 + $0x278] ss:$8 sps:$4 sm:$0xff] (!%p208_p3)  }
   0xc   : > { %648 = vmatpush1.bf16.msra.mxu0 (!%p208_p3), %v10115_v7  ;;  %v8311_v16 = vld [vmem:[%s14714_s1 + $0x288] sm:$0x33] (!%p208_p3)  ;;  %v10134_v28 = vld [vmem:[%s14714_s1 + $0x19c] ss:$8 sps:$4 sm:$0xff] (!%p208_p3)   ;;  %vm634_vm1 = vcmask (!%p208_p3), 556032   ;;  %vm7961_vm2 = vcmask (!%p208_p3), 123904  }
   0xd   : > { %689 = vmatpush1.bf16.msra.mxu1 (!%p208_p3), %v10116_v8  ;;  %649 = vmatprep.subr.bf16.mxu0 (!%p208_p3), %v10117_v9  ;;  %v10129_v18 = vld [vmem:[%s14714_s1 + $0x18c] ss:$8 sps:$4 sm:$0xff] (!%p208_p3)   ;;  %v8356_v19 = vcombine.high (!%p208_p3), %v8311_v16, %v8311_v16  ;;  %v8355_v20 = vcombine.low (!%p208_p3), %v8311_v16, %v8311_v16  ;;  %v10132_v24 = vld [vmem:[%s14714_s1 + $0x188] ss:$8 sps:$4 sm:$0xff] (!%p208_p3)   ;;  %v10140_v33 = vld [vmem:[%s14714_s1 + $0x198] ss:$8 sps:$4 sm:$0xff] (!%p208_p3)  }
   0xe   : > { %s14724_s18 = smov (!%p243_p4, %s11497_s18), 1  ;;  %690 = vmatprep.subr.bf16.mxu1 %v10119_v10  ;;  %v10139_v29 = vld [vmem:[%s14714_s1 + $0x4] ss:$8 sps:$4 sm:$0xff]   ;;  %v10137_v32 = vld [vmem:[%s14714_s1] ss:$8 sps:$4 sm:$0xff]   ;;  %vm8104_vm3 = vcmask 1041409  }
   0xf   : > { %s10078_s15 = smul.u32 36, %s14724_s18  ;;  %v640_v27 = vsel %vm638_vm0, %v8355_v20, 0  ;;  %v10141_v34 = vld [vmem:[%s14714_s1 + $0x1ac] ss:$8 sps:$4 sm:$0xff]   ;;  %v10143_v36 = vld [vmem:[%s14714_s1 + $0x10] ss:$8 sps:$4 sm:$0xff]  }
  0x10   : > { %650 = vmatpush1.bf16.msra.mxu0 %v10121_v11  ;;  %v10145_v35 = vld [vmem:[%s14714_s1 + $0x14] ss:$8 sps:$4 sm:$0xff]   ;;  %v10146_v37 = vld [vmem:[%s14714_s1 + $0x1a8] ss:$8 sps:$4 sm:$0xff]   ;;  %v10151_v39 = vld [vmem:[%s14714_s1 + $0x24] ss:$8 sps:$4 sm:$0xff]  }
  0x11   : > { %s11606_s7 = scalar_lea.vmem %s14713_s0, %s10078_s15  ;;  %691 = vmatpush1.bf16.msra.mxu1 %v10122_v12  ;;  %651 = vmatprep.subr.bf16.mxu0 %v10123_v13  ;;  %v10147_v38 = vld [vmem:[%s14714_s1 + $0x1bc] ss:$8 sps:$4 sm:$0xff]   ;;  %v10149_v40 = vld [vmem:[%s14714_s1 + $0x20] ss:$8 sps:$4 sm:$0xff]   ;;  %v10153_v42 = vld [vmem:[%s14714_s1 + $0x1cc] ss:$8 sps:$4 sm:$0xff]  }
  0x12   : > { %692 = vmatprep.subr.bf16.mxu1 %v10125_v14  ;;  %v11621_v21 = vld [vmem:[%s11606_s7 + $0x8] sm:$0xf]  ;;  %v265_v22 = vld [vmem:[%s11606_s7 + $0x14] sm:$0xf]  ;;  %v10152_v41 = vld [vmem:[%s14714_s1 + $0x1b8] ss:$8 sps:$4 sm:$0xff]  }
  0x13   : > { %v11625_v23 = vcombine.low %v11621_v21, %v265_v22  ;;  %v10157_v43 = vld [vmem:[%s14714_s1 + $0x34] ss:$8 sps:$4 sm:$0xff]   ;;  %v10155_v44 = vld [vmem:[%s14714_s1 + $0x30] ss:$8 sps:$4 sm:$0xff]   ;;  %v10163_v47 = vld [vmem:[%s14714_s1 + $0x44] ss:$8 sps:$4 sm:$0xff]  }
  0x14   : > { %652 = vmatpush1.bf16.msra.mxu0 %v10127_v15  ;;  %v10158_v45 = vld [vmem:[%s14714_s1 + $0x1c8] ss:$8 sps:$4 sm:$0xff]   ;;  %v10159_v46 = vld [vmem:[%s14714_s1 + $0x1dc] ss:$8 sps:$4 sm:$0xff]   ;;  %v10164_v49 = vld [vmem:[%s14714_s1 + $0x1d8] ss:$8 sps:$4 sm:$0xff]  }
  0x15   : > { %693 = vmatpush1.bf16.msra.mxu1 %v10128_v17  ;;  %v11631_v25 = vshrl.u32 %v11625_v23, 16  ;;  %v11634_v26 = vshll.u32 %v11625_v23, 16  ;;  %653 = vmatprep.subr.bf16.mxu0 %v10129_v18  ;;  %v10161_v48 = vld [vmem:[%s14714_s1 + $0x40] ss:$8 sps:$4 sm:$0xff]   ;;  %v10165_v50 = vld [vmem:[%s14714_s1 + $0x1ec] ss:$8 sps:$4 sm:$0xff]  }
  0x16   : > { %8357 = vmatprep.subr.msk.bf16.mxu1 %vm638_vm0, %v8356_v19  ;;  %v10169_v51 = vld [vmem:[%s14714_s1 + $0x54] ss:$8 sps:$4 sm:$0xff]   ;;  %v10167_v52 = vld [vmem:[%s14714_s1 + $0x50] ss:$8 sps:$4 sm:$0xff]   ;;  %v10175_v55 = vld [vmem:[%s14714_s1 + $0x64] ss:$8 sps:$4 sm:$0xff]  }
  0x17   : > { %v425_v30 = vrot.slane %v11634_v26, 1  ;;  %v10170_v53 = vld [vmem:[%s14714_s1 + $0x1e8] ss:$8 sps:$4 sm:$0xff]   ;;  %v10171_v54 = vld [vmem:[%s14714_s1 + $0x1fc] ss:$8 sps:$4 sm:$0xff]   ;;  %vm8107_vm4 = vcmask 1042434  }
  0x18   : > { %654 = vmatpush1.bf16.msra.mxu0 %v10132_v24  ;;  %v11723_v56 = vld [vmem:[%s11606_s7] sm:$0xff]  ;;  %v264_v57 = vld [vmem:[%s11606_s7 + $0xc] sm:$0xff]  ;;  %v10181_v63 = vld [vmem:[%s14714_s1 + $0x74] ss:$8 sps:$4 sm:$0xff]   ;;  %vm8110_vm5 = vcmask 1043459   ;;  %s10077_s15 = sshll.u32 %s14724_s18, 2 }
  0x19   : > { %695 = vmatpush1.bf16.msra.mxu1 %v640_v27  ;;  %v11646_v31 = vor.u32 %v425_v30, %v11631_v25  ;;  %655 = vmatprep.subr.bf16.mxu0 %v10134_v28  ;;  %v10173_v58 = vld [vmem:[%s14714_s1 + $0x60] ss:$8 sps:$4 sm:$0xff]   ;;  %v11730_v59 = vcombine.high %v11723_v56, %v264_v57  ;;  %v11734_v60 = vcombine.high %v11723_v56, %v11723_v56  ;;  %v10177_v62 = vld [vmem:[%s14714_s1 + $0x20c] ss:$8 sps:$4 sm:$0xff]   ;;  %v10179_v3 = vld [vmem:[%s14714_s1 + $0x70] ss:$8 sps:$4 sm:$0xff]   ;;  %s260_s17 = scalar_lea.vmem %s14718_s5, %s10077_s15 }
  0x1a   : > { %946 = vmatprep.subr.bf16.mxu1 %v10139_v29  ;;  %v10176_v61 = vld [vmem:[%s14714_s1 + $0x1f8] ss:$8 sps:$4 sm:$0xff]   ;;  %v10182_v4 = vld [vmem:[%s14714_s1 + $0x208] ss:$8 sps:$4 sm:$0xff]   ;;  %v10183_v6 = vld [vmem:[%s14714_s1 + $0x21c] ss:$8 sps:$4 sm:$0xff]   ;;  %v11776_v11 = vcombine.low %v11723_v56, %v264_v57 }
  0x1b   : > { %v11746_v0 = vshrl.u32 %v11730_v59, 16  ;;  %v11749_v1 = vshll.u32 %v11730_v59, 16  ;;  %v10187_v7 = vld [vmem:[%s14714_s1 + $0x84] ss:$8 sps:$4 sm:$0xff]   ;;  %v10185_v9 = vld [vmem:[%s14714_s1 + $0x80] ss:$8 sps:$4 sm:$0xff]  }
  0x1c   : > { %8358 = vmatmul.mubr.msk.bf16.vlgmr.msra.gmra.mrb[0].mxu1 %vm634_vm1, %v11646_v31  ;;  %656 = vmatpush1.bf16.msra.mxu0 %v10140_v33  ;;  %v10188_v10 = vld [vmem:[%s14714_s1 + $0x218] ss:$8 sps:$4 sm:$0xff]   ;;  %v10189_v12 = vld [vmem:[%s14714_s1 + $0x22c] ss:$8 sps:$4 sm:$0xff]   ;;  %v11788_v15 = vshll.u32 %v11776_v11, 16  ;;  %v11803_v20 = vshrl.u32 %v11776_v11, 16 }
  0x1d   : > { %947 = vmatpush1.bf16.msra.mxu1 %v10137_v32  ;;  %657 = vmatprep.subr.bf16.mxu0 %v10141_v34  ;;  %v418_v5 = vrot.slane %v11749_v1, 1  ;;  %v10193_v13 = vld [vmem:[%s14714_s1 + $0x94] ss:$8 sps:$4 sm:$0xff]   ;;  %v10191_v14 = vld [vmem:[%s14714_s1 + $0x90] ss:$8 sps:$4 sm:$0xff]   ;;  %vm8127_vm6 = vcmask 125954  }
  0x1e   : > { %948 = vmatprep.subr.bf16.mxu1 %v10145_v35  ;;  %978 = vmatprep.mubr.bf16.mxu1 %v11734_v60  ;;  %v10194_v16 = vld [vmem:[%s14714_s1 + $0x228] ss:$8 sps:$4 sm:$0xff]   ;;  %v10195_v17 = vld [vmem:[%s14714_s1 + $0x23c] ss:$8 sps:$4 sm:$0xff]   ;;  %v411_v22 = vrot.slane %v11788_v15, 1  ;;  %vm8128_vm7 = vmor %vm8127_vm6, %vm638_vm0 }
  0x1f   : > { %v11766_v8 = vor.u32 %v418_v5, %v11746_v0  ;;  %v10199_v18 = vld [vmem:[%s14714_s1 + $0xa4] ss:$8 sps:$4 sm:$0xff]   ;;  %v10197_v19 = vld [vmem:[%s14714_s1 + $0xa0] ss:$8 sps:$4 sm:$0xff]   ;;  %v10205_v27 = vld [vmem:[%s14714_s1 + $0xb4] ss:$8 sps:$4 sm:$0xff]  }
  0x20   : > { %658 = vmatpush1.bf16.msra.mxu0 %v10146_v37  ;;  %v10200_v24 = vld [vmem:[%s14714_s1 + $0x238] ss:$8 sps:$4 sm:$0xff]   ;;  %v10208_v28 = vld [vmem:[%s14714_s1 + $0x104] ss:$8 sps:$4 sm:$0xff]   ;;  %v11816_v29 = vor.u32 %v411_v22, %v11803_v20  ;;  %v10214_v34 = vld [vmem:[%s14714_s1 + $0x114] ss:$8 sps:$4 sm:$0xff]  }
  0x21   : > { %949 = vmatpush1.bf16.msra.mxu1 %v10143_v36  ;;  %659 = vmatprep.subr.bf16.mxu0 %v10147_v38  ;;  %v10203_v30 = vld [vmem:[%s14714_s1 + $0xb0] ss:$8 sps:$4 sm:$0xff]   ;;  %v10206_v32 = vld [vmem:[%s14714_s1 + $0x100] ss:$8 sps:$4 sm:$0xff]   ;;  %v10211_v33 = vld [vmem:[%s14714_s1 + $0xc4] ss:$8 sps:$4 sm:$0xff]  }
  0x22   : > { %950 = vmatprep.subr.bf16.mxu1 %v10151_v39  ;;  %677 = vmatprep.mubr.bf16.mxu0 %v11766_v8  ;;  %v10209_v35 = vld [vmem:[%s14714_s1 + $0xc0] ss:$8 sps:$4 sm:$0xff]   ;;  %v10212_v36 = vld [vmem:[%s14714_s1 + $0x110] ss:$8 sps:$4 sm:$0xff]   ;;  %v10217_v37 = vld [vmem:[%s14714_s1 + $0xd4] ss:$8 sps:$4 sm:$0xff]  }
  0x23   : > { %v10220_v38 = vld [vmem:[%s14714_s1 + $0x124] ss:$8 sps:$4 sm:$0xff]   ;;  %v10215_v39 = vld [vmem:[%s14714_s1 + $0xd0] ss:$8 sps:$4 sm:$0xff]   ;;  %v10238_v57 = vld [vmem:[%s14714_s1 + $0x1060] ss:$8 sps:$4 sm:$0xff]  }
  0x24   : > { %660 = vmatpush1.bf16.msra.mxu0 %v10152_v41  ;;  %v10223_v41 = vld [vmem:[%s14714_s1 + $0xe4] ss:$8 sps:$4 sm:$0xff]   ;;  %v10255_v5 = vld [vmem:[%s14714_s1 + $0xf94] ss:$8 sps:$4 sm:$0xff]   ;;  %v10267_v22 = vld [vmem:[%s14714_s1 + $0xe18] ss:$8 sps:$4 sm:$0xff]  }
  0x25   : > { %951 = vmatpush1.bf16.msra.mxu1 %v10149_v40  ;;  %661 = vmatprep.subr.bf16.mxu0 %v10153_v42  ;;  %v10218_v40 = vld [vmem:[%s14714_s1 + $0x120] ss:$8 sps:$4 sm:$0xff]   ;;  %v10226_v42 = vld [vmem:[%s14714_s1 + $0x134] ss:$8 sps:$4 sm:$0xff]  }
  0x26   : > { %952 = vmatprep.subr.bf16.mxu1 %v10157_v43  ;;  %v308_v43 = vld [vmem:[%s14714_s1 + $0x140] sm:$0x33] }
  0x28   : > { %662 = vmatpush1.bf16.msra.mxu0 %v10158_v45  ;;  %v10224_v45 = vld [vmem:[%s14714_s1 + $0x130] ss:$8 sps:$4 sm:$0xff]  }
  0x29   : > { %953 = vmatpush1.bf16.msra.mxu1 %v10155_v44  ;;  %663 = vmatprep.subr.bf16.mxu0 %v10159_v46  ;;  %v10221_v44 = vld [vmem:[%s14714_s1 + $0xe0] ss:$8 sps:$4 sm:$0xff]   ;;  %v10229_v46 = vld [vmem:[%s14714_s1 + $0xf4] ss:$8 sps:$4 sm:$0xff]  }
  0x2a   : > { %954 = vmatprep.subr.bf16.mxu1 %v10163_v47  ;;  %v8403_v47 = vcombine.high %v308_v43, %v308_v43 }
  0x2c   : > { %664 = vmatpush1.bf16.msra.mxu0 %v10164_v49  ;;  %v10227_v49 = vld [vmem:[%s14714_s1 + $0xf0] ss:$8 sps:$4 sm:$0xff]  }
  0x2d   : > { %955 = vmatpush1.bf16.msra.mxu1 %v10161_v48  ;;  %665 = vmatprep.subr.bf16.mxu0 %v10165_v50  ;;  %v8402_v48 = vcombine.low %v308_v43, %v308_v43  ;;  %v10299_v43 = vld [vmem:[%s14714_s1 + $0xe6c] ss:$8 sps:$4 sm:$0xff]  }
  0x2e   : > { %956 = vmatprep.subr.bf16.mxu1 %v10169_v51  ;;  %v10237_v51 = vld [vmem:[%s14714_s1 + $0xf64] ss:$8 sps:$4 sm:$0xff]  }
  0x2f   : > { %v941_v50 = vsel %vm638_vm0, %v8402_v48, 0  ;;  %v10300_v48 = vld [vmem:[%s14714_s1 + $0x1010] ss:$8 sps:$4 sm:$0xff]  }
  0x30   : > { %666 = vmatpush1.bf16.msra.mxu0 %v10170_v53  ;;  %v11881_v53 = vcombine.low %v11723_v56, %v11723_v56  ;;  %v10243_v56 = vld [vmem:[%s14714_s1 + $0xf74] ss:$8 sps:$4 sm:$0xff]  }
  0x31   : > { %957 = vmatpush1.bf16.msra.mxu1 %v10167_v52  ;;  %667 = vmatprep.subr.bf16.mxu0 %v10171_v54  ;;  %v10240_v52 = vld [vmem:[%s14714_s1 + $0x1064] ss:$8 sps:$4 sm:$0xff]   ;;  %v11885_v54 = vcombine.low %v11621_v21, %v11621_v21  ;;  %v10246_v21 = vld [vmem:[%s14714_s1 + $0x1074] ss:$8 sps:$4 sm:$0xff]  }
  0x32   : > { %958 = vmatprep.subr.bf16.mxu1 %v10175_v55  ;;  %v10235_v55 = vld [vmem:[%s14714_s1 + $0xf60] ss:$8 sps:$4 sm:$0xff]  }
  0x34   : > { %668 = vmatpush1.bf16.msra.mxu0 %v10176_v61  ;;  %v10244_v61 = vld [vmem:[%s14714_s1 + $0x1070] ss:$8 sps:$4 sm:$0xff]  }
  0x35   : > { %959 = vmatpush1.bf16.msra.mxu1 %v10173_v58  ;;  %669 = vmatprep.subr.bf16.mxu0 %v10177_v62  ;;  %v10241_v58 = vld [vmem:[%s14714_s1 + $0xf70] ss:$8 sps:$4 sm:$0xff]   ;;  %v10249_v62 = vld [vmem:[%s14714_s1 + $0xf84] ss:$8 sps:$4 sm:$0xff]  }
  0x36   : > { %960 = vmatprep.subr.bf16.mxu1 %v10181_v63  ;;  %v10252_v63 = vld [vmem:[%s14714_s1 + $0x1084] ss:$8 sps:$4 sm:$0xff]  }
  0x38   : > { %670 = vmatpush1.bf16.msra.mxu0 %v10182_v4  ;;  %v10250_v4 = vld [vmem:[%s14714_s1 + $0x1080] ss:$8 sps:$4 sm:$0xff]  }
  0x39   : > { %961 = vmatpush1.bf16.msra.mxu1 %v10179_v3  ;;  %671 = vmatprep.subr.bf16.mxu0 %v10183_v6  ;;  %v10247_v3 = vld [vmem:[%s14714_s1 + $0xf80] ss:$8 sps:$4 sm:$0xff]   ;;  %v10258_v6 = vld [vmem:[%s14714_s1 + $0x1094] ss:$8 sps:$4 sm:$0xff]  }
  0x3a   : > { %962 = vmatprep.subr.bf16.mxu1 %v10187_v7  ;;  %v8446_v7 = vld [vmem:[%s14714_s1 + $0x10a0] sm:$0x33] }
  0x3c   : > { %672 = vmatpush1.bf16.msra.mxu0 %v10188_v10  ;;  %v10261_v10 = vld [vmem:[%s14714_s1 + $0xfa4] ss:$8 sps:$4 sm:$0xff]  }
  0x3d   : > { %963 = vmatpush1.bf16.msra.mxu1 %v10185_v9  ;;  %673 = vmatprep.subr.bf16.mxu0 %v10189_v12  ;;  %v10256_v9 = vld [vmem:[%s14714_s1 + $0x1090] ss:$8 sps:$4 sm:$0xff]   ;;  %v8488_v12 = vcombine.high %v8446_v7, %v8446_v7 }
  0x3e   : > { %964 = vmatprep.subr.bf16.mxu1 %v10193_v13  ;;  %v8487_v13 = vcombine.low %v8446_v7, %v8446_v7  ;;  %v10327_v7 = vld [vmem:[%s14714_s1 + $0xeb8] ss:$8 sps:$4 sm:$0xff]  }
  0x40   : > { %674 = vmatpush1.bf16.msra.mxu0 %v10194_v16  ;;  %v1276_v16 = vsel %vm638_vm0, %v8487_v13, 0  ;;  %v10338_v13 = vld [vmem:[%s14714_s1 + $0xedc] ss:$8 sps:$4 sm:$0xff]  }
  0x41   : > { %965 = vmatpush1.bf16.msra.mxu1 %v10191_v14  ;;  %675 = vmatprep.subr.bf16.mxu0 %v10195_v17  ;;  %v10259_v14 = vld [vmem:[%s14714_s1 + $0xfa0] ss:$8 sps:$4 sm:$0xff]   ;;  %v10266_v17 = vld [vmem:[%s14714_s1 + $0xfb4] ss:$8 sps:$4 sm:$0xff]  }
  0x42   : > { %966 = vmatprep.subr.bf16.mxu1 %v10199_v18  ;;  %v10269_v18 = vld [vmem:[%s14714_s1 + $0xe1c] ss:$8 sps:$4 sm:$0xff]  }
  0x44   : > { %676 = vmatpush1.bf16.msra.mxu0 %v10200_v24  ;;  %v10272_v24 = vld [vmem:[%s14714_s1 + $0xfc4] ss:$8 sps:$4 sm:$0xff]  }
  0x45   : > { %967 = vmatpush1.bf16.msra.mxu1 %v10197_v19  ;;  %987 = vmatprep.subr.bf16.mxu0 %v10208_v28  ;;  %v10264_v19 = vld [vmem:[%s14714_s1 + $0xfb0] ss:$8 sps:$4 sm:$0xff]   ;;  %v10270_v28 = vld [vmem:[%s14714_s1 + $0xfc0] ss:$8 sps:$4 sm:$0xff]  }
  0x46   : > { %968 = vmatprep.subr.bf16.mxu1 %v10205_v27  ;;  %v10275_v27 = vld [vmem:[%s14714_s1 + $0xe2c] ss:$8 sps:$4 sm:$0xff]  }
  0x47   : > { %678 = vmatmul.mubr.bf16.vlgmr.msra.gmra.mrb[0].mxu0 %v11816_v29 }
  0x48   : > { %988 = vmatpush1.bf16.msra.mxu0 %v10206_v32  ;;  %1019 = vmatprep.mubr.bf16.mxu0 %v11507_v2  ;;  %v10278_v32 = vld [vmem:[%s14714_s1 + $0xfd4] ss:$8 sps:$4 sm:$0xff]  }
  0x49   : > { %969 = vmatpush1.bf16.msra.mxu1 %v10203_v30  ;;  %989 = vmatprep.subr.bf16.mxu0 %v10214_v34  ;;  %v10273_v30 = vld [vmem:[%s14714_s1 + $0xe28] ss:$8 sps:$4 sm:$0xff]   ;;  %v10279_v34 = vld [vmem:[%s14714_s1 + $0xe38] ss:$8 sps:$4 sm:$0xff]  }
  0x4a   : > { %970 = vmatprep.subr.bf16.mxu1 %v10211_v33  ;;  %v10276_v33 = vld [vmem:[%s14714_s1 + $0xfd0] ss:$8 sps:$4 sm:$0xff]  }
  0x4c   : > { %990 = vmatpush1.bf16.msra.mxu0 %v10212_v36  ;;  %v10282_v36 = vld [vmem:[%s14714_s1 + $0xfe0] ss:$8 sps:$4 sm:$0xff]  }
  0x4d   : > { %971 = vmatpush1.bf16.msra.mxu1 %v10209_v35  ;;  %991 = vmatprep.subr.bf16.mxu0 %v10220_v38  ;;  %v10284_v35 = vld [vmem:[%s14714_s1 + $0xfe4] ss:$8 sps:$4 sm:$0xff]   ;;  %v10290_v38 = vld [vmem:[%s14714_s1 + $0xff4] ss:$8 sps:$4 sm:$0xff]  }
  0x4e   : > { %972 = vmatprep.subr.bf16.mxu1 %v10217_v37  ;;  %v10285_v37 = vld [vmem:[%s14714_s1 + $0xe48] ss:$8 sps:$4 sm:$0xff]  }
  0x50   : > { %992 = vmatpush1.bf16.msra.mxu0 %v10218_v40  ;;  %v10288_v40 = vld [vmem:[%s14714_s1 + $0xff0] ss:$8 sps:$4 sm:$0xff]  }
  0x51   : > { %973 = vmatpush1.bf16.msra.mxu1 %v10215_v39  ;;  %993 = vmatprep.subr.bf16.mxu0 %v10226_v42  ;;  %v10293_v39 = vld [vmem:[%s14714_s1 + $0xe5c] ss:$8 sps:$4 sm:$0xff]  }
  0x52   : > { %974 = vmatprep.subr.bf16.mxu1 %v10223_v41  ;;  %v10291_v41 = vld [vmem:[%s14714_s1 + $0xe58] ss:$8 sps:$4 sm:$0xff]   ;;  %v10296_v42 = vld [vmem:[%s14714_s1 + $0x1004] ss:$8 sps:$4 sm:$0xff]  }
  0x54   : > { %994 = vmatpush1.bf16.msra.mxu0 %v10224_v45  ;;  %v10297_v45 = vld [vmem:[%s14714_s1 + $0xe68] ss:$8 sps:$4 sm:$0xff]  }
  0x55   : > { %975 = vmatpush1.bf16.msra.mxu1 %v10221_v44  ;;  %8404 = vmatprep.subr.msk.bf16.mxu0 %vm638_vm0, %v8403_v47  ;;  %v10294_v44 = vld [vmem:[%s14714_s1 + $0x1000] ss:$8 sps:$4 sm:$0xff]   ;;  %v10305_v47 = vld [vmem:[%s14714_s1 + $0xe7c] ss:$8 sps:$4 sm:$0xff]  }
  0x56   : > { %976 = vmatprep.subr.bf16.mxu1 %v10229_v46  ;;  %v10302_v46 = vld [vmem:[%s14714_s1 + $0x1014] ss:$8 sps:$4 sm:$0xff]  }
  0x58   : > { %996 = vmatpush1.bf16.msra.mxu0 %v941_v50  ;;  %v10308_v50 = vld [vmem:[%s14714_s1 + $0x1024] ss:$8 sps:$4 sm:$0xff]  }
  0x59   : > { %977 = vmatpush1.bf16.msra.mxu1 %v10227_v49  ;;  %1281 = vmatprep.subr.bf16.mxu0 %v10237_v51  ;;  %v10303_v49 = vld [vmem:[%s14714_s1 + $0xe78] ss:$8 sps:$4 sm:$0xff]   ;;  %v10311_v51 = vld [vmem:[%s14714_s1 + $0xe8c] ss:$8 sps:$4 sm:$0xff]  }
  0x5a   : > { %1322 = vmatprep.subr.bf16.mxu1 %v10240_v52  ;;  %v10306_v52 = vld [vmem:[%s14714_s1 + $0x1020] ss:$8 sps:$4 sm:$0xff]  }
  0x5b   : > { %8405 = vmatmul.mubr.msk.bf16.vlgmr.msra.gmra.mrb[4].mxu0 %vm634_vm1, %v11885_v54 }
  0x5c   : > { %979 = vmatmul.mubr.bf16.vlgmr.msra.gmra.mrb[4].mxu1 %v11881_v53  ;;  %1282 = vmatpush1.bf16.msra.mxu0 %v10235_v55  ;;  %v10309_v55 = vld [vmem:[%s14714_s1 + $0xe88] ss:$8 sps:$4 sm:$0xff]  }
  0x5d   : > { %1323 = vmatpush1.bf16.msra.mxu1 %v10238_v57  ;;  %1283 = vmatprep.subr.bf16.mxu0 %v10243_v56  ;;  %v10314_v57 = vld [vmem:[%s14714_s1 + $0x1034] ss:$8 sps:$4 sm:$0xff]  }
  0x5e   : > { %1324 = vmatprep.subr.bf16.mxu1 %v10246_v21  ;;  %1354 = vmatprep.mubr.bf16.mxu1 %v11507_v2  ;;  %v10317_v56 = vld [vmem:[%s14714_s1 + $0xe9c] ss:$8 sps:$4 sm:$0xff]   ;;  %v10312_v21 = vld [vmem:[%s14714_s1 + $0x1030] ss:$8 sps:$4 sm:$0xff]  }
  0x5f   : > { %1313 = vmatprep.mubr.bf16.mxu0 %v11766_v8  ;;  %v10253_v8 = vld [vmem:[%s14714_s1 + $0xf90] ss:$8 sps:$4 sm:$0xff]  }
  0x60   : > { %1284 = vmatpush1.bf16.msra.mxu0 %v10241_v58  ;;  %v10315_v58 = vld [vmem:[%s14714_s1 + $0xe98] ss:$8 sps:$4 sm:$0xff]  }
  0x61   : > { %1325 = vmatpush1.bf16.msra.mxu1 %v10244_v61  ;;  %1285 = vmatprep.subr.bf16.mxu0 %v10249_v62  ;;  %v10320_v61 = vld [vmem:[%s14714_s1 + $0x1044] ss:$8 sps:$4 sm:$0xff]  }
  0x62   : > { %1326 = vmatprep.subr.bf16.mxu1 %v10252_v63  ;;  %v10323_v62 = vld [vmem:[%s14714_s1 + $0xeac] ss:$8 sps:$4 sm:$0xff]   ;;  %v10318_v63 = vld [vmem:[%s14714_s1 + $0x1040] ss:$8 sps:$4 sm:$0xff]  }
  0x64   : > { %1286 = vmatpush1.bf16.msra.mxu0 %v10247_v3  ;;  %v10321_v3 = vld [vmem:[%s14714_s1 + $0xea8] ss:$8 sps:$4 sm:$0xff]  }
  0x65   : > { %1327 = vmatpush1.bf16.msra.mxu1 %v10250_v4  ;;  %1287 = vmatprep.subr.bf16.mxu0 %v10255_v5  ;;  %v10326_v4 = vld [vmem:[%s14714_s1 + $0x1054] ss:$8 sps:$4 sm:$0xff]  }
  0x66   : > { %1328 = vmatprep.subr.bf16.mxu1 %v10258_v6  ;;  %v10329_v5 = vld [vmem:[%s14714_s1 + $0xebc] ss:$8 sps:$4 sm:$0xff]   ;;  %v10324_v6 = vld [vmem:[%s14714_s1 + $0x1050] ss:$8 sps:$4 sm:$0xff]  }
  0x68   : > { %1288 = vmatpush1.bf16.msra.mxu0 %v10253_v8  ;;  %v10332_v8 = vld [vmem:[%s14714_s1 + $0xecc] ss:$8 sps:$4 sm:$0xff]  }
  0x69   : > { %1329 = vmatpush1.bf16.msra.mxu1 %v10256_v9  ;;  %1289 = vmatprep.subr.bf16.mxu0 %v10261_v10  ;;  %v10335_v9 = vld [vmem:[%s14714_s1 + $0xf1c] ss:$8 sps:$4 sm:$0xff]   ;;  %v10330_v10 = vld [vmem:[%s14714_s1 + $0xec8] ss:$8 sps:$4 sm:$0xff]  }
  0x6a   : > { %8489 = vmatprep.subr.msk.bf16.mxu1 %vm638_vm0, %v8488_v12  ;;  %v10333_v12 = vld [vmem:[%s14714_s1 + $0xf18] ss:$8 sps:$4 sm:$0xff]  }
  0x6c   : > { %1290 = vmatpush1.bf16.msra.mxu0 %v10259_v14  ;;  %v10341_v14 = vld [vmem:[%s14714_s1 + $0xf2c] ss:$8 sps:$4 sm:$0xff]  }
  0x6d   : > { %1331 = vmatpush1.bf16.msra.mxu1 %v1276_v16  ;;  %1291 = vmatprep.subr.bf16.mxu0 %v10266_v17  ;;  %v10336_v16 = vld [vmem:[%s14714_s1 + $0xed8] ss:$8 sps:$4 sm:$0xff]   ;;  %v10339_v17 = vld [vmem:[%s14714_s1 + $0xf28] ss:$8 sps:$4 sm:$0xff]  }
  0x6e   : > { %1574 = vmatprep.subr.bf16.mxu1 %v10269_v18  ;;  %v10344_v18 = vld [vmem:[%s14714_s1 + $0xeec] ss:$8 sps:$4 sm:$0xff]  }
  0x70   : > { %8490 = vmatmul.mubr.msk.bf16.vlgmr.msra.gmra.mrb[8].mxu1 %vm634_vm1, %v11646_v31  ;;  %1292 = vmatpush1.bf16.msra.mxu0 %v10264_v19  ;;  %v10281_v31 = vld [vmem:[%s14714_s1 + $0xe3c] ss:$8 sps:$4 sm:$0xff]   ;;  %v10342_v19 = vld [vmem:[%s14714_s1 + $0xee8] ss:$8 sps:$4 sm:$0xff]  }
  0x71   : > { %1575 = vmatpush1.bf16.msra.mxu1 %v10267_v22  ;;  %1293 = vmatprep.subr.bf16.mxu0 %v10272_v24  ;;  %v10345_v22 = vld [vmem:[%s14714_s1 + $0xf38] ss:$8 sps:$4 sm:$0xff]   ;;  %v10350_v24 = vld [vmem:[%s14714_s1 + $0xefc] ss:$8 sps:$4 sm:$0xff]  }
  0x72   : > { %1576 = vmatprep.subr.bf16.mxu1 %v10275_v27  ;;  %1606 = vmatprep.mubr.bf16.mxu1 %v11734_v60  ;;  %v10287_v60 = vld [vmem:[%s14714_s1 + $0xe4c] ss:$8 sps:$4 sm:$0xff]  }
  0x73   : > { %v10353_v27 = vld [vmem:[%s14714_s1 + $0xf4c] ss:$8 sps:$4 sm:$0xff]  }
  0x74   : > { %1294 = vmatpush1.bf16.msra.mxu0 %v10270_v28  ;;  %v8270_v28 = vld [vmem:[%s14714_s1 + $0xf58] sm:$0x33] }
  0x75   : > { %1577 = vmatpush1.bf16.msra.mxu1 %v10273_v30  ;;  %1295 = vmatprep.subr.bf16.mxu0 %v10278_v32  ;;  %v10348_v30 = vld [vmem:[%s14714_s1 + $0xef8] ss:$8 sps:$4 sm:$0xff]   ;;  %v10351_v32 = vld [vmem:[%s14714_s1 + $0xf48] ss:$8 sps:$4 sm:$0xff]  }
  0x76   : > { %1578 = vmatprep.subr.bf16.mxu1 %v10281_v31  ;;  %v10356_v31 = vld [vmem:[%s14714_s1 + $0xf0c] ss:$8 sps:$4 sm:$0xff]  }
  0x78   : > { %1296 = vmatpush1.bf16.msra.mxu0 %v10276_v33  ;;  %v8532_v33 = vcombine.high %v8270_v28, %v8270_v28 }
  0x79   : > { %1579 = vmatpush1.bf16.msra.mxu1 %v10279_v34  ;;  %1297 = vmatprep.subr.bf16.mxu0 %v10284_v35  ;;  %v8531_v34 = vcombine.low %v8270_v28, %v8270_v28  ;;  %v10354_v35 = vld [vmem:[%s14714_s1 + $0xf08] ss:$8 sps:$4 sm:$0xff]  }
  0x7a   : > { %1580 = vmatprep.subr.bf16.mxu1 %v10287_v60  ;;  %v10418_v28 = vld [vmem:[%s14714_s1 + $0x330] ss:$8 sps:$4 sm:$0xff]  }
  0x7b   : > { %v1569_v60 = vsel %vm638_vm0, %v8531_v34, 0  ;;  %v10427_v34 = vld [vmem:[%s14714_s1 + $0x1108] ss:$8 sps:$4 sm:$0xff]  }
  0x7c   : > { %1298 = vmatpush1.bf16.msra.mxu0 %v10282_v36  ;;  %v10361_v36 = vld [vmem:[%s14714_s1 + $0x294] ss:$8 sps:$4 sm:$0xff]  }
  0x7d   : > { %1581 = vmatpush1.bf16.msra.mxu1 %v10285_v37  ;;  %1299 = vmatprep.subr.bf16.mxu0 %v10290_v38  ;;  %v10364_v37 = vld [vmem:[%s14714_s1 + $0x394] ss:$8 sps:$4 sm:$0xff]   ;;  %v10359_v38 = vld [vmem:[%s14714_s1 + $0x290] ss:$8 sps:$4 sm:$0xff]  }
  0x7e   : > { %1582 = vmatprep.subr.bf16.mxu1 %v10293_v39  ;;  %v10362_v39 = vld [vmem:[%s14714_s1 + $0x390] ss:$8 sps:$4 sm:$0xff]  }
  0x80   : > { %1300 = vmatpush1.bf16.msra.mxu0 %v10288_v40  ;;  %v10367_v40 = vld [vmem:[%s14714_s1 + $0x2a4] ss:$8 sps:$4 sm:$0xff]  }
  0x81   : > { %1583 = vmatpush1.bf16.msra.mxu1 %v10291_v41  ;;  %1301 = vmatprep.subr.bf16.mxu0 %v10296_v42  ;;  %v10370_v41 = vld [vmem:[%s14714_s1 + $0x3a4] ss:$8 sps:$4 sm:$0xff]   ;;  %v1699_v42 = vrot.slane %v11730_v59, 1 }
  0x82   : > { %1584 = vmatprep.subr.bf16.mxu1 %v10299_v43  ;;  %v10365_v43 = vld [vmem:[%s14714_s1 + $0x2a0] ss:$8 sps:$4 sm:$0xff]  }
  0x84   : > { %1302 = vmatpush1.bf16.msra.mxu0 %v10294_v44  ;;  %v10368_v44 = vld [vmem:[%s14714_s1 + $0x3a0] ss:$8 sps:$4 sm:$0xff]  }
  0x85   : > { %1585 = vmatpush1.bf16.msra.mxu1 %v10297_v45  ;;  %1303 = vmatprep.subr.bf16.mxu0 %v10302_v46  ;;  %v10373_v45 = vld [vmem:[%s14714_s1 + $0x2b4] ss:$8 sps:$4 sm:$0xff]   ;;  %v10374_v46 = vld [vmem:[%s14714_s1 + $0x3b0] ss:$8 sps:$4 sm:$0xff]  }
  0x86   : > { %1586 = vmatprep.subr.bf16.mxu1 %v10305_v47  ;;  %v10379_v47 = vld [vmem:[%s14714_s1 + $0x2c4] ss:$8 sps:$4 sm:$0xff]  }
  0x88   : > { %1304 = vmatpush1.bf16.msra.mxu0 %v10300_v48  ;;  %v10382_v48 = vld [vmem:[%s14714_s1 + $0x3c4] ss:$8 sps:$4 sm:$0xff]  }
  0x89   : > { %1587 = vmatpush1.bf16.msra.mxu1 %v10303_v49  ;;  %1305 = vmatprep.subr.bf16.mxu0 %v10308_v50  ;;  %v8575_v49 = vld [vmem:[%s14714_s1 + $0x3d0] sm:$0x33]  ;;  %v10377_v50 = vld [vmem:[%s14714_s1 + $0x2c0] ss:$8 sps:$4 sm:$0xff]  }
  0x8a   : > { %1588 = vmatprep.subr.bf16.mxu1 %v10311_v51  ;;  %v10380_v51 = vld [vmem:[%s14714_s1 + $0x3c0] ss:$8 sps:$4 sm:$0xff]  }
  0x8c   : > { %1306 = vmatpush1.bf16.msra.mxu0 %v10306_v52  ;;  %v10385_v52 = vld [vmem:[%s14714_s1 + $0x2d4] ss:$8 sps:$4 sm:$0xff]  }
  0x8d   : > { %1589 = vmatpush1.bf16.msra.mxu1 %v10309_v55  ;;  %1307 = vmatprep.subr.bf16.mxu0 %v10314_v57  ;;  %v8617_v55 = vcombine.high %v8575_v49, %v8575_v49  ;;  %v8616_v57 = vcombine.low %v8575_v49, %v8575_v49  ;;  %v10459_v49 = vld [vmem:[%s14714_s1 + $0x11ac] ss:$8 sps:$4 sm:$0xff]  }
  0x8e   : > { %1590 = vmatprep.subr.bf16.mxu1 %v10317_v56  ;;  %v10383_v56 = vld [vmem:[%s14714_s1 + $0x2d0] ss:$8 sps:$4 sm:$0xff]  }
  0x90   : > { %1308 = vmatpush1.bf16.msra.mxu0 %v10312_v21  ;;  %v1912_v21 = vsel %vm638_vm0, %v8616_v57, 0  ;;  %v10465_v57 = vld [vmem:[%s14714_s1 + $0x11bc] ss:$8 sps:$4 sm:$0xff]  }
  0x91   : > { %1591 = vmatpush1.bf16.msra.mxu1 %v10315_v58  ;;  %1309 = vmatprep.subr.bf16.mxu0 %v10320_v61  ;;  %v10390_v58 = vld [vmem:[%s14714_s1 + $0x2e4] ss:$8 sps:$4 sm:$0xff]  }
  0x92   : > { %1592 = vmatprep.subr.bf16.mxu1 %v10323_v62  ;;  %v10393_v61 = vld [vmem:[%s14714_s1 + $0x10ac] ss:$8 sps:$4 sm:$0xff]   ;;  %v1700_v62 = vrot.slane %v11625_v23, 1 }
  0x94   : > { %1310 = vmatpush1.bf16.msra.mxu0 %v10318_v63  ;;  %v10388_v63 = vld [vmem:[%s14714_s1 + $0x2e0] ss:$8 sps:$4 sm:$0xff]  }
  0x95   : > { %1593 = vmatpush1.bf16.msra.mxu1 %v10321_v3  ;;  %1311 = vmatprep.subr.bf16.mxu0 %v10326_v4  ;;  %v10391_v3 = vld [vmem:[%s14714_s1 + $0x10a8] ss:$8 sps:$4 sm:$0xff]   ;;  %v10396_v4 = vld [vmem:[%s14714_s1 + $0x2f4] ss:$8 sps:$4 sm:$0xff]  }
  0x96   : > { %1594 = vmatprep.subr.bf16.mxu1 %v10329_v5  ;;  %v10399_v5 = vld [vmem:[%s14714_s1 + $0x10bc] ss:$8 sps:$4 sm:$0xff]  }
  0x98   : > { %1312 = vmatpush1.bf16.msra.mxu0 %v10324_v6  ;;  %v10394_v6 = vld [vmem:[%s14714_s1 + $0x2f0] ss:$8 sps:$4 sm:$0xff]  }
  0x99   : > { %1595 = vmatpush1.bf16.msra.mxu1 %v10327_v7  ;;  %1615 = vmatprep.subr.bf16.mxu0 %v10335_v9  ;;  %v10397_v7 = vld [vmem:[%s14714_s1 + $0x10b8] ss:$8 sps:$4 sm:$0xff]   ;;  %v10405_v9 = vld [vmem:[%s14714_s1 + $0x10cc] ss:$8 sps:$4 sm:$0xff]  }
  0x9a   : > { %1596 = vmatprep.subr.bf16.mxu1 %v10332_v8  ;;  %v10402_v8 = vld [vmem:[%s14714_s1 + $0x304] ss:$8 sps:$4 sm:$0xff]  }
  0x9b   : > { %1314 = vmatmul.mubr.bf16.vlgmr.msra.gmra.mrb[8].mxu0 %v11816_v29  ;;  %v10347_v29 = vld [vmem:[%s14714_s1 + $0xf3c] ss:$8 sps:$4 sm:$0xff]  }
  0x9c   : > { %1616 = vmatpush1.bf16.msra.mxu0 %v10333_v12  ;;  %1647 = vmatprep.mubr.bf16.mxu0 %v11507_v2  ;;  %v10403_v12 = vld [vmem:[%s14714_s1 + $0x10c8] ss:$8 sps:$4 sm:$0xff]  }
  0x9d   : > { %1597 = vmatpush1.bf16.msra.mxu1 %v10330_v10  ;;  %1617 = vmatprep.subr.bf16.mxu0 %v10341_v14  ;;  %v10400_v10 = vld [vmem:[%s14714_s1 + $0x300] ss:$8 sps:$4 sm:$0xff]   ;;  %v10411_v14 = vld [vmem:[%s14714_s1 + $0x10dc] ss:$8 sps:$4 sm:$0xff]  }
  0x9e   : > { %1598 = vmatprep.subr.bf16.mxu1 %v10338_v13  ;;  %v10408_v13 = vld [vmem:[%s14714_s1 + $0x314] ss:$8 sps:$4 sm:$0xff]  }
  0xa0   : > { %1618 = vmatpush1.bf16.msra.mxu0 %v10339_v17  ;;  %v10409_v17 = vld [vmem:[%s14714_s1 + $0x10d8] ss:$8 sps:$4 sm:$0xff]  }
  0xa1   : > { %1599 = vmatpush1.bf16.msra.mxu1 %v10336_v16  ;;  %1619 = vmatprep.subr.bf16.mxu0 %v10347_v29  ;;  %v10406_v16 = vld [vmem:[%s14714_s1 + $0x310] ss:$8 sps:$4 sm:$0xff]   ;;  %v10417_v29 = vld [vmem:[%s14714_s1 + $0x10ec] ss:$8 sps:$4 sm:$0xff]  }
  0xa2   : > { %1600 = vmatprep.subr.bf16.mxu1 %v10344_v18  ;;  %v10414_v18 = vld [vmem:[%s14714_s1 + $0x324] ss:$8 sps:$4 sm:$0xff]  }
  0xa4   : > { %1620 = vmatpush1.bf16.msra.mxu0 %v10345_v22  ;;  %v10415_v22 = vld [vmem:[%s14714_s1 + $0x10e8] ss:$8 sps:$4 sm:$0xff]  }
  0xa5   : > { %1601 = vmatpush1.bf16.msra.mxu1 %v10342_v19  ;;  %1621 = vmatprep.subr.bf16.mxu0 %v10353_v27  ;;  %v10412_v19 = vld [vmem:[%s14714_s1 + $0x320] ss:$8 sps:$4 sm:$0xff]   ;;  %v10423_v27 = vld [vmem:[%s14714_s1 + $0x10fc] ss:$8 sps:$4 sm:$0xff]  }
  0xa6   : > { %1602 = vmatprep.subr.bf16.mxu1 %v10350_v24  ;;  %v10420_v24 = vld [vmem:[%s14714_s1 + $0x334] ss:$8 sps:$4 sm:$0xff]  }
  0xa8   : > { %1622 = vmatpush1.bf16.msra.mxu0 %v10351_v32  ;;  %v10426_v32 = vld [vmem:[%s14714_s1 + $0x344] ss:$8 sps:$4 sm:$0xff]  }
  0xa9   : > { %1603 = vmatpush1.bf16.msra.mxu1 %v10348_v30  ;;  %8533 = vmatprep.subr.msk.bf16.mxu0 %vm638_vm0, %v8532_v33  ;;  %v10421_v30 = vld [vmem:[%s14714_s1 + $0x10f8] ss:$8 sps:$4 sm:$0xff]  }
  0xaa   : > { %1604 = vmatprep.subr.bf16.mxu1 %v10356_v31  ;;  %v10429_v31 = vld [vmem:[%s14714_s1 + $0x110c] ss:$8 sps:$4 sm:$0xff]   ;;  %v10424_v33 = vld [vmem:[%s14714_s1 + $0x340] ss:$8 sps:$4 sm:$0xff]  }
  0xac   : > { %1624 = vmatpush1.bf16.msra.mxu0 %v1569_v60  ;;  %v10435_v60 = vld [vmem:[%s14714_s1 + $0x111c] ss:$8 sps:$4 sm:$0xff]  }
  0xad   : > { %1605 = vmatpush1.bf16.msra.mxu1 %v10354_v35  ;;  %1917 = vmatprep.subr.bf16.mxu0 %v10361_v36  ;;  %v10432_v35 = vld [vmem:[%s14714_s1 + $0x354] ss:$8 sps:$4 sm:$0xff]   ;;  %v10430_v36 = vld [vmem:[%s14714_s1 + $0x350] ss:$8 sps:$4 sm:$0xff]  }
  0xae   : > { %1958 = vmatprep.subr.bf16.mxu1 %v10364_v37  ;;  %v10433_v37 = vld [vmem:[%s14714_s1 + $0x1118] ss:$8 sps:$4 sm:$0xff]  }
  0xaf   : > { %8534 = vmatmul.mubr.msk.bf16.vlgmr.msra.gmra.mrb[12].mxu0 %vm634_vm1, %v11885_v54  ;;  %v10371_v54 = vld [vmem:[%s14714_s1 + $0x2b0] ss:$8 sps:$4 sm:$0xff]  }
  0xb0   : > { %1607 = vmatmul.mubr.bf16.vlgmr.msra.gmra.mrb[12].mxu1 %v11881_v53  ;;  %1918 = vmatpush1.bf16.msra.mxu0 %v10359_v38  ;;  %v10376_v53 = vld [vmem:[%s14714_s1 + $0x3b4] ss:$8 sps:$4 sm:$0xff]   ;;  %v10438_v38 = vld [vmem:[%s14714_s1 + $0x364] ss:$8 sps:$4 sm:$0xff]  }
  0xb1   : > { %1959 = vmatpush1.bf16.msra.mxu1 %v10362_v39  ;;  %1919 = vmatprep.subr.bf16.mxu0 %v10367_v40  ;;  %v10441_v39 = vld [vmem:[%s14714_s1 + $0x112c] ss:$8 sps:$4 sm:$0xff]   ;;  %v10436_v40 = vld [vmem:[%s14714_s1 + $0x360] ss:$8 sps:$4 sm:$0xff]  }
  0xb2   : > { %1960 = vmatprep.subr.bf16.mxu1 %v10370_v41  ;;  %1990 = vmatprep.mubr.bf16.mxu1 %v11507_v2  ;;  %v10439_v41 = vld [vmem:[%s14714_s1 + $0x1128] ss:$8 sps:$4 sm:$0xff]  }
  0xb3   : > { %1949 = vmatprep.mubr.bf16.mxu0 %v1699_v42 }
  0xb4   : > { %1920 = vmatpush1.bf16.msra.mxu0 %v10365_v43  ;;  %v10447_v43 = vld [vmem:[%s14714_s1 + $0x113c] ss:$8 sps:$4 sm:$0xff]  }
  0xb5   : > { %1961 = vmatpush1.bf16.msra.mxu1 %v10368_v44  ;;  %1921 = vmatprep.subr.bf16.mxu0 %v10373_v45  ;;  %v10442_v44 = vld [vmem:[%s14714_s1 + $0x370] ss:$8 sps:$4 sm:$0xff]  }
  0xb6   : > { %1962 = vmatprep.subr.bf16.mxu1 %v10376_v53  ;;  %v10445_v45 = vld [vmem:[%s14714_s1 + $0x1138] ss:$8 sps:$4 sm:$0xff]   ;;  %v10450_v53 = vld [vmem:[%s14714_s1 + $0x384] ss:$8 sps:$4 sm:$0xff]  }
  0xb8   : > { %1922 = vmatpush1.bf16.msra.mxu0 %v10371_v54  ;;  %v10453_v54 = vld [vmem:[%s14714_s1 + $0x114c] ss:$8 sps:$4 sm:$0xff]  }
  0xb9   : > { %1963 = vmatpush1.bf16.msra.mxu1 %v10374_v46  ;;  %1923 = vmatprep.subr.bf16.mxu0 %v10379_v47  ;;  %v10448_v46 = vld [vmem:[%s14714_s1 + $0x380] ss:$8 sps:$4 sm:$0xff]  }
  0xba   : > { %1964 = vmatprep.subr.bf16.mxu1 %v10382_v48  ;;  %v10451_v47 = vld [vmem:[%s14714_s1 + $0x1148] ss:$8 sps:$4 sm:$0xff]   ;;  %v10456_v48 = vld [vmem:[%s14714_s1 + $0x115c] ss:$8 sps:$4 sm:$0xff]  }
  0xbc   : > { %1924 = vmatpush1.bf16.msra.mxu0 %v10377_v50  ;;  %v1698_v50 = vrot.slane %v11776_v11, 1 }
  0xbd   : > { %1965 = vmatpush1.bf16.msra.mxu1 %v10380_v51  ;;  %1925 = vmatprep.subr.bf16.mxu0 %v10385_v52  ;;  %v10454_v51 = vld [vmem:[%s14714_s1 + $0x1158] ss:$8 sps:$4 sm:$0xff]   ;;  %v10457_v52 = vld [vmem:[%s14714_s1 + $0x11a8] ss:$8 sps:$4 sm:$0xff]  }
  0xbe   : > { %8618 = vmatprep.subr.msk.bf16.mxu1 %vm638_vm0, %v8617_v55  ;;  %v10462_v55 = vld [vmem:[%s14714_s1 + $0x116c] ss:$8 sps:$4 sm:$0xff]  }
  0xc0   : > { %1926 = vmatpush1.bf16.msra.mxu0 %v10383_v56 }
  0xc1   : > { %1967 = vmatpush1.bf16.msra.mxu1 %v1912_v21  ;;  %1927 = vmatprep.subr.bf16.mxu0 %v10390_v58  ;;  %v10460_v58 = vld [vmem:[%s14714_s1 + $0x1168] ss:$8 sps:$4 sm:$0xff]  }
  0xc2   : > { %2254 = vmatprep.subr.bf16.mxu1 %v10393_v61  ;;  %v10463_v61 = vld [vmem:[%s14714_s1 + $0x11b8] ss:$8 sps:$4 sm:$0xff]  }
  0xc4   : > { %8619 = vmatmul.mubr.msk.bf16.vlgmr.msra.gmra.mrb[16].mxu1 %vm634_vm1, %v1700_v62  ;;  %1928 = vmatpush1.bf16.msra.mxu0 %v10388_v63 }
  0xc5   : > { %2255 = vmatpush1.bf16.msra.mxu1 %v10391_v3  ;;  %1929 = vmatprep.subr.bf16.mxu0 %v10396_v4  ;;  %v10468_v4 = vld [vmem:[%s14714_s1 + $0x117c] ss:$8 sps:$4 sm:$0xff]  }
  0xc6   : > { %2256 = vmatprep.subr.bf16.mxu1 %v10399_v5  ;;  %2286 = vmatprep.mubr.bf16.mxu1 %v1699_v42  ;;  %v10444_v42 = vld [vmem:[%s14714_s1 + $0x374] ss:$8 sps:$4 sm:$0xff]  }
  0xc7   : > { %v10471_v5 = vld [vmem:[%s14714_s1 + $0x11cc] ss:$8 sps:$4 sm:$0xff]  }
  0xc8   : > { %1930 = vmatpush1.bf16.msra.mxu0 %v10394_v6  ;;  %v10466_v6 = vld [vmem:[%s14714_s1 + $0x1178] ss:$8 sps:$4 sm:$0xff]  }
  0xc9   : > { %2257 = vmatpush1.bf16.msra.mxu1 %v10397_v7  ;;  %1931 = vmatprep.subr.bf16.mxu0 %v10402_v8  ;;  %v10469_v7 = vld [vmem:[%s14714_s1 + $0x11c8] ss:$8 sps:$4 sm:$0xff]   ;;  %v10474_v8 = vld [vmem:[%s14714_s1 + $0x118c] ss:$8 sps:$4 sm:$0xff]  }
  0xca   : > { %2258 = vmatprep.subr.bf16.mxu1 %v10405_v9  ;;  %v10477_v9 = vld [vmem:[%s14714_s1 + $0x11dc] ss:$8 sps:$4 sm:$0xff]  }
  0xcc   : > { %1932 = vmatpush1.bf16.msra.mxu0 %v10400_v10  ;;  %v8660_v10 = vld [vmem:[%s14714_s1 + $0x11e8] sm:$0x33] }
  0xcd   : > { %2259 = vmatpush1.bf16.msra.mxu1 %v10403_v12  ;;  %1933 = vmatprep.subr.bf16.mxu0 %v10408_v13  ;;  %v10472_v12 = vld [vmem:[%s14714_s1 + $0x1188] ss:$8 sps:$4 sm:$0xff]   ;;  %v10475_v13 = vld [vmem:[%s14714_s1 + $0x11d8] ss:$8 sps:$4 sm:$0xff]  }
  0xce   : > { %2260 = vmatprep.subr.bf16.mxu1 %v10411_v14  ;;  %v10480_v14 = vld [vmem:[%s14714_s1 + $0x119c] ss:$8 sps:$4 sm:$0xff]  }
  0xd0   : > { %1934 = vmatpush1.bf16.msra.mxu0 %v10406_v16  ;;  %v8702_v16 = vcombine.high %v8660_v10, %v8660_v10 }
  0xd1   : > { %2261 = vmatpush1.bf16.msra.mxu1 %v10409_v17  ;;  %1935 = vmatprep.subr.bf16.mxu0 %v10414_v18  ;;  %v8701_v17 = vcombine.low %v8660_v10, %v8660_v10  ;;  %v10478_v18 = vld [vmem:[%s14714_s1 + $0x1198] ss:$8 sps:$4 sm:$0xff]  }
  0xd2   : > { %2262 = vmatprep.subr.bf16.mxu1 %v10417_v29  ;;  %v10527_v10 = vld [vmem:[%s14714_s1 + $0x1210] ss:$8 sps:$4 sm:$0xff]  }
  0xd3   : > { %v2249_v29 = vsel %vm638_vm0, %v8701_v17, 0  ;;  %v10541_v17 = vld [vmem:[%s14714_s1 + $0x1234] ss:$8 sps:$4 sm:$0xff]  }
  0xd4   : > { %1936 = vmatpush1.bf16.msra.mxu0 %v10412_v19  ;;  %v10485_v19 = vld [vmem:[%s14714_s1 + $0x3dc] ss:$8 sps:$4 sm:$0xff]  }
  0xd5   : > { %2263 = vmatpush1.bf16.msra.mxu1 %v10415_v22  ;;  %1937 = vmatprep.subr.bf16.mxu0 %v10420_v24  ;;  %v10488_v22 = vld [vmem:[%s14714_s1 + $0x4dc] ss:$8 sps:$4 sm:$0xff]   ;;  %v10483_v24 = vld [vmem:[%s14714_s1 + $0x3d8] ss:$8 sps:$4 sm:$0xff]  }
  0xd6   : > { %2264 = vmatprep.subr.bf16.mxu1 %v10423_v27  ;;  %v10486_v27 = vld [vmem:[%s14714_s1 + $0x4d8] ss:$8 sps:$4 sm:$0xff]  }
  0xd8   : > { %1938 = vmatpush1.bf16.msra.mxu0 %v10418_v28  ;;  %v2383_v28 = vrot.slane %v11746_v0, 1 }
  0xd9   : > { %2265 = vmatpush1.bf16.msra.mxu1 %v10421_v30  ;;  %1939 = vmatprep.subr.bf16.mxu0 %v10426_v32  ;;  %v2384_v30 = vrot.slane %v11749_v1, 2  ;;  %v10491_v32 = vld [vmem:[%s14714_s1 + $0x3ec] ss:$8 sps:$4 sm:$0xff]  }
  0xda   : > { %2266 = vmatprep.subr.bf16.mxu1 %v10429_v31  ;;  %v10494_v31 = vld [vmem:[%s14714_s1 + $0x4ec] ss:$8 sps:$4 sm:$0xff]  }
  0xdc   : > { %1940 = vmatpush1.bf16.msra.mxu0 %v10424_v33  ;;  %v10489_v33 = vld [vmem:[%s14714_s1 + $0x3e8] ss:$8 sps:$4 sm:$0xff]  }
  0xdd   : > { %2267 = vmatpush1.bf16.msra.mxu1 %v10427_v34  ;;  %1941 = vmatprep.subr.bf16.mxu0 %v10432_v35  ;;  %v10492_v34 = vld [vmem:[%s14714_s1 + $0x4e8] ss:$8 sps:$4 sm:$0xff]   ;;  %v2385_v35 = vor.u32 %v2384_v30, %v2383_v28  ;;  %v10550_v28 = vld [vmem:[%s14714_s1 + $0x48c] ss:$8 sps:$4 sm:$0xff]  }
  0xde   : > { %2268 = vmatprep.subr.bf16.mxu1 %v10435_v60  ;;  %v10497_v60 = vld [vmem:[%s14714_s1 + $0x3fc] ss:$8 sps:$4 sm:$0xff]  }
  0xdf   : > { %v10553_v30 = vld [vmem:[%s14714_s1 + $0x1254] ss:$8 sps:$4 sm:$0xff]  }
  0xe0   : > { %1942 = vmatpush1.bf16.msra.mxu0 %v10430_v36  ;;  %v10500_v36 = vld [vmem:[%s14714_s1 + $0x4fc] ss:$8 sps:$4 sm:$0xff]  }
  0xe1   : > { %2269 = vmatpush1.bf16.msra.mxu1 %v10433_v37  ;;  %1943 = vmatprep.subr.bf16.mxu0 %v10438_v38  ;;  %v10495_v37 = vld [vmem:[%s14714_s1 + $0x3f8] ss:$8 sps:$4 sm:$0xff]   ;;  %v10503_v38 = vld [vmem:[%s14714_s1 + $0x40c] ss:$8 sps:$4 sm:$0xff]  }
  0xe2   : > { %2270 = vmatprep.subr.bf16.mxu1 %v10441_v39  ;;  %v10506_v39 = vld [vmem:[%s14714_s1 + $0x50c] ss:$8 sps:$4 sm:$0xff]  }
  0xe4   : > { %1944 = vmatpush1.bf16.msra.mxu0 %v10436_v40  ;;  %v8745_v40 = vld [vmem:[%s14714_s1 + $0x518] sm:$0x33] }
  0xe5   : > { %2271 = vmatpush1.bf16.msra.mxu1 %v10439_v41  ;;  %1945 = vmatprep.subr.bf16.mxu0 %v10444_v42  ;;  %v10501_v41 = vld [vmem:[%s14714_s1 + $0x408] ss:$8 sps:$4 sm:$0xff]  }
  0xe6   : > { %2272 = vmatprep.subr.bf16.mxu1 %v10447_v43  ;;  %v10504_v42 = vld [vmem:[%s14714_s1 + $0x508] ss:$8 sps:$4 sm:$0xff]   ;;  %v10509_v43 = vld [vmem:[%s14714_s1 + $0x41c] ss:$8 sps:$4 sm:$0xff]  }
  0xe8   : > { %1946 = vmatpush1.bf16.msra.mxu0 %v10442_v44  ;;  %v8787_v44 = vcombine.high %v8745_v40, %v8745_v40 }
  0xe9   : > { %2273 = vmatpush1.bf16.msra.mxu1 %v10445_v45  ;;  %1947 = vmatprep.subr.bf16.mxu0 %v10450_v53  ;;  %v8786_v45 = vcombine.low %v8745_v40, %v8745_v40  ;;  %v2386_v53 = vrot.slane %v11631_v25, 1 }
  0xea   : > { %2274 = vmatprep.subr.bf16.mxu1 %v10453_v54  ;;  %v2387_v54 = vrot.slane %v11634_v26, 2 }
  0xec   : > { %1948 = vmatpush1.bf16.msra.mxu0 %v10448_v46  ;;  %v10507_v46 = vld [vmem:[%s14714_s1 + $0x418] ss:$8 sps:$4 sm:$0xff]  }
  0xed   : > { %2275 = vmatpush1.bf16.msra.mxu1 %v10451_v47  ;;  %2295 = vmatprep.subr.bf16.mxu0 %v10459_v49  ;;  %v2600_v47 = vsel %vm638_vm0, %v8786_v45, 0  ;;  %v10517_v49 = vld [vmem:[%s14714_s1 + $0x11f4] ss:$8 sps:$4 sm:$0xff]  }
  0xee   : > { %2276 = vmatprep.subr.bf16.mxu1 %v10456_v48  ;;  %v10514_v48 = vld [vmem:[%s14714_s1 + $0x42c] ss:$8 sps:$4 sm:$0xff]  }
  0xef   : > { %v12360_v56 = vpop.f32.mrb[0].mxu1  ;;  %1950 = vmatmul.mubr.bf16.vlgmr.msra.gmra.mrb[16].mxu0 %v1698_v50 }
  0xf0   : > { %v12362_v21 = vpop.f32.mrb[1].mxu1  ;;  %2296 = vmatpush1.bf16.msra.mxu0 %v10457_v52  ;;  %2327 = vmatprep.mubr.bf16.mxu0 %v11507_v2  ;;  %v12485_v52 = vor.u32 %v2387_v54, %v2386_v53  ;;  %v10562_v53 = vld [vmem:[%s14714_s1 + $0x4ac] ss:$8 sps:$4 sm:$0xff]  }
  0xf1   : > { %v724_v63 = vpop.f32.mrb[2].mxu1  ;;  %2277 = vmatpush1.bf16.msra.mxu1 %v10454_v51  ;;  %2297 = vmatprep.subr.bf16.mxu0 %v10465_v57  ;;  %v10515_v51 = vld [vmem:[%s14714_s1 + $0x11f0] ss:$8 sps:$4 sm:$0xff]   ;;  %v10523_v57 = vld [vmem:[%s14714_s1 + $0x1204] ss:$8 sps:$4 sm:$0xff]  }
  0xf2   : > { %v725_v3 = vpop.f32.mrb[3].mxu1  ;;  %2278 = vmatprep.subr.bf16.mxu1 %v10462_v55  ;;  %v10520_v55 = vld [vmem:[%s14714_s1 + $0x43c] ss:$8 sps:$4 sm:$0xff]   ;;  %v10526_v63 = vld [vmem:[%s14714_s1 + $0x44c] ss:$8 sps:$4 sm:$0xff]  }
  0xf3   : > { %v10529_v3 = vld [vmem:[%s14714_s1 + $0x1214] ss:$8 sps:$4 sm:$0xff]  }
  0xf4   : > { %2298 = vmatpush1.bf16.msra.mxu0 %v10463_v61  ;;  %v10521_v61 = vld [vmem:[%s14714_s1 + $0x1200] ss:$8 sps:$4 sm:$0xff]   ;;  %v10565_v54 = vld [vmem:[%s14714_s1 + $0x1274] ss:$8 sps:$4 sm:$0xff]  }
  0xf5   : > { %2279 = vmatpush1.bf16.msra.mxu1 %v10460_v58  ;;  %2299 = vmatprep.subr.bf16.mxu0 %v10471_v5  ;;  %v10518_v58 = vld [vmem:[%s14714_s1 + $0x438] ss:$8 sps:$4 sm:$0xff]  }
  0xf6   : > { %2280 = vmatprep.subr.bf16.mxu1 %v10468_v4 }
  0xf8   : > { %2300 = vmatpush1.bf16.msra.mxu0 %v10469_v7 }
  0xf9   : > { %2281 = vmatpush1.bf16.msra.mxu1 %v10466_v6  ;;  %2301 = vmatprep.subr.bf16.mxu0 %v10477_v9  ;;  %v10524_v9 = vld [vmem:[%s14714_s1 + $0x448] ss:$8 sps:$4 sm:$0xff]  }
  0xfa   : > { %2282 = vmatprep.subr.bf16.mxu1 %v10474_v8 }
  0xfc   : > { %2302 = vmatpush1.bf16.msra.mxu0 %v10475_v13  ;;  %v10530_v13 = vld [vmem:[%s14714_s1 + $0x458] ss:$8 sps:$4 sm:$0xff]  }
  0xfd   : > { %2283 = vmatpush1.bf16.msra.mxu1 %v10472_v12  ;;  %8703 = vmatprep.subr.msk.bf16.mxu0 %vm638_vm0, %v8702_v16  ;;  %v10538_v16 = vld [vmem:[%s14714_s1 + $0x46c] ss:$8 sps:$4 sm:$0xff]  }
  0xfe   : > { %2284 = vmatprep.subr.bf16.mxu1 %v10480_v14  ;;  %v10533_v14 = vld [vmem:[%s14714_s1 + $0x1220] ss:$8 sps:$4 sm:$0xff]  }
 0x100   : > { %2304 = vmatpush1.bf16.msra.mxu0 %v2249_v29  ;;  %v10539_v29 = vld [vmem:[%s14714_s1 + $0x1230] ss:$8 sps:$4 sm:$0xff]  }
 0x101   : > { %2285 = vmatpush1.bf16.msra.mxu1 %v10478_v18  ;;  %2605 = vmatprep.subr.bf16.mxu0 %v10485_v19  ;;  %v10536_v18 = vld [vmem:[%s14714_s1 + $0x468] ss:$8 sps:$4 sm:$0xff]   ;;  %v10544_v19 = vld [vmem:[%s14714_s1 + $0x47c] ss:$8 sps:$4 sm:$0xff]  }
 0x102   : > { %2646 = vmatprep.subr.bf16.mxu1 %v10488_v22  ;;  %v10547_v22 = vld [vmem:[%s14714_s1 + $0x1244] ss:$8 sps:$4 sm:$0xff]  }
 0x103   : > { %8704 = vmatmul.mubr.msk.bf16.vlgmr.msra.gmra.mrb[20].mxu0 %vm634_vm1, %v1700_v62  ;;  %v10498_v62 = vld [vmem:[%s14714_s1 + $0x4f8] ss:$8 sps:$4 sm:$0xff]  }
 0x104   : > { %2287 = vmatmul.mubr.bf16.vlgmr.msra.gmra.mrb[20].mxu1 %v1698_v50  ;;  %2606 = vmatpush1.bf16.msra.mxu0 %v10483_v24  ;;  %v10512_v50 = vld [vmem:[%s14714_s1 + $0x428] ss:$8 sps:$4 sm:$0xff]   ;;  %v10542_v24 = vld [vmem:[%s14714_s1 + $0x478] ss:$8 sps:$4 sm:$0xff]  }
 0x105   : > { %2647 = vmatpush1.bf16.msra.mxu1 %v10486_v27  ;;  %2607 = vmatprep.subr.bf16.mxu0 %v10491_v32  ;;  %v10545_v27 = vld [vmem:[%s14714_s1 + $0x1240] ss:$8 sps:$4 sm:$0xff]  }
 0x106   : > { %2648 = vmatprep.subr.bf16.mxu1 %v10494_v31  ;;  %2678 = vmatprep.mubr.bf16.mxu1 %v11507_v2  ;;  %v10548_v32 = vld [vmem:[%s14714_s1 + $0x488] ss:$8 sps:$4 sm:$0xff]  }
 0x107   : > { %2637 = vmatprep.mubr.bf16.mxu0 %v2385_v35  ;;  %v10551_v31 = vld [vmem:[%s14714_s1 + $0x1250] ss:$8 sps:$4 sm:$0xff]  }
 0x108   : > { %2608 = vmatpush1.bf16.msra.mxu0 %v10489_v33  ;;  %v10556_v33 = vld [vmem:[%s14714_s1 + $0x49c] ss:$8 sps:$4 sm:$0xff]  }
 0x109   : > { %2649 = vmatpush1.bf16.msra.mxu1 %v10492_v34  ;;  %2609 = vmatprep.subr.bf16.mxu0 %v10497_v60  ;;  %v10559_v34 = vld [vmem:[%s14714_s1 + $0x1264] ss:$8 sps:$4 sm:$0xff]  }
 0x10a   : > { %2650 = vmatprep.subr.bf16.mxu1 %v10500_v36 }
 0x10c   : > { %2610 = vmatpush1.bf16.msra.mxu0 %v10495_v37 }
 0x10d   : > { %2651 = vmatpush1.bf16.msra.mxu1 %v10498_v62  ;;  %2611 = vmatprep.subr.bf16.mxu0 %v10503_v38 }
 0x10e   : > { %2652 = vmatprep.subr.bf16.mxu1 %v10506_v39 }
 0x110   : > { %2612 = vmatpush1.bf16.msra.mxu0 %v10501_v41  ;;  %v10554_v41 = vld [vmem:[%s14714_s1 + $0x498] ss:$8 sps:$4 sm:$0xff]  }
 0x111   : > { %2653 = vmatpush1.bf16.msra.mxu1 %v10504_v42  ;;  %2613 = vmatprep.subr.bf16.mxu0 %v10509_v43  ;;  %v10557_v42 = vld [vmem:[%s14714_s1 + $0x1260] ss:$8 sps:$4 sm:$0xff]  }
 0x112   : > { %8788 = vmatprep.subr.msk.bf16.mxu1 %vm638_vm0, %v8787_v44 }
 0x114   : > { %2614 = vmatpush1.bf16.msra.mxu0 %v10507_v46 }
 0x115   : > { %2655 = vmatpush1.bf16.msra.mxu1 %v2600_v47  ;;  %2615 = vmatprep.subr.bf16.mxu0 %v10514_v48  ;;  %v10560_v47 = vld [vmem:[%s14714_s1 + $0x4a8] ss:$8 sps:$4 sm:$0xff]  }
 0x116   : > { %2942 = vmatprep.subr.bf16.mxu1 %v10517_v49  ;;  %v10563_v48 = vld [vmem:[%s14714_s1 + $0x1270] ss:$8 sps:$4 sm:$0xff]   ;;  %v10568_v49 = vld [vmem:[%s14714_s1 + $0x4bc] ss:$8 sps:$4 sm:$0xff]  }
 0x118   : > { %8789 = vmatmul.mubr.msk.bf16.vlgmr.msra.gmra.mrb[24].mxu1 %vm634_vm1, %v12485_v52  ;;  %2616 = vmatpush1.bf16.msra.mxu0 %v10512_v50  ;;  %v10571_v50 = vld [vmem:[%s14714_s1 + $0x1284] ss:$8 sps:$4 sm:$0xff]  }
 0x119   : > { %2943 = vmatpush1.bf16.msra.mxu1 %v10515_v51  ;;  %2617 = vmatprep.subr.bf16.mxu0 %v10520_v55  ;;  %v10566_v51 = vld [vmem:[%s14714_s1 + $0x4b8] ss:$8 sps:$4 sm:$0xff]  }
 0x11a   : > { %2944 = vmatprep.subr.bf16.mxu1 %v10523_v57  ;;  %v679_v4 = vpop.f32.mrb[0].mxu0  ;;  %2974 = vmatprep.mubr.bf16.mxu1 %v2385_v35  ;;  %v10569_v55 = vld [vmem:[%s14714_s1 + $0x1280] ss:$8 sps:$4 sm:$0xff]   ;;  %v10574_v57 = vld [vmem:[%s14714_s1 + $0x4cc] ss:$8 sps:$4 sm:$0xff]  }
 0x11b   : > { %v721_v5 = vadd.f32 %v12360_v56, %v679_v4  ;;  %v681_v6 = vpop.f32.mrb[1].mxu0  ;;  %v10532_v56 = vld [vmem:[%s14714_s1 + $0x45c] ss:$8 sps:$4 sm:$0xff]   ;;  %v10575_v4 = vld [vmem:[%s14714_s1 + $0x1290] ss:$8 sps:$4 sm:$0xff]  }
 0x11c   : > { %v723_v7 = vadd.f32 %v12362_v21, %v681_v6  ;;  %v683_v8 = vpop.f32.mrb[2].mxu0  ;;  %2618 = vmatpush1.bf16.msra.mxu0 %v10518_v58  ;;  %v10535_v21 = vld [vmem:[%s14714_s1 + $0x1224] ss:$8 sps:$4 sm:$0xff]   ;;  %v10577_v58 = vld [vmem:[%s14714_s1 + $0x1294] ss:$8 sps:$4 sm:$0xff]  }
 0x11d   : > { %2945 = vmatpush1.bf16.msra.mxu1 %v10521_v61  ;;  %v684_v12 = vpop.f32.mrb[3].mxu0  ;;  %2619 = vmatprep.subr.bf16.mxu0 %v10526_v63  ;;  %v10572_v61 = vld [vmem:[%s14714_s1 + $0x4c8] ss:$8 sps:$4 sm:$0xff]   ;;  %v2380_v63 = vrot.slane %v11803_v20, 1  ;;  %v10583_v6 = vld [vmem:[%s14714_s1 + $0x12f4] ss:$8 sps:$4 sm:$0xff]  }
 0x11e   : > { %2946 = vmatprep.subr.bf16.mxu1 %v10529_v3  ;;  %v2381_v3 = vrot.slane %v11788_v15, 2  ;;  %v10581_v8 = vld [vmem:[%s14714_s1 + $0x12f0] ss:$8 sps:$4 sm:$0xff]   ;;  %v10589_v12 = vld [vmem:[%s14714_s1 + $0x1304] ss:$8 sps:$4 sm:$0xff]  }
 0x120   : > { %2620 = vmatpush1.bf16.msra.mxu0 %v10524_v9  ;;  %v2382_v9 = vor.u32 %v2381_v3, %v2380_v63  ;;  %v10638_v3 = vld [vmem:[%s14714_s1 + $0x574] ss:$8 sps:$4 sm:$0xff]  }
 0x121   : > { %2947 = vmatpush1.bf16.msra.mxu1 %v10527_v10  ;;  %2621 = vmatprep.subr.bf16.mxu0 %v10532_v56  ;;  %v10586_v10 = vld [vmem:[%s14714_s1 + $0x12b4] ss:$8 sps:$4 sm:$0xff]  }
 0x122   : > { %2948 = vmatprep.subr.bf16.mxu1 %v10535_v21  ;;  %v10584_v21 = vld [vmem:[%s14714_s1 + $0x12b0] ss:$8 sps:$4 sm:$0xff]  }
 0x124   : > { %2622 = vmatpush1.bf16.msra.mxu0 %v10530_v13  ;;  %v10587_v13 = vld [vmem:[%s14714_s1 + $0x1300] ss:$8 sps:$4 sm:$0xff]  }
 0x125   : > { %2949 = vmatpush1.bf16.msra.mxu1 %v10533_v14  ;;  %2623 = vmatprep.subr.bf16.mxu0 %v10538_v16 }
 0x126   : > { %2950 = vmatprep.subr.bf16.mxu1 %v10541_v17 }
 0x128   : > { %2624 = vmatpush1.bf16.msra.mxu0 %v10536_v18  ;;  %v10592_v18 = vld [vmem:[%s14714_s1 + $0x12c4] ss:$8 sps:$4 sm:$0xff]  }
 0x129   : > { %2951 = vmatpush1.bf16.msra.mxu1 %v10539_v29  ;;  %2625 = vmatprep.subr.bf16.mxu0 %v10544_v19  ;;  %v10595_v29 = vld [vmem:[%s14714_s1 + $0x1314] ss:$8 sps:$4 sm:$0xff]   ;;  %v10590_v19 = vld [vmem:[%s14714_s1 + $0x12c0] ss:$8 sps:$4 sm:$0xff]  }
 0x12a   : > { %2952 = vmatprep.subr.bf16.mxu1 %v10547_v22  ;;  %v10593_v22 = vld [vmem:[%s14714_s1 + $0x1310] ss:$8 sps:$4 sm:$0xff]  }
 0x12c   : > { %2626 = vmatpush1.bf16.msra.mxu0 %v10542_v24  ;;  %v10598_v24 = vld [vmem:[%s14714_s1 + $0x12d4] ss:$8 sps:$4 sm:$0xff]  }
 0x12d   : > { %2953 = vmatpush1.bf16.msra.mxu1 %v10545_v27  ;;  %2627 = vmatprep.subr.bf16.mxu0 %v10550_v28  ;;  %v10601_v27 = vld [vmem:[%s14714_s1 + $0x1324] ss:$8 sps:$4 sm:$0xff]   ;;  %v8830_v28 = vld [vmem:[%s14714_s1 + $0x1330] sm:$0x33] }
 0x12e   : > { %2954 = vmatprep.subr.bf16.mxu1 %v10553_v30  ;;  %v1021_v60 = vpop.f32.mrb[4].mxu0  ;;  %v10596_v30 = vld [vmem:[%s14714_s1 + $0x12d0] ss:$8 sps:$4 sm:$0xff]  }
 0x12f   : > { %v980_v35 = vpop.f32.mrb[4].mxu1  ;;  %v1023_v62 = vpop.f32.mrb[5].mxu0 }
 0x130   : > { %v981_v36 = vadd.f32 %v980_v35, %v721_v5  ;;  %v982_v37 = vpop.f32.mrb[5].mxu1  ;;  %v1025_v40 = vpop.f32.mrb[6].mxu0  ;;  %2628 = vmatpush1.bf16.msra.mxu0 %v10548_v32  ;;  %v10580_v5 = vld [vmem:[%s14714_s1 + $0x12a4] ss:$8 sps:$4 sm:$0xff]   ;;  %v10599_v32 = vld [vmem:[%s14714_s1 + $0x1320] ss:$8 sps:$4 sm:$0xff]  }
 0x131   : > { %v983_v38 = vadd.f32 %v982_v37, %v723_v7  ;;  %v984_v39 = vpop.f32.mrb[6].mxu1  ;;  %2955 = vmatpush1.bf16.msra.mxu1 %v10551_v31  ;;  %v1026_v45 = vpop.f32.mrb[7].mxu0  ;;  %2629 = vmatprep.subr.bf16.mxu0 %v10556_v33  ;;  %v10578_v7 = vld [vmem:[%s14714_s1 + $0x12a0] ss:$8 sps:$4 sm:$0xff]   ;;  %v10604_v31 = vld [vmem:[%s14714_s1 + $0x12e4] ss:$8 sps:$4 sm:$0xff]   ;;  %v8872_v33 = vcombine.high %v8830_v28, %v8830_v28 }
 0x132   : > { %v12575_v43 = vadd.f32 %v1021_v60, %v981_v36  ;;  %v985_v44 = vpop.f32.mrb[7].mxu1  ;;  %2956 = vmatprep.subr.bf16.mxu1 %v10559_v34  ;;  %v8871_v34 = vcombine.low %v8830_v28, %v8830_v28  ;;  %v10602_v35 = vld [vmem:[%s14714_s1 + $0x12e0] ss:$8 sps:$4 sm:$0xff]   ;;  %v10609_v36 = vld [vmem:[%s14714_s1 + $0x524] ss:$8 sps:$4 sm:$0xff]  }
 0x133   : > { %v12583_v46 = vadd.f32 %v1023_v62, %v983_v38  ;;  %v10612_v37 = vld [vmem:[%s14714_s1 + $0x624] ss:$8 sps:$4 sm:$0xff]   ;;  %v10607_v62 = vld [vmem:[%s14714_s1 + $0x520] ss:$8 sps:$4 sm:$0xff]   ;;  %v10615_v39 = vld [vmem:[%s14714_s1 + $0x534] ss:$8 sps:$4 sm:$0xff]  }
 0x134   : > { %2630 = vmatpush1.bf16.msra.mxu0 %v10554_v41  ;;  %v2937_v60 = vsel %vm638_vm0, %v8871_v34, 0  ;;  %v10610_v38 = vld [vmem:[%s14714_s1 + $0x620] ss:$8 sps:$4 sm:$0xff]   ;;  %v10618_v40 = vld [vmem:[%s14714_s1 + $0x634] ss:$8 sps:$4 sm:$0xff]   ;;  %v3069_v44 = vrot.slane %v11730_v59, 2 }
 0x135   : > { %2957 = vmatpush1.bf16.msra.mxu1 %v10557_v42  ;;  %2631 = vmatprep.subr.bf16.mxu0 %v10562_v53  ;;  %v10613_v41 = vld [vmem:[%s14714_s1 + $0x530] ss:$8 sps:$4 sm:$0xff]   ;;  %v10621_v45 = vld [vmem:[%s14714_s1 + $0x544] ss:$8 sps:$4 sm:$0xff]   ;;  %v10654_v28 = vld [vmem:[%s14714_s1 + $0x5a0] ss:$8 sps:$4 sm:$0xff]  }
 0x136   : > { %2958 = vmatprep.subr.bf16.mxu1 %v10565_v54  ;;  %v10616_v42 = vld [vmem:[%s14714_s1 + $0x630] ss:$8 sps:$4 sm:$0xff]   ;;  %v10624_v53 = vld [vmem:[%s14714_s1 + $0x644] ss:$8 sps:$4 sm:$0xff]   ;;  %v10619_v54 = vld [vmem:[%s14714_s1 + $0x540] ss:$8 sps:$4 sm:$0xff]  }
 0x137   : > { %v10663_v34 = vld [vmem:[%s14714_s1 + $0x1378] ss:$8 sps:$4 sm:$0xff]  }
 0x138   : > { %2632 = vmatpush1.bf16.msra.mxu0 %v10560_v47  ;;  %v10627_v47 = vld [vmem:[%s14714_s1 + $0x554] ss:$8 sps:$4 sm:$0xff]  }
 0x139   : > { %2959 = vmatpush1.bf16.msra.mxu1 %v10563_v48  ;;  %2633 = vmatprep.subr.bf16.mxu0 %v10568_v49  ;;  %v10630_v48 = vld [vmem:[%s14714_s1 + $0x654] ss:$8 sps:$4 sm:$0xff]   ;;  %v8915_v49 = vld [vmem:[%s14714_s1 + $0x660] sm:$0x33] }
 0x13a   : > { %2960 = vmatprep.subr.bf16.mxu1 %v10571_v50  ;;  %v10625_v50 = vld [vmem:[%s14714_s1 + $0x550] ss:$8 sps:$4 sm:$0xff]  }
 0x13c   : > { %2634 = vmatpush1.bf16.msra.mxu0 %v10566_v51  ;;  %v10628_v51 = vld [vmem:[%s14714_s1 + $0x650] ss:$8 sps:$4 sm:$0xff]  }
 0x13d   : > { %2961 = vmatpush1.bf16.msra.mxu1 %v10569_v55  ;;  %2635 = vmatprep.subr.bf16.mxu0 %v10574_v57  ;;  %v10633_v55 = vld [vmem:[%s14714_s1 + $0x564] ss:$8 sps:$4 sm:$0xff]   ;;  %v8957_v57 = vcombine.high %v8915_v49, %v8915_v49 }
 0x13e   : > { %2962 = vmatprep.subr.bf16.mxu1 %v10577_v58  ;;  %v8956_v58 = vcombine.low %v8915_v49, %v8915_v49 }
 0x140   : > { %2636 = vmatpush1.bf16.msra.mxu0 %v10572_v61  ;;  %v10631_v61 = vld [vmem:[%s14714_s1 + $0x560] ss:$8 sps:$4 sm:$0xff]   ;;  %v3282_v63 = vsel %vm638_vm0, %v8956_v58, 0 }
 0x141   : > { %2963 = vmatpush1.bf16.msra.mxu1 %v10575_v4  ;;  %2983 = vmatprep.subr.bf16.mxu0 %v10583_v6  ;;  %v10641_v4 = vld [vmem:[%s14714_s1 + $0x133c] ss:$8 sps:$4 sm:$0xff]   ;;  %v10639_v6 = vld [vmem:[%s14714_s1 + $0x1338] ss:$8 sps:$4 sm:$0xff]  }
 0x142   : > { %2964 = vmatprep.subr.bf16.mxu1 %v10580_v5  ;;  %v10636_v5 = vld [vmem:[%s14714_s1 + $0x570] ss:$8 sps:$4 sm:$0xff]  }
 0x143   : > { %v12635_v56 = vpop.f32.mrb[8].mxu1  ;;  %2638 = vmatmul.mubr.bf16.vlgmr.msra.gmra.mrb[24].mxu0 %v2382_v9 }
 0x144   : > { %v12643_v14 = vpop.f32.mrb[9].mxu1  ;;  %2984 = vmatpush1.bf16.msra.mxu0 %v10581_v8  ;;  %3015 = vmatprep.mubr.bf16.mxu0 %v11507_v2  ;;  %v10644_v8 = vld [vmem:[%s14714_s1 + $0x584] ss:$8 sps:$4 sm:$0xff]  }
 0x145   : > { %v1360_v16 = vpop.f32.mrb[10].mxu1  ;;  %2965 = vmatpush1.bf16.msra.mxu1 %v10578_v7  ;;  %2985 = vmatprep.subr.bf16.mxu0 %v10589_v12  ;;  %v3070_v7 = vrot.slane %v11625_v23, 2  ;;  %v10645_v12 = vld [vmem:[%s14714_s1 + $0x1348] ss:$8 sps:$4 sm:$0xff]  }
 0x146   : > { %v1361_v17 = vpop.f32.mrb[11].mxu1  ;;  %2966 = vmatprep.subr.bf16.mxu1 %v10586_v10  ;;  %v10642_v10 = vld [vmem:[%s14714_s1 + $0x580] ss:$8 sps:$4 sm:$0xff]  }
 0x148   : > { %2986 = vmatpush1.bf16.msra.mxu0 %v10587_v13  ;;  %v10653_v13 = vld [vmem:[%s14714_s1 + $0x135c] ss:$8 sps:$4 sm:$0xff]  }
 0x149   : > { %2967 = vmatpush1.bf16.msra.mxu1 %v10584_v21  ;;  %2987 = vmatprep.subr.bf16.mxu0 %v10595_v29  ;;  %v10650_v21 = vld [vmem:[%s14714_s1 + $0x594] ss:$8 sps:$4 sm:$0xff]  }
 0x14a   : > { %2968 = vmatprep.subr.bf16.mxu1 %v10592_v18 }
 0x14c   : > { %2988 = vmatpush1.bf16.msra.mxu0 %v10593_v22  ;;  %v10648_v22 = vld [vmem:[%s14714_s1 + $0x590] ss:$8 sps:$4 sm:$0xff]  }
 0x14d   : > { %2969 = vmatpush1.bf16.msra.mxu1 %v10590_v19  ;;  %2989 = vmatprep.subr.bf16.mxu0 %v10601_v27 }
 0x14e   : > { %2970 = vmatprep.subr.bf16.mxu1 %v10598_v24  ;;  %v10651_v24 = vld [vmem:[%s14714_s1 + $0x1358] ss:$8 sps:$4 sm:$0xff]  }
 0x150   : > { %2990 = vmatpush1.bf16.msra.mxu0 %v10599_v32  ;;  %v10662_v32 = vld [vmem:[%s14714_s1 + $0x5b4] ss:$8 sps:$4 sm:$0xff]  }
 0x151   : > { %2971 = vmatpush1.bf16.msra.mxu1 %v10596_v30  ;;  %8873 = vmatprep.subr.msk.bf16.mxu0 %vm638_vm0, %v8872_v33  ;;  %v10657_v30 = vld [vmem:[%s14714_s1 + $0x1368] ss:$8 sps:$4 sm:$0xff]  }
 0x152   : > { %2972 = vmatprep.subr.bf16.mxu1 %v10604_v31  ;;  %v10665_v31 = vld [vmem:[%s14714_s1 + $0x137c] ss:$8 sps:$4 sm:$0xff]   ;;  %v10660_v33 = vld [vmem:[%s14714_s1 + $0x5b0] ss:$8 sps:$4 sm:$0xff]  }
 0x154   : > { %2992 = vmatpush1.bf16.msra.mxu0 %v2937_v60  ;;  %v10671_v60 = vld [vmem:[%s14714_s1 + $0x138c] ss:$8 sps:$4 sm:$0xff]  }
 0x155   : > { %2973 = vmatpush1.bf16.msra.mxu1 %v10602_v35  ;;  %3287 = vmatprep.subr.bf16.mxu0 %v10609_v36  ;;  %v10668_v35 = vld [vmem:[%s14714_s1 + $0x5c4] ss:$8 sps:$4 sm:$0xff]   ;;  %v10666_v36 = vld [vmem:[%s14714_s1 + $0x5c0] ss:$8 sps:$4 sm:$0xff]  }
 0x156   : > { %3328 = vmatprep.subr.bf16.mxu1 %v10612_v37  ;;  %v10669_v37 = vld [vmem:[%s14714_s1 + $0x1388] ss:$8 sps:$4 sm:$0xff]  }
 0x157   : > { %8874 = vmatmul.mubr.msk.bf16.vlgmr.msra.gmra.mrb[28].mxu0 %vm634_vm1, %v12485_v52  ;;  %v10622_v52 = vld [vmem:[%s14714_s1 + $0x640] ss:$8 sps:$4 sm:$0xff]  }
 0x158   : > { %2975 = vmatmul.mubr.bf16.vlgmr.msra.gmra.mrb[28].mxu1 %v2382_v9  ;;  %3288 = vmatpush1.bf16.msra.mxu0 %v10607_v62  ;;  %v10647_v9 = vld [vmem:[%s14714_s1 + $0x134c] ss:$8 sps:$4 sm:$0xff]  }
 0x159   : > { %3329 = vmatpush1.bf16.msra.mxu1 %v10610_v38  ;;  %3289 = vmatprep.subr.bf16.mxu0 %v10615_v39  ;;  %v10674_v62 = vld [vmem:[%s14714_s1 + $0x5d4] ss:$8 sps:$4 sm:$0xff]   ;;  %v10672_v39 = vld [vmem:[%s14714_s1 + $0x5d0] ss:$8 sps:$4 sm:$0xff]  }
 0x15a   : > { %3330 = vmatprep.subr.bf16.mxu1 %v10618_v40  ;;  %3360 = vmatprep.mubr.bf16.mxu1 %v11507_v2  ;;  %v10677_v38 = vld [vmem:[%s14714_s1 + $0x139c] ss:$8 sps:$4 sm:$0xff]   ;;  %v10675_v40 = vld [vmem:[%s14714_s1 + $0x1398] ss:$8 sps:$4 sm:$0xff]  }
 0x15b   : > { %3319 = vmatprep.mubr.bf16.mxu0 %v3069_v44 }
 0x15c   : > { %3290 = vmatpush1.bf16.msra.mxu0 %v10613_v41  ;;  %v10680_v41 = vld [vmem:[%s14714_s1 + $0x5e4] ss:$8 sps:$4 sm:$0xff]  }
 0x15d   : > { %3331 = vmatpush1.bf16.msra.mxu1 %v10616_v42  ;;  %3291 = vmatprep.subr.bf16.mxu0 %v10621_v45  ;;  %v10683_v42 = vld [vmem:[%s14714_s1 + $0x13ac] ss:$8 sps:$4 sm:$0xff]  }
 0x15e   : > { %3332 = vmatprep.subr.bf16.mxu1 %v10624_v53 }
 0x160   : > { %3292 = vmatpush1.bf16.msra.mxu0 %v10619_v54 }
 0x161   : > { %3333 = vmatpush1.bf16.msra.mxu1 %v10622_v52  ;;  %3293 = vmatprep.subr.bf16.mxu0 %v10627_v47 }
 0x162   : > { %3334 = vmatprep.subr.bf16.mxu1 %v10630_v48 }
 0x164   : > { %3294 = vmatpush1.bf16.msra.mxu0 %v10625_v50  ;;  %v10678_v50 = vld [vmem:[%s14714_s1 + $0x5e0] ss:$8 sps:$4 sm:$0xff]  }
 0x165   : > { %3335 = vmatpush1.bf16.msra.mxu1 %v10628_v51  ;;  %3295 = vmatprep.subr.bf16.mxu0 %v10633_v55  ;;  %v10681_v51 = vld [vmem:[%s14714_s1 + $0x13a8] ss:$8 sps:$4 sm:$0xff]  }
 0x166   : > { %8958 = vmatprep.subr.msk.bf16.mxu1 %vm638_vm0, %v8957_v57 }
 0x168   : > { %3296 = vmatpush1.bf16.msra.mxu0 %v10631_v61  ;;  %v10686_v61 = vld [vmem:[%s14714_s1 + $0x5f4] ss:$8 sps:$4 sm:$0xff]  }
 0x169   : > { %3337 = vmatpush1.bf16.msra.mxu1 %v3282_v63  ;;  %3297 = vmatprep.subr.bf16.mxu0 %v10638_v3  ;;  %v10689_v63 = vld [vmem:[%s14714_s1 + $0x13bc] ss:$8 sps:$4 sm:$0xff]  }
 0x16a   : > { %3624 = vmatprep.subr.bf16.mxu1 %v10641_v4  ;;  %v10684_v4 = vld [vmem:[%s14714_s1 + $0x5f0] ss:$8 sps:$4 sm:$0xff]  }
 0x16c   : > { %8959 = vmatmul.mubr.msk.bf16.vlgmr.msra.gmra.mrb[32].mxu1 %vm634_vm1, %v3070_v7  ;;  %3298 = vmatpush1.bf16.msra.mxu0 %v10636_v5  ;;  %v10687_v5 = vld [vmem:[%s14714_s1 + $0x13b8] ss:$8 sps:$4 sm:$0xff]  }
 0x16d   : > { %3625 = vmatpush1.bf16.msra.mxu1 %v10639_v6  ;;  %3299 = vmatprep.subr.bf16.mxu0 %v10644_v8  ;;  %v10692_v6 = vld [vmem:[%s14714_s1 + $0x604] ss:$8 sps:$4 sm:$0xff]  }
 0x16e   : > { %3626 = vmatprep.subr.bf16.mxu1 %v10647_v9  ;;  %v1315_v16 = vpop.f32.mrb[8].mxu0  ;;  %3656 = vmatprep.mubr.bf16.mxu1 %v3069_v44  ;;  %v10695_v8 = vld [vmem:[%s14714_s1 + $0x13cc] ss:$8 sps:$4 sm:$0xff]   ;;  %v10690_v9 = vld [vmem:[%s14714_s1 + $0x600] ss:$8 sps:$4 sm:$0xff]  }
 0x16f   : > { %v1357_v17 = vadd.f32 %v12635_v56, %v1315_v16  ;;  %v1317_v18 = vpop.f32.mrb[9].mxu0  ;;  %v10656_v56 = vld [vmem:[%s14714_s1 + $0x5a4] ss:$8 sps:$4 sm:$0xff]   ;;  %v10699_v16 = vld [vmem:[%s14714_s1 + $0x13d8] ss:$8 sps:$4 sm:$0xff]  }
 0x170   : > { %v1359_v29 = vadd.f32 %v12643_v14, %v1317_v18  ;;  %v1319_v19 = vpop.f32.mrb[10].mxu0  ;;  %3300 = vmatpush1.bf16.msra.mxu0 %v10642_v10  ;;  %v10659_v14 = vld [vmem:[%s14714_s1 + $0x136c] ss:$8 sps:$4 sm:$0xff]   ;;  %v10693_v10 = vld [vmem:[%s14714_s1 + $0x13c8] ss:$8 sps:$4 sm:$0xff]  }
 0x171   : > { %3627 = vmatpush1.bf16.msra.mxu1 %v10645_v12  ;;  %v1320_v27 = vpop.f32.mrb[11].mxu0  ;;  %3301 = vmatprep.subr.bf16.mxu0 %v10650_v21  ;;  %v10698_v12 = vld [vmem:[%s14714_s1 + $0x614] ss:$8 sps:$4 sm:$0xff]   ;;  %v10705_v19 = vld [vmem:[%s14714_s1 + $0x1438] ss:$8 sps:$4 sm:$0xff]  }
 0x172   : > { %3628 = vmatprep.subr.bf16.mxu1 %v10653_v13  ;;  %v10701_v21 = vld [vmem:[%s14714_s1 + $0x13dc] ss:$8 sps:$4 sm:$0xff]   ;;  %v10696_v13 = vld [vmem:[%s14714_s1 + $0x610] ss:$8 sps:$4 sm:$0xff]   ;;  %v10713_v27 = vld [vmem:[%s14714_s1 + $0x144c] ss:$8 sps:$4 sm:$0xff]  }
 0x173   : > { %v10707_v18 = vld [vmem:[%s14714_s1 + $0x143c] ss:$8 sps:$4 sm:$0xff]  }
 0x174   : > { %3302 = vmatpush1.bf16.msra.mxu0 %v10648_v22  ;;  %v3068_v22 = vrot.slane %v11776_v11, 2 }
 0x175   : > { %3629 = vmatpush1.bf16.msra.mxu1 %v10651_v24  ;;  %3303 = vmatprep.subr.bf16.mxu0 %v10656_v56  ;;  %v10710_v24 = vld [vmem:[%s14714_s1 + $0x13fc] ss:$8 sps:$4 sm:$0xff]  }
 0x176   : > { %3630 = vmatprep.subr.bf16.mxu1 %v10659_v14  ;;  %v10708_v14 = vld [vmem:[%s14714_s1 + $0x13f8] ss:$8 sps:$4 sm:$0xff]  }
 0x178   : > { %3304 = vmatpush1.bf16.msra.mxu0 %v10654_v28  ;;  %v10711_v28 = vld [vmem:[%s14714_s1 + $0x1448] ss:$8 sps:$4 sm:$0xff]  }
 0x179   : > { %3631 = vmatpush1.bf16.msra.mxu1 %v10657_v30  ;;  %3305 = vmatprep.subr.bf16.mxu0 %v10662_v32 }
 0x17a   : > { %3632 = vmatprep.subr.bf16.mxu1 %v10665_v31 }
 0x17c   : > { %3306 = vmatpush1.bf16.msra.mxu0 %v10660_v33  ;;  %v10716_v33 = vld [vmem:[%s14714_s1 + $0x140c] ss:$8 sps:$4 sm:$0xff]  }
 0x17d   : > { %3633 = vmatpush1.bf16.msra.mxu1 %v10663_v34  ;;  %3307 = vmatprep.subr.bf16.mxu0 %v10668_v35  ;;  %v10719_v34 = vld [vmem:[%s14714_s1 + $0x145c] ss:$8 sps:$4 sm:$0xff]   ;;  %v10714_v35 = vld [vmem:[%s14714_s1 + $0x1408] ss:$8 sps:$4 sm:$0xff]  }
 0x17e   : > { %3634 = vmatprep.subr.bf16.mxu1 %v10671_v60  ;;  %v10717_v60 = vld [vmem:[%s14714_s1 + $0x1458] ss:$8 sps:$4 sm:$0xff]  }
 0x180   : > { %3308 = vmatpush1.bf16.msra.mxu0 %v10666_v36  ;;  %v10722_v36 = vld [vmem:[%s14714_s1 + $0x141c] ss:$8 sps:$4 sm:$0xff]  }
 0x181   : > { %3635 = vmatpush1.bf16.msra.mxu1 %v10669_v37  ;;  %3309 = vmatprep.subr.bf16.mxu0 %v10674_v62  ;;  %v10725_v37 = vld [vmem:[%s14714_s1 + $0x146c] ss:$8 sps:$4 sm:$0xff]   ;;  %v9000_v62 = vld [vmem:[%s14714_s1 + $0x1478] sm:$0x33] }
 0x182   : > { %3636 = vmatprep.subr.bf16.mxu1 %v10677_v38  ;;  %v1649_v45 = vpop.f32.mrb[12].mxu0  ;;  %v10720_v38 = vld [vmem:[%s14714_s1 + $0x1418] ss:$8 sps:$4 sm:$0xff]  }
 0x183   : > { %v1608_v44 = vpop.f32.mrb[12].mxu1  ;;  %v1651_v52 = vpop.f32.mrb[13].mxu0 }
 0x184   : > { %v1609_v53 = vadd.f32 %v1608_v44, %v1357_v17  ;;  %v1610_v54 = vpop.f32.mrb[13].mxu1  ;;  %v1653_v49 = vpop.f32.mrb[14].mxu0  ;;  %3310 = vmatpush1.bf16.msra.mxu0 %v10672_v39  ;;  %v10704_v17 = vld [vmem:[%s14714_s1 + $0x13ec] ss:$8 sps:$4 sm:$0xff]   ;;  %v10723_v39 = vld [vmem:[%s14714_s1 + $0x1468] ss:$8 sps:$4 sm:$0xff]  }
 0x185   : > { %v1611_v47 = vadd.f32 %v1610_v54, %v1359_v29  ;;  %v1612_v48 = vpop.f32.mrb[14].mxu1  ;;  %3637 = vmatpush1.bf16.msra.mxu1 %v10675_v40  ;;  %v1654_v58 = vpop.f32.mrb[15].mxu0  ;;  %3311 = vmatprep.subr.bf16.mxu0 %v10680_v41  ;;  %v10702_v29 = vld [vmem:[%s14714_s1 + $0x13e8] ss:$8 sps:$4 sm:$0xff]   ;;  %v10728_v40 = vld [vmem:[%s14714_s1 + $0x142c] ss:$8 sps:$4 sm:$0xff]   ;;  %v9042_v41 = vcombine.high %v9000_v62, %v9000_v62 }
 0x186   : > { %v12846_v55 = vadd.f32 %v1649_v45, %v1609_v53  ;;  %v1613_v57 = vpop.f32.mrb[15].mxu1  ;;  %3638 = vmatprep.subr.bf16.mxu1 %v10683_v42  ;;  %v9041_v42 = vcombine.low %v9000_v62, %v9000_v62  ;;  %v10726_v44 = vld [vmem:[%s14714_s1 + $0x1428] ss:$8 sps:$4 sm:$0xff]   ;;  %v10733_v53 = vld [vmem:[%s14714_s1 + $0x66c] ss:$8 sps:$4 sm:$0xff]   ;;  %v3753_v48 = vrot.slane %v11746_v0, 2 }
 0x187   : > { %v12854_v3 = vadd.f32 %v1651_v52, %v1611_v47  ;;  %v10736_v54 = vld [vmem:[%s14714_s1 + $0x76c] ss:$8 sps:$4 sm:$0xff]   ;;  %v10731_v52 = vld [vmem:[%s14714_s1 + $0x668] ss:$8 sps:$4 sm:$0xff]   ;;  %v3754_v49 = vrot.slane %v11749_v1, 3 }
 0x188   : > { %3312 = vmatpush1.bf16.msra.mxu0 %v10678_v50  ;;  %v3619_v45 = vsel %vm638_vm0, %v9041_v42, 0  ;;  %v10734_v47 = vld [vmem:[%s14714_s1 + $0x768] ss:$8 sps:$4 sm:$0xff]   ;;  %v10739_v50 = vld [vmem:[%s14714_s1 + $0x67c] ss:$8 sps:$4 sm:$0xff]  }
 0x189   : > { %3639 = vmatpush1.bf16.msra.mxu1 %v10681_v51  ;;  %3313 = vmatprep.subr.bf16.mxu0 %v10686_v61  ;;  %v10742_v51 = vld [vmem:[%s14714_s1 + $0x77c] ss:$8 sps:$4 sm:$0xff]   ;;  %v10737_v57 = vld [vmem:[%s14714_s1 + $0x678] ss:$8 sps:$4 sm:$0xff]   ;;  %v3755_v61 = vor.u32 %v3754_v49, %v3753_v48  ;;  %v10792_v48 = vld [vmem:[%s14714_s1 + $0x70c] ss:$8 sps:$4 sm:$0xff]  }
 0x18a   : > { %3640 = vmatprep.subr.bf16.mxu1 %v10689_v63  ;;  %v10740_v58 = vld [vmem:[%s14714_s1 + $0x778] ss:$8 sps:$4 sm:$0xff]   ;;  %v10745_v63 = vld [vmem:[%s14714_s1 + $0x68c] ss:$8 sps:$4 sm:$0xff]  }
 0x18b   : > { %v10795_v49 = vld [vmem:[%s14714_s1 + $0x14d4] ss:$8 sps:$4 sm:$0xff]  }
 0x18c   : > { %3314 = vmatpush1.bf16.msra.mxu0 %v10684_v4  ;;  %v10748_v4 = vld [vmem:[%s14714_s1 + $0x78c] ss:$8 sps:$4 sm:$0xff]  }
 0x18d   : > { %3641 = vmatpush1.bf16.msra.mxu1 %v10687_v5  ;;  %3315 = vmatprep.subr.bf16.mxu0 %v10692_v6  ;;  %v10743_v5 = vld [vmem:[%s14714_s1 + $0x688] ss:$8 sps:$4 sm:$0xff]   ;;  %v10751_v6 = vld [vmem:[%s14714_s1 + $0x69c] ss:$8 sps:$4 sm:$0xff]  }
 0x18e   : > { %3642 = vmatprep.subr.bf16.mxu1 %v10695_v8  ;;  %v10754_v8 = vld [vmem:[%s14714_s1 + $0x79c] ss:$8 sps:$4 sm:$0xff]  }
 0x190   : > { %3316 = vmatpush1.bf16.msra.mxu0 %v10690_v9  ;;  %v9085_v9 = vld [vmem:[%s14714_s1 + $0x7a8] sm:$0x33] }
 0x191   : > { %3643 = vmatpush1.bf16.msra.mxu1 %v10693_v10  ;;  %3317 = vmatprep.subr.bf16.mxu0 %v10698_v12  ;;  %v10749_v10 = vld [vmem:[%s14714_s1 + $0x698] ss:$8 sps:$4 sm:$0xff]  }
 0x192   : > { %3644 = vmatprep.subr.bf16.mxu1 %v10701_v21  ;;  %v10752_v12 = vld [vmem:[%s14714_s1 + $0x798] ss:$8 sps:$4 sm:$0xff]   ;;  %v10757_v21 = vld [vmem:[%s14714_s1 + $0x6ac] ss:$8 sps:$4 sm:$0xff]  }
 0x194   : > { %3318 = vmatpush1.bf16.msra.mxu0 %v10696_v13  ;;  %v9127_v13 = vcombine.high %v9085_v9, %v9085_v9 }
 0x195   : > { %3645 = vmatpush1.bf16.msra.mxu1 %v10699_v16  ;;  %3665 = vmatprep.subr.bf16.mxu0 %v10707_v18  ;;  %v9126_v16 = vcombine.low %v9085_v9, %v9085_v9  ;;  %v3757_v18 = vrot.slane %v11634_v26, 3 }
 0x196   : > { %3646 = vmatprep.subr.bf16.mxu1 %v10704_v17  ;;  %v3756_v17 = vrot.slane %v11631_v25, 2 }
 0x197   : > { %v12905_v56 = vpop.f32.mrb[16].mxu1  ;;  %3320 = vmatmul.mubr.bf16.vlgmr.msra.gmra.mrb[32].mxu0 %v3068_v22 }
 0x198   : > { %v12913_v30 = vpop.f32.mrb[17].mxu1  ;;  %3666 = vmatpush1.bf16.msra.mxu0 %v10705_v19  ;;  %3697 = vmatprep.mubr.bf16.mxu0 %v11507_v2  ;;  %v3970_v19 = vsel %vm638_vm0, %v9126_v16, 0  ;;  %v10802_v16 = vld [vmem:[%s14714_s1 + $0x728] ss:$8 sps:$4 sm:$0xff]  }
 0x199   : > { %v1996_v32 = vpop.f32.mrb[18].mxu1  ;;  %3647 = vmatpush1.bf16.msra.mxu1 %v10702_v29  ;;  %3667 = vmatprep.subr.bf16.mxu0 %v10713_v27  ;;  %v10755_v29 = vld [vmem:[%s14714_s1 + $0x6a8] ss:$8 sps:$4 sm:$0xff]   ;;  %v10760_v27 = vld [vmem:[%s14714_s1 + $0x6b8] ss:$8 sps:$4 sm:$0xff]  }
 0x19a   : > { %v1997_v31 = vpop.f32.mrb[19].mxu1  ;;  %3648 = vmatprep.subr.bf16.mxu1 %v10710_v24  ;;  %v10765_v24 = vld [vmem:[%s14714_s1 + $0x1484] ss:$8 sps:$4 sm:$0xff]  }
 0x19b   : > { %v10768_v32 = vld [vmem:[%s14714_s1 + $0x6cc] ss:$8 sps:$4 sm:$0xff]  }
 0x19c   : > { %3668 = vmatpush1.bf16.msra.mxu0 %v10711_v28  ;;  %v13030_v28 = vor.u32 %v3757_v18, %v3756_v17  ;;  %v10771_v31 = vld [vmem:[%s14714_s1 + $0x1494] ss:$8 sps:$4 sm:$0xff]   ;;  %v10805_v17 = vld [vmem:[%s14714_s1 + $0x14f0] ss:$8 sps:$4 sm:$0xff]  }
 0x19d   : > { %3649 = vmatpush1.bf16.msra.mxu1 %v10708_v14  ;;  %3669 = vmatprep.subr.bf16.mxu0 %v10719_v34  ;;  %v10763_v14 = vld [vmem:[%s14714_s1 + $0x1480] ss:$8 sps:$4 sm:$0xff]   ;;  %v10769_v34 = vld [vmem:[%s14714_s1 + $0x1490] ss:$8 sps:$4 sm:$0xff]  }
 0x19e   : > { %3650 = vmatprep.subr.bf16.mxu1 %v10716_v33  ;;  %v10766_v33 = vld [vmem:[%s14714_s1 + $0x6c8] ss:$8 sps:$4 sm:$0xff]  }
 0x1a0   : > { %3670 = vmatpush1.bf16.msra.mxu0 %v10717_v60  ;;  %v10777_v60 = vld [vmem:[%s14714_s1 + $0x14a4] ss:$8 sps:$4 sm:$0xff]  }
 0x1a1   : > { %3651 = vmatpush1.bf16.msra.mxu1 %v10714_v35  ;;  %3671 = vmatprep.subr.bf16.mxu0 %v10725_v37  ;;  %v10774_v35 = vld [vmem:[%s14714_s1 + $0x6dc] ss:$8 sps:$4 sm:$0xff]  }
 0x1a2   : > { %3652 = vmatprep.subr.bf16.mxu1 %v10722_v36 }
 0x1a4   : > { %3672 = vmatpush1.bf16.msra.mxu0 %v10723_v39 }
 0x1a5   : > { %3653 = vmatpush1.bf16.msra.mxu1 %v10720_v38  ;;  %9043 = vmatprep.subr.msk.bf16.mxu0 %vm638_vm0, %v9042_v41  ;;  %v10775_v41 = vld [vmem:[%s14714_s1 + $0x14a0] ss:$8 sps:$4 sm:$0xff]  }
 0x1a6   : > { %3654 = vmatprep.subr.bf16.mxu1 %v10728_v40  ;;  %v10772_v40 = vld [vmem:[%s14714_s1 + $0x6d8] ss:$8 sps:$4 sm:$0xff]  }
 0x1a8   : > { %3674 = vmatpush1.bf16.msra.mxu0 %v3619_v45 }
 0x1a9   : > { %3655 = vmatpush1.bf16.msra.mxu1 %v10726_v44  ;;  %3975 = vmatprep.subr.bf16.mxu0 %v10733_v53  ;;  %v10781_v53 = vld [vmem:[%s14714_s1 + $0x14b0] ss:$8 sps:$4 sm:$0xff]  }
 0x1aa   : > { %4016 = vmatprep.subr.bf16.mxu1 %v10736_v54  ;;  %v10786_v54 = vld [vmem:[%s14714_s1 + $0x6fc] ss:$8 sps:$4 sm:$0xff]  }
 0x1ab   : > { %9044 = vmatmul.mubr.msk.bf16.vlgmr.msra.gmra.mrb[36].mxu0 %vm634_vm1, %v3070_v7  ;;  %v10746_v7 = vld [vmem:[%s14714_s1 + $0x788] ss:$8 sps:$4 sm:$0xff]  }
 0x1ac   : > { %3657 = vmatmul.mubr.bf16.vlgmr.msra.gmra.mrb[36].mxu1 %v3068_v22  ;;  %3976 = vmatpush1.bf16.msra.mxu0 %v10731_v52  ;;  %v10762_v22 = vld [vmem:[%s14714_s1 + $0x6bc] ss:$8 sps:$4 sm:$0xff]   ;;  %v10784_v52 = vld [vmem:[%s14714_s1 + $0x6f8] ss:$8 sps:$4 sm:$0xff]  }
 0x1ad   : > { %4017 = vmatpush1.bf16.msra.mxu1 %v10734_v47  ;;  %3977 = vmatprep.subr.bf16.mxu0 %v10739_v50  ;;  %v10787_v47 = vld [vmem:[%s14714_s1 + $0x14c0] ss:$8 sps:$4 sm:$0xff]  }
 0x1ae   : > { %4018 = vmatprep.subr.bf16.mxu1 %v10742_v51  ;;  %4048 = vmatprep.mubr.bf16.mxu1 %v11507_v2  ;;  %v10790_v50 = vld [vmem:[%s14714_s1 + $0x708] ss:$8 sps:$4 sm:$0xff]  }
 0x1af   : > { %4007 = vmatprep.mubr.bf16.mxu0 %v3755_v61  ;;  %v10793_v51 = vld [vmem:[%s14714_s1 + $0x14d0] ss:$8 sps:$4 sm:$0xff]  }
 0x1b0   : > { %3978 = vmatpush1.bf16.msra.mxu0 %v10737_v57  ;;  %v10798_v57 = vld [vmem:[%s14714_s1 + $0x71c] ss:$8 sps:$4 sm:$0xff]  }
 0x1b1   : > { %4019 = vmatpush1.bf16.msra.mxu1 %v10740_v58  ;;  %3979 = vmatprep.subr.bf16.mxu0 %v10745_v63  ;;  %v10801_v58 = vld [vmem:[%s14714_s1 + $0x14e4] ss:$8 sps:$4 sm:$0xff]   ;;  %v10799_v63 = vld [vmem:[%s14714_s1 + $0x14e0] ss:$8 sps:$4 sm:$0xff]  }
 0x1b2   : > { %4020 = vmatprep.subr.bf16.mxu1 %v10748_v4  ;;  %v10804_v4 = vld [vmem:[%s14714_s1 + $0x72c] ss:$8 sps:$4 sm:$0xff]  }
 0x1b4   : > { %3980 = vmatpush1.bf16.msra.mxu0 %v10743_v5  ;;  %v10807_v5 = vld [vmem:[%s14714_s1 + $0x14f4] ss:$8 sps:$4 sm:$0xff]  }
 0x1b5   : > { %4021 = vmatpush1.bf16.msra.mxu1 %v10746_v7  ;;  %3981 = vmatprep.subr.bf16.mxu0 %v10751_v6 }
 0x1b6   : > { %4022 = vmatprep.subr.bf16.mxu1 %v10754_v8 }
 0x1b8   : > { %3982 = vmatpush1.bf16.msra.mxu0 %v10749_v10 }
 0x1b9   : > { %4023 = vmatpush1.bf16.msra.mxu1 %v10752_v12  ;;  %3983 = vmatprep.subr.bf16.mxu0 %v10757_v21 }
 0x1ba   : > { %9128 = vmatprep.subr.msk.bf16.mxu1 %vm638_vm0, %v9127_v13 }
 0x1bc   : > { %3984 = vmatpush1.bf16.msra.mxu0 %v10755_v29 }
 0x1bd   : > { %4025 = vmatpush1.bf16.msra.mxu1 %v3970_v19  ;;  %3985 = vmatprep.subr.bf16.mxu0 %v10762_v22  ;;  %v10810_v22 = vld [vmem:[%s14714_s1 + $0x73c] ss:$8 sps:$4 sm:$0xff]  }
 0x1be   : > { %4312 = vmatprep.subr.bf16.mxu1 %v10765_v24  ;;  %v10813_v24 = vld [vmem:[%s14714_s1 + $0x1504] ss:$8 sps:$4 sm:$0xff]  }
 0x1c0   : > { %9129 = vmatmul.mubr.msk.bf16.vlgmr.msra.gmra.mrb[40].mxu1 %vm634_vm1, %v13030_v28  ;;  %3986 = vmatpush1.bf16.msra.mxu0 %v10760_v27 }
 0x1c1   : > { %4313 = vmatpush1.bf16.msra.mxu1 %v10763_v14  ;;  %3987 = vmatprep.subr.bf16.mxu0 %v10768_v32  ;;  %v10811_v14 = vld [vmem:[%s14714_s1 + $0x1500] ss:$8 sps:$4 sm:$0xff]   ;;  %v10816_v32 = vld [vmem:[%s14714_s1 + $0x74c] ss:$8 sps:$4 sm:$0xff]  }
 0x1c2   : > { %4314 = vmatprep.subr.bf16.mxu1 %v10771_v31  ;;  %v1951_v36 = vpop.f32.mrb[16].mxu0  ;;  %4344 = vmatprep.mubr.bf16.mxu1 %v3755_v61  ;;  %v10796_v61 = vld [vmem:[%s14714_s1 + $0x718] ss:$8 sps:$4 sm:$0xff]   ;;  %v10814_v31 = vld [vmem:[%s14714_s1 + $0x748] ss:$8 sps:$4 sm:$0xff]  }
 0x1c3   : > { %v1993_v37 = vadd.f32 %v12905_v56, %v1951_v36  ;;  %v1953_v62 = vpop.f32.mrb[17].mxu0  ;;  %v10780_v56 = vld [vmem:[%s14714_s1 + $0x6ec] ss:$8 sps:$4 sm:$0xff]   ;;  %v3750_v36 = vrot.slane %v11803_v20, 2 }
 0x1c4   : > { %v1995_v38 = vadd.f32 %v12913_v30, %v1953_v62  ;;  %v1955_v39 = vpop.f32.mrb[18].mxu0  ;;  %3988 = vmatpush1.bf16.msra.mxu0 %v10766_v33  ;;  %v10783_v30 = vld [vmem:[%s14714_s1 + $0x14b4] ss:$8 sps:$4 sm:$0xff]   ;;  %v10817_v33 = vld [vmem:[%s14714_s1 + $0x1510] ss:$8 sps:$4 sm:$0xff]  }
 0x1c5   : > { %4315 = vmatpush1.bf16.msra.mxu1 %v10769_v34  ;;  %v13061_v42 = vadd.f32 %v1993_v37, %v12575_v43  ;;  %v1956_v44 = vpop.f32.mrb[19].mxu0  ;;  %3989 = vmatprep.subr.bf16.mxu0 %v10774_v35  ;;  %v10778_v43 = vld [vmem:[%s14714_s1 + $0x6e8] ss:$8 sps:$4 sm:$0xff]   ;;  %v10822_v34 = vld [vmem:[%s14714_s1 + $0x75c] ss:$8 sps:$4 sm:$0xff]   ;;  %v3751_v37 = vrot.slane %v11788_v15, 3 }
 0x1c6   : > { %4316 = vmatprep.subr.bf16.mxu1 %v10777_v60  ;;  %v13070_v45 = vadd.f32 %v1995_v38, %v12583_v46  ;;  %v10789_v46 = vld [vmem:[%s14714_s1 + $0x14c4] ss:$8 sps:$4 sm:$0xff]   ;;  %v10820_v60 = vld [vmem:[%s14714_s1 + $0x758] ss:$8 sps:$4 sm:$0xff]   ;;  %v10828_v38 = vld [vmem:[%s14714_s1 + $0x1534] ss:$8 sps:$4 sm:$0xff]  }
 0x1c7   : > { %v10825_v35 = vld [vmem:[%s14714_s1 + $0x1524] ss:$8 sps:$4 sm:$0xff]   ;;  %v10823_v62 = vld [vmem:[%s14714_s1 + $0x1520] ss:$8 sps:$4 sm:$0xff]   ;;  %v3752_v44 = vor.u32 %v3751_v37, %v3750_v36  ;;  %v10879_v36 = vld [vmem:[%s14714_s1 + $0x7f0] ss:$8 sps:$4 sm:$0xff]  }
 0x1c8   : > { %3990 = vmatpush1.bf16.msra.mxu0 %v10772_v40  ;;  %v10831_v39 = vld [vmem:[%s14714_s1 + $0x1584] ss:$8 sps:$4 sm:$0xff]   ;;  %v10826_v40 = vld [vmem:[%s14714_s1 + $0x1530] ss:$8 sps:$4 sm:$0xff]  }
 0x1c9   : > { %4317 = vmatpush1.bf16.msra.mxu1 %v10775_v41  ;;  %3991 = vmatprep.subr.bf16.mxu0 %v10780_v56  ;;  %v10829_v41 = vld [vmem:[%s14714_s1 + $0x1580] ss:$8 sps:$4 sm:$0xff]   ;;  %v10834_v56 = vld [vmem:[%s14714_s1 + $0x1544] ss:$8 sps:$4 sm:$0xff]  }
 0x1ca   : > { %4318 = vmatprep.subr.bf16.mxu1 %v10783_v30  ;;  %v10837_v30 = vld [vmem:[%s14714_s1 + $0x1594] ss:$8 sps:$4 sm:$0xff]  }
 0x1cc   : > { %3992 = vmatpush1.bf16.msra.mxu0 %v10778_v43 }
 0x1cd   : > { %4319 = vmatpush1.bf16.msra.mxu1 %v10781_v53  ;;  %3993 = vmatprep.subr.bf16.mxu0 %v10786_v54  ;;  %v10832_v53 = vld [vmem:[%s14714_s1 + $0x1540] ss:$8 sps:$4 sm:$0xff]   ;;  %v10835_v54 = vld [vmem:[%s14714_s1 + $0x1590] ss:$8 sps:$4 sm:$0xff]  }
 0x1ce   : > { %4320 = vmatprep.subr.bf16.mxu1 %v10789_v46 }
 0x1d0   : > { %3994 = vmatpush1.bf16.msra.mxu0 %v10784_v52 }
 0x1d1   : > { %4321 = vmatpush1.bf16.msra.mxu1 %v10787_v47  ;;  %3995 = vmatprep.subr.bf16.mxu0 %v10792_v48  ;;  %v10840_v48 = vld [vmem:[%s14714_s1 + $0x1554] ss:$8 sps:$4 sm:$0xff]  }
 0x1d2   : > { %4322 = vmatprep.subr.bf16.mxu1 %v10795_v49  ;;  %v10843_v49 = vld [vmem:[%s14714_s1 + $0x15a4] ss:$8 sps:$4 sm:$0xff]  }
 0x1d4   : > { %3996 = vmatpush1.bf16.msra.mxu0 %v10790_v50  ;;  %v10838_v50 = vld [vmem:[%s14714_s1 + $0x1550] ss:$8 sps:$4 sm:$0xff]  }
 0x1d5   : > { %4323 = vmatpush1.bf16.msra.mxu1 %v10793_v51  ;;  %3997 = vmatprep.subr.bf16.mxu0 %v10798_v57  ;;  %v10841_v51 = vld [vmem:[%s14714_s1 + $0x15a0] ss:$8 sps:$4 sm:$0xff]   ;;  %v10846_v57 = vld [vmem:[%s14714_s1 + $0x1564] ss:$8 sps:$4 sm:$0xff]  }
 0x1d6   : > { %4324 = vmatprep.subr.bf16.mxu1 %v10801_v58  ;;  %v2329_v6 = vpop.f32.mrb[20].mxu0  ;;  %v10849_v58 = vld [vmem:[%s14714_s1 + $0x15b4] ss:$8 sps:$4 sm:$0xff]  }
 0x1d7   : > { %v2288_v7 = vpop.f32.mrb[20].mxu1  ;;  %v2331_v10 = vpop.f32.mrb[21].mxu0 }
 0x1d8   : > { %v2330_v8 = vadd.f32 %v2329_v6, %v2288_v7  ;;  %v2290_v9 = vpop.f32.mrb[21].mxu1  ;;  %v2333_v13 = vpop.f32.mrb[22].mxu0  ;;  %3998 = vmatpush1.bf16.msra.mxu0 %v10796_v61  ;;  %v9170_v61 = vld [vmem:[%s14714_s1 + $0x15c0] sm:$0x33] }
 0x1d9   : > { %v2332_v12 = vadd.f32 %v2331_v10, %v2290_v9  ;;  %v2292_v21 = vpop.f32.mrb[22].mxu1  ;;  %4325 = vmatpush1.bf16.msra.mxu1 %v10799_v63  ;;  %v2334_v19 = vpop.f32.mrb[23].mxu0  ;;  %3999 = vmatprep.subr.bf16.mxu0 %v10804_v4  ;;  %v10844_v63 = vld [vmem:[%s14714_s1 + $0x1560] ss:$8 sps:$4 sm:$0xff]   ;;  %v10847_v4 = vld [vmem:[%s14714_s1 + $0x15b0] ss:$8 sps:$4 sm:$0xff]   ;;  %v9212_v7 = vcombine.high %v9170_v61, %v9170_v61  ;;  %v9211_v6 = vcombine.low %v9170_v61, %v9170_v61 }
 0x1da   : > { %v13127_v18 = vadd.f32 %v2330_v8, %v12846_v55  ;;  %v2293_v29 = vpop.f32.mrb[23].mxu1  ;;  %4326 = vmatprep.subr.bf16.mxu1 %v10807_v5  ;;  %v10808_v55 = vld [vmem:[%s14714_s1 + $0x738] ss:$8 sps:$4 sm:$0xff]   ;;  %v10852_v5 = vld [vmem:[%s14714_s1 + $0x1574] ss:$8 sps:$4 sm:$0xff]  }
 0x1db   : > { %v13136_v27 = vadd.f32 %v2332_v12, %v12854_v3  ;;  %v10819_v3 = vld [vmem:[%s14714_s1 + $0x1514] ss:$8 sps:$4 sm:$0xff]   ;;  %v10850_v8 = vld [vmem:[%s14714_s1 + $0x1570] ss:$8 sps:$4 sm:$0xff]   ;;  %v4307_v9 = vsel %vm638_vm0, %v9211_v6, 0  ;;  %v4439_v29 = vrot.slane %v11730_v59, 3 }
 0x1dc   : > { %4000 = vmatpush1.bf16.msra.mxu0 %v10802_v16  ;;  %v10857_v10 = vld [vmem:[%s14714_s1 + $0x7b4] ss:$8 sps:$4 sm:$0xff]   ;;  %v10855_v21 = vld [vmem:[%s14714_s1 + $0x7b0] ss:$8 sps:$4 sm:$0xff]   ;;  %v10863_v16 = vld [vmem:[%s14714_s1 + $0x7c4] ss:$8 sps:$4 sm:$0xff]  }
 0x1dd   : > { %4327 = vmatpush1.bf16.msra.mxu1 %v10805_v17  ;;  %4001 = vmatprep.subr.bf16.mxu0 %v10810_v22  ;;  %v10860_v12 = vld [vmem:[%s14714_s1 + $0x8b4] ss:$8 sps:$4 sm:$0xff]   ;;  %v10858_v13 = vld [vmem:[%s14714_s1 + $0x8b0] ss:$8 sps:$4 sm:$0xff]   ;;  %v10866_v17 = vld [vmem:[%s14714_s1 + $0x8c4] ss:$8 sps:$4 sm:$0xff]  }
 0x1de   : > { %4328 = vmatprep.subr.bf16.mxu1 %v10813_v24  ;;  %v10861_v19 = vld [vmem:[%s14714_s1 + $0x7c0] ss:$8 sps:$4 sm:$0xff]   ;;  %v10869_v59 = vld [vmem:[%s14714_s1 + $0x7d4] ss:$8 sps:$4 sm:$0xff]   ;;  %v10867_v24 = vld [vmem:[%s14714_s1 + $0x7d0] ss:$8 sps:$4 sm:$0xff]  }
 0x1df   : > { %v10864_v22 = vld [vmem:[%s14714_s1 + $0x8c0] ss:$8 sps:$4 sm:$0xff]  }
 0x1e0   : > { %4002 = vmatpush1.bf16.msra.mxu0 %v10808_v55  ;;  %v10870_v55 = vld [vmem:[%s14714_s1 + $0x8d0] ss:$8 sps:$4 sm:$0xff]   ;;  %v10908_v6 = vld [vmem:[%s14714_s1 + $0x840] ss:$8 sps:$4 sm:$0xff]  }
 0x1e1   : > { %4329 = vmatpush1.bf16.msra.mxu1 %v10811_v14  ;;  %4003 = vmatprep.subr.bf16.mxu0 %v10816_v32  ;;  %v10875_v14 = vld [vmem:[%s14714_s1 + $0x7e4] ss:$8 sps:$4 sm:$0xff]  }
 0x1e2   : > { %4330 = vmatprep.subr.bf16.mxu1 %v10819_v3  ;;  %v10878_v32 = vld [vmem:[%s14714_s1 + $0x8e4] ss:$8 sps:$4 sm:$0xff]   ;;  %v9255_v3 = vld [vmem:[%s14714_s1 + $0x8f0] sm:$0x33] }
 0x1e4   : > { %4004 = vmatpush1.bf16.msra.mxu0 %v10814_v31  ;;  %v10873_v31 = vld [vmem:[%s14714_s1 + $0x7e0] ss:$8 sps:$4 sm:$0xff]  }
 0x1e5   : > { %4331 = vmatpush1.bf16.msra.mxu1 %v10817_v33  ;;  %4005 = vmatprep.subr.bf16.mxu0 %v10822_v34  ;;  %v10876_v33 = vld [vmem:[%s14714_s1 + $0x8e0] ss:$8 sps:$4 sm:$0xff]   ;;  %v10881_v34 = vld [vmem:[%s14714_s1 + $0x7f4] ss:$8 sps:$4 sm:$0xff]  }
 0x1e6   : > { %4332 = vmatprep.subr.bf16.mxu1 %v10825_v35  ;;  %v9297_v35 = vcombine.high %v9255_v3, %v9255_v3 }
 0x1e8   : > { %4006 = vmatpush1.bf16.msra.mxu0 %v10820_v60  ;;  %v9296_v60 = vcombine.low %v9255_v3, %v9255_v3 }
 0x1e9   : > { %4333 = vmatpush1.bf16.msra.mxu1 %v10823_v62  ;;  %4353 = vmatprep.subr.bf16.mxu0 %v10831_v39  ;;  %v10886_v62 = vld [vmem:[%s14714_s1 + $0x804] ss:$8 sps:$4 sm:$0xff]   ;;  %v4440_v39 = vrot.slane %v11625_v23, 3 }
 0x1ea   : > { %4334 = vmatprep.subr.bf16.mxu1 %v10828_v38  ;;  %v4652_v37 = vsel %vm638_vm0, %v9296_v60, 0  ;;  %v10889_v38 = vld [vmem:[%s14714_s1 + $0x15cc] ss:$8 sps:$4 sm:$0xff]   ;;  %v10996_v23 = vld [vmem:[%s14714_s1 + $0xa1c] ss:$8 sps:$4 sm:$0xff]  }
 0x1eb   : > { %v13188_v43 = vpop.f32.mrb[24].mxu1  ;;  %4008 = vmatmul.mubr.bf16.vlgmr.msra.gmra.mrb[40].mxu0 %v3752_v44 }
 0x1ec   : > { %v13196_v46 = vpop.f32.mrb[25].mxu1  ;;  %4354 = vmatpush1.bf16.msra.mxu0 %v10829_v41  ;;  %4385 = vmatprep.mubr.bf16.mxu0 %v11507_v2  ;;  %v10887_v41 = vld [vmem:[%s14714_s1 + $0x15c8] ss:$8 sps:$4 sm:$0xff]  }
 0x1ed   : > { %v2684_v52 = vpop.f32.mrb[26].mxu1  ;;  %4335 = vmatpush1.bf16.msra.mxu1 %v10826_v40  ;;  %4355 = vmatprep.subr.bf16.mxu0 %v10837_v30  ;;  %v10884_v40 = vld [vmem:[%s14714_s1 + $0x800] ss:$8 sps:$4 sm:$0xff]   ;;  %v10890_v30 = vld [vmem:[%s14714_s1 + $0x810] ss:$8 sps:$4 sm:$0xff]  }
 0x1ee   : > { %v2685_v47 = vpop.f32.mrb[27].mxu1  ;;  %4336 = vmatprep.subr.bf16.mxu1 %v10834_v56  ;;  %v10895_v56 = vld [vmem:[%s14714_s1 + $0x15dc] ss:$8 sps:$4 sm:$0xff]   ;;  %v10901_v52 = vld [vmem:[%s14714_s1 + $0x15ec] ss:$8 sps:$4 sm:$0xff]  }
 0x1f0   : > { %4356 = vmatpush1.bf16.msra.mxu0 %v10835_v54  ;;  %v10898_v54 = vld [vmem:[%s14714_s1 + $0x824] ss:$8 sps:$4 sm:$0xff]  }
 0x1f1   : > { %4337 = vmatpush1.bf16.msra.mxu1 %v10832_v53  ;;  %4357 = vmatprep.subr.bf16.mxu0 %v10843_v49  ;;  %v10893_v53 = vld [vmem:[%s14714_s1 + $0x15d8] ss:$8 sps:$4 sm:$0xff]  }
 0x1f2   : > { %4338 = vmatprep.subr.bf16.mxu1 %v10840_v48 }
 0x1f4   : > { %4358 = vmatpush1.bf16.msra.mxu0 %v10841_v51 }
 0x1f5   : > { %4339 = vmatpush1.bf16.msra.mxu1 %v10838_v50  ;;  %4359 = vmatprep.subr.bf16.mxu0 %v10849_v58  ;;  %v10899_v58 = vld [vmem:[%s14714_s1 + $0x15e8] ss:$8 sps:$4 sm:$0xff]  }
 0x1f6   : > { %4340 = vmatprep.subr.bf16.mxu1 %v10846_v57  ;;  %v10896_v57 = vld [vmem:[%s14714_s1 + $0x820] ss:$8 sps:$4 sm:$0xff]  }
 0x1f8   : > { %4360 = vmatpush1.bf16.msra.mxu0 %v10847_v4 }
 0x1f9   : > { %4341 = vmatpush1.bf16.msra.mxu1 %v10844_v63  ;;  %9213 = vmatprep.subr.msk.bf16.mxu0 %vm638_vm0, %v9212_v7  ;;  %v10910_v7 = vld [vmem:[%s14714_s1 + $0x844] ss:$8 sps:$4 sm:$0xff]  }
 0x1fa   : > { %4342 = vmatprep.subr.bf16.mxu1 %v10852_v5  ;;  %v10905_v5 = vld [vmem:[%s14714_s1 + $0x15f8] ss:$8 sps:$4 sm:$0xff]  }
 0x1fc   : > { %4362 = vmatpush1.bf16.msra.mxu0 %v4307_v9  ;;  %v10916_v9 = vld [vmem:[%s14714_s1 + $0x854] ss:$8 sps:$4 sm:$0xff]  }
 0x1fd   : > { %4343 = vmatpush1.bf16.msra.mxu1 %v10850_v8  ;;  %4657 = vmatprep.subr.bf16.mxu0 %v10857_v10  ;;  %v10911_v8 = vld [vmem:[%s14714_s1 + $0x1608] ss:$8 sps:$4 sm:$0xff]   ;;  %v10919_v10 = vld [vmem:[%s14714_s1 + $0x161c] ss:$8 sps:$4 sm:$0xff]  }
 0x1fe   : > { %4698 = vmatprep.subr.bf16.mxu1 %v10860_v12  ;;  %v10914_v12 = vld [vmem:[%s14714_s1 + $0x850] ss:$8 sps:$4 sm:$0xff]  }
 0x1ff   : > { %9214 = vmatmul.mubr.msk.bf16.vlgmr.msra.gmra.mrb[44].mxu0 %vm634_vm1, %v13030_v28  ;;  %v10872_v28 = vld [vmem:[%s14714_s1 + $0x8d4] ss:$8 sps:$4 sm:$0xff]  }
 0x200   : > { %4345 = vmatmul.mubr.bf16.vlgmr.msra.gmra.mrb[44].mxu1 %v3752_v44  ;;  %4658 = vmatpush1.bf16.msra.mxu0 %v10855_v21  ;;  %v10892_v44 = vld [vmem:[%s14714_s1 + $0x814] ss:$8 sps:$4 sm:$0xff]   ;;  %v10917_v21 = vld [vmem:[%s14714_s1 + $0x1618] ss:$8 sps:$4 sm:$0xff]  }
 0x201   : > { %4699 = vmatpush1.bf16.msra.mxu1 %v10858_v13  ;;  %4659 = vmatprep.subr.bf16.mxu0 %v10863_v16  ;;  %v10922_v13 = vld [vmem:[%s14714_s1 + $0x864] ss:$8 sps:$4 sm:$0xff]  }
 0x202   : > { %4700 = vmatprep.subr.bf16.mxu1 %v10866_v17  ;;  %4730 = vmatprep.mubr.bf16.mxu1 %v11507_v2  ;;  %v10925_v16 = vld [vmem:[%s14714_s1 + $0x162c] ss:$8 sps:$4 sm:$0xff]   ;;  %v10920_v17 = vld [vmem:[%s14714_s1 + $0x860] ss:$8 sps:$4 sm:$0xff]  }
 0x203   : > { %4689 = vmatprep.mubr.bf16.mxu0 %v4439_v29 }
 0x204   : > { %4660 = vmatpush1.bf16.msra.mxu0 %v10861_v19  ;;  %v10928_v19 = vld [vmem:[%s14714_s1 + $0x874] ss:$8 sps:$4 sm:$0xff]  }
 0x205   : > { %4701 = vmatpush1.bf16.msra.mxu1 %v10864_v22  ;;  %4661 = vmatprep.subr.bf16.mxu0 %v10869_v59  ;;  %v10931_v22 = vld [vmem:[%s14714_s1 + $0x163c] ss:$8 sps:$4 sm:$0xff]  }
 0x206   : > { %4702 = vmatprep.subr.bf16.mxu1 %v10872_v28 }
 0x208   : > { %4662 = vmatpush1.bf16.msra.mxu0 %v10867_v24 }
 0x209   : > { %4703 = vmatpush1.bf16.msra.mxu1 %v10870_v55  ;;  %4663 = vmatprep.subr.bf16.mxu0 %v10875_v14 }
 0x20a   : > { %4704 = vmatprep.subr.bf16.mxu1 %v10878_v32 }
 0x20c   : > { %4664 = vmatpush1.bf16.msra.mxu0 %v10873_v31 }
 0x20d   : > { %4705 = vmatpush1.bf16.msra.mxu1 %v10876_v33  ;;  %4665 = vmatprep.subr.bf16.mxu0 %v10881_v34  ;;  %v10926_v33 = vld [vmem:[%s14714_s1 + $0x870] ss:$8 sps:$4 sm:$0xff]  }
 0x20e   : > { %9298 = vmatprep.subr.msk.bf16.mxu1 %vm638_vm0, %v9297_v35  ;;  %v10929_v34 = vld [vmem:[%s14714_s1 + $0x1638] ss:$8 sps:$4 sm:$0xff]  }
 0x210   : > { %4666 = vmatpush1.bf16.msra.mxu0 %v10879_v36 }
 0x211   : > { %4707 = vmatpush1.bf16.msra.mxu1 %v4652_v37  ;;  %4667 = vmatprep.subr.bf16.mxu0 %v10886_v62  ;;  %v10934_v37 = vld [vmem:[%s14714_s1 + $0x884] ss:$8 sps:$4 sm:$0xff]  }
 0x212   : > { %4994 = vmatprep.subr.bf16.mxu1 %v10889_v38  ;;  %v10937_v62 = vld [vmem:[%s14714_s1 + $0x164c] ss:$8 sps:$4 sm:$0xff]  }
 0x214   : > { %9299 = vmatmul.mubr.msk.bf16.vlgmr.msra.gmra.mrb[48].mxu1 %vm634_vm1, %v4440_v39  ;;  %4668 = vmatpush1.bf16.msra.mxu0 %v10884_v40  ;;  %v10935_v40 = vld [vmem:[%s14714_s1 + $0x1648] ss:$8 sps:$4 sm:$0xff]  }
 0x215   : > { %4995 = vmatpush1.bf16.msra.mxu1 %v10887_v41  ;;  %4669 = vmatprep.subr.bf16.mxu0 %v10892_v44  ;;  %v10940_v41 = vld [vmem:[%s14714_s1 + $0x894] ss:$8 sps:$4 sm:$0xff]   ;;  %v10938_v44 = vld [vmem:[%s14714_s1 + $0x890] ss:$8 sps:$4 sm:$0xff]  }
 0x216   : > { %4996 = vmatprep.subr.bf16.mxu1 %v10895_v56  ;;  %v2639_v47 = vpop.f32.mrb[24].mxu0  ;;  %5026 = vmatprep.mubr.bf16.mxu1 %v4439_v29  ;;  %v10923_v29 = vld [vmem:[%s14714_s1 + $0x1628] ss:$8 sps:$4 sm:$0xff]   ;;  %v10941_v56 = vld [vmem:[%s14714_s1 + $0x1658] ss:$8 sps:$4 sm:$0xff]  }
 0x217   : > { %v2681_v48 = vadd.f32 %v13188_v43, %v2639_v47  ;;  %v2641_v49 = vpop.f32.mrb[25].mxu0  ;;  %v10904_v43 = vld [vmem:[%s14714_s1 + $0x834] ss:$8 sps:$4 sm:$0xff]  }
 0x218   : > { %v2683_v50 = vadd.f32 %v13196_v46, %v2641_v49  ;;  %v2643_v51 = vpop.f32.mrb[26].mxu0  ;;  %4670 = vmatpush1.bf16.msra.mxu0 %v10890_v30  ;;  %v10907_v46 = vld [vmem:[%s14714_s1 + $0x15fc] ss:$8 sps:$4 sm:$0xff]   ;;  %v4438_v49 = vrot.slane %v11776_v11, 3 }
 0x219   : > { %4997 = vmatpush1.bf16.msra.mxu1 %v10893_v53  ;;  %v13340_v61 = vadd.f32 %v2681_v48, %v13061_v42  ;;  %v2644_v63 = vpop.f32.mrb[27].mxu0  ;;  %4671 = vmatprep.subr.bf16.mxu0 %v10898_v54  ;;  %v10902_v42 = vld [vmem:[%s14714_s1 + $0x830] ss:$8 sps:$4 sm:$0xff]   ;;  %v10946_v30 = vld [vmem:[%s14714_s1 + $0x8a4] ss:$8 sps:$4 sm:$0xff]  }
 0x21a   : > { %4998 = vmatprep.subr.bf16.mxu1 %v10901_v52  ;;  %v13349_v4 = vadd.f32 %v2683_v50, %v13070_v45  ;;  %v10913_v45 = vld [vmem:[%s14714_s1 + $0x160c] ss:$8 sps:$4 sm:$0xff]   ;;  %v10944_v54 = vld [vmem:[%s14714_s1 + $0x8a0] ss:$8 sps:$4 sm:$0xff]   ;;  %v10952_v47 = vld [vmem:[%s14714_s1 + $0x167c] ss:$8 sps:$4 sm:$0xff]  }
 0x21b   : > { %v10949_v53 = vld [vmem:[%s14714_s1 + $0x166c] ss:$8 sps:$4 sm:$0xff]   ;;  %v10947_v52 = vld [vmem:[%s14714_s1 + $0x1668] ss:$8 sps:$4 sm:$0xff]   ;;  %v10950_v50 = vld [vmem:[%s14714_s1 + $0x1678] ss:$8 sps:$4 sm:$0xff]  }
 0x21c   : > { %4672 = vmatpush1.bf16.msra.mxu0 %v10896_v57  ;;  %v10955_v48 = vld [vmem:[%s14714_s1 + $0x16cc] ss:$8 sps:$4 sm:$0xff]   ;;  %v10953_v51 = vld [vmem:[%s14714_s1 + $0x16c8] ss:$8 sps:$4 sm:$0xff]   ;;  %v10961_v11 = vld [vmem:[%s14714_s1 + $0x16dc] ss:$8 sps:$4 sm:$0xff]  }
 0x21d   : > { %4999 = vmatpush1.bf16.msra.mxu1 %v10899_v58  ;;  %4673 = vmatprep.subr.bf16.mxu0 %v10904_v43  ;;  %v10958_v57 = vld [vmem:[%s14714_s1 + $0x168c] ss:$8 sps:$4 sm:$0xff]  }
 0x21e   : > { %5000 = vmatprep.subr.bf16.mxu1 %v10907_v46  ;;  %v10956_v46 = vld [vmem:[%s14714_s1 + $0x1688] ss:$8 sps:$4 sm:$0xff]  }
 0x220   : > { %4674 = vmatpush1.bf16.msra.mxu0 %v10902_v42  ;;  %v10959_v42 = vld [vmem:[%s14714_s1 + $0x16d8] ss:$8 sps:$4 sm:$0xff]  }
 0x221   : > { %5001 = vmatpush1.bf16.msra.mxu1 %v10905_v5  ;;  %4675 = vmatprep.subr.bf16.mxu0 %v10910_v7  ;;  %v10964_v7 = vld [vmem:[%s14714_s1 + $0x169c] ss:$8 sps:$4 sm:$0xff]  }
 0x222   : > { %5002 = vmatprep.subr.bf16.mxu1 %v10913_v45  ;;  %v10967_v45 = vld [vmem:[%s14714_s1 + $0x16ec] ss:$8 sps:$4 sm:$0xff]  }
 0x224   : > { %4676 = vmatpush1.bf16.msra.mxu0 %v10908_v6  ;;  %v10962_v6 = vld [vmem:[%s14714_s1 + $0x1698] ss:$8 sps:$4 sm:$0xff]  }
 0x225   : > { %5003 = vmatpush1.bf16.msra.mxu1 %v10911_v8  ;;  %4677 = vmatprep.subr.bf16.mxu0 %v10916_v9  ;;  %v10965_v8 = vld [vmem:[%s14714_s1 + $0x16e8] ss:$8 sps:$4 sm:$0xff]   ;;  %v10970_v9 = vld [vmem:[%s14714_s1 + $0x16ac] ss:$8 sps:$4 sm:$0xff]  }
 0x226   : > { %5004 = vmatprep.subr.bf16.mxu1 %v10919_v10  ;;  %v10973_v10 = vld [vmem:[%s14714_s1 + $0x16fc] ss:$8 sps:$4 sm:$0xff]  }
 0x228   : > { %4678 = vmatpush1.bf16.msra.mxu0 %v10914_v12  ;;  %v9340_v12 = vld [vmem:[%s14714_s1 + $0x1708] sm:$0x33] }
 0x229   : > { %5005 = vmatpush1.bf16.msra.mxu1 %v10917_v21  ;;  %4679 = vmatprep.subr.bf16.mxu0 %v10922_v13  ;;  %v10968_v21 = vld [vmem:[%s14714_s1 + $0x16a8] ss:$8 sps:$4 sm:$0xff]   ;;  %v10971_v13 = vld [vmem:[%s14714_s1 + $0x16f8] ss:$8 sps:$4 sm:$0xff]  }
 0x22a   : > { %5006 = vmatprep.subr.bf16.mxu1 %v10925_v16  ;;  %v3017_v28 = vpop.f32.mrb[28].mxu0  ;;  %v10976_v16 = vld [vmem:[%s14714_s1 + $0x16bc] ss:$8 sps:$4 sm:$0xff]  }
 0x22b   : > { %v2976_v59 = vpop.f32.mrb[28].mxu1  ;;  %v3019_v14 = vpop.f32.mrb[29].mxu0 }
 0x22c   : > { %v3018_v24 = vadd.f32 %v3017_v28, %v2976_v59  ;;  %v2978_v55 = vpop.f32.mrb[29].mxu1  ;;  %v3021_v31 = vpop.f32.mrb[30].mxu0  ;;  %4680 = vmatpush1.bf16.msra.mxu0 %v10920_v17  ;;  %v9382_v17 = vcombine.high %v9340_v12, %v9340_v12  ;;  %v10981_v59 = vld [vmem:[%s14714_s1 + $0x8fc] ss:$8 sps:$4 sm:$0xff]  }
 0x22d   : > { %v3020_v32 = vadd.f32 %v3019_v14, %v2978_v55  ;;  %v2980_v3 = vpop.f32.mrb[30].mxu1  ;;  %5007 = vmatpush1.bf16.msra.mxu1 %v10923_v29  ;;  %v3022_v36 = vpop.f32.mrb[31].mxu0  ;;  %4681 = vmatprep.subr.bf16.mxu0 %v10928_v19  ;;  %v9381_v29 = vcombine.low %v9340_v12, %v9340_v12  ;;  %v10974_v19 = vld [vmem:[%s14714_s1 + $0x16b8] ss:$8 sps:$4 sm:$0xff]   ;;  %v10984_v28 = vld [vmem:[%s14714_s1 + $0x9fc] ss:$8 sps:$4 sm:$0xff]  }
 0x22e   : > { %v13406_v35 = vadd.f32 %v3018_v24, %v13127_v18  ;;  %v2981_v60 = vpop.f32.mrb[31].mxu1  ;;  %5008 = vmatprep.subr.bf16.mxu1 %v10931_v22  ;;  %v10932_v18 = vld [vmem:[%s14714_s1 + $0x880] ss:$8 sps:$4 sm:$0xff]   ;;  %v5123_v24 = vrot.slane %v11746_v0, 3  ;;  %v5124_v55 = vrot.slane %v11749_v1, 4 }
 0x22f   : > { %v13415_v38 = vadd.f32 %v3020_v32, %v13136_v27  ;;  %v10943_v27 = vld [vmem:[%s14714_s1 + $0x165c] ss:$8 sps:$4 sm:$0xff]   ;;  %v4989_v22 = vsel %vm638_vm0, %v9381_v29, 0  ;;  %v10979_v14 = vld [vmem:[%s14714_s1 + $0x8f8] ss:$8 sps:$4 sm:$0xff]  }
 0x230   : > { %4682 = vmatpush1.bf16.msra.mxu0 %v10926_v33  ;;  %v10982_v32 = vld [vmem:[%s14714_s1 + $0x9f8] ss:$8 sps:$4 sm:$0xff]   ;;  %v10987_v3 = vld [vmem:[%s14714_s1 + $0x90c] ss:$8 sps:$4 sm:$0xff]   ;;  %v5125_v1 = vor.u32 %v5124_v55, %v5123_v24  ;;  %v10985_v31 = vld [vmem:[%s14714_s1 + $0x908] ss:$8 sps:$4 sm:$0xff]  }
 0x231   : > { %5009 = vmatpush1.bf16.msra.mxu1 %v10929_v34  ;;  %4683 = vmatprep.subr.bf16.mxu0 %v10934_v37  ;;  %v10990_v0 = vld [vmem:[%s14714_s1 + $0xa0c] ss:$8 sps:$4 sm:$0xff]   ;;  %v10988_v33 = vld [vmem:[%s14714_s1 + $0xa08] ss:$8 sps:$4 sm:$0xff]   ;;  %v10993_v34 = vld [vmem:[%s14714_s1 + $0x91c] ss:$8 sps:$4 sm:$0xff]  }
 0x232   : > { %5010 = vmatprep.subr.bf16.mxu1 %v10937_v62  ;;  %v10994_v60 = vld [vmem:[%s14714_s1 + $0xa18] ss:$8 sps:$4 sm:$0xff]   ;;  %v10999_v36 = vld [vmem:[%s14714_s1 + $0x92c] ss:$8 sps:$4 sm:$0xff]   ;;  %v11040_v29 = vld [vmem:[%s14714_s1 + $0x99c] ss:$8 sps:$4 sm:$0xff]  }
 0x233   : > { %v11002_v37 = vld [vmem:[%s14714_s1 + $0xa2c] ss:$8 sps:$4 sm:$0xff]   ;;  %v9425_v62 = vld [vmem:[%s14714_s1 + $0xa38] sm:$0x33]  ;;  %v11044_v55 = vld [vmem:[%s14714_s1 + $0x9a8] ss:$8 sps:$4 sm:$0xff]  }
 0x234   : > { %4684 = vmatpush1.bf16.msra.mxu0 %v10932_v18  ;;  %v10997_v18 = vld [vmem:[%s14714_s1 + $0x928] ss:$8 sps:$4 sm:$0xff]   ;;  %v11049_v24 = vld [vmem:[%s14714_s1 + $0x1774] ss:$8 sps:$4 sm:$0xff]  }
 0x235   : > { %5011 = vmatpush1.bf16.msra.mxu1 %v10935_v40  ;;  %4685 = vmatprep.subr.bf16.mxu0 %v10940_v41  ;;  %v11000_v40 = vld [vmem:[%s14714_s1 + $0xa28] ss:$8 sps:$4 sm:$0xff]   ;;  %v11005_v41 = vld [vmem:[%s14714_s1 + $0x93c] ss:$8 sps:$4 sm:$0xff]  }
 0x236   : > { %5012 = vmatprep.subr.bf16.mxu1 %v10943_v27  ;;  %v9467_v27 = vcombine.high %v9425_v62, %v9425_v62 }
 0x238   : > { %4686 = vmatpush1.bf16.msra.mxu0 %v10938_v44  ;;  %v9466_v44 = vcombine.low %v9425_v62, %v9425_v62 }
 0x239   : > { %5013 = vmatpush1.bf16.msra.mxu1 %v10941_v56  ;;  %4687 = vmatprep.subr.bf16.mxu0 %v10946_v30  ;;  %v5126_v56 = vrot.slane %v11631_v25, 3  ;;  %v5127_v30 = vrot.slane %v11634_v26, 4  ;;  %v11013_v25 = vld [vmem:[%s14714_s1 + $0x1714] ss:$8 sps:$4 sm:$0xff]  }
 0x23a   : > { %5014 = vmatprep.subr.bf16.mxu1 %v10949_v53  ;;  %v11003_v53 = vld [vmem:[%s14714_s1 + $0x938] ss:$8 sps:$4 sm:$0xff]  }
 0x23b   : > { %v13585_v26 = vor.u32 %v5127_v30, %v5126_v56  ;;  %v11059_v56 = vld [vmem:[%s14714_s1 + $0x1790] ss:$8 sps:$4 sm:$0xff]   ;;  %v11064_v30 = vld [vmem:[%s14714_s1 + $0x9dc] ss:$8 sps:$4 sm:$0xff]  }
 0x23c   : > { %4688 = vmatpush1.bf16.msra.mxu0 %v10944_v54  ;;  %v5340_v54 = vsel %vm638_vm0, %v9466_v44, 0 }
 0x23d   : > { %5015 = vmatpush1.bf16.msra.mxu1 %v10947_v52  ;;  %5035 = vmatprep.subr.bf16.mxu0 %v10955_v48  ;;  %v11010_v52 = vld [vmem:[%s14714_s1 + $0x94c] ss:$8 sps:$4 sm:$0xff]   ;;  %v11011_v48 = vld [vmem:[%s14714_s1 + $0x1710] ss:$8 sps:$4 sm:$0xff]  }
 0x23e   : > { %5016 = vmatprep.subr.bf16.mxu1 %v10952_v47  ;;  %v11008_v47 = vld [vmem:[%s14714_s1 + $0x948] ss:$8 sps:$4 sm:$0xff]  }
 0x23f   : > { %v13466_v58 = vpop.f32.mrb[32].mxu1  ;;  %4690 = vmatmul.mubr.bf16.vlgmr.msra.gmra.mrb[48].mxu0 %v4438_v49 }
 0x240   : > { %v13468_v63 = vpop.f32.mrb[33].mxu1  ;;  %5036 = vmatpush1.bf16.msra.mxu0 %v10953_v51  ;;  %5067 = vmatprep.mubr.bf16.mxu0 %v11507_v2  ;;  %v11014_v51 = vld [vmem:[%s14714_s1 + $0x958] ss:$8 sps:$4 sm:$0xff]  }
 0x241   : > { %v3366_v43 = vpop.f32.mrb[34].mxu1  ;;  %5017 = vmatpush1.bf16.msra.mxu1 %v10950_v50  ;;  %5037 = vmatprep.subr.bf16.mxu0 %v10961_v11  ;;  %v11019_v50 = vld [vmem:[%s14714_s1 + $0x1724] ss:$8 sps:$4 sm:$0xff]  }
 0x242   : > { %v3367_v5 = vpop.f32.mrb[35].mxu1  ;;  %5018 = vmatprep.subr.bf16.mxu1 %v10958_v57  ;;  %v11017_v57 = vld [vmem:[%s14714_s1 + $0x1720] ss:$8 sps:$4 sm:$0xff]   ;;  %v11022_v11 = vld [vmem:[%s14714_s1 + $0x96c] ss:$8 sps:$4 sm:$0xff]  }
 0x243   : > { %v11025_v43 = vld [vmem:[%s14714_s1 + $0x1734] ss:$8 sps:$4 sm:$0xff]  }
 0x244   : > { %5038 = vmatpush1.bf16.msra.mxu0 %v10959_v42 }
 0x245   : > { %5019 = vmatpush1.bf16.msra.mxu1 %v10956_v46  ;;  %5039 = vmatprep.subr.bf16.mxu0 %v10967_v45 }
 0x246   : > { %5020 = vmatprep.subr.bf16.mxu1 %v10964_v7 }
 0x248   : > { %5040 = vmatpush1.bf16.msra.mxu0 %v10965_v8  ;;  %v11023_v8 = vld [vmem:[%s14714_s1 + $0x1730] ss:$8 sps:$4 sm:$0xff]  }
 0x249   : > { %5021 = vmatpush1.bf16.msra.mxu1 %v10962_v6  ;;  %5041 = vmatprep.subr.bf16.mxu0 %v10973_v10  ;;  %v11020_v6 = vld [vmem:[%s14714_s1 + $0x968] ss:$8 sps:$4 sm:$0xff]  }
 0x24a   : > { %5022 = vmatprep.subr.bf16.mxu1 %v10970_v9 }
 0x24c   : > { %5042 = vmatpush1.bf16.msra.mxu0 %v10971_v13  ;;  %v11034_v13 = vld [vmem:[%s14714_s1 + $0x98c] ss:$8 sps:$4 sm:$0xff]  }
 0x24d   : > { %5023 = vmatpush1.bf16.msra.mxu1 %v10968_v21  ;;  %9383 = vmatprep.subr.msk.bf16.mxu0 %vm638_vm0, %v9382_v17  ;;  %v11029_v21 = vld [vmem:[%s14714_s1 + $0x1740] ss:$8 sps:$4 sm:$0xff]   ;;  %v11035_v17 = vld [vmem:[%s14714_s1 + $0x1750] ss:$8 sps:$4 sm:$0xff]  }
 0x24e   : > { %5024 = vmatprep.subr.bf16.mxu1 %v10976_v16  ;;  %v11032_v16 = vld [vmem:[%s14714_s1 + $0x988] ss:$8 sps:$4 sm:$0xff]  }
 0x250   : > { %5044 = vmatpush1.bf16.msra.mxu0 %v4989_v22  ;;  %v11038_v22 = vld [vmem:[%s14714_s1 + $0x998] ss:$8 sps:$4 sm:$0xff]  }
 0x251   : > { %5025 = vmatpush1.bf16.msra.mxu1 %v10974_v19  ;;  %5345 = vmatprep.subr.bf16.mxu0 %v10981_v59  ;;  %v11043_v19 = vld [vmem:[%s14714_s1 + $0x1764] ss:$8 sps:$4 sm:$0xff]   ;;  %v11041_v59 = vld [vmem:[%s14714_s1 + $0x1760] ss:$8 sps:$4 sm:$0xff]  }
 0x252   : > { %5386 = vmatprep.subr.bf16.mxu1 %v10984_v28  ;;  %v11046_v28 = vld [vmem:[%s14714_s1 + $0x9ac] ss:$8 sps:$4 sm:$0xff]  }
 0x253   : > { %9384 = vmatmul.mubr.msk.bf16.vlgmr.msra.gmra.mrb[52].mxu0 %vm634_vm1, %v4440_v39  ;;  %v10991_v39 = vld [vmem:[%s14714_s1 + $0x918] ss:$8 sps:$4 sm:$0xff]  }
 0x254   : > { %5027 = vmatmul.mubr.bf16.vlgmr.msra.gmra.mrb[52].mxu1 %v4438_v49  ;;  %5346 = vmatpush1.bf16.msra.mxu0 %v10979_v14  ;;  %v11016_v49 = vld [vmem:[%s14714_s1 + $0x95c] ss:$8 sps:$4 sm:$0xff]   ;;  %v11047_v14 = vld [vmem:[%s14714_s1 + $0x1770] ss:$8 sps:$4 sm:$0xff]  }
 0x255   : > { %5387 = vmatpush1.bf16.msra.mxu1 %v10982_v32  ;;  %5347 = vmatprep.subr.bf16.mxu0 %v10987_v3  ;;  %v11052_v32 = vld [vmem:[%s14714_s1 + $0x9bc] ss:$8 sps:$4 sm:$0xff]  }
 0x256   : > { %5388 = vmatprep.subr.bf16.mxu1 %v10990_v0  ;;  %5418 = vmatprep.mubr.bf16.mxu1 %v11507_v2  ;;  %v11055_v3 = vld [vmem:[%s14714_s1 + $0x1784] ss:$8 sps:$4 sm:$0xff]  }
 0x257   : > { %5377 = vmatprep.mubr.bf16.mxu0 %v5125_v1 }
 0x258   : > { %5348 = vmatpush1.bf16.msra.mxu0 %v10985_v31 }
 0x259   : > { %5389 = vmatpush1.bf16.msra.mxu1 %v10988_v33  ;;  %5349 = vmatprep.subr.bf16.mxu0 %v10993_v34 }
 0x25a   : > { %5390 = vmatprep.subr.bf16.mxu1 %v10996_v23 }
 0x25c   : > { %5350 = vmatpush1.bf16.msra.mxu0 %v10991_v39 }
 0x25d   : > { %5391 = vmatpush1.bf16.msra.mxu1 %v10994_v60  ;;  %5351 = vmatprep.subr.bf16.mxu0 %v10999_v36  ;;  %v11050_v36 = vld [vmem:[%s14714_s1 + $0x9b8] ss:$8 sps:$4 sm:$0xff]  }
 0x25e   : > { %5392 = vmatprep.subr.bf16.mxu1 %v11002_v37  ;;  %v11053_v37 = vld [vmem:[%s14714_s1 + $0x1780] ss:$8 sps:$4 sm:$0xff]  }
 0x260   : > { %5352 = vmatpush1.bf16.msra.mxu0 %v10997_v18 }
 0x261   : > { %5393 = vmatpush1.bf16.msra.mxu1 %v11000_v40  ;;  %5353 = vmatprep.subr.bf16.mxu0 %v11005_v41  ;;  %v11058_v41 = vld [vmem:[%s14714_s1 + $0x9cc] ss:$8 sps:$4 sm:$0xff]  }
 0x262   : > { %9468 = vmatprep.subr.msk.bf16.mxu1 %vm638_vm0, %v9467_v27  ;;  %v11061_v27 = vld [vmem:[%s14714_s1 + $0x1794] ss:$8 sps:$4 sm:$0xff]  }
 0x264   : > { %5354 = vmatpush1.bf16.msra.mxu0 %v11003_v53  ;;  %v11062_v53 = vld [vmem:[%s14714_s1 + $0x9d8] ss:$8 sps:$4 sm:$0xff]  }
 0x265   : > { %5395 = vmatpush1.bf16.msra.mxu1 %v5340_v54  ;;  %5355 = vmatprep.subr.bf16.mxu0 %v11010_v52  ;;  %v11065_v54 = vld [vmem:[%s14714_s1 + $0x17a0] ss:$8 sps:$4 sm:$0xff]   ;;  %v11070_v52 = vld [vmem:[%s14714_s1 + $0x9ec] ss:$8 sps:$4 sm:$0xff]  }
 0x266   : > { %5682 = vmatprep.subr.bf16.mxu1 %v11013_v25  ;;  %v11073_v25 = vld [vmem:[%s14714_s1 + $0x17b4] ss:$8 sps:$4 sm:$0xff]  }
 0x268   : > { %9469 = vmatmul.mubr.msk.bf16.vlgmr.msra.gmra.mrb[56].mxu1 %vm634_vm1, %v13585_v26  ;;  %5356 = vmatpush1.bf16.msra.mxu0 %v11008_v47  ;;  %v5120_v47 = vrot.slane %v11803_v20, 3 }
 0x269   : > { %5683 = vmatpush1.bf16.msra.mxu1 %v11011_v48  ;;  %5357 = vmatprep.subr.bf16.mxu0 %v11016_v49  ;;  %v5121_v48 = vrot.slane %v11788_v15, 4  ;;  %v11068_v49 = vld [vmem:[%s14714_s1 + $0x9e8] ss:$8 sps:$4 sm:$0xff]   ;;  %v11079_v15 = vld [vmem:[%s14714_s1 + $0x1814] ss:$8 sps:$4 sm:$0xff]  }
 0x26a   : > { %5684 = vmatprep.subr.bf16.mxu1 %v11019_v50  ;;  %v3321_v46 = vpop.f32.mrb[32].mxu0  ;;  %5714 = vmatprep.mubr.bf16.mxu1 %v5125_v1  ;;  %v11071_v50 = vld [vmem:[%s14714_s1 + $0x17b0] ss:$8 sps:$4 sm:$0xff]  }
 0x26b   : > { %v3363_v42 = vadd.f32 %v13466_v58, %v3321_v46  ;;  %v3323_v5 = vpop.f32.mrb[33].mxu0  ;;  %v11028_v58 = vld [vmem:[%s14714_s1 + $0x97c] ss:$8 sps:$4 sm:$0xff]   ;;  %v5122_v20 = vor.u32 %v5121_v48, %v5120_v47  ;;  %v11132_v47 = vld [vmem:[%s14714_s1 + $0xa90] ss:$8 sps:$4 sm:$0xff]  }
 0x26c   : > { %v3365_v7 = vadd.f32 %v13468_v63, %v3323_v5  ;;  %v3325_v45 = vpop.f32.mrb[34].mxu0  ;;  %5358 = vmatpush1.bf16.msra.mxu0 %v11014_v51  ;;  %v11031_v63 = vld [vmem:[%s14714_s1 + $0x1744] ss:$8 sps:$4 sm:$0xff]   ;;  %v11136_v48 = vld [vmem:[%s14714_s1 + $0x1858] ss:$8 sps:$4 sm:$0xff]  }
 0x26d   : > { %5685 = vmatpush1.bf16.msra.mxu1 %v11017_v57  ;;  %v13622_v9 = vadd.f32 %v3363_v42, %v13340_v61  ;;  %v3326_v10 = vpop.f32.mrb[35].mxu0  ;;  %5359 = vmatprep.subr.bf16.mxu0 %v11022_v11  ;;  %v11026_v61 = vld [vmem:[%s14714_s1 + $0x978] ss:$8 sps:$4 sm:$0xff]   ;;  %v11076_v51 = vld [vmem:[%s14714_s1 + $0x17c4] ss:$8 sps:$4 sm:$0xff]  }
 0x26e   : > { %5686 = vmatprep.subr.bf16.mxu1 %v11025_v43  ;;  %v13631_v12 = vadd.f32 %v3365_v7, %v13349_v4  ;;  %v11037_v4 = vld [vmem:[%s14714_s1 + $0x1754] ss:$8 sps:$4 sm:$0xff]   ;;  %v11074_v57 = vld [vmem:[%s14714_s1 + $0x17c0] ss:$8 sps:$4 sm:$0xff]   ;;  %v11077_v11 = vld [vmem:[%s14714_s1 + $0x1810] ss:$8 sps:$4 sm:$0xff]  }
 0x26f   : > { %v11082_v43 = vld [vmem:[%s14714_s1 + $0x17d4] ss:$8 sps:$4 sm:$0xff]   ;;  %v11085_v46 = vld [vmem:[%s14714_s1 + $0x1824] ss:$8 sps:$4 sm:$0xff]   ;;  %v11080_v45 = vld [vmem:[%s14714_s1 + $0x17d0] ss:$8 sps:$4 sm:$0xff]  }
 0x270   : > { %5360 = vmatpush1.bf16.msra.mxu0 %v11020_v6  ;;  %v11083_v6 = vld [vmem:[%s14714_s1 + $0x1820] ss:$8 sps:$4 sm:$0xff]   ;;  %v11088_v10 = vld [vmem:[%s14714_s1 + $0x17e4] ss:$8 sps:$4 sm:$0xff]  }
 0x271   : > { %5687 = vmatpush1.bf16.msra.mxu1 %v11023_v8  ;;  %5361 = vmatprep.subr.bf16.mxu0 %v11028_v58  ;;  %v11091_v58 = vld [vmem:[%s14714_s1 + $0x1834] ss:$8 sps:$4 sm:$0xff]  }
 0x272   : > { %5688 = vmatprep.subr.bf16.mxu1 %v11031_v63  ;;  %v11086_v63 = vld [vmem:[%s14714_s1 + $0x17e0] ss:$8 sps:$4 sm:$0xff]  }
 0x274   : > { %5362 = vmatpush1.bf16.msra.mxu0 %v11026_v61  ;;  %v11089_v61 = vld [vmem:[%s14714_s1 + $0x1830] ss:$8 sps:$4 sm:$0xff]  }
 0x275   : > { %5689 = vmatpush1.bf16.msra.mxu1 %v11029_v21  ;;  %5363 = vmatprep.subr.bf16.mxu0 %v11034_v13  ;;  %v11094_v21 = vld [vmem:[%s14714_s1 + $0x17f4] ss:$8 sps:$4 sm:$0xff]   ;;  %v11097_v13 = vld [vmem:[%s14714_s1 + $0x1844] ss:$8 sps:$4 sm:$0xff]  }
 0x276   : > { %5690 = vmatprep.subr.bf16.mxu1 %v11037_v4  ;;  %v9510_v4 = vld [vmem:[%s14714_s1 + $0x1850] sm:$0x33] }
 0x278   : > { %5364 = vmatpush1.bf16.msra.mxu0 %v11032_v16  ;;  %v11092_v16 = vld [vmem:[%s14714_s1 + $0x17f0] ss:$8 sps:$4 sm:$0xff]  }
 0x279   : > { %5691 = vmatpush1.bf16.msra.mxu1 %v11035_v17  ;;  %5365 = vmatprep.subr.bf16.mxu0 %v11040_v29  ;;  %v11095_v17 = vld [vmem:[%s14714_s1 + $0x1840] ss:$8 sps:$4 sm:$0xff]   ;;  %v11100_v29 = vld [vmem:[%s14714_s1 + $0x1804] ss:$8 sps:$4 sm:$0xff]  }
 0x27a   : > { %5692 = vmatprep.subr.bf16.mxu1 %v11043_v19  ;;  %v9552_v19 = vcombine.high %v9510_v4, %v9510_v4 }
 0x27c   : > { %5366 = vmatpush1.bf16.msra.mxu0 %v11038_v22  ;;  %v9551_v22 = vcombine.low %v9510_v4, %v9510_v4  ;;  %v11160_v4 = vld [vmem:[%s14714_s1 + $0x1898] ss:$8 sps:$4 sm:$0xff]  }
 0x27d   : > { %5693 = vmatpush1.bf16.msra.mxu1 %v11041_v59  ;;  %5367 = vmatprep.subr.bf16.mxu0 %v11046_v28  ;;  %v11098_v59 = vld [vmem:[%s14714_s1 + $0x1800] ss:$8 sps:$4 sm:$0xff]  }
 0x27e   : > { %5694 = vmatprep.subr.bf16.mxu1 %v11049_v24  ;;  %v3699_v1 = vpop.f32.mrb[36].mxu0  ;;  %v5677_v28 = vsel %vm638_vm0, %v9551_v22, 0  ;;  %v11105_v24 = vld [vmem:[%s14714_s1 + $0xa44] ss:$8 sps:$4 sm:$0xff]   ;;  %v11171_v22 = vld [vmem:[%s14714_s1 + $0xaf4] ss:$8 sps:$4 sm:$0xff]  }
 0x27f   : > { %v3658_v0 = vpop.f32.mrb[36].mxu1  ;;  %v3701_v34 = vpop.f32.mrb[37].mxu0 }
 0x280   : > { %v3700_v31 = vadd.f32 %v3699_v1, %v3658_v0  ;;  %v3660_v33 = vpop.f32.mrb[37].mxu1  ;;  %v3703_v60 = vpop.f32.mrb[38].mxu0  ;;  %5368 = vmatpush1.bf16.msra.mxu0 %v11044_v55  ;;  %v11108_v55 = vld [vmem:[%s14714_s1 + $0xb44] ss:$8 sps:$4 sm:$0xff]   ;;  %v11114_v0 = vld [vmem:[%s14714_s1 + $0xb54] ss:$8 sps:$4 sm:$0xff]  }
 0x281   : > { %v3702_v23 = vadd.f32 %v3701_v34, %v3660_v33  ;;  %v3662_v39 = vpop.f32.mrb[38].mxu1  ;;  %5695 = vmatpush1.bf16.msra.mxu1 %v11047_v14  ;;  %v3704_v40 = vpop.f32.mrb[39].mxu0  ;;  %5369 = vmatprep.subr.bf16.mxu0 %v11052_v32  ;;  %v11103_v14 = vld [vmem:[%s14714_s1 + $0xa40] ss:$8 sps:$4 sm:$0xff]   ;;  %v13814_v1 = vld [vmem:[%s11606_s7 + $0xc] sm:$0xff] }
 0x282   : > { %v13688_v62 = vadd.f32 %v3700_v31, %v13406_v35  ;;  %v3663_v18 = vpop.f32.mrb[39].mxu1  ;;  %5696 = vmatprep.subr.bf16.mxu1 %v11055_v3  ;;  %v11056_v35 = vld [vmem:[%s14714_s1 + $0x9c8] ss:$8 sps:$4 sm:$0xff]   ;;  %v11111_v3 = vld [vmem:[%s14714_s1 + $0xa54] ss:$8 sps:$4 sm:$0xff]   ;;  %v9597_v31 = vcombine.high %v13814_v1, %v13814_v1 }
 0x283   : > { %v13697_v44 = vadd.f32 %v3702_v23, %v13415_v38  ;;  %v11067_v38 = vld [vmem:[%s14714_s1 + $0x17a4] ss:$8 sps:$4 sm:$0xff]   ;;  %v11106_v32 = vld [vmem:[%s14714_s1 + $0xb40] ss:$8 sps:$4 sm:$0xff]   ;;  %v11109_v33 = vld [vmem:[%s14714_s1 + $0xa50] ss:$8 sps:$4 sm:$0xff]  }
 0x284   : > { %5370 = vmatpush1.bf16.msra.mxu0 %v11050_v36  ;;  %v11112_v34 = vld [vmem:[%s14714_s1 + $0xb50] ss:$8 sps:$4 sm:$0xff]   ;;  %v11117_v23 = vld [vmem:[%s14714_s1 + $0xa64] ss:$8 sps:$4 sm:$0xff]   ;;  %v11115_v39 = vld [vmem:[%s14714_s1 + $0xa60] ss:$8 sps:$4 sm:$0xff]  }
 0x285   : > { %5697 = vmatpush1.bf16.msra.mxu1 %v11053_v37  ;;  %5371 = vmatprep.subr.bf16.mxu0 %v11058_v41  ;;  %v11118_v60 = vld [vmem:[%s14714_s1 + $0xb60] ss:$8 sps:$4 sm:$0xff]   ;;  %v11123_v36 = vld [vmem:[%s14714_s1 + $0xa74] ss:$8 sps:$4 sm:$0xff]   ;;  %v11121_v40 = vld [vmem:[%s14714_s1 + $0xa70] ss:$8 sps:$4 sm:$0xff]  }
 0x286   : > { %5698 = vmatprep.subr.bf16.mxu1 %v11061_v27  ;;  %v11126_v37 = vld [vmem:[%s14714_s1 + $0xb74] ss:$8 sps:$4 sm:$0xff]   ;;  %v9595_v18 = vld [vmem:[%s14714_s1 + $0xb80] sm:$0x33]  ;;  %v11124_v41 = vld [vmem:[%s14714_s1 + $0xb70] ss:$8 sps:$4 sm:$0xff]  }
 0x287   : > { %v11129_v27 = vld [vmem:[%s14714_s1 + $0xa84] ss:$8 sps:$4 sm:$0xff]  }
 0x288   : > { %5372 = vmatpush1.bf16.msra.mxu0 %v11056_v35  ;;  %v9640_v35 = vcombine.high %v9595_v18, %v9595_v18 }
 0x289   : > { %5699 = vmatpush1.bf16.msra.mxu1 %v11059_v56  ;;  %5373 = vmatprep.subr.bf16.mxu0 %v11064_v30  ;;  %v9639_v56 = vcombine.low %v9595_v18, %v9595_v18  ;;  %v11127_v30 = vld [vmem:[%s14714_s1 + $0xa80] ss:$8 sps:$4 sm:$0xff]  }
 0x28a   : > { %5700 = vmatprep.subr.bf16.mxu1 %v11067_v38 }
 0x28b   : > { %v6022_v38 = vsel %vm638_vm0, %v9639_v56, 0  ;;  %v11189_v56 = vld [vmem:[%s14714_s1 + $0xb24] ss:$8 sps:$4 sm:$0xff]  }
 0x28c   : > { %5374 = vmatpush1.bf16.msra.mxu0 %v11062_v53  ;;  %v11134_v53 = vld [vmem:[%s14714_s1 + $0xa94] ss:$8 sps:$4 sm:$0xff]  }
 0x28d   : > { %5701 = vmatpush1.bf16.msra.mxu1 %v11065_v54  ;;  %5375 = vmatprep.subr.bf16.mxu0 %v11070_v52  ;;  %v11138_v54 = vld [vmem:[%s14714_s1 + $0x185c] ss:$8 sps:$4 sm:$0xff]   ;;  %v13869_v52 = vld [vmem:[%s11606_s7 + $0x14] sm:$0xf] }
 0x28e   : > { %5702 = vmatprep.subr.bf16.mxu1 %v11073_v25  ;;  %v13873_v25 = vcombine.low %v13869_v52, %v13869_v52 }
 0x290   : > { %5376 = vmatpush1.bf16.msra.mxu0 %v11068_v49  ;;  %v11141_v49 = vld [vmem:[%s14714_s1 + $0xaa4] ss:$8 sps:$4 sm:$0xff]  }
 0x291   : > { %5703 = vmatpush1.bf16.msra.mxu1 %v11071_v50  ;;  %5723 = vmatprep.subr.bf16.mxu0 %v11079_v15  ;;  %v11144_v50 = vld [vmem:[%s14714_s1 + $0x186c] ss:$8 sps:$4 sm:$0xff]   ;;  %v11142_v15 = vld [vmem:[%s14714_s1 + $0x1868] ss:$8 sps:$4 sm:$0xff]  }
 0x292   : > { %5704 = vmatprep.subr.bf16.mxu1 %v11076_v51  ;;  %v11139_v51 = vld [vmem:[%s14714_s1 + $0xaa0] ss:$8 sps:$4 sm:$0xff]  }
 0x293   : > { %v13749_v42 = vpop.f32.mrb[40].mxu1  ;;  %5378 = vmatmul.mubr.bf16.vlgmr.msra.gmra.mrb[56].mxu0 %v5122_v20 }
 0x294   : > { %v13751_v5 = vpop.f32.mrb[41].mxu1  ;;  %5724 = vmatpush1.bf16.msra.mxu0 %v11077_v11  ;;  %5755 = vmatprep.mubr.bf16.mxu0 %v11507_v2 }
 0x295   : > { %v4054_v7 = vpop.f32.mrb[42].mxu1  ;;  %5705 = vmatpush1.bf16.msra.mxu1 %v11074_v57  ;;  %5725 = vmatprep.subr.bf16.mxu0 %v11085_v46  ;;  %v11150_v57 = vld [vmem:[%s14714_s1 + $0x187c] ss:$8 sps:$4 sm:$0xff]  }
 0x296   : > { %v4055_v8 = vpop.f32.mrb[43].mxu1  ;;  %5706 = vmatprep.subr.bf16.mxu1 %v11082_v43 }
 0x297   : > { %v11148_v8 = vld [vmem:[%s14714_s1 + $0x1878] ss:$8 sps:$4 sm:$0xff]  }
 0x298   : > { %5726 = vmatpush1.bf16.msra.mxu0 %v11083_v6  ;;  %v11145_v6 = vld [vmem:[%s14714_s1 + $0xab0] ss:$8 sps:$4 sm:$0xff]  }
 0x299   : > { %5707 = vmatpush1.bf16.msra.mxu1 %v11080_v45  ;;  %5727 = vmatprep.subr.bf16.mxu0 %v11091_v58 }
 0x29a   : > { %5708 = vmatprep.subr.bf16.mxu1 %v11088_v10 }
 0x29c   : > { %5728 = vmatpush1.bf16.msra.mxu0 %v11089_v61  ;;  %v11154_v61 = vld [vmem:[%s14714_s1 + $0x1888] ss:$8 sps:$4 sm:$0xff]  }
 0x29d   : > { %5709 = vmatpush1.bf16.msra.mxu1 %v11086_v63  ;;  %5729 = vmatprep.subr.bf16.mxu0 %v11097_v13  ;;  %v11157_v13 = vld [vmem:[%s14714_s1 + $0xad0] ss:$8 sps:$4 sm:$0xff]  }
 0x29e   : > { %5710 = vmatprep.subr.bf16.mxu1 %v11094_v21  ;;  %v11159_v21 = vld [vmem:[%s14714_s1 + $0xad4] ss:$8 sps:$4 sm:$0xff]  }
 0x2a0   : > { %5730 = vmatpush1.bf16.msra.mxu0 %v11095_v17  ;;  %v11168_v17 = vld [vmem:[%s14714_s1 + $0x18ac] ss:$8 sps:$4 sm:$0xff]  }
 0x2a1   : > { %5711 = vmatpush1.bf16.msra.mxu1 %v11092_v16  ;;  %9553 = vmatprep.subr.msk.bf16.mxu0 %vm638_vm0, %v9552_v19  ;;  %v11165_v16 = vld [vmem:[%s14714_s1 + $0xae4] ss:$8 sps:$4 sm:$0xff]   ;;  %v11166_v19 = vld [vmem:[%s14714_s1 + $0x18a8] ss:$8 sps:$4 sm:$0xff]  }
 0x2a2   : > { %5712 = vmatprep.subr.bf16.mxu1 %v11100_v29  ;;  %v11163_v29 = vld [vmem:[%s14714_s1 + $0xae0] ss:$8 sps:$4 sm:$0xff]  }
 0x2a4   : > { %5732 = vmatpush1.bf16.msra.mxu0 %v5677_v28  ;;  %v11169_v28 = vld [vmem:[%s14714_s1 + $0xaf0] ss:$8 sps:$4 sm:$0xff]  }
 0x2a5   : > { %5713 = vmatpush1.bf16.msra.mxu1 %v11098_v59  ;;  %6027 = vmatprep.subr.bf16.mxu0 %v11105_v24  ;;  %v11174_v59 = vld [vmem:[%s14714_s1 + $0x18bc] ss:$8 sps:$4 sm:$0xff]   ;;  %v11172_v24 = vld [vmem:[%s14714_s1 + $0x18b8] ss:$8 sps:$4 sm:$0xff]  }
 0x2a6   : > { %6068 = vmatprep.subr.bf16.mxu1 %v11108_v55  ;;  %v11177_v55 = vld [vmem:[%s14714_s1 + $0xb04] ss:$8 sps:$4 sm:$0xff]  }
 0x2a7   : > { %9554 = vmatmul.mubr.msk.bf16.vlgmr.msra.gmra.mrb[60].mxu0 %vm634_vm1, %v13585_v26  ;;  %v11120_v26 = vld [vmem:[%s14714_s1 + $0xb64] ss:$8 sps:$4 sm:$0xff]  }
 0x2a8   : > { %5715 = vmatmul.mubr.bf16.vlgmr.msra.gmra.mrb[60].mxu1 %v5122_v20  ;;  %6028 = vmatpush1.bf16.msra.mxu0 %v11103_v14  ;;  %v11147_v20 = vld [vmem:[%s14714_s1 + $0xab4] ss:$8 sps:$4 sm:$0xff]  }
 0x2a9   : > { %6069 = vmatpush1.bf16.msra.mxu1 %v11106_v32  ;;  %6029 = vmatprep.subr.bf16.mxu0 %v11111_v3  ;;  %v11180_v14 = vld [vmem:[%s14714_s1 + $0x18cc] ss:$8 sps:$4 sm:$0xff]  }
 0x2aa   : > { %6070 = vmatprep.subr.bf16.mxu1 %v11114_v0  ;;  %6100 = vmatprep.mubr.bf16.mxu1 %v11507_v2 }
 0x2ab   : > { %6059 = vmatprep.mubr.bf16.mxu0 %v9597_v31 }
 0x2ac   : > { %6030 = vmatpush1.bf16.msra.mxu0 %v11109_v33 }
 0x2ad   : > { %6071 = vmatpush1.bf16.msra.mxu1 %v11112_v34  ;;  %6031 = vmatprep.subr.bf16.mxu0 %v11117_v23 }
 0x2ae   : > { %6072 = vmatprep.subr.bf16.mxu1 %v11120_v26 }
 0x2b0   : > { %6032 = vmatpush1.bf16.msra.mxu0 %v11115_v39  ;;  %v11175_v39 = vld [vmem:[%s14714_s1 + $0xb00] ss:$8 sps:$4 sm:$0xff]  }
 0x2b1   : > { %6073 = vmatpush1.bf16.msra.mxu1 %v11118_v60  ;;  %6033 = vmatprep.subr.bf16.mxu0 %v11123_v36  ;;  %v11178_v60 = vld [vmem:[%s14714_s1 + $0x18c8] ss:$8 sps:$4 sm:$0xff]  }
 0x2b2   : > { %6074 = vmatprep.subr.bf16.mxu1 %v11126_v37 }
 0x2b4   : > { %6034 = vmatpush1.bf16.msra.mxu0 %v11121_v40  ;;  %v11183_v40 = vld [vmem:[%s14714_s1 + $0xb14] ss:$8 sps:$4 sm:$0xff]  }
 0x2b5   : > { %6075 = vmatpush1.bf16.msra.mxu1 %v11124_v41  ;;  %6035 = vmatprep.subr.bf16.mxu0 %v11129_v27  ;;  %v11186_v41 = vld [vmem:[%s14714_s1 + $0x18dc] ss:$8 sps:$4 sm:$0xff]  }
 0x2b6   : > { %9641 = vmatprep.subr.msk.bf16.mxu1 %vm638_vm0, %v9640_v35  ;;  %v11184_v35 = vld [vmem:[%s14714_s1 + $0x18d8] ss:$8 sps:$4 sm:$0xff]  }
 0x2b8   : > { %6036 = vmatpush1.bf16.msra.mxu0 %v11127_v30  ;;  %v11187_v30 = vld [vmem:[%s14714_s1 + $0xb20] ss:$8 sps:$4 sm:$0xff]  }
 0x2b9   : > { %6077 = vmatpush1.bf16.msra.mxu1 %v6022_v38  ;;  %6037 = vmatprep.subr.bf16.mxu0 %v11134_v53  ;;  %v11190_v38 = vld [vmem:[%s14714_s1 + $0x18e8] ss:$8 sps:$4 sm:$0xff]   ;;  %v11195_v53 = vld [vmem:[%s14714_s1 + $0xb34] ss:$8 sps:$4 sm:$0xff]  }
 0x2ba   : > { %6364 = vmatprep.subr.bf16.mxu1 %v11138_v54  ;;  %v11198_v54 = vld [vmem:[%s14714_s1 + $0x18fc] ss:$8 sps:$4 sm:$0xff]  }
 0x2bc   : > { %9642 = vmatmul.mubr.msk.bf16.vlgmr.msra.gmra.mrb[64].mxu1 %vm634_vm1, %v13873_v25  ;;  %6038 = vmatpush1.bf16.msra.mxu0 %v11132_v47  ;;  %v11193_v47 = vld [vmem:[%s14714_s1 + $0xb30] ss:$8 sps:$4 sm:$0xff]  }
 0x2bd   : > { %6365 = vmatpush1.bf16.msra.mxu1 %v11136_v48  ;;  %6039 = vmatprep.subr.bf16.mxu0 %v11141_v49  ;;  %v11196_v48 = vld [vmem:[%s14714_s1 + $0x18f8] ss:$8 sps:$4 sm:$0xff]   ;;  %v11203_v49 = vld [vmem:[%s14714_s1 + $0x190c] ss:$8 sps:$4 sm:$0xff]  }
 0x2be   : > { %6366 = vmatprep.subr.bf16.mxu1 %v11144_v50  ;;  %v4009_v11 = vpop.f32.mrb[40].mxu0  ;;  %6396 = vmatprep.mubr.bf16.mxu1 %v9597_v31  ;;  %v11206_v50 = vld [vmem:[%s14714_s1 + $0x195c] ss:$8 sps:$4 sm:$0xff]  }
 0x2bf   : > { %v4051_v43 = vadd.f32 %v13749_v42, %v4009_v11  ;;  %v4011_v46 = vpop.f32.mrb[41].mxu0  ;;  %v11153_v42 = vld [vmem:[%s14714_s1 + $0xac4] ss:$8 sps:$4 sm:$0xff]  }
 0x2c0   : > { %v4053_v7 = vadd.f32 %v13751_v5, %v4011_v46  ;;  %v4013_v45 = vpop.f32.mrb[42].mxu0  ;;  %6040 = vmatpush1.bf16.msra.mxu0 %v11139_v51  ;;  %v11156_v5 = vld [vmem:[%s14714_s1 + $0x188c] ss:$8 sps:$4 sm:$0xff]   ;;  %v14025_v51 = vcombine.low %v13814_v1, %v13814_v1 }
 0x2c1   : > { %6367 = vmatpush1.bf16.msra.mxu1 %v11142_v15  ;;  %v13910_v10 = vadd.f32 %v4051_v43, %v13622_v9  ;;  %v4014_v58 = vpop.f32.mrb[43].mxu0  ;;  %6041 = vmatprep.subr.bf16.mxu0 %v11147_v20  ;;  %v11151_v9 = vld [vmem:[%s14714_s1 + $0xac0] ss:$8 sps:$4 sm:$0xff]   ;;  %v11212_v11 = vld [vmem:[%s14714_s1 + $0x196c] ss:$8 sps:$4 sm:$0xff]  }
 0x2c2   : > { %6368 = vmatprep.subr.bf16.mxu1 %v11150_v57  ;;  %v13919_v63 = vadd.f32 %v4053_v7, %v13631_v12  ;;  %v11162_v12 = vld [vmem:[%s14714_s1 + $0x189c] ss:$8 sps:$4 sm:$0xff]   ;;  %v11201_v15 = vld [vmem:[%s14714_s1 + $0x1908] ss:$8 sps:$4 sm:$0xff]   ;;  %v11204_v20 = vld [vmem:[%s14714_s1 + $0x1958] ss:$8 sps:$4 sm:$0xff]  }
 0x2c3   : > { %v11209_v57 = vld [vmem:[%s14714_s1 + $0x191c] ss:$8 sps:$4 sm:$0xff]   ;;  %v11207_v45 = vld [vmem:[%s14714_s1 + $0x1918] ss:$8 sps:$4 sm:$0xff]   ;;  %v11215_v58 = vld [vmem:[%s14714_s1 + $0x192c] ss:$8 sps:$4 sm:$0xff]  }
 0x2c4   : > { %6042 = vmatpush1.bf16.msra.mxu0 %v11145_v6  ;;  %v11210_v6 = vld [vmem:[%s14714_s1 + $0x1968] ss:$8 sps:$4 sm:$0xff]  }
 0x2c5   : > { %6369 = vmatpush1.bf16.msra.mxu1 %v11148_v8  ;;  %6043 = vmatprep.subr.bf16.mxu0 %v11153_v42  ;;  %v11218_v42 = vld [vmem:[%s14714_s1 + $0x197c] ss:$8 sps:$4 sm:$0xff]  }
 0x2c6   : > { %6370 = vmatprep.subr.bf16.mxu1 %v11156_v5  ;;  %v14058_v5 = vld [vmem:[%s11606_s7 + $0x18] sm:$0x11] }
 0x2c8   : > { %6044 = vmatpush1.bf16.msra.mxu0 %v11151_v9  ;;  %v11213_v9 = vld [vmem:[%s14714_s1 + $0x1928] ss:$8 sps:$4 sm:$0xff]  }
 0x2c9   : > { %6371 = vmatpush1.bf16.msra.mxu1 %v11154_v61  ;;  %6045 = vmatprep.subr.bf16.mxu0 %v11159_v21  ;;  %v11216_v61 = vld [vmem:[%s14714_s1 + $0x1978] ss:$8 sps:$4 sm:$0xff]   ;;  %v11221_v21 = vld [vmem:[%s14714_s1 + $0x193c] ss:$8 sps:$4 sm:$0xff]  }
 0x2ca   : > { %6372 = vmatprep.subr.bf16.mxu1 %v11162_v12  ;;  %v11224_v12 = vld [vmem:[%s14714_s1 + $0x198c] ss:$8 sps:$4 sm:$0xff]  }
 0x2cc   : > { %6046 = vmatpush1.bf16.msra.mxu0 %v11157_v13  ;;  %v9683_v13 = vld [vmem:[%s14714_s1 + $0x1998] sm:$0x33] }
 0x2cd   : > { %6373 = vmatpush1.bf16.msra.mxu1 %v11160_v4  ;;  %6047 = vmatprep.subr.bf16.mxu0 %v11165_v16  ;;  %v14077_v4 = vcombine.high %v13814_v1, %v14058_v5  ;;  %v11219_v16 = vld [vmem:[%s14714_s1 + $0x1938] ss:$8 sps:$4 sm:$0xff]  }
 0x2ce   : > { %6374 = vmatprep.subr.bf16.mxu1 %v11168_v17  ;;  %v11222_v17 = vld [vmem:[%s14714_s1 + $0x1988] ss:$8 sps:$4 sm:$0xff]  }
 0x2d0   : > { %6048 = vmatpush1.bf16.msra.mxu0 %v11163_v29  ;;  %v11227_v29 = vld [vmem:[%s14714_s1 + $0x194c] ss:$8 sps:$4 sm:$0xff]  }
 0x2d1   : > { %6375 = vmatpush1.bf16.msra.mxu1 %v11166_v19  ;;  %6049 = vmatprep.subr.bf16.mxu0 %v11171_v22  ;;  %v9725_v19 = vcombine.high %v9683_v13, %v9683_v13  ;;  %v9724_v22 = vcombine.low %v9683_v13, %v9683_v13 }
 0x2d2   : > { %6376 = vmatprep.subr.bf16.mxu1 %v11174_v59  ;;  %v4387_v3 = vpop.f32.mrb[44].mxu0  ;;  %v6508_v59 = vshll.u32 %v14077_v4, 16 }
 0x2d3   : > { %v4346_v32 = vpop.f32.mrb[44].mxu1  ;;  %v4389_v33 = vpop.f32.mrb[45].mxu0 }
 0x2d4   : > { %v4388_v0 = vadd.f32 %v4387_v3, %v4346_v32  ;;  %v4348_v31 = vpop.f32.mrb[45].mxu1  ;;  %v4391_v26 = vpop.f32.mrb[46].mxu0  ;;  %6050 = vmatpush1.bf16.msra.mxu0 %v11169_v28  ;;  %v11225_v28 = vld [vmem:[%s14714_s1 + $0x1948] ss:$8 sps:$4 sm:$0xff]   ;;  %v6506_v32 = vshrl.u32 %v14077_v4, 16  ;;  %v6510_v3 = vrot.slane %v6508_v59, 1 }
 0x2d5   : > { %v4390_v34 = vadd.f32 %v4389_v33, %v4348_v31  ;;  %v4350_v23 = vpop.f32.mrb[46].mxu1  ;;  %6377 = vmatpush1.bf16.msra.mxu1 %v11172_v24  ;;  %v4392_v18 = vpop.f32.mrb[47].mxu0  ;;  %6051 = vmatprep.subr.bf16.mxu0 %v11177_v55  ;;  %v6359_v24 = vsel %vm638_vm0, %v9724_v22, 0  ;;  %v11232_v55 = vld [vmem:[%s14714_s1 + $0xb8c] ss:$8 sps:$4 sm:$0xff]  }
 0x2d6   : > { %v13976_v36 = vadd.f32 %v4388_v0, %v13688_v62  ;;  %v4351_v37 = vpop.f32.mrb[47].mxu1  ;;  %6378 = vmatprep.subr.bf16.mxu1 %v11180_v14  ;;  %v11181_v62 = vld [vmem:[%s14714_s1 + $0xb10] ss:$8 sps:$4 sm:$0xff]   ;;  %v11235_v14 = vld [vmem:[%s14714_s1 + $0xc8c] ss:$8 sps:$4 sm:$0xff]   ;;  %v6511_v23 = vor.u32 %v6510_v3, %v6506_v32 }
 0x2d7   : > { %v13985_v27 = vadd.f32 %v4390_v34, %v13697_v44  ;;  %v11192_v44 = vld [vmem:[%s14714_s1 + $0x18ec] ss:$8 sps:$4 sm:$0xff]   ;;  %v11230_v0 = vld [vmem:[%s14714_s1 + $0xb88] ss:$8 sps:$4 sm:$0xff]   ;;  %v11238_v33 = vld [vmem:[%s14714_s1 + $0xb9c] ss:$8 sps:$4 sm:$0xff]  }
 0x2d8   : > { %6052 = vmatpush1.bf16.msra.mxu0 %v11175_v39  ;;  %v11233_v31 = vld [vmem:[%s14714_s1 + $0xc88] ss:$8 sps:$4 sm:$0xff]   ;;  %v11241_v34 = vld [vmem:[%s14714_s1 + $0xc9c] ss:$8 sps:$4 sm:$0xff]   ;;  %v11236_v26 = vld [vmem:[%s14714_s1 + $0xb98] ss:$8 sps:$4 sm:$0xff]  }
 0x2d9   : > { %6379 = vmatpush1.bf16.msra.mxu1 %v11178_v60  ;;  %6053 = vmatprep.subr.bf16.mxu0 %v11183_v40  ;;  %v11239_v39 = vld [vmem:[%s14714_s1 + $0xc98] ss:$8 sps:$4 sm:$0xff]   ;;  %v11244_v37 = vld [vmem:[%s14714_s1 + $0xbac] ss:$8 sps:$4 sm:$0xff]   ;;  %v11242_v40 = vld [vmem:[%s14714_s1 + $0xba8] ss:$8 sps:$4 sm:$0xff]  }
 0x2da   : > { %6380 = vmatprep.subr.bf16.mxu1 %v11186_v41  ;;  %v267_v60 = vld [vmem:[%s11606_s7 + $0x20] sm:$0x1]  ;;  %v11245_v41 = vld [vmem:[%s14714_s1 + $0xca8] ss:$8 sps:$4 sm:$0xff]   ;;  %v11295_v32 = vld [vmem:[%s14714_s1 + $0x19f4] ss:$8 sps:$4 sm:$0xff]  }
 0x2db   : > { %v14131_v18 = vcombine.low %v13869_v52, %v267_v60  ;;  %v11253_v52 = vld [vmem:[%s14714_s1 + $0xcbc] ss:$8 sps:$4 sm:$0xff]   ;;  %v11281_v59 = vld [vmem:[%s14714_s1 + $0x19d0] ss:$8 sps:$4 sm:$0xff]  }
 0x2dc   : > { %6054 = vmatpush1.bf16.msra.mxu0 %v11181_v62  ;;  %v11250_v62 = vld [vmem:[%s14714_s1 + $0xbbc] ss:$8 sps:$4 sm:$0xff]   ;;  %v11290_v3 = vld [vmem:[%s14714_s1 + $0xc28] ss:$8 sps:$4 sm:$0xff]  }
 0x2dd   : > { %6381 = vmatpush1.bf16.msra.mxu1 %v11184_v35  ;;  %6055 = vmatprep.subr.bf16.mxu0 %v11189_v56  ;;  %v9768_v35 = vld [vmem:[%s14714_s1 + $0xcc8] sm:$0x33]  ;;  %v6515_v56 = vshll.u32 %v14131_v18, 16 }
 0x2de   : > { %6382 = vmatprep.subr.bf16.mxu1 %v11192_v44  ;;  %v11248_v44 = vld [vmem:[%s14714_s1 + $0xbb8] ss:$8 sps:$4 sm:$0xff]  }
 0x2e0   : > { %6056 = vmatpush1.bf16.msra.mxu0 %v11187_v30  ;;  %v11251_v30 = vld [vmem:[%s14714_s1 + $0xcb8] ss:$8 sps:$4 sm:$0xff]  }
 0x2e1   : > { %6383 = vmatpush1.bf16.msra.mxu1 %v11190_v38  ;;  %6057 = vmatprep.subr.bf16.mxu0 %v11195_v53  ;;  %v11256_v38 = vld [vmem:[%s14714_s1 + $0xbcc] ss:$8 sps:$4 sm:$0xff]   ;;  %v9813_v53 = vcombine.high %v9768_v35, %v9768_v35 }
 0x2e2   : > { %6384 = vmatprep.subr.bf16.mxu1 %v11198_v54  ;;  %v9812_v54 = vcombine.low %v9768_v35, %v9768_v35 }
 0x2e4   : > { %6058 = vmatpush1.bf16.msra.mxu0 %v11193_v47  ;;  %v6513_v47 = vshrl.u32 %v14131_v18, 16 }
 0x2e5   : > { %6385 = vmatpush1.bf16.msra.mxu1 %v11196_v48  ;;  %6405 = vmatprep.subr.bf16.mxu0 %v11206_v50  ;;  %v6517_v48 = vrot.slane %v6515_v56, 1  ;;  %v6730_v50 = vsel %vm638_vm0, %v9812_v54, 0  ;;  %v11302_v56 = vld [vmem:[%s14714_s1 + $0xc48] ss:$8 sps:$4 sm:$0xff]   ;;  %v11310_v54 = vld [vmem:[%s14714_s1 + $0xc5c] ss:$8 sps:$4 sm:$0xff]  }
 0x2e6   : > { %6386 = vmatprep.subr.bf16.mxu1 %v11203_v49  ;;  %v11254_v49 = vld [vmem:[%s14714_s1 + $0xbc8] ss:$8 sps:$4 sm:$0xff]  }
 0x2e7   : > { %v14039_v43 = vpop.f32.mrb[48].mxu1  ;;  %6060 = vmatmul.mubr.bf16.vlgmr.msra.gmra.mrb[64].mxu0 %v14025_v51 }
 0x2e8   : > { %v14041_v46 = vpop.f32.mrb[49].mxu1  ;;  %6406 = vmatpush1.bf16.msra.mxu0 %v11204_v20  ;;  %6437 = vmatprep.mubr.bf16.mxu0 %v11507_v2  ;;  %v14170_v20 = vor.u32 %v6517_v48, %v6513_v47  ;;  %v11313_v47 = vld [vmem:[%s14714_s1 + $0x1a24] ss:$8 sps:$4 sm:$0xff]  }
 0x2e9   : > { %v4736_v7 = vpop.f32.mrb[50].mxu1  ;;  %6387 = vmatpush1.bf16.msra.mxu1 %v11201_v15  ;;  %6407 = vmatprep.subr.bf16.mxu0 %v11212_v11  ;;  %v11265_v15 = vld [vmem:[%s14714_s1 + $0x19a4] ss:$8 sps:$4 sm:$0xff]   ;;  %v11263_v11 = vld [vmem:[%s14714_s1 + $0x19a0] ss:$8 sps:$4 sm:$0xff]  }
 0x2ea   : > { %v4737_v8 = vpop.f32.mrb[51].mxu1  ;;  %6388 = vmatprep.subr.bf16.mxu1 %v11209_v57  ;;  %v11259_v57 = vld [vmem:[%s14714_s1 + $0xbd8] ss:$8 sps:$4 sm:$0xff]   ;;  %v11268_v7 = vld [vmem:[%s14714_s1 + $0xbec] ss:$8 sps:$4 sm:$0xff]  }
 0x2eb   : > { %v11269_v8 = vld [vmem:[%s14714_s1 + $0x19b0] ss:$8 sps:$4 sm:$0xff]  }
 0x2ec   : > { %6408 = vmatpush1.bf16.msra.mxu0 %v11210_v6  ;;  %v11266_v6 = vld [vmem:[%s14714_s1 + $0xbe8] ss:$8 sps:$4 sm:$0xff]  }
 0x2ed   : > { %6389 = vmatpush1.bf16.msra.mxu1 %v11207_v45  ;;  %6409 = vmatprep.subr.bf16.mxu0 %v11218_v42  ;;  %v11271_v45 = vld [vmem:[%s14714_s1 + $0x19b4] ss:$8 sps:$4 sm:$0xff]   ;;  %v11277_v42 = vld [vmem:[%s14714_s1 + $0x19c4] ss:$8 sps:$4 sm:$0xff]  }
 0x2ee   : > { %6390 = vmatprep.subr.bf16.mxu1 %v11215_v58  ;;  %v11274_v58 = vld [vmem:[%s14714_s1 + $0xbfc] ss:$8 sps:$4 sm:$0xff]  }
 0x2f0   : > { %6410 = vmatpush1.bf16.msra.mxu0 %v11216_v61 }
 0x2f1   : > { %6391 = vmatpush1.bf16.msra.mxu1 %v11213_v9  ;;  %6411 = vmatprep.subr.bf16.mxu0 %v11224_v12 }
 0x2f2   : > { %6392 = vmatprep.subr.bf16.mxu1 %v11221_v21 }
 0x2f4   : > { %6412 = vmatpush1.bf16.msra.mxu0 %v11222_v17  ;;  %v11275_v17 = vld [vmem:[%s14714_s1 + $0x19c0] ss:$8 sps:$4 sm:$0xff]  }
 0x2f5   : > { %6393 = vmatpush1.bf16.msra.mxu1 %v11219_v16  ;;  %9726 = vmatprep.subr.msk.bf16.mxu0 %vm638_vm0, %v9725_v19  ;;  %v11272_v16 = vld [vmem:[%s14714_s1 + $0xbf8] ss:$8 sps:$4 sm:$0xff]  }
 0x2f6   : > { %6394 = vmatprep.subr.bf16.mxu1 %v11227_v29 }
 0x2f8   : > { %6414 = vmatpush1.bf16.msra.mxu0 %v6359_v24  ;;  %v11284_v24 = vld [vmem:[%s14714_s1 + $0xc18] ss:$8 sps:$4 sm:$0xff]  }
 0x2f9   : > { %6395 = vmatpush1.bf16.msra.mxu1 %v11225_v28  ;;  %6735 = vmatprep.subr.bf16.mxu0 %v11232_v55  ;;  %v11286_v28 = vld [vmem:[%s14714_s1 + $0xc1c] ss:$8 sps:$4 sm:$0xff]   ;;  %v11287_v55 = vld [vmem:[%s14714_s1 + $0x19e0] ss:$8 sps:$4 sm:$0xff]  }
 0x2fa   : > { %6776 = vmatprep.subr.bf16.mxu1 %v11235_v14  ;;  %v11292_v14 = vld [vmem:[%s14714_s1 + $0xc2c] ss:$8 sps:$4 sm:$0xff]  }
 0x2fb   : > { %9727 = vmatmul.mubr.msk.bf16.vlgmr.msra.gmra.mrb[68].mxu0 %vm634_vm1, %v13873_v25  ;;  %v11247_v25 = vld [vmem:[%s14714_s1 + $0xcac] ss:$8 sps:$4 sm:$0xff]  }
 0x2fc   : > { %6397 = vmatmul.mubr.bf16.vlgmr.msra.gmra.mrb[68].mxu1 %v14025_v51  ;;  %6736 = vmatpush1.bf16.msra.mxu0 %v11230_v0  ;;  %v11261_v51 = vld [vmem:[%s14714_s1 + $0xbdc] ss:$8 sps:$4 sm:$0xff]   ;;  %v11293_v0 = vld [vmem:[%s14714_s1 + $0x19f0] ss:$8 sps:$4 sm:$0xff]  }
 0x2fd   : > { %6777 = vmatpush1.bf16.msra.mxu1 %v11233_v31  ;;  %6737 = vmatprep.subr.bf16.mxu0 %v11238_v33  ;;  %v11298_v31 = vld [vmem:[%s14714_s1 + $0xc3c] ss:$8 sps:$4 sm:$0xff]  }
 0x2fe   : > { %6778 = vmatprep.subr.bf16.mxu1 %v11241_v34  ;;  %6808 = vmatprep.mubr.bf16.mxu1 %v11507_v2  ;;  %v11301_v33 = vld [vmem:[%s14714_s1 + $0x1a04] ss:$8 sps:$4 sm:$0xff]   ;;  %v11296_v34 = vld [vmem:[%s14714_s1 + $0xc38] ss:$8 sps:$4 sm:$0xff]  }
 0x2ff   : > { %6767 = vmatprep.mubr.bf16.mxu0 %v6511_v23 }
 0x300   : > { %6738 = vmatpush1.bf16.msra.mxu0 %v11236_v26  ;;  %v11304_v26 = vld [vmem:[%s14714_s1 + $0xc4c] ss:$8 sps:$4 sm:$0xff]  }
 0x301   : > { %6779 = vmatpush1.bf16.msra.mxu1 %v11239_v39  ;;  %6739 = vmatprep.subr.bf16.mxu0 %v11244_v37  ;;  %v11307_v39 = vld [vmem:[%s14714_s1 + $0x1a14] ss:$8 sps:$4 sm:$0xff]  }
 0x302   : > { %6780 = vmatprep.subr.bf16.mxu1 %v11247_v25 }
 0x304   : > { %6740 = vmatpush1.bf16.msra.mxu0 %v11242_v40 }
 0x305   : > { %6781 = vmatpush1.bf16.msra.mxu1 %v11245_v41  ;;  %6741 = vmatprep.subr.bf16.mxu0 %v11250_v62 }
 0x306   : > { %6782 = vmatprep.subr.bf16.mxu1 %v11253_v52 }
 0x308   : > { %6742 = vmatpush1.bf16.msra.mxu0 %v11248_v44  ;;  %v11305_v44 = vld [vmem:[%s14714_s1 + $0x1a10] ss:$8 sps:$4 sm:$0xff]  }
 0x309   : > { %6783 = vmatpush1.bf16.msra.mxu1 %v11251_v30  ;;  %6743 = vmatprep.subr.bf16.mxu0 %v11256_v38 }
 0x30a   : > { %9814 = vmatprep.subr.msk.bf16.mxu1 %vm638_vm0, %v9813_v53 }
 0x30c   : > { %6744 = vmatpush1.bf16.msra.mxu0 %v11254_v49  ;;  %v14286_v49 = vcombine.low %v13814_v1, %v14058_v5  ;;  %v11319_v1 = vld [vmem:[%s14714_s1 + $0x1a34] ss:$8 sps:$4 sm:$0xff]  }
 0x30d   : > { %6785 = vmatpush1.bf16.msra.mxu1 %v6730_v50  ;;  %6745 = vmatprep.subr.bf16.mxu0 %v11261_v51  ;;  %v11311_v50 = vld [vmem:[%s14714_s1 + $0x1a20] ss:$8 sps:$4 sm:$0xff]  }
 0x30e   : > { %7072 = vmatprep.subr.bf16.mxu1 %v11265_v15  ;;  %v6501_v5 = vshll.u32 %v14286_v49, 16  ;;  %v11314_v51 = vld [vmem:[%s14714_s1 + $0xc68] ss:$8 sps:$4 sm:$0xff]  }
 0x30f   : > { %v11317_v15 = vld [vmem:[%s14714_s1 + $0x1a30] ss:$8 sps:$4 sm:$0xff]  }
 0x310   : > { %9815 = vmatmul.mubr.msk.bf16.vlgmr.msra.gmra.mrb[72].mxu1 %vm634_vm1, %v14170_v20  ;;  %6746 = vmatpush1.bf16.msra.mxu0 %v11259_v57  ;;  %v11322_v57 = vld [vmem:[%s14714_s1 + $0xc7c] ss:$8 sps:$4 sm:$0xff]  }
 0x311   : > { %7073 = vmatpush1.bf16.msra.mxu1 %v11263_v11  ;;  %6747 = vmatprep.subr.bf16.mxu0 %v11268_v7  ;;  %v11325_v11 = vld [vmem:[%s14714_s1 + $0x1a44] ss:$8 sps:$4 sm:$0xff]   ;;  %v6499_v7 = vshrl.u32 %v14286_v49, 16 }
 0x312   : > { %7074 = vmatprep.subr.bf16.mxu1 %v11271_v45  ;;  %v4691_v9 = vpop.f32.mrb[48].mxu0  ;;  %7104 = vmatprep.mubr.bf16.mxu1 %v6511_v23  ;;  %v11299_v23 = vld [vmem:[%s14714_s1 + $0x1a00] ss:$8 sps:$4 sm:$0xff]   ;;  %v6503_v45 = vrot.slane %v6501_v5, 1  ;;  %v11381_v5 = vld [vmem:[%s14714_s1 + $0xd10] ss:$8 sps:$4 sm:$0xff]  }
 0x313   : > { %v4733_v61 = vadd.f32 %v14039_v43, %v4691_v9  ;;  %v4693_v21 = vpop.f32.mrb[49].mxu0  ;;  %v11280_v43 = vld [vmem:[%s14714_s1 + $0xc0c] ss:$8 sps:$4 sm:$0xff]  }
 0x314   : > { %v4735_v12 = vadd.f32 %v14041_v46, %v4693_v21  ;;  %v4695_v13 = vpop.f32.mrb[50].mxu0  ;;  %6748 = vmatpush1.bf16.msra.mxu0 %v11266_v6  ;;  %v11283_v46 = vld [vmem:[%s14714_s1 + $0x19d4] ss:$8 sps:$4 sm:$0xff]   ;;  %v11320_v6 = vld [vmem:[%s14714_s1 + $0xc78] ss:$8 sps:$4 sm:$0xff]   ;;  %v6504_v9 = vor.u32 %v6503_v45, %v6499_v7 }
 0x315   : > { %7075 = vmatpush1.bf16.msra.mxu1 %v11269_v8  ;;  %v14207_v29 = vadd.f32 %v4733_v61, %v13910_v10  ;;  %v4696_v19 = vpop.f32.mrb[51].mxu0  ;;  %6749 = vmatprep.subr.bf16.mxu0 %v11274_v58  ;;  %v11278_v10 = vld [vmem:[%s14714_s1 + $0xc08] ss:$8 sps:$4 sm:$0xff]   ;;  %v11330_v58 = vld [vmem:[%s14714_s1 + $0x1a54] ss:$8 sps:$4 sm:$0xff]  }
 0x316   : > { %7076 = vmatprep.subr.bf16.mxu1 %v11277_v42  ;;  %v14216_v22 = vadd.f32 %v4735_v12, %v13919_v63  ;;  %v11289_v63 = vld [vmem:[%s14714_s1 + $0x19e4] ss:$8 sps:$4 sm:$0xff]   ;;  %v11323_v8 = vld [vmem:[%s14714_s1 + $0x1a40] ss:$8 sps:$4 sm:$0xff]   ;;  %v11328_v61 = vld [vmem:[%s14714_s1 + $0x1a50] ss:$8 sps:$4 sm:$0xff]  }
 0x317   : > { %v11333_v42 = vld [vmem:[%s14714_s1 + $0x1aa4] ss:$8 sps:$4 sm:$0xff]   ;;  %v11331_v21 = vld [vmem:[%s14714_s1 + $0x1aa0] ss:$8 sps:$4 sm:$0xff]   ;;  %v11339_v13 = vld [vmem:[%s14714_s1 + $0x1ab4] ss:$8 sps:$4 sm:$0xff]  }
 0x318   : > { %6750 = vmatpush1.bf16.msra.mxu0 %v11272_v16  ;;  %v11336_v12 = vld [vmem:[%s14714_s1 + $0x1a64] ss:$8 sps:$4 sm:$0xff]   ;;  %v11386_v7 = vld [vmem:[%s14714_s1 + $0xd20] ss:$8 sps:$4 sm:$0xff]  }
 0x319   : > { %7077 = vmatpush1.bf16.msra.mxu1 %v11275_v17  ;;  %6751 = vmatprep.subr.bf16.mxu0 %v11280_v43  ;;  %v11334_v43 = vld [vmem:[%s14714_s1 + $0x1a60] ss:$8 sps:$4 sm:$0xff]  }
 0x31a   : > { %7078 = vmatprep.subr.bf16.mxu1 %v11283_v46  ;;  %v11337_v46 = vld [vmem:[%s14714_s1 + $0x1ab0] ss:$8 sps:$4 sm:$0xff]  }
 0x31b   : > { %v11389_v45 = vld [vmem:[%s14714_s1 + $0x1ae8] ss:$8 sps:$4 sm:$0xff]  }
 0x31c   : > { %6752 = vmatpush1.bf16.msra.mxu0 %v11278_v10 }
 0x31d   : > { %7079 = vmatpush1.bf16.msra.mxu1 %v11281_v59  ;;  %6753 = vmatprep.subr.bf16.mxu0 %v11286_v28  ;;  %v11342_v59 = vld [vmem:[%s14714_s1 + $0x1a74] ss:$8 sps:$4 sm:$0xff]   ;;  %v11345_v28 = vld [vmem:[%s14714_s1 + $0x1ac4] ss:$8 sps:$4 sm:$0xff]  }
 0x31e   : > { %7080 = vmatprep.subr.bf16.mxu1 %v11289_v63  ;;  %v11340_v63 = vld [vmem:[%s14714_s1 + $0x1a70] ss:$8 sps:$4 sm:$0xff]  }
 0x320   : > { %6754 = vmatpush1.bf16.msra.mxu0 %v11284_v24  ;;  %v11343_v24 = vld [vmem:[%s14714_s1 + $0x1ac0] ss:$8 sps:$4 sm:$0xff]  }
 0x321   : > { %7081 = vmatpush1.bf16.msra.mxu1 %v11287_v55  ;;  %6755 = vmatprep.subr.bf16.mxu0 %v11292_v14  ;;  %v11348_v55 = vld [vmem:[%s14714_s1 + $0x1a84] ss:$8 sps:$4 sm:$0xff]   ;;  %v11351_v14 = vld [vmem:[%s14714_s1 + $0x1ad4] ss:$8 sps:$4 sm:$0xff]  }
 0x322   : > { %7082 = vmatprep.subr.bf16.mxu1 %v11295_v32  ;;  %v9856_v32 = vld [vmem:[%s14714_s1 + $0x1ae0] sm:$0x33] }
 0x324   : > { %6756 = vmatpush1.bf16.msra.mxu0 %v11290_v3  ;;  %v11346_v3 = vld [vmem:[%s14714_s1 + $0x1a80] ss:$8 sps:$4 sm:$0xff]  }
 0x325   : > { %7083 = vmatpush1.bf16.msra.mxu1 %v11293_v0  ;;  %6757 = vmatprep.subr.bf16.mxu0 %v11298_v31  ;;  %v11349_v0 = vld [vmem:[%s14714_s1 + $0x1ad0] ss:$8 sps:$4 sm:$0xff]   ;;  %v11354_v31 = vld [vmem:[%s14714_s1 + $0x1a94] ss:$8 sps:$4 sm:$0xff]  }
 0x326   : > { %7084 = vmatprep.subr.bf16.mxu1 %v11301_v33  ;;  %v5069_v37 = vpop.f32.mrb[52].mxu0  ;;  %v9898_v33 = vcombine.high %v9856_v32, %v9856_v32 }
 0x327   : > { %v5028_v60 = vpop.f32.mrb[52].mxu1  ;;  %v5071_v41 = vpop.f32.mrb[53].mxu0 }
 0x328   : > { %v5070_v25 = vadd.f32 %v5069_v37, %v5028_v60  ;;  %v5030_v40 = vpop.f32.mrb[53].mxu1  ;;  %v5073_v35 = vpop.f32.mrb[54].mxu0  ;;  %6758 = vmatpush1.bf16.msra.mxu0 %v11296_v34  ;;  %v9897_v34 = vcombine.low %v9856_v32, %v9856_v32  ;;  %v11362_v60 = vld [vmem:[%s14714_s1 + $0xdd4] ss:$8 sps:$4 sm:$0xff]   ;;  %v11357_v37 = vld [vmem:[%s14714_s1 + $0xcd0] ss:$8 sps:$4 sm:$0xff]  }
 0x329   : > { %v5072_v62 = vadd.f32 %v5071_v41, %v5030_v40  ;;  %v5032_v52 = vpop.f32.mrb[54].mxu1  ;;  %7085 = vmatpush1.bf16.msra.mxu1 %v11299_v23  ;;  %v5074_v53 = vpop.f32.mrb[55].mxu0  ;;  %6759 = vmatprep.subr.bf16.mxu0 %v11304_v26  ;;  %v11352_v23 = vld [vmem:[%s14714_s1 + $0x1a90] ss:$8 sps:$4 sm:$0xff]   ;;  %v11365_v40 = vld [vmem:[%s14714_s1 + $0xce4] ss:$8 sps:$4 sm:$0xff]  }
 0x32a   : > { %v14273_v30 = vadd.f32 %v5070_v25, %v13976_v36  ;;  %v5033_v38 = vpop.f32.mrb[55].mxu1  ;;  %7086 = vmatprep.subr.bf16.mxu1 %v11307_v39  ;;  %v11308_v36 = vld [vmem:[%s14714_s1 + $0xc58] ss:$8 sps:$4 sm:$0xff]   ;;  %v7067_v26 = vsel %vm638_vm0, %v9897_v34, 0  ;;  %v11359_v39 = vld [vmem:[%s14714_s1 + $0xcd4] ss:$8 sps:$4 sm:$0xff]  }
 0x32b   : > { %v14282_v48 = vadd.f32 %v5072_v62, %v13985_v27  ;;  %v11316_v27 = vld [vmem:[%s14714_s1 + $0xc6c] ss:$8 sps:$4 sm:$0xff]   ;;  %v11360_v25 = vld [vmem:[%s14714_s1 + $0xdd0] ss:$8 sps:$4 sm:$0xff]   ;;  %v7199_v62 = vrot.slane %v14077_v4, 1 }
 0x32c   : > { %6760 = vmatpush1.bf16.msra.mxu0 %v11302_v56  ;;  %v11368_v41 = vld [vmem:[%s14714_s1 + $0xde4] ss:$8 sps:$4 sm:$0xff]   ;;  %v11363_v52 = vld [vmem:[%s14714_s1 + $0xce0] ss:$8 sps:$4 sm:$0xff]   ;;  %v11371_v4 = vld [vmem:[%s14714_s1 + $0xcf4] ss:$8 sps:$4 sm:$0xff]  }
 0x32d   : > { %7087 = vmatpush1.bf16.msra.mxu1 %v11305_v44  ;;  %6761 = vmatprep.subr.bf16.mxu0 %v11310_v54  ;;  %v11366_v35 = vld [vmem:[%s14714_s1 + $0xde0] ss:$8 sps:$4 sm:$0xff]   ;;  %v11369_v56 = vld [vmem:[%s14714_s1 + $0xcf0] ss:$8 sps:$4 sm:$0xff]   ;;  %v11377_v38 = vld [vmem:[%s14714_s1 + $0xd04] ss:$8 sps:$4 sm:$0xff]  }
 0x32e   : > { %7088 = vmatprep.subr.bf16.mxu1 %v11313_v47  ;;  %v11372_v44 = vld [vmem:[%s14714_s1 + $0xdf0] ss:$8 sps:$4 sm:$0xff]   ;;  %v11380_v53 = vld [vmem:[%s14714_s1 + $0xe04] ss:$8 sps:$4 sm:$0xff]   ;;  %v11375_v47 = vld [vmem:[%s14714_s1 + $0xd00] ss:$8 sps:$4 sm:$0xff]  }
 0x32f   : > { %v9941_v54 = vld [vmem:[%s14714_s1 + $0xe10] sm:$0x33]  ;;  %v11424_v34 = vld [vmem:[%s14714_s1 + $0xd84] ss:$8 sps:$4 sm:$0xff]  }
 0x330   : > { %6762 = vmatpush1.bf16.msra.mxu0 %v11308_v36  ;;  %v11378_v36 = vld [vmem:[%s14714_s1 + $0xe00] ss:$8 sps:$4 sm:$0xff]  }
 0x331   : > { %7089 = vmatpush1.bf16.msra.mxu1 %v11311_v50  ;;  %6763 = vmatprep.subr.bf16.mxu0 %v11316_v27  ;;  %v11383_v50 = vld [vmem:[%s14714_s1 + $0xd14] ss:$8 sps:$4 sm:$0xff]   ;;  %v9983_v27 = vcombine.high %v9941_v54, %v9941_v54  ;;  %v11413_v32 = vld [vmem:[%s14714_s1 + $0x1b28] ss:$8 sps:$4 sm:$0xff]  }
 0x332   : > { %7090 = vmatprep.subr.bf16.mxu1 %v11319_v1  ;;  %v9982_v1 = vcombine.low %v9941_v54, %v9941_v54 }
 0x334   : > { %6764 = vmatpush1.bf16.msra.mxu0 %v11314_v51  ;;  %v7412_v51 = vsel %vm638_vm0, %v9982_v1, 0  ;;  %v11442_v1 = vld [vmem:[%s14714_s1 + $0xdb4] ss:$8 sps:$4 sm:$0xff]  }
 0x335   : > { %7091 = vmatpush1.bf16.msra.mxu1 %v11317_v15  ;;  %6765 = vmatprep.subr.bf16.mxu0 %v11322_v57  ;;  %v11388_v15 = vld [vmem:[%s14714_s1 + $0xd24] ss:$8 sps:$4 sm:$0xff]  }
 0x336   : > { %7092 = vmatprep.subr.bf16.mxu1 %v11325_v11  ;;  %v11391_v57 = vld [vmem:[%s14714_s1 + $0x1aec] ss:$8 sps:$4 sm:$0xff]   ;;  %v7200_v11 = vrot.slane %v14131_v18, 1 }
 0x338   : > { %6766 = vmatpush1.bf16.msra.mxu0 %v11320_v6  ;;  %v11394_v6 = vld [vmem:[%s14714_s1 + $0xd34] ss:$8 sps:$4 sm:$0xff]  }
 0x339   : > { %7093 = vmatpush1.bf16.msra.mxu1 %v11323_v8  ;;  %7113 = vmatprep.subr.bf16.mxu0 %v11333_v42  ;;  %v11397_v8 = vld [vmem:[%s14714_s1 + $0x1afc] ss:$8 sps:$4 sm:$0xff]   ;;  %v11395_v42 = vld [vmem:[%s14714_s1 + $0x1af8] ss:$8 sps:$4 sm:$0xff]  }
 0x33a   : > { %7094 = vmatprep.subr.bf16.mxu1 %v11330_v58  ;;  %v11392_v58 = vld [vmem:[%s14714_s1 + $0xd30] ss:$8 sps:$4 sm:$0xff]  }
 0x33b   : > { %v14338_v16 = vpop.f32.mrb[56].mxu1  ;;  %6768 = vmatmul.mubr.bf16.vlgmr.msra.gmra.mrb[72].mxu0 %v6504_v9 }
 0x33c   : > { %v14340_v17 = vpop.f32.mrb[57].mxu1  ;;  %7114 = vmatpush1.bf16.msra.mxu0 %v11331_v21  ;;  %7145 = vmatprep.mubr.bf16.mxu0 %v11507_v2 }
 0x33d   : > { %v5424_v19 = vpop.f32.mrb[58].mxu1  ;;  %7095 = vmatpush1.bf16.msra.mxu1 %v11328_v61  ;;  %7115 = vmatprep.subr.bf16.mxu0 %v11339_v13  ;;  %v11403_v61 = vld [vmem:[%s14714_s1 + $0x1b0c] ss:$8 sps:$4 sm:$0xff]  }
 0x33e   : > { %v5425_v10 = vpop.f32.mrb[59].mxu1  ;;  %7096 = vmatprep.subr.bf16.mxu1 %v11336_v12 }
 0x33f   : > { %v11401_v10 = vld [vmem:[%s14714_s1 + $0x1b08] ss:$8 sps:$4 sm:$0xff]  }
 0x340   : > { %7116 = vmatpush1.bf16.msra.mxu0 %v11337_v46  ;;  %v11398_v46 = vld [vmem:[%s14714_s1 + $0xd40] ss:$8 sps:$4 sm:$0xff]  }
 0x341   : > { %7097 = vmatpush1.bf16.msra.mxu1 %v11334_v43  ;;  %7117 = vmatprep.subr.bf16.mxu0 %v11345_v28 }
 0x342   : > { %7098 = vmatprep.subr.bf16.mxu1 %v11342_v59 }
 0x344   : > { %7118 = vmatpush1.bf16.msra.mxu0 %v11343_v24  ;;  %v11407_v24 = vld [vmem:[%s14714_s1 + $0x1b18] ss:$8 sps:$4 sm:$0xff]  }
 0x345   : > { %7099 = vmatpush1.bf16.msra.mxu1 %v11340_v63  ;;  %7119 = vmatprep.subr.bf16.mxu0 %v11351_v14  ;;  %v11410_v14 = vld [vmem:[%s14714_s1 + $0xd60] ss:$8 sps:$4 sm:$0xff]  }
 0x346   : > { %7100 = vmatprep.subr.bf16.mxu1 %v11348_v55  ;;  %v11412_v55 = vld [vmem:[%s14714_s1 + $0xd64] ss:$8 sps:$4 sm:$0xff]  }
 0x348   : > { %7120 = vmatpush1.bf16.msra.mxu0 %v11349_v0  ;;  %v11421_v0 = vld [vmem:[%s14714_s1 + $0x1b3c] ss:$8 sps:$4 sm:$0xff]  }
 0x349   : > { %7101 = vmatpush1.bf16.msra.mxu1 %v11346_v3  ;;  %9899 = vmatprep.subr.msk.bf16.mxu0 %vm638_vm0, %v9898_v33  ;;  %v11418_v3 = vld [vmem:[%s14714_s1 + $0xd74] ss:$8 sps:$4 sm:$0xff]   ;;  %v11419_v33 = vld [vmem:[%s14714_s1 + $0x1b38] ss:$8 sps:$4 sm:$0xff]  }
 0x34a   : > { %7102 = vmatprep.subr.bf16.mxu1 %v11354_v31  ;;  %v11416_v31 = vld [vmem:[%s14714_s1 + $0xd70] ss:$8 sps:$4 sm:$0xff]  }
 0x34c   : > { %7122 = vmatpush1.bf16.msra.mxu0 %v7067_v26  ;;  %v11422_v26 = vld [vmem:[%s14714_s1 + $0xd80] ss:$8 sps:$4 sm:$0xff]  }
 0x34d   : > { %7103 = vmatpush1.bf16.msra.mxu1 %v11352_v23  ;;  %7417 = vmatprep.subr.bf16.mxu0 %v11359_v39  ;;  %v11427_v23 = vld [vmem:[%s14714_s1 + $0x1b4c] ss:$8 sps:$4 sm:$0xff]   ;;  %v11425_v39 = vld [vmem:[%s14714_s1 + $0x1b48] ss:$8 sps:$4 sm:$0xff]  }
 0x34e   : > { %7458 = vmatprep.subr.bf16.mxu1 %v11362_v60  ;;  %v11430_v60 = vld [vmem:[%s14714_s1 + $0xd94] ss:$8 sps:$4 sm:$0xff]  }
 0x34f   : > { %9900 = vmatmul.mubr.msk.bf16.vlgmr.msra.gmra.mrb[76].mxu0 %vm634_vm1, %v14170_v20  ;;  %v11374_v20 = vld [vmem:[%s14714_s1 + $0xdf4] ss:$8 sps:$4 sm:$0xff]  }
 0x350   : > { %7105 = vmatmul.mubr.bf16.vlgmr.msra.gmra.mrb[76].mxu1 %v6504_v9  ;;  %7418 = vmatpush1.bf16.msra.mxu0 %v11357_v37  ;;  %v11400_v9 = vld [vmem:[%s14714_s1 + $0xd44] ss:$8 sps:$4 sm:$0xff]  }
 0x351   : > { %7459 = vmatpush1.bf16.msra.mxu1 %v11360_v25  ;;  %7419 = vmatprep.subr.bf16.mxu0 %v11365_v40  ;;  %v11433_v37 = vld [vmem:[%s14714_s1 + $0x1b5c] ss:$8 sps:$4 sm:$0xff]  }
 0x352   : > { %7460 = vmatprep.subr.bf16.mxu1 %v11368_v41  ;;  %7490 = vmatprep.mubr.bf16.mxu1 %v11507_v2 }
 0x353   : > { %7449 = vmatprep.mubr.bf16.mxu0 %v7199_v62 }
 0x354   : > { %7420 = vmatpush1.bf16.msra.mxu0 %v11363_v52 }
 0x355   : > { %7461 = vmatpush1.bf16.msra.mxu1 %v11366_v35  ;;  %7421 = vmatprep.subr.bf16.mxu0 %v11371_v4 }
 0x356   : > { %7462 = vmatprep.subr.bf16.mxu1 %v11374_v20 }
 0x358   : > { %7422 = vmatpush1.bf16.msra.mxu0 %v11369_v56  ;;  %v11428_v56 = vld [vmem:[%s14714_s1 + $0xd90] ss:$8 sps:$4 sm:$0xff]  }
 0x359   : > { %7463 = vmatpush1.bf16.msra.mxu1 %v11372_v44  ;;  %7423 = vmatprep.subr.bf16.mxu0 %v11377_v38  ;;  %v11431_v44 = vld [vmem:[%s14714_s1 + $0x1b58] ss:$8 sps:$4 sm:$0xff]  }
 0x35a   : > { %7464 = vmatprep.subr.bf16.mxu1 %v11380_v53 }
 0x35c   : > { %7424 = vmatpush1.bf16.msra.mxu0 %v11375_v47  ;;  %v11436_v47 = vld [vmem:[%s14714_s1 + $0xda4] ss:$8 sps:$4 sm:$0xff]  }
 0x35d   : > { %7465 = vmatpush1.bf16.msra.mxu1 %v11378_v36  ;;  %7425 = vmatprep.subr.bf16.mxu0 %v11383_v50  ;;  %v11439_v36 = vld [vmem:[%s14714_s1 + $0x1b6c] ss:$8 sps:$4 sm:$0xff]  }
 0x35e   : > { %9984 = vmatprep.subr.msk.bf16.mxu1 %vm638_vm0, %v9983_v27  ;;  %v11437_v27 = vld [vmem:[%s14714_s1 + $0x1b68] ss:$8 sps:$4 sm:$0xff]  }
 0x360   : > { %7426 = vmatpush1.bf16.msra.mxu0 %v11381_v5  ;;  %v11440_v5 = vld [vmem:[%s14714_s1 + $0xdb0] ss:$8 sps:$4 sm:$0xff]  }
 0x361   : > { %7467 = vmatpush1.bf16.msra.mxu1 %v7412_v51  ;;  %7427 = vmatprep.subr.bf16.mxu0 %v11388_v15  ;;  %v11443_v51 = vld [vmem:[%s14714_s1 + $0x1b78] ss:$8 sps:$4 sm:$0xff]   ;;  %v11448_v15 = vld [vmem:[%s14714_s1 + $0xdc4] ss:$8 sps:$4 sm:$0xff]  }
 0x362   : > { %7754 = vmatprep.subr.bf16.mxu1 %v11391_v57  ;;  %v11451_v57 = vld [vmem:[%s14714_s1 + $0x1b8c] ss:$8 sps:$4 sm:$0xff]  }
 0x364   : > { %9985 = vmatmul.mubr.msk.bf16.vlgmr.msra.gmra.mrb[80].mxu1 %vm634_vm1, %v7200_v11  ;;  %7428 = vmatpush1.bf16.msra.mxu0 %v11386_v7  ;;  %v11446_v7 = vld [vmem:[%s14714_s1 + $0xdc0] ss:$8 sps:$4 sm:$0xff]  }
 0x365   : > { %7755 = vmatpush1.bf16.msra.mxu1 %v11389_v45  ;;  %7429 = vmatprep.subr.bf16.mxu0 %v11394_v6  ;;  %v11449_v45 = vld [vmem:[%s14714_s1 + $0x1b88] ss:$8 sps:$4 sm:$0xff]   ;;  %v11454_v6 = vld [vmem:[%s14714_s1 + $0x1b9c] ss:$8 sps:$4 sm:$0xff]  }
 0x366   : > { %7756 = vmatprep.subr.bf16.mxu1 %v11397_v8  ;;  %v5379_v21 = vpop.f32.mrb[56].mxu0  ;;  %7786 = vmatprep.mubr.bf16.mxu1 %v7199_v62  ;;  %v11457_v8 = vld [vmem:[%s14714_s1 + $0x1bec] ss:$8 sps:$4 sm:$0xff]  }
 0x367   : > { %v5421_v12 = vadd.f32 %v14338_v16, %v5379_v21  ;;  %v5381_v13 = vpop.f32.mrb[57].mxu0  ;;  %v11406_v16 = vld [vmem:[%s14714_s1 + $0xd54] ss:$8 sps:$4 sm:$0xff]  }
 0x368   : > { %v5423_v19 = vadd.f32 %v14340_v17, %v5381_v13  ;;  %v5383_v43 = vpop.f32.mrb[58].mxu0  ;;  %7430 = vmatpush1.bf16.msra.mxu0 %v11392_v58  ;;  %v11409_v17 = vld [vmem:[%s14714_s1 + $0x1b1c] ss:$8 sps:$4 sm:$0xff]   ;;  %v7198_v58 = vrot.slane %v14286_v49, 1 }
 0x369   : > { %7757 = vmatpush1.bf16.msra.mxu1 %v11395_v42  ;;  %v14490_v59 = vadd.f32 %v5421_v12, %v14207_v29  ;;  %v5384_v28 = vpop.f32.mrb[59].mxu0  ;;  %7431 = vmatprep.subr.bf16.mxu0 %v11400_v9  ;;  %v11404_v29 = vld [vmem:[%s14714_s1 + $0xd50] ss:$8 sps:$4 sm:$0xff]   ;;  %v11463_v49 = vld [vmem:[%s14714_s1 + $0x1bfc] ss:$8 sps:$4 sm:$0xff]  }
 0x36a   : > { %7758 = vmatprep.subr.bf16.mxu1 %v11403_v61  ;;  %v14499_v63 = vadd.f32 %v5423_v19, %v14216_v22  ;;  %v11415_v22 = vld [vmem:[%s14714_s1 + $0x1b2c] ss:$8 sps:$4 sm:$0xff]   ;;  %v11452_v42 = vld [vmem:[%s14714_s1 + $0x1b98] ss:$8 sps:$4 sm:$0xff]   ;;  %v11455_v9 = vld [vmem:[%s14714_s1 + $0x1be8] ss:$8 sps:$4 sm:$0xff]  }
 0x36b   : > { %v11460_v61 = vld [vmem:[%s14714_s1 + $0x1bac] ss:$8 sps:$4 sm:$0xff]   ;;  %v11458_v19 = vld [vmem:[%s14714_s1 + $0x1ba8] ss:$8 sps:$4 sm:$0xff]   ;;  %v11461_v43 = vld [vmem:[%s14714_s1 + $0x1bf8] ss:$8 sps:$4 sm:$0xff]  }
 0x36c   : > { %7432 = vmatpush1.bf16.msra.mxu0 %v11398_v46  ;;  %v11469_v28 = vld [vmem:[%s14714_s1 + $0x1c0c] ss:$8 sps:$4 sm:$0xff]  }
 0x36d   : > { %7759 = vmatpush1.bf16.msra.mxu1 %v11401_v10  ;;  %7433 = vmatprep.subr.bf16.mxu0 %v11406_v16  ;;  %v11466_v10 = vld [vmem:[%s14714_s1 + $0x1bbc] ss:$8 sps:$4 sm:$0xff]   ;;  %v11464_v16 = vld [vmem:[%s14714_s1 + $0x1bb8] ss:$8 sps:$4 sm:$0xff]  }
 0x36e   : > { %7760 = vmatprep.subr.bf16.mxu1 %v11409_v17  ;;  %v11467_v17 = vld [vmem:[%s14714_s1 + $0x1c08] ss:$8 sps:$4 sm:$0xff]  }
 0x370   : > { %7434 = vmatpush1.bf16.msra.mxu0 %v11404_v29  ;;  %v11472_v29 = vld [vmem:[%s14714_s1 + $0x1bcc] ss:$8 sps:$4 sm:$0xff]  }
 0x371   : > { %7761 = vmatpush1.bf16.msra.mxu1 %v11407_v24  ;;  %7435 = vmatprep.subr.bf16.mxu0 %v11412_v55  ;;  %v10026_v24 = vld [vmem:[%s14714_s1 + $0x1c28] sm:$0x33] }
 0x372   : > { %7762 = vmatprep.subr.bf16.mxu1 %v11415_v22  ;;  %v11470_v55 = vld [vmem:[%s14714_s1 + $0x1bc8] ss:$8 sps:$4 sm:$0xff]   ;;  %v11473_v22 = vld [vmem:[%s14714_s1 + $0x1c18] ss:$8 sps:$4 sm:$0xff]  }
 0x374   : > { %7436 = vmatpush1.bf16.msra.mxu0 %v11410_v14  ;;  %v11478_v14 = vld [vmem:[%s14714_s1 + $0x1bdc] ss:$8 sps:$4 sm:$0xff]  }
 0x375   : > { %7763 = vmatpush1.bf16.msra.mxu1 %v11413_v32  ;;  %7437 = vmatprep.subr.bf16.mxu0 %v11418_v3  ;;  %v10068_v32 = vcombine.high %v10026_v24, %v10026_v24  ;;  %v10067_v3 = vcombine.low %v10026_v24, %v10026_v24 }
 0x376   : > { %7764 = vmatprep.subr.bf16.mxu1 %v11421_v0  ;;  %v11476_v0 = vld [vmem:[%s14714_s1 + $0x1bd8] ss:$8 sps:$4 sm:$0xff]  }
 0x378   : > { %7438 = vmatpush1.bf16.msra.mxu0 %v11416_v31  ;;  %v7749_v31 = vsel %vm638_vm0, %v10067_v3, 0 }
 0x379   : > { %7765 = vmatpush1.bf16.msra.mxu1 %v11419_v33  ;;  %7439 = vmatprep.subr.bf16.mxu0 %v11424_v34 }
 0x37a   : > { %7766 = vmatprep.subr.bf16.mxu1 %v11427_v23  ;;  %v5757_v40 = vpop.f32.mrb[60].mxu0 }
 0x37b   : > { %v5716_v25 = vpop.f32.mrb[60].mxu1  ;;  %v5759_v52 = vpop.f32.mrb[61].mxu0 }
 0x37c   : > { %v5758_v41 = vadd.f32 %v5757_v40, %v5716_v25  ;;  %v5718_v62 = vpop.f32.mrb[61].mxu1  ;;  %v5761_v20 = vpop.f32.mrb[62].mxu0  ;;  %7440 = vmatpush1.bf16.msra.mxu0 %v11422_v26 }
 0x37d   : > { %v5760_v35 = vadd.f32 %v5759_v52, %v5718_v62  ;;  %v5720_v4 = vpop.f32.mrb[62].mxu1  ;;  %7767 = vmatpush1.bf16.msra.mxu1 %v11425_v39  ;;  %v5762_v54 = vpop.f32.mrb[63].mxu0  ;;  %7441 = vmatprep.subr.bf16.mxu0 %v11430_v60 }
 0x37e   : > { %v14556_v38 = vadd.f32 %v5758_v41, %v14273_v30  ;;  %v5721_v53 = vpop.f32.mrb[63].mxu1  ;;  %7768 = vmatprep.subr.bf16.mxu1 %v11433_v37  ;;  %v11434_v30 = vld [vmem:[%s14714_s1 + $0xda0] ss:$8 sps:$4 sm:$0xff]  }
 0x37f   : > { %v14565_v50 = vadd.f32 %v5760_v35, %v14282_v48  ;;  %v11445_v48 = vld [vmem:[%s14714_s1 + $0x1b7c] ss:$8 sps:$4 sm:$0xff]  }
 0x380   : > { %7442 = vmatpush1.bf16.msra.mxu0 %v11428_v56 }
 0x381   : > { %7769 = vmatpush1.bf16.msra.mxu1 %v11431_v44  ;;  %7443 = vmatprep.subr.bf16.mxu0 %v11436_v47 }
 0x382   : > { %7770 = vmatprep.subr.bf16.mxu1 %v11439_v36 }
 0x384   : > { %7444 = vmatpush1.bf16.msra.mxu0 %v11434_v30 }
 0x385   : > { %7771 = vmatpush1.bf16.msra.mxu1 %v11437_v27  ;;  %7445 = vmatprep.subr.bf16.mxu0 %v11442_v1 }
 0x386   : > { %7772 = vmatprep.subr.bf16.mxu1 %v11445_v48 }
 0x388   : > { %7446 = vmatpush1.bf16.msra.mxu0 %v11440_v5 }
 0x389   : > { %7773 = vmatpush1.bf16.msra.mxu1 %v11443_v51  ;;  %7447 = vmatprep.subr.bf16.mxu0 %v11448_v15 }
 0x38a   : > { %7774 = vmatprep.subr.bf16.mxu1 %v11451_v57 }
 0x38c   : > { %7448 = vmatpush1.bf16.msra.mxu0 %v11446_v7 }
 0x38d   : > { %7775 = vmatpush1.bf16.msra.mxu1 %v11449_v45  ;;  %7795 = vmatprep.subr.bf16.mxu0 %v11457_v8 }
 0x38e   : > { %7776 = vmatprep.subr.bf16.mxu1 %v11454_v6 }
 0x38f   : > { %v6102_v21 = vpop.f32.mrb[64].mxu1  ;;  %7450 = vmatmul.mubr.bf16.vlgmr.msra.gmra.mrb[80].mxu0 %v7198_v58 }
 0x390   : > { %v6104_v12 = vpop.f32.mrb[65].mxu1  ;;  %7796 = vmatpush1.bf16.msra.mxu0 %v11455_v9  ;;  %7827 = vmatprep.mubr.bf16.mxu0 %v11507_v2  ;;  %v11475_v2 = vld [vmem:[%s14714_s1 + $0x1c1c] ss:$8 sps:$4 sm:$0xff]  }
 0x391   : > { %v6106_v13 = vpop.f32.mrb[66].mxu1  ;;  %7777 = vmatpush1.bf16.msra.mxu1 %v11452_v42  ;;  %7797 = vmatprep.subr.bf16.mxu0 %v11463_v49 }
 0x392   : > { %v6107_v46 = vpop.f32.mrb[67].mxu1  ;;  %7778 = vmatprep.subr.bf16.mxu1 %v11460_v61 }
 0x394   : > { %7798 = vmatpush1.bf16.msra.mxu0 %v11461_v43 }
 0x395   : > { %7779 = vmatpush1.bf16.msra.mxu1 %v11458_v19  ;;  %7799 = vmatprep.subr.bf16.mxu0 %v11469_v28 }
 0x396   : > { %7780 = vmatprep.subr.bf16.mxu1 %v11466_v10 }
 0x398   : > { %7800 = vmatpush1.bf16.msra.mxu0 %v11467_v17 }
 0x399   : > { %7781 = vmatpush1.bf16.msra.mxu1 %v11464_v16  ;;  %7801 = vmatprep.subr.bf16.mxu0 %v11475_v2 }
 0x39a   : > { %7782 = vmatprep.subr.bf16.mxu1 %v11472_v29  ;;  %v7842_v29 = vlaneseq }
 0x39c   : > { %7802 = vmatpush1.bf16.msra.mxu0 %v11473_v22 }
 0x39d   : > { %7783 = vmatpush1.bf16.msra.mxu1 %v11470_v55  ;;  %10069 = vmatprep.subr.msk.bf16.mxu0 %vm638_vm0, %v10068_v32  ;;  %v7843_v55 = vshrl.u32 %v7842_v29, 7 }
 0x39e   : > { %7784 = vmatprep.subr.bf16.mxu1 %v11478_v14  ;;  %v7838_v14 = vld [vmem:[%s14715_s2] sm:$0x3] }
 0x39f   : > { %v7844_v22 = vsub.s32 0, %v7843_v55  ;;  %v7848_v32 = vsub.s32 1, %v7843_v55 }
 0x3a0   : > { %7804 = vmatpush1.bf16.msra.mxu0 %v7749_v31 }
 0x3a1   : > { %7785 = vmatpush1.bf16.msra.mxu1 %v11476_v0  ;;  %v7845_v3 = vrot.slane %v7838_v14, %v7844_v22  ;;  %v7849_v0 = vrot.slane %v7838_v14, %v7848_v32 }
 0x3a3   : > { %10070 = vmatmul.mubr.msk.bf16.vlgmr.msra.gmra.mrb[84].mxu0 %vm634_vm1, %v7200_v11 }
 0x3a4   : > { %7787 = vmatmul.mubr.bf16.vlgmr.msra.gmra.mrb[84].mxu1 %v7198_v58 }
 0x3ba   : > { %v6061_v33 = vpop.f32.mrb[64].mxu0 }
 0x3bb   : > { %v6103_v34 = vadd.f32 %v6102_v21, %v6061_v33  ;;  %v6063_v23 = vpop.f32.mrb[65].mxu0  ;;  %v7839_v33 = vld [vmem:[%s14716_s3] sm:$0x3] }
 0x3bc   : > { %v6105_v26 = vadd.f32 %v6104_v12, %v6063_v23  ;;  %v6065_v39 = vpop.f32.mrb[66].mxu0 }
 0x3bd   : > { %v6109_v60 = vadd.f32 %v6103_v34, %v14490_v59  ;;  %v6066_v37 = vpop.f32.mrb[67].mxu0 }
 0x3be   : > { %v6110_v25 = vadd.f32 %v6105_v26, %v14499_v63 }
 0x3ce   : > { %v6439_v41 = vpop.f32.mrb[68].mxu0 }
 0x3cf   : > { %v6398_v40 = vpop.f32.mrb[68].mxu1  ;;  %v6441_v35 = vpop.f32.mrb[69].mxu0 }
 0x3d0   : > { %v6440_v62 = vadd.f32 %v6439_v41, %v6398_v40  ;;  %v6400_v52 = vpop.f32.mrb[69].mxu1  ;;  %v6443_v18 = vpop.f32.mrb[70].mxu0 }
 0x3d1   : > { %v6442_v4 = vadd.f32 %v6441_v35, %v6400_v52  ;;  %v6402_v20 = vpop.f32.mrb[70].mxu1  ;;  %v6444_v44 = vpop.f32.mrb[71].mxu0  ;;  %v7860_v52 = vrot.slane %v7839_v33, %v7844_v22  ;;  %v7840_v18 = vld [vmem:[%s14717_s4] sm:$0x3] }
 0x3d2   : > { %v6446_v11 = vadd.f32 %v6440_v62, %v14556_v38  ;;  %v6403_v56 = vpop.f32.mrb[71].mxu1 }
 0x3d3   : > { %v6447_v53 = vadd.f32 %v6442_v4, %v14565_v50  ;;  %v7864_v56 = vrot.slane %v7839_v33, %v7848_v32 }
 0x3e3   : > { %v6810_v54 = vpop.f32.mrb[72].mxu1 }
 0x3e4   : > { %v6812_v47 = vpop.f32.mrb[73].mxu1 }
 0x3e5   : > { %v6814_v59 = vpop.f32.mrb[74].mxu1 }
 0x3e6   : > { %v6815_v36 = vpop.f32.mrb[75].mxu1  ;;  %v7873_v59 = vrot.slane %v7840_v18, %v7844_v22 }
 0x40e   : > { %v6769_v30 = vpop.f32.mrb[72].mxu0 }
 0x40f   : > { %v6811_v63 = vadd.f32 %v6810_v54, %v6769_v30  ;;  %v6771_v27 = vpop.f32.mrb[73].mxu0  ;;  %v11508_v30 = vmov 1983009808  }
 0x410   : > { %v6813_v1 = vadd.f32 %v6812_v47, %v6771_v27  ;;  %v6773_v48 = vpop.f32.mrb[74].mxu0 }
 0x411   : > { %v6817_v5 = vadd.f32 %v6811_v63, %v6109_v60  ;;  %v6774_v51 = vpop.f32.mrb[75].mxu0  ;;  %v7899_v63 = vunpack.c.l.s4 %v11508_v30 }
 0x412   : > { %v6818_v15 = vadd.f32 %v6813_v1, %v6110_v25  ;;  %v7877_v1 = vrot.slane %v7840_v18, %v7848_v32 }
 0x422   : > { %v7147_v7 = vpop.f32.mrb[76].mxu0 }
 0x423   : > { %v7106_v57 = vpop.f32.mrb[76].mxu1  ;;  %v7149_v6 = vpop.f32.mrb[77].mxu0 }
 0x424   : > { %v7148_v45 = vadd.f32 %v7147_v7, %v7106_v57  ;;  %v7108_v38 = vpop.f32.mrb[77].mxu1  ;;  %v7151_v50 = vpop.f32.mrb[78].mxu0  ;;  %v7900_v7 = vunpack.c.0.s8 %v7899_v63 }
 0x425   : > { %v7150_v8 = vadd.f32 %v7149_v6, %v7108_v38  ;;  %v7110_v58 = vpop.f32.mrb[78].mxu1  ;;  %v7152_v61 = vpop.f32.mrb[79].mxu0 }
 0x426   : > { %v7154_v42 = vadd.f32 %v7148_v45, %v6446_v11  ;;  %v7111_v9 = vpop.f32.mrb[79].mxu1  ;;  %v14674_v50 = vsub.s32 %v7900_v7, %v7843_v55 }
 0x427   : > { %v7155_v49 = vadd.f32 %v7150_v8, %v6447_v53 }
 0x437   : > { %v7492_v21 = vpop.f32.mrb[80].mxu1 }
 0x438   : > { %v7494_v12 = vpop.f32.mrb[81].mxu1 }
 0x439   : > { %v7496_v13 = vpop.f32.mrb[82].mxu1 }
 0x43a   : > { %v7497_v19 = vpop.f32.mrb[83].mxu1 }
 0x462   : > { %v7451_v43 = vpop.f32.mrb[80].mxu0 }
 0x463   : > { %v7493_v46 = vadd.f32 %v7492_v21, %v7451_v43  ;;  %v7453_v10 = vpop.f32.mrb[81].mxu0 }
 0x464   : > { %v7495_v28 = vadd.f32 %v7494_v12, %v7453_v10  ;;  %v7455_v16 = vpop.f32.mrb[82].mxu0 }
 0x465   : > { %v7499_v17 = vadd.f32 %v7493_v46, %v6817_v5  ;;  %v7456_v2 = vpop.f32.mrb[83].mxu0 }
 0x466   : > { %v7500_v24 = vadd.f32 %v7495_v28, %v6818_v15 }
 0x467   : > { %v7852_v31 = vadd.f32 %v7845_v3, %v7499_v17 }
 0x468   : > { %v7853_v34 = vadd.f32 %v7849_v0, %v7500_v24 }
 0x469   : > { %v7854_v62 = vmax.f32 %v7852_v31, 0.0 }
 0x46a   : > { %v7855_v11 = vmax.f32 %v7853_v34, 0.0 }
 0x46b   : > { %v7867_v47 = vmul.f32 %v7860_v52, %v7854_v62 }
 0x46c   : > { %v7868_v27 = vmul.f32 %v7864_v56, %v7855_v11 }
 0x46d   : > { %v7880_v15 = vadd.f32 %v7873_v59, %v7867_v47 }
 0x46e   : > { %v7881_v45 = vadd.f32 %v7877_v1, %v7868_v27 }
 0x476   : > { %v7829_v26 = vpop.f32.mrb[84].mxu0 }
 0x477   : > { %v7788_v23 = vpop.f32.mrb[84].mxu1  ;;  %v7831_v37 = vpop.f32.mrb[85].mxu0 }
 0x478   : > { %v7830_v39 = vadd.f32 %v7829_v26, %v7788_v23  ;;  %v7790_v60 = vpop.f32.mrb[85].mxu1  ;;  %v7833_v41 = vpop.f32.mrb[86].mxu0 }
 0x479   : > { %v7832_v25 = vadd.f32 %v7831_v37, %v7790_v60  ;;  %v7792_v40 = vpop.f32.mrb[86].mxu1  ;;  %v7834_v20 = vpop.f32.mrb[87].mxu0 }
 0x47a   : > { %v7836_v35 = vadd.f32 %v7830_v39, %v7154_v42  ;;  %v7793_v4 = vpop.f32.mrb[87].mxu1 }
 0x47b   : > { %v7837_v44 = vadd.f32 %v7832_v25, %v7155_v49 }
 0x47c   : > { %v7882_v53 = vadd.f32 %v7845_v3, %v7836_v35 }
 0x47d   : > { %v7883_v54 = vadd.f32 %v7849_v0, %v7837_v44 }
 0x47e   : > { %v7884_v36 = vmax.f32 %v7882_v53, 0.0 }
 0x47f   : > { %v7885_v48 = vmax.f32 %v7883_v54, 0.0 }
 0x480   : > { %v7886_v5 = vmul.f32 %v7884_v36, %v7860_v52 }
 0x481   : > { %v7887_v51 = vmul.f32 %v7885_v48, %v7864_v56 }
 0x482   : > { %v7888_v57 = vadd.f32 %v7886_v5, %v7873_v59 }
 0x483   : > { %v7889_v38 = vadd.f32 %v7887_v51, %v7877_v1 }
 0x484   : > { %v7890_v6 = vadd.f32 %v7888_v57, %v7880_v15 }
 0x485   : > { %v7891_v8 = vadd.f32 %v7889_v38, %v7881_v45 }
 0x486   : > { %v7892_v58 = vmul.f32 0.5, %v7890_v6 }
 0x487   : > { %v7893_v42 = vmul.f32 0.5, %v7891_v8 }
 0x489   : > { %v7896_v9 = vcombine.low %v7892_v58, %v7893_v42  ;;  %v7897_v61 = vcombine.high %v7892_v58, %v7893_v42 }
 0x48b   : > { %v7904_v49 = vrot.slane %v7896_v9, %v14674_v50  ;;  %v7911_v21 = vrot.slane %v7897_v61, %v14674_v50 }
 0x48d   : > { %v7912_v12 = vcombine.high %v7904_v49, %v7904_v49  ;;  %v7913_v13 = vcombine.high %v7911_v21, %v7911_v21  ;;  %v7920_v19 = vrot.slane %v7904_v49, %v14674_v50  ;;  %v7936_v43 = vrot.slane %v7911_v21, %v14674_v50 }
 0x48f   : > { %v7921_v46 = vcombine.high %v7920_v19, %v7920_v19  ;;  %v7928_v10 = vrot.slane %v7912_v12, %v14674_v50  ;;  %v7937_v28 = vcombine.high %v7936_v43, %v7936_v43  ;;  %v7944_v16 = vrot.slane %v7913_v13, %v14674_v50 }
 0x490   : > { %v7954_v17 = vsel %vm638_vm0, %v7920_v19, 0.0  ;;  %v7983_v29 = vsel %vm638_vm0, %v7936_v43, 0.0 }
 0x491   : > { %v7929_v2 = vcombine.high %v7928_v10, %v7928_v10  ;;  %v7945_v24 = vcombine.high %v7944_v16, %v7944_v16  ;;  %v7955_v55 = vrot.slane %v7954_v17, 4  ;;  %v7962_v22 = vsel %vm7961_vm2, %v7921_v46, 0.0 }
 0x492   : > { %v7963_v14 = vrot.slane %v7962_v22, 4  ;;  %v7969_v32 = vsel %vm638_vm0, %v7928_v10, 0.0  ;;  %v7984_v3 = vrot.slane %v7983_v29, 4  ;;  %v7990_v0 = vsel %vm7961_vm2, %v7937_v28, 0.0 }
 0x493   : > { %v7956_v31 = vadd.f32 %v7955_v55, %v7954_v17  ;;  %v7970_v33 = vrot.slane %v7969_v32, 4  ;;  %v7976_v34 = vsel %vm7961_vm2, %v7929_v2, 0.0  ;;  %v7991_v23 = vrot.slane %v7990_v0, 4 }
 0x494   : > { %v7964_v26 = vadd.f32 %v7963_v14, %v7962_v22  ;;  %v7977_v39 = vrot.slane %v7976_v34, 4  ;;  %v7985_v60 = vadd.f32 %v7984_v3, %v7983_v29  ;;  %v7997_v37 = vsel %vm638_vm0, %v7944_v16, 0.0 }
 0x495   : > { %v7957_v25 = vrot.slane %v7956_v31, 2  ;;  %v7971_v40 = vadd.f32 %v7970_v33, %v7969_v32  ;;  %v7992_v41 = vadd.f32 %v7991_v23, %v7990_v0  ;;  %v7998_v62 = vrot.slane %v7997_v37, 4 }
 0x496   : > { %v7965_v52 = vrot.slane %v7964_v26, 2  ;;  %v7978_v35 = vadd.f32 %v7977_v39, %v7976_v34  ;;  %v7986_v4 = vrot.slane %v7985_v60, 2  ;;  %v8004_v20 = vsel %vm7961_vm2, %v7945_v24, 0.0 }
 0x497   : > { %v7958_v18 = vadd.f32 %v7957_v25, %v7956_v31  ;;  %v7972_v11 = vrot.slane %v7971_v40, 2  ;;  %v7993_v56 = vrot.slane %v7992_v41, 2  ;;  %v7999_v44 = vadd.f32 %v7998_v62, %v7997_v37 }
 0x498   : > { %v7966_v53 = vadd.f32 %v7965_v52, %v7964_v26  ;;  %v7979_v54 = vrot.slane %v7978_v35, 2  ;;  %v7987_v47 = vadd.f32 %v7986_v4, %v7985_v60  ;;  %v8005_v59 = vrot.slane %v8004_v20, 4 }
 0x499   : > { %v7959_v36 = vrot.slane %v7958_v18, 1  ;;  %v7973_v30 = vadd.f32 %v7972_v11, %v7971_v40  ;;  %v7994_v63 = vadd.f32 %v7993_v56, %v7992_v41  ;;  %v8000_v27 = vrot.slane %v7999_v44, 2 }
 0x49a   : > { %v7967_v1 = vrot.slane %v7966_v53, 1  ;;  %v7980_v48 = vadd.f32 %v7979_v54, %v7978_v35  ;;  %v7988_v5 = vrot.slane %v7987_v47, 1  ;;  %v8006_v51 = vadd.f32 %v8005_v59, %v8004_v20 }
 0x49b   : > { %v7960_v15 = vadd.f32 %v7959_v36, %v7958_v18  ;;  %v7974_v57 = vrot.slane %v7973_v30, 1  ;;  %v7995_v7 = vrot.slane %v7994_v63, 1  ;;  %v8001_v45 = vadd.f32 %v8000_v27, %v7999_v44 }
 0x49c   : > { %v7968_v38 = vadd.f32 %v7967_v1, %v7966_v53  ;;  %v7981_v6 = vrot.slane %v7980_v48, 1  ;;  %v7989_v8 = vadd.f32 %v7988_v5, %v7987_v47  ;;  %v8007_v58 = vrot.slane %v8006_v51, 2 }
 0x49d   : > { %v7975_v42 = vadd.f32 %v7974_v57, %v7973_v30  ;;  %v7996_v9 = vadd.f32 %v7995_v7, %v7994_v63  ;;  %v8002_v61 = vrot.slane %v8001_v45, 1  ;;  %v8011_v12 = vmul.f32 0.5, %v7960_v15 }
 0x49e   : > { %v7982_v49 = vadd.f32 %v7981_v6, %v7980_v48  ;;  %v8008_v21 = vadd.f32 %v8007_v58, %v8006_v51  ;;  %v8012_v13 = vmul.f32 0.5, %v7968_v38  ;;  %v8015_v43 = vmul.f32 0.5, %v7989_v8 }
 0x49f   : > { %v8003_v19 = vadd.f32 %v8002_v61, %v8001_v45  ;;  %v8016_v46 = vmul.f32 0.5, %v7996_v9  ;;  %v8013_v28 = vmul.f32 0.5, %v7975_v42 }
 0x4a0   : > { %v8009_v10 = vrot.slane %v8008_v21, 1  ;;  %v8014_v16 = vmul.f32 0.5, %v7982_v49  ;;  %v10071_v17 = vpack.c.bf16 %v8012_v13, %v8011_v12 }
 0x4a1   : > { %v10073_v29 = vpack.c.bf16 %v8016_v46, %v8015_v43  ;;  %v8017_v14 = vmul.f32 0.5, %v8003_v19 }
 0x4a2   : > { %v8010_v2 = vadd.f32 %v8009_v10, %v8008_v21  ;;  %v8042_v24 = vrot.slane %v10071_v17, %v14674_v50  ;;  %v10072_v55 = vpack.c.bf16 %v8014_v16, %v8013_v28 }
 0x4a3   : > { %v8058_v22 = vrot.slane %v10073_v29, %v14674_v50 }
 0x4a4   : > { %v8018_v32 = vmul.f32 0.5, %v8010_v2  ;;  %v8050_v3 = vrot.slane %v10072_v55, %v14674_v50  ;;  %v8073_v0 = vrot.slane %v8042_v24, %v14674_v50 }
 0x4a5   : > { %v8087_v31 = vrot.slane %v8058_v22, %v14674_v50 }
 0x4a6   : > { %v10074_v33 = vpack.c.bf16 %v8018_v32, %v8017_v14  ;;  %v8080_v34 = vrot.slane %v8050_v3, %v14674_v50  ;;  %v8095_v25 = vunpack.c.l.b16 %v8073_v0  ;;  %v8096_v41 = vunpack.c.h.b16 %v8073_v0 }
 0x4a7   : > { %v8099_v23 = vunpack.c.l.b16 %v8087_v31  ;;  %v8100_v26 = vunpack.c.h.b16 %v8087_v31 }
 0x4a8   : > { %v8066_v39 = vrot.slane %v10074_v33, %v14674_v50  ;;  %v8097_v60 = vunpack.c.l.b16 %v8080_v34  ;;  %v8098_v37 = vunpack.c.h.b16 %v8080_v34 }
 0x4a9   : > { %v8106_v35 = vrot.slane %v8099_v23, 6  ;;  %v8114_v4 = vrot.slane %v8100_v26, 6 }
 0x4aa   : > { %v8094_v40 = vrot.slane %v8066_v39, %v14674_v50  ;;  %v8103_v62 = vrot.slane %v8097_v60, 7  ;;  %v8112_v52 = vrot.slane %v8098_v37, 7 }
 0x4ac   : > { %v8101_v20 = vunpack.c.l.b16 %v8094_v40  ;;  %v8102_v18 = vunpack.c.h.b16 %v8094_v40  ;;  %v8105_v11 = vsel %vm8104_vm3, %v8103_v62, %v8095_v25  ;;  %v8113_v56 = vsel %vm8104_vm3, %v8112_v52, %v8096_v41 }
 0x4ad   : > { %v8108_v44 = vsel %vm8107_vm4, %v8106_v35, %v8105_v11  ;;  %v8115_v53 = vsel %vm8107_vm4, %v8114_v4, %v8113_v56 }
 0x4ae   : > { %v8109_v54 = vrot.slane %v8101_v20, 5  ;;  %v8116_v47 = vrot.slane %v8102_v18, 5 }
 0x4b0   : > { %v8111_v59 = vsel %vm8110_vm5, %v8109_v54, %v8108_v44  ;;  %v8117_v36 = vsel %vm8110_vm5, %v8116_v47, %v8115_v53 }
 0x4b1   : > { %v8118_v30 = vpack.c.b16 %v8117_v36, %v8111_v59 }
 0x4b3   : > { %v8125_v63 = vrot.slane %v8118_v30, %v14674_v50 }
 0x4b5   : > { %8129 = vst.msk [vmem:[%s260_s17] sm:$0xf] %vm8128_vm7, %v8125_v63 }
 0x4b6 PF: > { %s15_s20 = sadd.s32 1, %s11505_s20   ;;  %s14719_s18 = smov %s11501_s19 }
 0x4b7   : > { %p12_p5 = scmp.ge.s32.totalorder %s15_s20, 4   ;;  %s14720_s19 = smov %s14722_s21 }
 0x4b9   :  { %14 = sbr.rel (!%p12_p5) target bundleno = 2 (0x2), region = 91 }

// kernel: cnn_forward.5
= control target key start
LH: loop header
LB: loop body
LE: loop exit
PB: predicated region body
PF: predicated region fallthrough
CT: control target
= control target key end

     0   :  { %v2294_v36 = vmov 1966171168   ;;  %v194_v38 = vlaneseq  ;;  %s2943_s0 = inlined_call_operand.vmem [shape: bf16[2,640], index: 0, kind: input, shape index: {}]   ;;  %s2944_s1 = inlined_call_operand.vmem [shape: bf16[640,512], index: 1, kind: input, shape index: {}]   ;;  %s2945_s2 = inlined_call_operand.vmem [shape: f32[1,512], index: 2, kind: input, shape index: {}]   ;;  %s2946_s3 = inlined_call_operand.vmem [shape: bf16[512,128], index: 3, kind: input, shape index: {}]   ;;  %s2947_s4 = inlined_call_operand.vmem [shape: f32[1,128], index: 4, kind: input, shape index: {}]   ;;  %s2948_s5 = inlined_call_operand.hbm [shape: f32[2,128], index: 5, kind: output, shape index: {}]  }
   0x1   :  { %v1993_v0 = vld [vmem:[%s2944_s1 + $0x4] ss:$16 sps:$4 sm:$0xff]   ;;  %v1995_v1 = vld [vmem:[%s2944_s1 + $0xc] ss:$16 sps:$4 sm:$0xff]   ;;  %v1997_v2 = vld [vmem:[%s2944_s1] ss:$16 sps:$4 sm:$0xff]   ;;  %v192_v37 = vunpack.c.l.s4 %v2294_v36 }
   0x2   :  { %1034 = vmatprep.subr.bf16.mxu0 %v1993_v0  ;;  %v1998_v3 = vld [vmem:[%s2944_s1 + $0x8] ss:$16 sps:$4 sm:$0xff]   ;;  %1157 = vmatprep.subr.bf16.mxu1 %v1995_v1  ;;  %v1999_v4 = vld [vmem:[%s2944_s1 + $0x24] ss:$16 sps:$4 sm:$0xff]   ;;  %v2001_v5 = vld [vmem:[%s2944_s1 + $0x2c] ss:$16 sps:$4 sm:$0xff]  }
   0x3   :  { %1035 = vmatpush1.bf16.msra.mxu0 %v1997_v2  ;;  %1158 = vmatpush1.bf16.msra.mxu1 %v1998_v3  ;;  %v2003_v6 = vld [vmem:[%s2944_s1 + $0x20] ss:$16 sps:$4 sm:$0xff]   ;;  %v2004_v7 = vld [vmem:[%s2944_s1 + $0x28] ss:$16 sps:$4 sm:$0xff]   ;;  %v2005_v8 = vld [vmem:[%s2944_s1 + $0x44] ss:$16 sps:$4 sm:$0xff]   ;;  %v193_v42 = vunpack.c.0.s8 %v192_v37 }
   0x4   :  { %1036 = vmatprep.subr.bf16.mxu0 %v1999_v4  ;;  %1159 = vmatprep.subr.bf16.mxu1 %v2001_v5  ;;  %v2007_v9 = vld [vmem:[%s2944_s1 + $0x4c] ss:$16 sps:$4 sm:$0xff]   ;;  %v2009_v10 = vld [vmem:[%s2944_s1 + $0x40] ss:$16 sps:$4 sm:$0xff]   ;;  %v2010_v11 = vld [vmem:[%s2944_s1 + $0x48] ss:$16 sps:$4 sm:$0xff]  }
   0x5   :  { %v2011_v12 = vld [vmem:[%s2944_s1 + $0x64] ss:$16 sps:$4 sm:$0xff]   ;;  %v2013_v13 = vld [vmem:[%s2944_s1 + $0x6c] ss:$16 sps:$4 sm:$0xff]   ;;  %v2015_v14 = vld [vmem:[%s2944_s1 + $0x60] ss:$16 sps:$4 sm:$0xff]  }
   0x6   :  { %v2016_v15 = vld [vmem:[%s2944_s1 + $0x68] ss:$16 sps:$4 sm:$0xff]   ;;  %v2017_v16 = vld [vmem:[%s2944_s1 + $0x84] ss:$16 sps:$4 sm:$0xff]   ;;  %v2019_v17 = vld [vmem:[%s2944_s1 + $0x8c] ss:$16 sps:$4 sm:$0xff]  }
   0x7   :  { %1037 = vmatpush1.bf16.msra.mxu0 %v2003_v6  ;;  %1160 = vmatpush1.bf16.msra.mxu1 %v2004_v7  ;;  %v2021_v18 = vld [vmem:[%s2944_s1 + $0x80] ss:$16 sps:$4 sm:$0xff]   ;;  %v2022_v19 = vld [vmem:[%s2944_s1 + $0x88] ss:$16 sps:$4 sm:$0xff]   ;;  %v2023_v20 = vld [vmem:[%s2944_s1 + $0xa4] ss:$16 sps:$4 sm:$0xff]  }
   0x8   :  { %1038 = vmatprep.subr.bf16.mxu0 %v2005_v8  ;;  %1161 = vmatprep.subr.bf16.mxu1 %v2007_v9  ;;  %v2025_v21 = vld [vmem:[%s2944_s1 + $0xac] ss:$16 sps:$4 sm:$0xff]   ;;  %v2027_v22 = vld [vmem:[%s2944_s1 + $0xa0] ss:$16 sps:$4 sm:$0xff]   ;;  %v2028_v23 = vld [vmem:[%s2944_s1 + $0xa8] ss:$16 sps:$4 sm:$0xff]  }
   0x9   :  { %v2029_v24 = vld [vmem:[%s2944_s1 + $0xc4] ss:$16 sps:$4 sm:$0xff]   ;;  %v2031_v25 = vld [vmem:[%s2944_s1 + $0xcc] ss:$16 sps:$4 sm:$0xff]   ;;  %v2033_v26 = vld [vmem:[%s2944_s1 + $0xc0] ss:$16 sps:$4 sm:$0xff]  }
   0xa   :  { %v2034_v27 = vld [vmem:[%s2944_s1 + $0xc8] ss:$16 sps:$4 sm:$0xff]   ;;  %v2035_v28 = vld [vmem:[%s2944_s1 + $0xe4] ss:$16 sps:$4 sm:$0xff]   ;;  %v2037_v29 = vld [vmem:[%s2944_s1 + $0xec] ss:$16 sps:$4 sm:$0xff]  }
   0xb   :  { %1039 = vmatpush1.bf16.msra.mxu0 %v2009_v10  ;;  %1162 = vmatpush1.bf16.msra.mxu1 %v2010_v11  ;;  %v2039_v30 = vld [vmem:[%s2944_s1 + $0xe0] ss:$16 sps:$4 sm:$0xff]   ;;  %v2040_v31 = vld [vmem:[%s2944_s1 + $0xe8] ss:$16 sps:$4 sm:$0xff]   ;;  %v2041_v32 = vld [vmem:[%s2944_s1 + $0x104] ss:$16 sps:$4 sm:$0xff]  }
   0xc   :  { %1040 = vmatprep.subr.bf16.mxu0 %v2011_v12  ;;  %1163 = vmatprep.subr.bf16.mxu1 %v2013_v13  ;;  %v2043_v33 = vld [vmem:[%s2944_s1 + $0x10c] ss:$16 sps:$4 sm:$0xff]   ;;  %v2045_v34 = vld [vmem:[%s2944_s1 + $0x100] ss:$16 sps:$4 sm:$0xff]   ;;  %v2046_v35 = vld [vmem:[%s2944_s1 + $0x108] ss:$16 sps:$4 sm:$0xff]  }
   0xd   :  { %v2047_v39 = vld [vmem:[%s2944_s1 + $0x124] ss:$16 sps:$4 sm:$0xff]   ;;  %v2049_v40 = vld [vmem:[%s2944_s1 + $0x12c] ss:$16 sps:$4 sm:$0xff]   ;;  %v2051_v41 = vld [vmem:[%s2944_s1 + $0x120] ss:$16 sps:$4 sm:$0xff]  }
   0xe   :  { %v2445_v43 = vshrl.u32 %v194_v38, 7  ;;  %v2052_v44 = vld [vmem:[%s2944_s1 + $0x128] ss:$16 sps:$4 sm:$0xff]   ;;  %v2053_v45 = vld [vmem:[%s2944_s1 + $0x144] ss:$16 sps:$4 sm:$0xff]  }
   0xf   :  { %1041 = vmatpush1.bf16.msra.mxu0 %v2015_v14  ;;  %1164 = vmatpush1.bf16.msra.mxu1 %v2016_v15  ;;  %v2055_v46 = vld [vmem:[%s2944_s1 + $0x14c] ss:$16 sps:$4 sm:$0xff]   ;;  %v2057_v47 = vld [vmem:[%s2944_s1 + $0x140] ss:$16 sps:$4 sm:$0xff]   ;;  %v2058_v48 = vld [vmem:[%s2944_s1 + $0x148] ss:$16 sps:$4 sm:$0xff]  }
  0x10   :  { %1042 = vmatprep.subr.bf16.mxu0 %v2017_v16  ;;  %1165 = vmatprep.subr.bf16.mxu1 %v2019_v17  ;;  %v196_v49 = vsub.s32 %v193_v42, %v2445_v43  ;;  %v2059_v50 = vld [vmem:[%s2944_s1 + $0x164] ss:$16 sps:$4 sm:$0xff]   ;;  %v2061_v51 = vld [vmem:[%s2944_s1 + $0x16c] ss:$16 sps:$4 sm:$0xff]   ;;  %v2063_v53 = vld [vmem:[%s2944_s1 + $0x160] ss:$16 sps:$4 sm:$0xff]  }
  0x11   :  { %v28_v52 = vld [vmem:[%s2943_s0] sm:$0x1f]  ;;  %v2064_v56 = vld [vmem:[%s2944_s1 + $0x168] ss:$16 sps:$4 sm:$0xff]   ;;  %v2067_v58 = vld [vmem:[%s2944_s1 + $0x18c] ss:$16 sps:$4 sm:$0xff]  }
  0x12   :  { %v190_v54 = vcombine.high %v28_v52, %v28_v52  ;;  %v197_v55 = vrot.slane %v28_v52, %v196_v49  ;;  %v2065_v57 = vld [vmem:[%s2944_s1 + $0x184] ss:$16 sps:$4 sm:$0xff]   ;;  %v2069_v61 = vld [vmem:[%s2944_s1 + $0x180] ss:$16 sps:$4 sm:$0xff]   ;;  %v2070_v0 = vld [vmem:[%s2944_s1 + $0x188] ss:$16 sps:$4 sm:$0xff]  }
  0x13   :  { %1043 = vmatpush1.bf16.msra.mxu0 %v2021_v18  ;;  %1166 = vmatpush1.bf16.msra.mxu1 %v2022_v19  ;;  %v2071_v1 = vld [vmem:[%s2944_s1 + $0x1a4] ss:$16 sps:$4 sm:$0xff]   ;;  %v2073_v2 = vld [vmem:[%s2944_s1 + $0x1ac] ss:$16 sps:$4 sm:$0xff]   ;;  %v2075_v3 = vld [vmem:[%s2944_s1 + $0x1a0] ss:$16 sps:$4 sm:$0xff]  }
  0x14   :  { %1044 = vmatprep.subr.bf16.mxu0 %v2023_v20  ;;  %1167 = vmatprep.subr.bf16.mxu1 %v2025_v21  ;;  %v205_v59 = vcombine.high %v197_v55, %v197_v55  ;;  %v204_v60 = vrot.slane %v190_v54, %v196_v49  ;;  %v2076_v4 = vld [vmem:[%s2944_s1 + $0x1a8] ss:$16 sps:$4 sm:$0xff]   ;;  %v2077_v5 = vld [vmem:[%s2944_s1 + $0x1c4] ss:$16 sps:$4 sm:$0xff]   ;;  %v2079_v6 = vld [vmem:[%s2944_s1 + $0x1cc] ss:$16 sps:$4 sm:$0xff]   ;;  %v2537_v16 = vrot.slane %v197_v55, %v196_v49 }
  0x15   :  { %v2081_v7 = vld [vmem:[%s2944_s1 + $0x1c0] ss:$16 sps:$4 sm:$0xff]   ;;  %v2082_v8 = vld [vmem:[%s2944_s1 + $0x1c8] ss:$16 sps:$4 sm:$0xff]   ;;  %v2083_v9 = vld [vmem:[%s2944_s1 + $0x1e4] ss:$16 sps:$4 sm:$0xff]  }
  0x16   :  { %v226_v62 = vrot.slane %v205_v59, %v196_v49  ;;  %v2487_v63 = vrot.slane %v204_v60, %v196_v49  ;;  %v2085_v10 = vld [vmem:[%s2944_s1 + $0x1ec] ss:$16 sps:$4 sm:$0xff]   ;;  %v2087_v11 = vld [vmem:[%s2944_s1 + $0x1e0] ss:$16 sps:$4 sm:$0xff]   ;;  %v2088_v12 = vld [vmem:[%s2944_s1 + $0x1e8] ss:$16 sps:$4 sm:$0xff]  }
  0x17   :  { %1045 = vmatpush1.bf16.msra.mxu0 %v2027_v22  ;;  %1168 = vmatpush1.bf16.msra.mxu1 %v2028_v23  ;;  %v2092_v13 = vld [vmem:[%s2944_s1 + $0x204] ss:$16 sps:$4 sm:$0xff]   ;;  %v2095_v14 = vld [vmem:[%s2944_s1 + $0x20c] ss:$16 sps:$4 sm:$0xff]   ;;  %v2090_v15 = vld [vmem:[%s2944_s1 + $0x200] ss:$16 sps:$4 sm:$0xff]  }
  0x18   :  { %1046 = vmatprep.subr.bf16.mxu0 %v2029_v24  ;;  %1169 = vmatprep.subr.bf16.mxu1 %v2031_v25  ;;  %v2093_v17 = vld [vmem:[%s2944_s1 + $0x208] ss:$16 sps:$4 sm:$0xff]   ;;  %v2098_v18 = vld [vmem:[%s2944_s1 + $0x224] ss:$16 sps:$4 sm:$0xff]   ;;  %v2101_v19 = vld [vmem:[%s2944_s1 + $0x22c] ss:$16 sps:$4 sm:$0xff]   ;;  %v228_v20 = vcombine.high %v226_v62, %v226_v62 }
  0x19   :  { %1066 = vmatprep.mubr.bf16.mxu0 %v226_v62  ;;  %1189 = vmatprep.mubr.bf16.mxu1 %v226_v62  ;;  %v2096_v21 = vld [vmem:[%s2944_s1 + $0x220] ss:$16 sps:$4 sm:$0xff]   ;;  %v2099_v22 = vld [vmem:[%s2944_s1 + $0x228] ss:$16 sps:$4 sm:$0xff]   ;;  %v2104_v23 = vld [vmem:[%s2944_s1 + $0x244] ss:$16 sps:$4 sm:$0xff]  }
  0x1a   :  { %v2107_v24 = vld [vmem:[%s2944_s1 + $0x24c] ss:$16 sps:$4 sm:$0xff]   ;;  %v2102_v25 = vld [vmem:[%s2944_s1 + $0x240] ss:$16 sps:$4 sm:$0xff]   ;;  %v2123_v38 = vld [vmem:[%s2944_s1 + $0x2a8] ss:$16 sps:$4 sm:$0xff]  }
  0x1b   :  { %1047 = vmatpush1.bf16.msra.mxu0 %v2033_v26  ;;  %1170 = vmatpush1.bf16.msra.mxu1 %v2034_v27  ;;  %v2105_v26 = vld [vmem:[%s2944_s1 + $0x248] ss:$16 sps:$4 sm:$0xff]   ;;  %v2110_v27 = vld [vmem:[%s2944_s1 + $0x264] ss:$16 sps:$4 sm:$0xff]   ;;  %v2125_v36 = vld [vmem:[%s2944_s1 + $0x2ac] ss:$16 sps:$4 sm:$0xff]  }
  0x1c   :  { %1048 = vmatprep.subr.bf16.mxu0 %v2035_v28  ;;  %1171 = vmatprep.subr.bf16.mxu1 %v2037_v29  ;;  %v2113_v28 = vld [vmem:[%s2944_s1 + $0x26c] ss:$16 sps:$4 sm:$0xff]   ;;  %v2108_v29 = vld [vmem:[%s2944_s1 + $0x260] ss:$16 sps:$4 sm:$0xff]   ;;  %v2129_v42 = vld [vmem:[%s2944_s1 + $0x2c8] ss:$16 sps:$4 sm:$0xff]  }
  0x1d   :  { %v2120_v37 = vld [vmem:[%s2944_s1 + $0x2a0] ss:$16 sps:$4 sm:$0xff]   ;;  %v2143_v49 = vld [vmem:[%s2944_s1 + $0x30c] ss:$16 sps:$4 sm:$0xff]   ;;  %v2146_v52 = vld [vmem:[%s2944_s1 + $0x324] ss:$16 sps:$4 sm:$0xff]  }
  0x1e   :  { %v2144_v54 = vld [vmem:[%s2944_s1 + $0x320] ss:$16 sps:$4 sm:$0xff]   ;;  %v2147_v55 = vld [vmem:[%s2944_s1 + $0x328] ss:$16 sps:$4 sm:$0xff]   ;;  %v2158_v60 = vld [vmem:[%s2944_s1 + $0x364] ss:$16 sps:$4 sm:$0xff]  }
  0x1f   :  { %1049 = vmatpush1.bf16.msra.mxu0 %v2039_v30  ;;  %1172 = vmatpush1.bf16.msra.mxu1 %v2040_v31  ;;  %v2111_v30 = vld [vmem:[%s2944_s1 + $0x268] ss:$16 sps:$4 sm:$0xff]   ;;  %v2116_v31 = vld [vmem:[%s2944_s1 + $0x284] ss:$16 sps:$4 sm:$0xff]   ;;  %v2156_v62 = vld [vmem:[%s2944_s1 + $0x360] ss:$16 sps:$4 sm:$0xff]  }
  0x20   :  { %1050 = vmatprep.subr.bf16.mxu0 %v2041_v32  ;;  %1173 = vmatprep.subr.bf16.mxu1 %v2043_v33  ;;  %v2119_v32 = vld [vmem:[%s2944_s1 + $0x28c] ss:$16 sps:$4 sm:$0xff]   ;;  %v2114_v33 = vld [vmem:[%s2944_s1 + $0x280] ss:$16 sps:$4 sm:$0xff]   ;;  %v2153_v59 = vld [vmem:[%s2944_s1 + $0x348] ss:$16 sps:$4 sm:$0xff]  }
  0x23   :  { %1051 = vmatpush1.bf16.msra.mxu0 %v2045_v34  ;;  %1174 = vmatpush1.bf16.msra.mxu1 %v2046_v35  ;;  %v2117_v34 = vld [vmem:[%s2944_s1 + $0x288] ss:$16 sps:$4 sm:$0xff]   ;;  %v2122_v35 = vld [vmem:[%s2944_s1 + $0x2a4] ss:$16 sps:$4 sm:$0xff]  }
  0x24   :  { %1052 = vmatprep.subr.bf16.mxu0 %v2047_v39  ;;  %1175 = vmatprep.subr.bf16.mxu1 %v2049_v40  ;;  %v2128_v39 = vld [vmem:[%s2944_s1 + $0x2c4] ss:$16 sps:$4 sm:$0xff]   ;;  %v2131_v40 = vld [vmem:[%s2944_s1 + $0x2cc] ss:$16 sps:$4 sm:$0xff]  }
  0x27   :  { %1053 = vmatpush1.bf16.msra.mxu0 %v2051_v41  ;;  %1176 = vmatpush1.bf16.msra.mxu1 %v2052_v44  ;;  %v2126_v41 = vld [vmem:[%s2944_s1 + $0x2c0] ss:$16 sps:$4 sm:$0xff]   ;;  %v2134_v44 = vld [vmem:[%s2944_s1 + $0x2e4] ss:$16 sps:$4 sm:$0xff]  }
  0x28   :  { %1054 = vmatprep.subr.bf16.mxu0 %v2053_v45  ;;  %1177 = vmatprep.subr.bf16.mxu1 %v2055_v46  ;;  %v2137_v45 = vld [vmem:[%s2944_s1 + $0x2ec] ss:$16 sps:$4 sm:$0xff]   ;;  %v2132_v46 = vld [vmem:[%s2944_s1 + $0x2e0] ss:$16 sps:$4 sm:$0xff]  }
  0x2b   :  { %1055 = vmatpush1.bf16.msra.mxu0 %v2057_v47  ;;  %1178 = vmatpush1.bf16.msra.mxu1 %v2058_v48  ;;  %v2135_v47 = vld [vmem:[%s2944_s1 + $0x2e8] ss:$16 sps:$4 sm:$0xff]   ;;  %v2140_v48 = vld [vmem:[%s2944_s1 + $0x304] ss:$16 sps:$4 sm:$0xff]  }
  0x2c   :  { %1056 = vmatprep.subr.bf16.mxu0 %v2059_v50  ;;  %1179 = vmatprep.subr.bf16.mxu1 %v2061_v51  ;;  %v2138_v50 = vld [vmem:[%s2944_s1 + $0x300] ss:$16 sps:$4 sm:$0xff]   ;;  %v2141_v51 = vld [vmem:[%s2944_s1 + $0x308] ss:$16 sps:$4 sm:$0xff]  }
  0x2f   :  { %1057 = vmatpush1.bf16.msra.mxu0 %v2063_v53  ;;  %1180 = vmatpush1.bf16.msra.mxu1 %v2064_v56  ;;  %v2149_v53 = vld [vmem:[%s2944_s1 + $0x32c] ss:$16 sps:$4 sm:$0xff]   ;;  %v2152_v56 = vld [vmem:[%s2944_s1 + $0x344] ss:$16 sps:$4 sm:$0xff]  }
  0x30   :  { %1058 = vmatprep.subr.bf16.mxu0 %v2065_v57  ;;  %1181 = vmatprep.subr.bf16.mxu1 %v2067_v58  ;;  %v2155_v57 = vld [vmem:[%s2944_s1 + $0x34c] ss:$16 sps:$4 sm:$0xff]   ;;  %v2150_v58 = vld [vmem:[%s2944_s1 + $0x340] ss:$16 sps:$4 sm:$0xff]  }
  0x33   :  { %1059 = vmatpush1.bf16.msra.mxu0 %v2069_v61  ;;  %1182 = vmatpush1.bf16.msra.mxu1 %v2070_v0  ;;  %v2161_v61 = vld [vmem:[%s2944_s1 + $0x36c] ss:$16 sps:$4 sm:$0xff]   ;;  %v2159_v0 = vld [vmem:[%s2944_s1 + $0x368] ss:$16 sps:$4 sm:$0xff]  }
  0x34   :  { %1060 = vmatprep.subr.bf16.mxu0 %v2071_v1  ;;  %1183 = vmatprep.subr.bf16.mxu1 %v2073_v2  ;;  %v2164_v1 = vld [vmem:[%s2944_s1 + $0x384] ss:$16 sps:$4 sm:$0xff]   ;;  %v2167_v2 = vld [vmem:[%s2944_s1 + $0x38c] ss:$16 sps:$4 sm:$0xff]  }
  0x37   :  { %1061 = vmatpush1.bf16.msra.mxu0 %v2075_v3  ;;  %1184 = vmatpush1.bf16.msra.mxu1 %v2076_v4  ;;  %v2162_v3 = vld [vmem:[%s2944_s1 + $0x380] ss:$16 sps:$4 sm:$0xff]   ;;  %v2165_v4 = vld [vmem:[%s2944_s1 + $0x388] ss:$16 sps:$4 sm:$0xff]  }
  0x38   :  { %1062 = vmatprep.subr.bf16.mxu0 %v2077_v5  ;;  %1185 = vmatprep.subr.bf16.mxu1 %v2079_v6  ;;  %v2170_v5 = vld [vmem:[%s2944_s1 + $0x3a4] ss:$16 sps:$4 sm:$0xff]   ;;  %v2173_v6 = vld [vmem:[%s2944_s1 + $0x3ac] ss:$16 sps:$4 sm:$0xff]  }
  0x3b   :  { %1063 = vmatpush1.bf16.msra.mxu0 %v2081_v7  ;;  %1186 = vmatpush1.bf16.msra.mxu1 %v2082_v8  ;;  %v2168_v7 = vld [vmem:[%s2944_s1 + $0x3a0] ss:$16 sps:$4 sm:$0xff]   ;;  %v2171_v8 = vld [vmem:[%s2944_s1 + $0x3a8] ss:$16 sps:$4 sm:$0xff]  }
  0x3c   :  { %1064 = vmatprep.subr.bf16.mxu0 %v2083_v9  ;;  %1187 = vmatprep.subr.bf16.mxu1 %v2085_v10  ;;  %v2176_v9 = vld [vmem:[%s2944_s1 + $0x3c4] ss:$16 sps:$4 sm:$0xff]   ;;  %v2179_v10 = vld [vmem:[%s2944_s1 + $0x3cc] ss:$16 sps:$4 sm:$0xff]  }
  0x3f   :  { %1065 = vmatpush1.bf16.msra.mxu0 %v2087_v11  ;;  %1188 = vmatpush1.bf16.msra.mxu1 %v2088_v12  ;;  %v2174_v11 = vld [vmem:[%s2944_s1 + $0x3c0] ss:$16 sps:$4 sm:$0xff]   ;;  %v2177_v12 = vld [vmem:[%s2944_s1 + $0x3c8] ss:$16 sps:$4 sm:$0xff]  }
  0x40   :  { %1075 = vmatprep.subr.bf16.mxu0 %v2092_v13  ;;  %1198 = vmatprep.subr.bf16.mxu1 %v2095_v14  ;;  %v2182_v13 = vld [vmem:[%s2944_s1 + $0x3e4] ss:$16 sps:$4 sm:$0xff]   ;;  %v2185_v14 = vld [vmem:[%s2944_s1 + $0x3ec] ss:$16 sps:$4 sm:$0xff]  }
  0x42   :  { %1067 = vmatmul.mubr.bf16.vlgmr.msra.gmra.mrb[0].mxu0 %v2537_v16  ;;  %1190 = vmatmul.mubr.bf16.vlgmr.msra.gmra.mrb[0].mxu1 %v2537_v16 }
  0x43   :  { %1076 = vmatpush1.bf16.msra.mxu0 %v2090_v15  ;;  %1199 = vmatpush1.bf16.msra.mxu1 %v2093_v17  ;;  %v2180_v15 = vld [vmem:[%s2944_s1 + $0x3e0] ss:$16 sps:$4 sm:$0xff]   ;;  %v2183_v17 = vld [vmem:[%s2944_s1 + $0x3e8] ss:$16 sps:$4 sm:$0xff]  }
  0x44   :  { %1077 = vmatprep.subr.bf16.mxu0 %v2098_v18  ;;  %1200 = vmatprep.subr.bf16.mxu1 %v2101_v19  ;;  %v2188_v18 = vld [vmem:[%s2944_s1 + $0x404] ss:$16 sps:$4 sm:$0xff]   ;;  %v2191_v19 = vld [vmem:[%s2944_s1 + $0x40c] ss:$16 sps:$4 sm:$0xff]  }
  0x45   :  { %1107 = vmatprep.mubr.bf16.mxu0 %v228_v20  ;;  %1230 = vmatprep.mubr.bf16.mxu1 %v228_v20  ;;  %v2186_v20 = vld [vmem:[%s2944_s1 + $0x400] ss:$16 sps:$4 sm:$0xff]  }
  0x47   :  { %1078 = vmatpush1.bf16.msra.mxu0 %v2096_v21  ;;  %1201 = vmatpush1.bf16.msra.mxu1 %v2099_v22  ;;  %v2189_v21 = vld [vmem:[%s2944_s1 + $0x408] ss:$16 sps:$4 sm:$0xff]   ;;  %v227_v22 = vcombine.high %v2537_v16, %v2537_v16 }
  0x48   :  { %1079 = vmatprep.subr.bf16.mxu0 %v2104_v23  ;;  %1202 = vmatprep.subr.bf16.mxu1 %v2107_v24  ;;  %v2194_v23 = vld [vmem:[%s2944_s1 + $0x424] ss:$16 sps:$4 sm:$0xff]   ;;  %v2197_v24 = vld [vmem:[%s2944_s1 + $0x42c] ss:$16 sps:$4 sm:$0xff]   ;;  %v2195_v16 = vld [vmem:[%s2944_s1 + $0x428] ss:$16 sps:$4 sm:$0xff]  }
  0x4b   :  { %1080 = vmatpush1.bf16.msra.mxu0 %v2102_v25  ;;  %1203 = vmatpush1.bf16.msra.mxu1 %v2105_v26  ;;  %v2192_v25 = vld [vmem:[%s2944_s1 + $0x420] ss:$16 sps:$4 sm:$0xff]  }
  0x4c   :  { %1081 = vmatprep.subr.bf16.mxu0 %v2110_v27  ;;  %1204 = vmatprep.subr.bf16.mxu1 %v2113_v28 }
  0x4f   :  { %1082 = vmatpush1.bf16.msra.mxu0 %v2108_v29  ;;  %1205 = vmatpush1.bf16.msra.mxu1 %v2111_v30 }
  0x50   :  { %1083 = vmatprep.subr.bf16.mxu0 %v2116_v31  ;;  %1206 = vmatprep.subr.bf16.mxu1 %v2119_v32 }
  0x53   :  { %1084 = vmatpush1.bf16.msra.mxu0 %v2114_v33  ;;  %1207 = vmatpush1.bf16.msra.mxu1 %v2117_v34 }
  0x54   :  { %1085 = vmatprep.subr.bf16.mxu0 %v2122_v35  ;;  %1208 = vmatprep.subr.bf16.mxu1 %v2125_v36 }
  0x57   :  { %1086 = vmatpush1.bf16.msra.mxu0 %v2120_v37  ;;  %1209 = vmatpush1.bf16.msra.mxu1 %v2123_v38 }
  0x58   :  { %1087 = vmatprep.subr.bf16.mxu0 %v2128_v39  ;;  %1210 = vmatprep.subr.bf16.mxu1 %v2131_v40 }
  0x5b   :  { %1088 = vmatpush1.bf16.msra.mxu0 %v2126_v41  ;;  %1211 = vmatpush1.bf16.msra.mxu1 %v2129_v42 }
  0x5c   :  { %1089 = vmatprep.subr.bf16.mxu0 %v2134_v44  ;;  %1212 = vmatprep.subr.bf16.mxu1 %v2137_v45 }
  0x5f   :  { %1090 = vmatpush1.bf16.msra.mxu0 %v2132_v46  ;;  %1213 = vmatpush1.bf16.msra.mxu1 %v2135_v47 }
  0x60   :  { %1091 = vmatprep.subr.bf16.mxu0 %v2140_v48  ;;  %1214 = vmatprep.subr.bf16.mxu1 %v2143_v49 }
  0x63   :  { %1092 = vmatpush1.bf16.msra.mxu0 %v2138_v50  ;;  %1215 = vmatpush1.bf16.msra.mxu1 %v2141_v51 }
  0x64   :  { %1093 = vmatprep.subr.bf16.mxu0 %v2146_v52  ;;  %1216 = vmatprep.subr.bf16.mxu1 %v2149_v53 }
  0x67   :  { %1094 = vmatpush1.bf16.msra.mxu0 %v2144_v54  ;;  %1217 = vmatpush1.bf16.msra.mxu1 %v2147_v55 }
  0x68   :  { %1095 = vmatprep.subr.bf16.mxu0 %v2152_v56  ;;  %1218 = vmatprep.subr.bf16.mxu1 %v2155_v57 }
  0x6b   :  { %1096 = vmatpush1.bf16.msra.mxu0 %v2150_v58  ;;  %1219 = vmatpush1.bf16.msra.mxu1 %v2153_v59 }
  0x6c   :  { %1097 = vmatprep.subr.bf16.mxu0 %v2158_v60  ;;  %1220 = vmatprep.subr.bf16.mxu1 %v2161_v61 }
  0x6f   :  { %1098 = vmatpush1.bf16.msra.mxu0 %v2156_v62  ;;  %1221 = vmatpush1.bf16.msra.mxu1 %v2159_v0 }
  0x70   :  { %1099 = vmatprep.subr.bf16.mxu0 %v2164_v1  ;;  %1222 = vmatprep.subr.bf16.mxu1 %v2167_v2 }
  0x73   :  { %1100 = vmatpush1.bf16.msra.mxu0 %v2162_v3  ;;  %1223 = vmatpush1.bf16.msra.mxu1 %v2165_v4 }
  0x74   :  { %1101 = vmatprep.subr.bf16.mxu0 %v2170_v5  ;;  %1224 = vmatprep.subr.bf16.mxu1 %v2173_v6 }
  0x77   :  { %1102 = vmatpush1.bf16.msra.mxu0 %v2168_v7  ;;  %1225 = vmatpush1.bf16.msra.mxu1 %v2171_v8 }
  0x78   :  { %1103 = vmatprep.subr.bf16.mxu0 %v2176_v9  ;;  %1226 = vmatprep.subr.bf16.mxu1 %v2179_v10 }
  0x7b   :  { %1104 = vmatpush1.bf16.msra.mxu0 %v2174_v11  ;;  %1227 = vmatpush1.bf16.msra.mxu1 %v2177_v12 }
  0x7c   :  { %1105 = vmatprep.subr.bf16.mxu0 %v2182_v13  ;;  %1228 = vmatprep.subr.bf16.mxu1 %v2185_v14 }
  0x7f   :  { %1106 = vmatpush1.bf16.msra.mxu0 %v2180_v15  ;;  %1229 = vmatpush1.bf16.msra.mxu1 %v2183_v17 }
  0x80   :  { %1116 = vmatprep.subr.bf16.mxu0 %v2188_v18  ;;  %1239 = vmatprep.subr.bf16.mxu1 %v2191_v19 }
  0x82   :  { %1108 = vmatmul.mubr.bf16.vlgmr.msra.gmra.mrb[0].mxu0 %v227_v22  ;;  %1231 = vmatmul.mubr.bf16.vlgmr.msra.gmra.mrb[0].mxu1 %v227_v22 }
  0x83   :  { %1117 = vmatpush1.bf16.msra.mxu0 %v2186_v20  ;;  %1240 = vmatpush1.bf16.msra.mxu1 %v2189_v21 }
  0x84   :  { %10 = vsyncpa [#allocation4], 0  ;;  %1118 = vmatprep.subr.bf16.mxu0 %v2194_v23  ;;  %1241 = vmatprep.subr.bf16.mxu1 %v2197_v24  ;;  %v2200_v26 = vld [vmem:[%s2944_s1 + $0x444] ss:$16 sps:$4 sm:$0xff]   ;;  %v2203_v27 = vld [vmem:[%s2944_s1 + $0x44c] ss:$16 sps:$4 sm:$0xff]  }
  0x85   :  { %v2295_v28 = vmov 0   ;;  %v2198_v29 = vld [vmem:[%s2944_s1 + $0x440] ss:$16 sps:$4 sm:$0xff]   ;;  %v2201_v30 = vld [vmem:[%s2944_s1 + $0x448] ss:$16 sps:$4 sm:$0xff]   ;;  %v1312_v23 = vsub.s32 0, %v2445_v43 }
  0x86   :  { %1148 = vmatprep.mubr.bf16.mxu0 %v2295_v28  ;;  %1271 = vmatprep.mubr.bf16.mxu1 %v2295_v28  ;;  %v2206_v31 = vld [vmem:[%s2944_s1 + $0x464] ss:$16 sps:$4 sm:$0xff]   ;;  %v2209_v32 = vld [vmem:[%s2944_s1 + $0x46c] ss:$16 sps:$4 sm:$0xff]   ;;  %v2204_v33 = vld [vmem:[%s2944_s1 + $0x460] ss:$16 sps:$4 sm:$0xff]  }
  0x87   :  { %1119 = vmatpush1.bf16.msra.mxu0 %v2192_v25  ;;  %1242 = vmatpush1.bf16.msra.mxu1 %v2195_v16  ;;  %v2207_v34 = vld [vmem:[%s2944_s1 + $0x468] ss:$16 sps:$4 sm:$0xff]   ;;  %v2212_v35 = vld [vmem:[%s2944_s1 + $0x484] ss:$16 sps:$4 sm:$0xff]   ;;  %v2215_v36 = vld [vmem:[%s2944_s1 + $0x48c] ss:$16 sps:$4 sm:$0xff]  }
  0x88   :  { %1120 = vmatprep.subr.bf16.mxu0 %v2200_v26  ;;  %1243 = vmatprep.subr.bf16.mxu1 %v2203_v27  ;;  %v2210_v37 = vld [vmem:[%s2944_s1 + $0x480] ss:$16 sps:$4 sm:$0xff]   ;;  %v2213_v38 = vld [vmem:[%s2944_s1 + $0x488] ss:$16 sps:$4 sm:$0xff]   ;;  %v2218_v39 = vld [vmem:[%s2944_s1 + $0x4a4] ss:$16 sps:$4 sm:$0xff]  }
  0x89   :  { %v2221_v40 = vld [vmem:[%s2944_s1 + $0x4ac] ss:$16 sps:$4 sm:$0xff]   ;;  %v2216_v41 = vld [vmem:[%s2944_s1 + $0x4a0] ss:$16 sps:$4 sm:$0xff]   ;;  %v2219_v42 = vld [vmem:[%s2944_s1 + $0x4a8] ss:$16 sps:$4 sm:$0xff]  }
  0x8a   :  { %v2224_v44 = vld [vmem:[%s2944_s1 + $0x4c4] ss:$16 sps:$4 sm:$0xff]   ;;  %v2227_v45 = vld [vmem:[%s2944_s1 + $0x4cc] ss:$16 sps:$4 sm:$0xff]   ;;  %v2222_v46 = vld [vmem:[%s2944_s1 + $0x4c0] ss:$16 sps:$4 sm:$0xff]  }
  0x8b   :  { %1121 = vmatpush1.bf16.msra.mxu0 %v2198_v29  ;;  %1244 = vmatpush1.bf16.msra.mxu1 %v2201_v30  ;;  %v2225_v47 = vld [vmem:[%s2944_s1 + $0x4c8] ss:$16 sps:$4 sm:$0xff]   ;;  %v2230_v48 = vld [vmem:[%s2944_s1 + $0x4e4] ss:$16 sps:$4 sm:$0xff]   ;;  %v2233_v49 = vld [vmem:[%s2944_s1 + $0x4ec] ss:$16 sps:$4 sm:$0xff]  }
  0x8c   :  { %1122 = vmatprep.subr.bf16.mxu0 %v2206_v31  ;;  %1245 = vmatprep.subr.bf16.mxu1 %v2209_v32  ;;  %v2228_v50 = vld [vmem:[%s2944_s1 + $0x4e0] ss:$16 sps:$4 sm:$0xff]   ;;  %v2231_v51 = vld [vmem:[%s2944_s1 + $0x4e8] ss:$16 sps:$4 sm:$0xff]   ;;  %v2296_v21 = vmov 1983009808  }
  0x8d   :  { %v2234_v52 = vld [vmem:[%s2946_s3 + $0x40] sm:$0xff]   ;;  %v2238_v56 = vld [vmem:[%s2946_s3 + $0x48] sm:$0xff]   ;;  %v2242_v60 = vld [vmem:[%s2946_s3 + $0x50] sm:$0xff]   ;;  %v1287_v22 = vunpack.c.l.s4 %v2296_v21  ;;  %v1316_v24 = vsub.s32 1, %v2445_v43  ;;  %v1320_v25 = vsub.s32 2, %v2445_v43  ;;  %v1324_v16 = vsub.s32 3, %v2445_v43 }
  0x8e   :  { %v2236_v53 = vld [vmem:[%s2946_s3 + $0xc0] sm:$0xff]   ;;  %v2240_v57 = vld [vmem:[%s2946_s3 + $0xc8] sm:$0xff]   ;;  %v2243_v61 = vld [vmem:[%s2946_s3 + $0x10] sm:$0xff]   ;;  %s2297_s17 = smov [#allocation3]  }
  0x8f   :  { %1123 = vmatpush1.bf16.msra.mxu0 %v2204_v33  ;;  %1246 = vmatpush1.bf16.msra.mxu1 %v2207_v34  ;;  %v2235_v54 = vld [vmem:[%s2946_s3] sm:$0xff]   ;;  %v2239_v58 = vld [vmem:[%s2946_s3 + $0x8] sm:$0xff]   ;;  %v2245_v62 = vld [vmem:[%s2946_s3 + $0x90] sm:$0xff]   ;;  %v1288_v27 = vunpack.c.0.s8 %v1287_v22  ;;  %s1728_s18 = sshll.u32 %s2297_s17, 4  ;;  %s1729_s18 = int_to_ptr.vmem [resolvable:$true] %s1728_s18 }
  0x90   :  { %1124 = vmatprep.subr.bf16.mxu0 %v2212_v35  ;;  %1247 = vmatprep.subr.bf16.mxu1 %v2215_v36  ;;  %v2237_v55 = vld [vmem:[%s2946_s3 + $0x80] sm:$0xff]   ;;  %v2241_v59 = vld [vmem:[%s2946_s3 + $0x88] sm:$0xff]   ;;  %v2246_v0 = vld [vmem:[%s2946_s3 + $0x58] sm:$0xff]   ;;  %p2275_p1 = scmp.lt.s32.totalorder %s1729_s18, %s1729_s18 }
  0x91   :  { %v2247_v1 = vld [vmem:[%s2946_s3 + $0x18] sm:$0xff]   ;;  %v2250_v4 = vld [vmem:[%s2946_s3 + $0x60] sm:$0xff]   ;;  %v2254_v8 = vld [vmem:[%s2946_s3 + $0x68] sm:$0xff]   ;;  %v1291_v32 = vsub.s32 %v1288_v27, %v2445_v43 }
  0x92   :  { %v2248_v2 = vld [vmem:[%s2946_s3 + $0xd8] sm:$0xff]   ;;  %v2251_v5 = vld [vmem:[%s2946_s3 + $0x20] sm:$0xff]   ;;  %v2255_v9 = vld [vmem:[%s2946_s3 + $0x28] sm:$0xff]  }
  0x93   :  { %1125 = vmatpush1.bf16.msra.mxu0 %v2210_v37  ;;  %1248 = vmatpush1.bf16.msra.mxu1 %v2213_v38  ;;  %v2249_v3 = vld [vmem:[%s2946_s3 + $0x98] sm:$0xff]   ;;  %v2252_v6 = vld [vmem:[%s2946_s3 + $0xe0] sm:$0xff]   ;;  %v2256_v10 = vld [vmem:[%s2946_s3 + $0xe8] sm:$0xff]  }
  0x94   :  { %1126 = vmatprep.subr.bf16.mxu0 %v2218_v39  ;;  %1249 = vmatprep.subr.bf16.mxu1 %v2221_v40  ;;  %v2253_v7 = vld [vmem:[%s2946_s3 + $0xa0] sm:$0xff]   ;;  %v2257_v11 = vld [vmem:[%s2946_s3 + $0xa8] sm:$0xff]   ;;  %v2258_v12 = vld [vmem:[%s2946_s3 + $0x70] sm:$0xff]  }
  0x95   :  { %v2259_v13 = vld [vmem:[%s2946_s3 + $0x30] sm:$0xff]   ;;  %v2262_v17 = vld [vmem:[%s2946_s3 + $0x78] sm:$0xff]   ;;  %v1308_v26 = vld [vmem:[%s2945_s2] sm:$0xf] }
  0x96   :  { %v2260_v14 = vld [vmem:[%s2946_s3 + $0xf0] sm:$0xff]   ;;  %v2264_v18 = vld [vmem:[%s2946_s3 + $0xf8] sm:$0xff]   ;;  %v1313_v28 = vrot.slane %v1308_v26, %v1312_v23  ;;  %v1317_v29 = vrot.slane %v1308_v26, %v1316_v24  ;;  %v1321_v30 = vrot.slane %v1308_v26, %v1320_v25  ;;  %v1325_v31 = vrot.slane %v1308_v26, %v1324_v16 }
  0x97   :  { %1127 = vmatpush1.bf16.msra.mxu0 %v2216_v41  ;;  %1250 = vmatpush1.bf16.msra.mxu1 %v2219_v42  ;;  %v2261_v15 = vld [vmem:[%s2946_s3 + $0xb0] sm:$0xff]   ;;  %v2263_v19 = vld [vmem:[%s2946_s3 + $0x38] sm:$0xff]  }
  0x98   :  { %1128 = vmatprep.subr.bf16.mxu0 %v2224_v44  ;;  %1251 = vmatprep.subr.bf16.mxu1 %v2227_v45  ;;  %v2265_v20 = vld [vmem:[%s2946_s3 + $0xb8] sm:$0xff]   ;;  %v1326_v33 = vcombine.low %v1313_v28, %v1317_v29  ;;  %v1327_v34 = vcombine.low %v1321_v30, %v1325_v31 }
  0x9a   :  { %v1334_v37 = vrot.slane %v1326_v33, %v1291_v32  ;;  %v1341_v38 = vrot.slane %v1327_v34, %v1291_v32 }
  0x9b   :  { %1129 = vmatpush1.bf16.msra.mxu0 %v2222_v46  ;;  %1252 = vmatpush1.bf16.msra.mxu1 %v2225_v47 }
  0x9c   :  { %1130 = vmatprep.subr.bf16.mxu0 %v2230_v48  ;;  %1253 = vmatprep.subr.bf16.mxu1 %v2233_v49 }
  0x9f   :  { %1131 = vmatpush1.bf16.msra.mxu0 %v2228_v50  ;;  %1254 = vmatpush1.bf16.msra.mxu1 %v2231_v51  ;;  %v1342_v50 = vcombine.low %v1334_v37, %v1341_v38 }
  0xa0   :  { %1929 = vmatprep.subr.bf16.mxu0 %v2234_v52  ;;  %1951 = vmatprep.subr.bf16.mxu1 %v2236_v53 }
  0xa2   :  { %1149 = vmatmul.mubr.bf16.vlgmr.msra.gmra.mrb[0].mxu0 %v2487_v63  ;;  %1272 = vmatmul.mubr.bf16.vlgmr.msra.gmra.mrb[0].mxu1 %v2487_v63  ;;  %v2244_v63 = vld [vmem:[%s2946_s3 + $0xd0] sm:$0xff]  }
  0xa3   :  { %1930 = vmatpush3.bf16.msra.mxu0 %v2235_v54  ;;  %1952 = vmatpush3.bf16.msra.mxu1 %v2237_v55 }
  0xa4   :  { %1931 = vmatprep.subr.bf16.mxu0 %v2238_v56  ;;  %1953 = vmatprep.subr.bf16.mxu1 %v2240_v57 }
  0xa7   :  { %1932 = vmatpush3.bf16.msra.mxu0 %v2239_v58  ;;  %1954 = vmatpush3.bf16.msra.mxu1 %v2241_v59 }
  0xa8   :  { %1933 = vmatprep.subr.bf16.mxu0 %v2242_v60  ;;  %1955 = vmatprep.subr.bf16.mxu1 %v2244_v63 }
  0xab   :  { %1934 = vmatpush3.bf16.msra.mxu0 %v2243_v61  ;;  %1956 = vmatpush3.bf16.msra.mxu1 %v2245_v62  ;;  %v1896_v62 = vld [vmem:[%s2947_s4] ss:$0 sm:$0xff]  ;;  %s2270_s4 = scalar_lea.vmem %s1729_s18, 32 }
  0xac   :  { %1935 = vmatprep.subr.bf16.mxu0 %v2246_v0  ;;  %1957 = vmatprep.subr.bf16.mxu1 %v2248_v2  ;;  %p2271_p0 = scmp.ne.s32.totalorder %s1729_s18, %s2270_s4  ;;  %p2276_p2 = scmp.lt.s32.totalorder %s2270_s4, %s2270_s4 }
  0xae   :  { %p2277_p3 = por %p2276_p2, %p2275_p1 }
  0xaf   :  { %1936 = vmatpush3.bf16.msra.mxu0 %v2247_v1  ;;  %1958 = vmatpush3.bf16.msra.mxu1 %v2249_v3 }
  0xb0   :  { %1937 = vmatprep.subr.bf16.mxu0 %v2250_v4  ;;  %1959 = vmatprep.subr.bf16.mxu1 %v2252_v6  ;;  %p2278_p4 = pnand %p2277_p3, %p2271_p0 }
  0xb3   :  { %1938 = vmatpush3.bf16.msra.mxu0 %v2251_v5  ;;  %1960 = vmatpush3.bf16.msra.mxu1 %v2253_v7 }
  0xb4   :  { %1939 = vmatprep.subr.bf16.mxu0 %v2254_v8  ;;  %1961 = vmatprep.subr.bf16.mxu1 %v2256_v10 }
  0xb7   :  { %1940 = vmatpush3.bf16.msra.mxu0 %v2255_v9  ;;  %1962 = vmatpush3.bf16.msra.mxu1 %v2257_v11 }
  0xb8   :  { %1941 = vmatprep.subr.bf16.mxu0 %v2258_v12  ;;  %1963 = vmatprep.subr.bf16.mxu1 %v2260_v14 }
  0xbb   :  { %1942 = vmatpush3.bf16.msra.mxu0 %v2259_v13  ;;  %1964 = vmatpush3.bf16.msra.mxu1 %v2261_v15 }
  0xbc   :  { %1943 = vmatprep.subr.bf16.mxu0 %v2262_v17  ;;  %1965 = vmatprep.subr.bf16.mxu1 %v2264_v18 }
  0xbf   :  { %1944 = vmatpush3.bf16.msra.mxu0 %v2263_v19  ;;  %1966 = vmatpush3.bf16.msra.mxu1 %v2265_v20 }
 0x175   :  { %v1150_v35 = vpop.f32.mrb[0].mxu0  ;;  %v1273_v36 = vpop.f32.mrb[0].mxu1 }
 0x176   :  { %v1152_v39 = vpop.f32.mrb[1].mxu0  ;;  %v1275_v40 = vpop.f32.mrb[1].mxu1 }
 0x177   :  { %v1284_v41 = vcombine.low %v1150_v35, %v1152_v39  ;;  %v1285_v42 = vcombine.low %v1273_v36, %v1275_v40  ;;  %v1154_v44 = vpop.f32.mrb[2].mxu0  ;;  %v1277_v45 = vpop.f32.mrb[2].mxu1 }
 0x178   :  { %v1155_v46 = vpop.f32.mrb[3].mxu0  ;;  %v1278_v47 = vpop.f32.mrb[3].mxu1 }
 0x179   :  { %v1292_v48 = vrot.slane %v1284_v41, %v1291_v32  ;;  %v1299_v49 = vrot.slane %v1285_v42, %v1291_v32 }
 0x17b   :  { %v1300_v51 = vcombine.low %v1292_v48, %v1299_v49 }
 0x17d   :  { %v1344_v52 = vadd.f32 %v1342_v50, %v1300_v51 }
 0x17f   :  { %v1345_v43 = vmax.f32 %v1344_v52, 0.0 }
 0x181   :  { %v1354_v53 = vrot.slane %v1345_v43, %v1291_v32  ;;  %v1347_v54 = vcombine.high %v1345_v43, %v1345_v43 }
 0x183   :  { %v1362_v55 = vcombine.high %v1354_v53, %v1354_v53  ;;  %v1361_v56 = vrot.slane %v1347_v54, %v1291_v32  ;;  %v1368_v59 = vpack.c.bf16 %v1354_v53, %v1354_v53 }
 0x185   :  { %v1369_v57 = vpack.c.bf16 %v1362_v55, %v1362_v55  ;;  %v1363_v58 = vcombine.high %v1361_v56, %v1361_v56  ;;  %v1370_v63 = vpack.c.bf16 %v1361_v56, %v1361_v56 }
 0x187   :  { %1667 = vmatprep.mubr.bf16.mxu0 %v1369_v57  ;;  %v1371_v60 = vpack.c.bf16 %v1363_v58, %v1363_v58 }
 0x188   :  { %1668 = vmatmul.mubr.bf16.vlgmr.msra.gmra.mrb[4].mxu0 %v1368_v59 }
 0x189   :  { %1707 = vmatprep.mubr.bf16.mxu1 %v1371_v60 }
 0x18a   :  { %1708 = vmatmul.mubr.bf16.vlgmr.msra.gmra.mrb[4].mxu1 %v1370_v63 }
 0x25b   :  { %v1945_v61 = vpop.f32.mrb[4].mxu0 }
 0x25c   :  { %v1946_v0 = vpop.f32.mrb[5].mxu0 }
 0x25d   :  { %v1947_v1 = vadd.f32 %v1946_v0, %v1945_v61  ;;  %v1948_v2 = vpop.f32.mrb[6].mxu0  ;;  %v1967_v3 = vpop.f32.mrb[4].mxu1 }
 0x25e   :  { %v1949_v4 = vpop.f32.mrb[7].mxu0  ;;  %v1968_v5 = vpop.f32.mrb[5].mxu1 }
 0x25f   :  { %v1670_v6 = vadd.f32 %v1947_v1, %v1896_v62  ;;  %v1969_v7 = vadd.f32 %v1968_v5, %v1967_v3  ;;  %v1970_v8 = vpop.f32.mrb[6].mxu1 }
 0x260   :  { %v1971_v9 = vpop.f32.mrb[7].mxu1 }
 0x261   :  { %v1710_v10 = vadd.f32 %v1969_v7, %v1670_v6 }
 0x263   :  { %v1715_v11 = vsub.f32 0.0, %v1710_v10 }
 0x265   :  { %v1716_v12 = vmul.f32 1.442695, %v1715_v11 }
 0x267   :  { %2266 = vpow2.f32 %v1716_v12 }
 0x271   :  { %v2267_v13 = vpop.eup %2266 }
 0x272   :  { %v1718_v14 = vadd.f32 1.0, %v2267_v13 }
 0x274   :  { %2268 = vrcp.f32 %v1718_v14 }
 0x27e   :  { %v2269_v15 = vpop.eup %2268 }
 0x27f   :  { %1721 = vst [vmem:[#allocation3] sm:$0x3] %v2269_v15 }
 0x280   :  { %2281 = shalt.err (!%p2278_p4)
}
 0x281   :  { %s2282_s20 = scalar_lea.hbm %s2948_s5, 32 }
 0x282   :  { %p2283_p5 = scmp.ne.s32.totalorder %s2948_s5, %s2282_s20  ;;  %p2286_p6 = scmp.lt.u32.totalorder %s2282_s20, %s2948_s5 }
 0x284   :  { %p2288_p7 = pnand %p2286_p6, %p2283_p5 }
 0x286   :  { %2291 = shalt.err (!%p2288_p7)
}
 0x287   :  { %1731 = dma.vmem_to_hbm [thread:$0]  %s1729_s18, 32, %s2948_s5, [#allocation4]  }
 0x288   :  { %2292 = dma.done.wait [#allocation4], 32  }
 0x289   :  { %2293 = vsyncadd [#allocation4], 4294967264 }
 0x28a   :  { %1735 = vsyncpa [#allocation4], 1 }

</bundles_post_ra>
